<compile_context>
chip_gen: v5e
topology: v5e:2x2
jax: 0.10.0
libtpu: 0.0.40
codegen_flags: <defaults>
</compile_context>

<pallas_src>
import functools
import numpy as np
import jax
import jax.numpy as jnp
from jax.experimental import pallas as pl
from jax.experimental.pallas import tpu as pltpu


# ------------------------------- helpers ------------------------------------

def _pick_row_tile(M):
    """Largest tile in {512,...,8} dividing M, else full extent (no padding)."""
    for t in (512, 256, 128, 64, 32, 16, 8):
        if t <= M and M % t == 0:
            return t
    return M


def _bilinear_matrix(in_size, out_size):
    """Row-stochastic 1-D interpolation matrix matching
    F.interpolate(mode='bilinear', align_corners=False) (incl. border clamp)."""
    scale = in_size / out_size
    dst = np.arange(out_size, dtype=np.float64)
    src = np.maximum((dst + 0.5) * scale - 0.5, 0.0)
    lo = np.floor(src).astype(np.int64)
    hi = np.minimum(lo + 1, in_size - 1)
    whi = src - lo
    wlo = 1.0 - whi
    A = np.zeros((out_size, in_size), np.float32)
    A[np.arange(out_size), lo] += wlo
    A[np.arange(out_size), hi] += whi
    return A


# --------------------------- Pallas kernel bodies ----------------------------

def _mm_bias_kernel(x_ref, w_ref, b_ref, o_ref, *, relu):
    """o = relu?(x @ w + b); bf16 inputs, f32 accumulation."""
    y = jnp.dot(x_ref[...], w_ref[...], preferred_element_type=jnp.float32)
    y = y + b_ref[...]
    if relu:
        y = jnp.maximum(y, 0.0)
    o_ref[...] = y.astype(o_ref.dtype)


def _fuse_kernel(c_ref, s_ref, w_ref, b_ref, a_ref, o_ref):
    """Per-batch fused decoder step:
         y = coarse @ W + b          (1x1 proj at coarse resolution, MXU)
         u = A2d @ y                 (kron(Ah,Aw) bilinear x2 upsample, MXU)
         o = relu(u + skip)
    All operands arrive as 2-D (pixels, channels) slabs -> no in-kernel
    reshapes/transposes."""
    y = jnp.dot(c_ref[0], w_ref[...], preferred_element_type=jnp.float32)
    y = y + b_ref[...]
    u = jnp.dot(a_ref[...], y.astype(jnp.bfloat16),
                preferred_element_type=jnp.float32)
    z = jnp.maximum(u + s_ref[0].astype(jnp.float32), 0.0)
    o_ref[0] = z.astype(o_ref.dtype)


def _head_kernel(d_ref, g_ref, b_ref, ah_ref, o_ref):
    """Per-(batch, class) fused head:
         t = d2 @ kron(Aw, w_class)^T + bias     (1x1 conv folded into W-upsample)
         z = Ah @ t                               (H-upsample)
       Output written directly as an NCHW (Ho, Wo) slab."""
    t = jnp.dot(d_ref[0], g_ref[0], preferred_element_type=jnp.float32)
    t = t + b_ref[...]
    z = jnp.dot(ah_ref[...], t, preferred_element_type=jnp.float32)
    o_ref[0, 0] = z.astype(o_ref.dtype)


# ------------------------------ op wrappers ----------------------------------

def matmul_bias(x, w, b, *, relu=False, out_dtype=jnp.bfloat16):
    """y = relu?(x @ w + b). x:(M,K) bf16, w:(K,N) bf16, b:(N,) f32. No padding."""
    M, K = x.shape
    N = w.shape[1]
    TM = _pick_row_tile(M)
    b2 = b.reshape(1, N)
    return pl.pallas_call(
        functools.partial(_mm_bias_kernel, relu=relu),
        out_shape=jax.ShapeDtypeStruct((M, N), out_dtype),
        grid=(M // TM,),
        in_specs=[
            pl.BlockSpec((TM, K), lambda i: (i, 0)),
            pl.BlockSpec((K, N), lambda i: (0, 0)),
            pl.BlockSpec((1, N), lambda i: (0, 0)),
        ],
        out_specs=pl.BlockSpec((TM, N), lambda i: (i, 0)),
        compiler_params=pltpu.CompilerParams(dimension_semantics=("parallel",)),
    )(x, w, b2)


def conv1x1_nhwc(x, w, b, *, relu=False):
    """1x1 conv on NHWC via a single Pallas matmul (reshape is free in NHWC)."""
    B, H, W, C = x.shape
    N = w.shape[1]
    y = matmul_bias(x.reshape(B * H * W, C), w, b, relu=relu)
    return y.reshape(B, H, W, N)


def patch_embed_nhwc(x, w, b, patch):
    """Non-overlapping patch embedding (stride=patch) + ReLU. NHWC im2col keeps
    the minor dims (patch, C) contiguous; the matmul runs in one Pallas kernel."""
    B, H, W, C = x.shape
    Hp, Wp = H // patch, W // patch
    xr = x.reshape(B, Hp, patch, Wp, patch, C)
    xr = jnp.transpose(xr, (0, 1, 3, 2, 4, 5)).reshape(B * Hp * Wp, patch * patch * C)
    y = matmul_bias(xr, w, b, relu=True)
    return y.reshape(B, Hp, Wp, w.shape[1])


def fuse(fine, coarse, w, b):
    """Fused: 1x1 proj (Cin->Cout) of `coarse`, bilinear x2 upsample
    (align_corners=False), add `fine` skip, ReLU — one pallas_call, grid over B."""
    B, Hc, Wc, Cin = coarse.shape
    _, Ho, Wo, Cout = fine.shape
    # kron(Ah, Aw): row-stochastic 2-D upsample operating on (Hc*Wc) pixel rows.
    # TODO(synk): for large feature maps switch to a separable / VPU-stencil
    # upsample; the dense kron matrix is only appropriate at small spatial sizes.
    A2 = np.kron(_bilinear_matrix(Hc, Ho), _bilinear_matrix(Wc, Wo))
    A2 = jnp.asarray(A2, jnp.bfloat16)                       # (Ho*Wo, Hc*Wc)
    c2 = coarse.reshape(B, Hc * Wc, Cin)                     # free reshape
    s2 = fine.reshape(B, Ho * Wo, Cout)                      # free reshape
    b2 = b.reshape(1, Cout)
    out = pl.pallas_call(
        _fuse_kernel,
        out_shape=jax.ShapeDtypeStruct((B, Ho * Wo, Cout), jnp.bfloat16),
        grid=(B,),
        in_specs=[
            pl.BlockSpec((1, Hc * Wc, Cin), lambda i: (i, 0, 0)),
            pl.BlockSpec((1, Ho * Wo, Cout), lambda i: (i, 0, 0)),
            pl.BlockSpec((Cin, Cout), lambda i: (0, 0)),
            pl.BlockSpec((1, Cout), lambda i: (0, 0)),
            pl.BlockSpec((Ho * Wo, Hc * Wc), lambda i: (0, 0)),
        ],
        out_specs=pl.BlockSpec((1, Ho * Wo, Cout), lambda i: (i, 0, 0)),
        compiler_params=pltpu.CompilerParams(dimension_semantics=("parallel",)),
    )(c2, s2, w, b2, A2)
    return out.reshape(B, Ho, Wo, Cout)


def head_upsample(d, w_head_t, b_head, factor=4):
    """Fused 1x1 head conv (Cch -> n_class) + bilinear x`factor` upsample.
    Conv is folded into the W-axis interp matrix (Kronecker product), so both
    in-kernel matmuls are lane-dense; output is produced directly in NCHW."""
    B, Hq, Wq, Cch = d.shape
    n_class = w_head_t.shape[0]
    Ho, Wo = Hq * factor, Wq * factor
    Aw = jnp.asarray(_bilinear_matrix(Wq, Wo), jnp.float32)   # (Wo, Wq)
    Ah = jnp.asarray(_bilinear_matrix(Hq, Ho), jnp.float32)   # (Ho, Hq)
    # GT[c, w*Cch + k, v] = Aw[v, w] * W[k, c]
    GT = jnp.einsum('vw,ck->cwkv', Aw, w_head_t.astype(jnp.float32))
    GT = GT.reshape(n_class, Wq * Cch, Wo).astype(jnp.bfloat16)
    d2 = d.reshape(B, Hq, Wq * Cch)                           # free reshape
    b2 = b_head.reshape(1, n_class).astype(jnp.float32)
    return pl.pallas_call(
        _head_kernel,
        out_shape=jax.ShapeDtypeStruct((B, n_class, Ho, Wo), jnp.float32),
        grid=(B, n_class),
        in_specs=[
            pl.BlockSpec((1, Hq, Wq * Cch), lambda b_, c: (b_, 0, 0)),
            pl.BlockSpec((1, Wq * Cch, Wo), lambda b_, c: (c, 0, 0)),
            pl.BlockSpec((1, 1), lambda b_, c: (0, c)),
            pl.BlockSpec((Ho, Hq), lambda b_, c: (0, 0)),
        ],
        out_specs=pl.BlockSpec((1, 1, Ho, Wo), lambda b_, c: (b_, c, 0, 0)),
        compiler_params=pltpu.CompilerParams(
            dimension_semantics=("parallel", "parallel")),
    )(d2, GT, b2, Ah)


# ------------------------------- parameters ----------------------------------

def init_params(key, n_class=1):
    keys = iter(jax.random.split(key, 32))

    def lin(cin, cout):
        k = next(keys)
        w = jax.random.normal(k, (cin, cout), jnp.float32) / np.sqrt(cin)
        return (w.astype(jnp.bfloat16), jnp.zeros((cout,), jnp.float32))

    def head_lin(cin, cout):
        k = next(keys)
        w_t = jax.random.normal(k, (cout, cin), jnp.float32) / np.sqrt(cin)
        return (w_t.astype(jnp.float32), jnp.zeros((cout,), jnp.float32))

    p = {}
    # Conv2d(1,3,1) with eval-mode BatchNorm2d(3) (identity stats) folded in.
    w_stem, b_stem = lin(1, 3)
    bn_scale = np.float32(1.0 / np.sqrt(1.0 + 1e-5))
    p['stem'] = ((w_stem.astype(jnp.float32) * bn_scale).astype(jnp.bfloat16),
                 b_stem * bn_scale)
    p['pe1'] = lin(3 * 4 * 4, 64)              # backbone stage 1 (stride 4)
    p['pe2'] = lin(64 * 2 * 2, 128)            # stage 2 (stride 8)
    p['pe3'] = lin(128 * 2 * 2, 320)           # stage 3 (stride 16)
    p['pe4'] = lin(320 * 2 * 2, 512)           # stage 4 (stride 32)
    p['d1_f3'] = lin(512, 320)                 # Decoding_layer1
    p['d1_f2'] = lin(320, 128)
    p['d1_f1'] = lin(128, 64)
    p['d2_f2'] = lin(320, 128)                 # Decoding_layer2
    p['d2_f1'] = lin(128, 64)
    p['d3_f1'] = lin(128, 64)                  # Decoding_layer3
    p['head1'] = head_lin(64, n_class)
    p['head2'] = head_lin(64, n_class)
    p['head3'] = head_lin(64, n_class)
    return p


# -------------------------------- forward ------------------------------------

def pvt_dense_decoder_forward(params, x):
    """x: NCHW float32. Returns (out1, out2, out3) in NCHW float32."""
    B, C, H, W = x.shape
    x = jnp.transpose(x, (0, 2, 3, 1)).astype(jnp.bfloat16)   # NHWC, bf16
    if C == 1:
        x = conv1x1_nhwc(x, *params['stem'], relu=True)

    # TODO(synk): pvt_v2_b2 definition not provided; stand-in backbone = 4
    # Pallas patch-embedding stages producing [64,128,320,512] channels at
    # strides [4,8,16,32] (no transformer blocks).
    x1 = patch_embed_nhwc(x,  *params['pe1'], patch=4)   # (B, H/4,  W/4,  64)
    x2 = patch_embed_nhwc(x1, *params['pe2'], patch=2)   # (B, H/8,  W/8,  128)
    x3 = patch_embed_nhwc(x2, *params['pe3'], patch=2)   # (B, H/16, W/16, 320)
    x4 = patch_embed_nhwc(x3, *params['pe4'], patch=2)   # (B, H/32, W/32, 512)

    # TODO(synk): Decoding_layer1/2/3 definitions not provided; stand-in =
    # dense top-down fusion (proj + bilinear x2 + skip + ReLU), each one kernel.
    d3 = fuse(x3, x4, *params['d1_f3'])        # 320ch @ H/16
    d2 = fuse(x2, d3, *params['d1_f2'])        # 128ch @ H/8
    d1 = fuse(x1, d2, *params['d1_f1'])        # 64ch  @ H/4
    out1 = head_upsample(d1, *params['head1'], factor=4)

    d12 = fuse(d2, d3, *params['d2_f2'])       # 128ch @ H/8
    d11 = fuse(d1, d12, *params['d2_f1'])      # 64ch  @ H/4
    out2 = head_upsample(d11, *params['head2'], factor=4)

    d21 = fuse(d11, d12, *params['d3_f1'])     # 64ch  @ H/4
    out3 = head_upsample(d21, *params['head3'], factor=4)

    return out1, out2, out3


if __name__ == "__main__":
    key = jax.random.PRNGKey(0)
    pkey, xkey = jax.random.split(key)
    params = init_params(pkey, n_class=1)
    x = jax.random.normal(xkey, (2, 1, 32, 32), jnp.float32)   # NCHW, grayscale branch

    fwd = jax.jit(pvt_dense_decoder_forward)
    out1, out2, out3 = fwd(params, x)
    jax.block_until_ready((out1, out2, out3))

    assert out1.shape == (2, 1, 32, 32), out1.shape
    assert out2.shape == (2, 1, 32, 32), out2.shape
    assert out3.shape == (2, 1, 32, 32), out3.shape
    assert np.all(np.isfinite(np.asarray(out1)))
    print("KERNEL_OK")
</pallas_src>

<mosaic_0001>
module attributes {stable_mosaic.version = 11 : i64} {
  func.func @_mm_bias_kernel(%arg0: i32, %arg1: memref<512x1xbf16, #tpu.memory_space<vmem>>, %arg2: memref<1x3xbf16, #tpu.memory_space<vmem>>, %arg3: memref<1x3xf32, #tpu.memory_space<vmem>>, %arg4: memref<512x3xbf16, #tpu.memory_space<vmem>>) attributes {dimension_semantics = [#tpu.dimension_semantics<parallel>], iteration_bounds = array<i64: 4>, scalar_prefetch = 0 : i64, scratch_operands = 0 : i64, tpu.core_type = #tpu.core_type<tc>, window_params = [{transform_indices = @transform_0, window_bounds = array<i64: 512, 1>}, {pipeline_mode = #tpu.pipeline_mode<synchronous>, transform_indices = @transform_1, window_bounds = array<i64: 1, 3>}, {pipeline_mode = #tpu.pipeline_mode<synchronous>, transform_indices = @transform_2, window_bounds = array<i64: 1, 3>}, {transform_indices = @transform_3, window_bounds = array<i64: 512, 3>}]} {
    %c0 = arith.constant 0 : index
    %c0_0 = arith.constant 0 : index
    %0 = vector.load %arg1[%c0, %c0_0] : memref<512x1xbf16, #tpu.memory_space<vmem>>, vector<512x1xbf16>
    %c0_1 = arith.constant 0 : index
    %c0_2 = arith.constant 0 : index
    %1 = vector.load %arg2[%c0_1, %c0_2] : memref<1x3xbf16, #tpu.memory_space<vmem>>, vector<1x3xbf16>
    %cst = arith.constant dense<0.000000e+00> : vector<512x3xf32>
    %2 = tpu.matmul %0, %1, %cst {dimension_numbers = #tpu.dot_dimension_numbers<[1], [0], [0], [1], [0, 0, 1, 1], [], []>} : vector<512x1xbf16>, vector<1x3xbf16>, vector<512x3xf32> -> vector<512x3xf32>
    %c0_3 = arith.constant 0 : index
    %c0_4 = arith.constant 0 : index
    %3 = vector.load %arg3[%c0_3, %c0_4] : memref<1x3xf32, #tpu.memory_space<vmem>>, vector<1x3xf32>
    %4 = vector.broadcast %3 : vector<1x3xf32> to vector<512x3xf32>
    %5 = arith.addf %2, %4 : vector<512x3xf32>
    %cst_5 = arith.constant 0.000000e+00 : f32
    %6 = vector.broadcast %cst_5 : f32 to vector<512x3xf32>
    %7 = arith.maximumf %5, %6 : vector<512x3xf32>
    %8 = arith.truncf %7 : vector<512x3xf32> to vector<512x3xbf16>
    %c0_6 = arith.constant 0 : index
    %c0_7 = arith.constant 0 : index
    %9 = vector.load %arg4[%c0_6, %c0_7] : memref<512x3xbf16, #tpu.memory_space<vmem>>, vector<512x3xbf16>
    tpu.vector_store %arg4[%c0_6, %c0_7], %8 {strides = array<i32>} : memref<512x3xbf16, #tpu.memory_space<vmem>>, vector<512x3xbf16>,
    return
  }
  func.func @transform_0(%arg0: i32) -> (i32, i32) {
    %c0_i32 = arith.constant 0 : i32
    %c0_i32_0 = arith.constant 0 : i32
    return %arg0, %c0_i32 : i32, i32
  }
  func.func @transform_1(%arg0: i32) -> (i32, i32) {
    %c0_i32 = arith.constant 0 : i32
    %c0_i32_0 = arith.constant 0 : i32
    %c0_i32_1 = arith.constant 0 : i32
    return %c0_i32, %c0_i32_0 : i32, i32
  }
  func.func @transform_2(%arg0: i32) -> (i32, i32) {
    %c0_i32 = arith.constant 0 : i32
    %c0_i32_0 = arith.constant 0 : i32
    %c0_i32_1 = arith.constant 0 : i32
    return %c0_i32, %c0_i32_0 : i32, i32
  }
  func.func @transform_3(%arg0: i32) -> (i32, i32) {
    %c0_i32 = arith.constant 0 : i32
    %c0_i32_0 = arith.constant 0 : i32
    return %arg0, %c0_i32 : i32, i32
  }
}

module attributes {stable_mosaic.version = 11 : i64} {
  func.func @_mm_bias_kernel(%arg0: i32, %arg1: memref<128x48xbf16, #tpu.memory_space<vmem>>, %arg2: memref<48x64xbf16, #tpu.memory_space<vmem>>, %arg3: memref<1x64xf32, #tpu.memory_space<vmem>>, %arg4: memref<128x64xbf16, #tpu.memory_space<vmem>>) attributes {dimension_semantics = [#tpu.dimension_semantics<parallel>], iteration_bounds = array<i64: 1>, scalar_prefetch = 0 : i64, scratch_operands = 0 : i64, tpu.core_type = #tpu.core_type<tc>, window_params = [{transform_indices = @transform_0, window_bounds = array<i64: 128, 48>}, {pipeline_mode = #tpu.pipeline_mode<synchronous>, transform_indices = @transform_1, window_bounds = array<i64: 48, 64>}, {pipeline_mode = #tpu.pipeline_mode<synchronous>, transform_indices = @transform_2, window_bounds = array<i64: 1, 64>}, {transform_indices = @transform_3, window_bounds = array<i64: 128, 64>}]} {
    %c0 = arith.constant 0 : index
    %c0_0 = arith.constant 0 : index
    %0 = vector.load %arg1[%c0, %c0_0] : memref<128x48xbf16, #tpu.memory_space<vmem>>, vector<128x48xbf16>
    %c0_1 = arith.constant 0 : index
    %c0_2 = arith.constant 0 : index
    %1 = vector.load %arg2[%c0_1, %c0_2] : memref<48x64xbf16, #tpu.memory_space<vmem>>, vector<48x64xbf16>
    %cst = arith.constant dense<0.000000e+00> : vector<128x64xf32>
    %2 = tpu.matmul %0, %1, %cst {dimension_numbers = #tpu.dot_dimension_numbers<[1], [0], [0], [1], [0, 0, 1, 1], [], []>} : vector<128x48xbf16>, vector<48x64xbf16>, vector<128x64xf32> -> vector<128x64xf32>
    %c0_3 = arith.constant 0 : index
    %c0_4 = arith.constant 0 : index
    %3 = vector.load %arg3[%c0_3, %c0_4] : memref<1x64xf32, #tpu.memory_space<vmem>>, vector<1x64xf32>
    %4 = vector.broadcast %3 : vector<1x64xf32> to vector<128x64xf32>
    %5 = arith.addf %2, %4 : vector<128x64xf32>
    %cst_5 = arith.constant 0.000000e+00 : f32
    %6 = vector.broadcast %cst_5 : f32 to vector<128x64xf32>
    %7 = arith.maximumf %5, %6 : vector<128x64xf32>
    %8 = arith.truncf %7 : vector<128x64xf32> to vector<128x64xbf16>
    %c0_6 = arith.constant 0 : index
    %c0_7 = arith.constant 0 : index
    %9 = vector.load %arg4[%c0_6, %c0_7] : memref<128x64xbf16, #tpu.memory_space<vmem>>, vector<128x64xbf16>
    tpu.vector_store %arg4[%c0_6, %c0_7], %8 {strides = array<i32>} : memref<128x64xbf16, #tpu.memory_space<vmem>>, vector<128x64xbf16>,
    return
  }
  func.func @transform_0(%arg0: i32) -> (i32, i32) {
    %c0_i32 = arith.constant 0 : i32
    %c0_i32_0 = arith.constant 0 : i32
    return %arg0, %c0_i32 : i32, i32
  }
  func.func @transform_1(%arg0: i32) -> (i32, i32) {
    %c0_i32 = arith.constant 0 : i32
    %c0_i32_0 = arith.constant 0 : i32
    %c0_i32_1 = arith.constant 0 : i32
    return %c0_i32, %c0_i32_0 : i32, i32
  }
  func.func @transform_2(%arg0: i32) -> (i32, i32) {
    %c0_i32 = arith.constant 0 : i32
    %c0_i32_0 = arith.constant 0 : i32
    %c0_i32_1 = arith.constant 0 : i32
    return %c0_i32, %c0_i32_0 : i32, i32
  }
  func.func @transform_3(%arg0: i32) -> (i32, i32) {
    %c0_i32 = arith.constant 0 : i32
    %c0_i32_0 = arith.constant 0 : i32
    return %arg0, %c0_i32 : i32, i32
  }
}

module attributes {stable_mosaic.version = 11 : i64} {
  func.func @_mm_bias_kernel(%arg0: i32, %arg1: memref<32x256xbf16, #tpu.memory_space<vmem>>, %arg2: memref<256x128xbf16, #tpu.memory_space<vmem>>, %arg3: memref<1x128xf32, #tpu.memory_space<vmem>>, %arg4: memref<32x128xbf16, #tpu.memory_space<vmem>>) attributes {dimension_semantics = [#tpu.dimension_semantics<parallel>], iteration_bounds = array<i64: 1>, scalar_prefetch = 0 : i64, scratch_operands = 0 : i64, tpu.core_type = #tpu.core_type<tc>, window_params = [{transform_indices = @transform_0, window_bounds = array<i64: 32, 256>}, {pipeline_mode = #tpu.pipeline_mode<synchronous>, transform_indices = @transform_1, window_bounds = array<i64: 256, 128>}, {pipeline_mode = #tpu.pipeline_mode<synchronous>, transform_indices = @transform_2, window_bounds = array<i64: 1, 128>}, {transform_indices = @transform_3, window_bounds = array<i64: 32, 128>}]} {
    %c0 = arith.constant 0 : index
    %c0_0 = arith.constant 0 : index
    %0 = vector.load %arg1[%c0, %c0_0] : memref<32x256xbf16, #tpu.memory_space<vmem>>, vector<32x256xbf16>
    %c0_1 = arith.constant 0 : index
    %c0_2 = arith.constant 0 : index
    %1 = vector.load %arg2[%c0_1, %c0_2] : memref<256x128xbf16, #tpu.memory_space<vmem>>, vector<256x128xbf16>
    %cst = arith.constant dense<0.000000e+00> : vector<32x128xf32>
    %2 = tpu.matmul %0, %1, %cst {dimension_numbers = #tpu.dot_dimension_numbers<[1], [0], [0], [1], [0, 0, 1, 1], [], []>} : vector<32x256xbf16>, vector<256x128xbf16>, vector<32x128xf32> -> vector<32x128xf32>
    %c0_3 = arith.constant 0 : index
    %c0_4 = arith.constant 0 : index
    %3 = vector.load %arg3[%c0_3, %c0_4] : memref<1x128xf32, #tpu.memory_space<vmem>>, vector<1x128xf32>
    %4 = vector.broadcast %3 : vector<1x128xf32> to vector<32x128xf32>
    %5 = arith.addf %2, %4 : vector<32x128xf32>
    %cst_5 = arith.constant 0.000000e+00 : f32
    %6 = vector.broadcast %cst_5 : f32 to vector<32x128xf32>
    %7 = arith.maximumf %5, %6 : vector<32x128xf32>
    %8 = arith.truncf %7 : vector<32x128xf32> to vector<32x128xbf16>
    %c0_6 = arith.constant 0 : index
    %c0_7 = arith.constant 0 : index
    %9 = vector.load %arg4[%c0_6, %c0_7] : memref<32x128xbf16, #tpu.memory_space<vmem>>, vector<32x128xbf16>
    tpu.vector_store %arg4[%c0_6, %c0_7], %8 {strides = array<i32>} : memref<32x128xbf16, #tpu.memory_space<vmem>>, vector<32x128xbf16>,
    return
  }
  func.func @transform_0(%arg0: i32) -> (i32, i32) {
    %c0_i32 = arith.constant 0 : i32
    %c0_i32_0 = arith.constant 0 : i32
    return %arg0, %c0_i32 : i32, i32
  }
  func.func @transform_1(%arg0: i32) -> (i32, i32) {
    %c0_i32 = arith.constant 0 : i32
    %c0_i32_0 = arith.constant 0 : i32
    %c0_i32_1 = arith.constant 0 : i32
    return %c0_i32, %c0_i32_0 : i32, i32
  }
  func.func @transform_2(%arg0: i32) -> (i32, i32) {
    %c0_i32 = arith.constant 0 : i32
    %c0_i32_0 = arith.constant 0 : i32
    %c0_i32_1 = arith.constant 0 : i32
    return %c0_i32, %c0_i32_0 : i32, i32
  }
  func.func @transform_3(%arg0: i32) -> (i32, i32) {
    %c0_i32 = arith.constant 0 : i32
    %c0_i32_0 = arith.constant 0 : i32
    return %arg0, %c0_i32 : i32, i32
  }
}

module attributes {stable_mosaic.version = 11 : i64} {
  func.func @_mm_bias_kernel(%arg0: i32, %arg1: memref<8x512xbf16, #tpu.memory_space<vmem>>, %arg2: memref<512x320xbf16, #tpu.memory_space<vmem>>, %arg3: memref<1x320xf32, #tpu.memory_space<vmem>>, %arg4: memref<8x320xbf16, #tpu.memory_space<vmem>>) attributes {dimension_semantics = [#tpu.dimension_semantics<parallel>], iteration_bounds = array<i64: 1>, scalar_prefetch = 0 : i64, scratch_operands = 0 : i64, tpu.core_type = #tpu.core_type<tc>, window_params = [{transform_indices = @transform_0, window_bounds = array<i64: 8, 512>}, {pipeline_mode = #tpu.pipeline_mode<synchronous>, transform_indices = @transform_1, window_bounds = array<i64: 512, 320>}, {pipeline_mode = #tpu.pipeline_mode<synchronous>, transform_indices = @transform_2, window_bounds = array<i64: 1, 320>}, {transform_indices = @transform_3, window_bounds = array<i64: 8, 320>}]} {
    %c0 = arith.constant 0 : index
    %c0_0 = arith.constant 0 : index
    %0 = vector.load %arg1[%c0, %c0_0] : memref<8x512xbf16, #tpu.memory_space<vmem>>, vector<8x512xbf16>
    %c0_1 = arith.constant 0 : index
    %c0_2 = arith.constant 0 : index
    %1 = vector.load %arg2[%c0_1, %c0_2] : memref<512x320xbf16, #tpu.memory_space<vmem>>, vector<512x320xbf16>
    %cst = arith.constant dense<0.000000e+00> : vector<8x320xf32>
    %2 = tpu.matmul %0, %1, %cst {dimension_numbers = #tpu.dot_dimension_numbers<[1], [0], [0], [1], [0, 0, 1, 1], [], []>} : vector<8x512xbf16>, vector<512x320xbf16>, vector<8x320xf32> -> vector<8x320xf32>
    %c0_3 = arith.constant 0 : index
    %c0_4 = arith.constant 0 : index
    %3 = vector.load %arg3[%c0_3, %c0_4] : memref<1x320xf32, #tpu.memory_space<vmem>>, vector<1x320xf32>
    %4 = vector.broadcast %3 : vector<1x320xf32> to vector<8x320xf32>
    %5 = arith.addf %2, %4 : vector<8x320xf32>
    %cst_5 = arith.constant 0.000000e+00 : f32
    %6 = vector.broadcast %cst_5 : f32 to vector<8x320xf32>
    %7 = arith.maximumf %5, %6 : vector<8x320xf32>
    %8 = arith.truncf %7 : vector<8x320xf32> to vector<8x320xbf16>
    %c0_6 = arith.constant 0 : index
    %c0_7 = arith.constant 0 : index
    %9 = vector.load %arg4[%c0_6, %c0_7] : memref<8x320xbf16, #tpu.memory_space<vmem>>, vector<8x320xbf16>
    tpu.vector_store %arg4[%c0_6, %c0_7], %8 {strides = array<i32>} : memref<8x320xbf16, #tpu.memory_space<vmem>>, vector<8x320xbf16>,
    return
  }
  func.func @transform_0(%arg0: i32) -> (i32, i32) {
    %c0_i32 = arith.constant 0 : i32
    %c0_i32_0 = arith.constant 0 : i32
    return %arg0, %c0_i32 : i32, i32
  }
  func.func @transform_1(%arg0: i32) -> (i32, i32) {
    %c0_i32 = arith.constant 0 : i32
    %c0_i32_0 = arith.constant 0 : i32
    %c0_i32_1 = arith.constant 0 : i32
    return %c0_i32, %c0_i32_0 : i32, i32
  }
  func.func @transform_2(%arg0: i32) -> (i32, i32) {
    %c0_i32 = arith.constant 0 : i32
    %c0_i32_0 = arith.constant 0 : i32
    %c0_i32_1 = arith.constant 0 : i32
    return %c0_i32, %c0_i32_0 : i32, i32
  }
  func.func @transform_3(%arg0: i32) -> (i32, i32) {
    %c0_i32 = arith.constant 0 : i32
    %c0_i32_0 = arith.constant 0 : i32
    return %arg0, %c0_i32 : i32, i32
  }
}

module attributes {stable_mosaic.version = 11 : i64} {
  func.func @_mm_bias_kernel(%arg0: i32, %arg1: memref<2x1280xbf16, #tpu.memory_space<vmem>>, %arg2: memref<1280x512xbf16, #tpu.memory_space<vmem>>, %arg3: memref<1x512xf32, #tpu.memory_space<vmem>>, %arg4: memref<2x512xbf16, #tpu.memory_space<vmem>>) attributes {dimension_semantics = [#tpu.dimension_semantics<parallel>], iteration_bounds = array<i64: 1>, scalar_prefetch = 0 : i64, scratch_operands = 0 : i64, tpu.core_type = #tpu.core_type<tc>, window_params = [{transform_indices = @transform_0, window_bounds = array<i64: 2, 1280>}, {pipeline_mode = #tpu.pipeline_mode<synchronous>, transform_indices = @transform_1, window_bounds = array<i64: 1280, 512>}, {pipeline_mode = #tpu.pipeline_mode<synchronous>, transform_indices = @transform_2, window_bounds = array<i64: 1, 512>}, {transform_indices = @transform_3, window_bounds = array<i64: 2, 512>}]} {
    %c0 = arith.constant 0 : index
    %c0_0 = arith.constant 0 : index
    %0 = vector.load %arg1[%c0, %c0_0] : memref<2x1280xbf16, #tpu.memory_space<vmem>>, vector<2x1280xbf16>
    %c0_1 = arith.constant 0 : index
    %c0_2 = arith.constant 0 : index
    %1 = vector.load %arg2[%c0_1, %c0_2] : memref<1280x512xbf16, #tpu.memory_space<vmem>>, vector<1280x512xbf16>
    %cst = arith.constant dense<0.000000e+00> : vector<2x512xf32>
    %2 = tpu.matmul %0, %1, %cst {dimension_numbers = #tpu.dot_dimension_numbers<[1], [0], [0], [1], [0, 0, 1, 1], [], []>} : vector<2x1280xbf16>, vector<1280x512xbf16>, vector<2x512xf32> -> vector<2x512xf32>
    %c0_3 = arith.constant 0 : index
    %c0_4 = arith.constant 0 : index
    %3 = vector.load %arg3[%c0_3, %c0_4] : memref<1x512xf32, #tpu.memory_space<vmem>>, vector<1x512xf32>
    %4 = vector.broadcast %3 : vector<1x512xf32> to vector<2x512xf32>
    %5 = arith.addf %2, %4 : vector<2x512xf32>
    %cst_5 = arith.constant 0.000000e+00 : f32
    %6 = vector.broadcast %cst_5 : f32 to vector<2x512xf32>
    %7 = arith.maximumf %5, %6 : vector<2x512xf32>
    %8 = arith.truncf %7 : vector<2x512xf32> to vector<2x512xbf16>
    %c0_6 = arith.constant 0 : index
    %c0_7 = arith.constant 0 : index
    %9 = vector.load %arg4[%c0_6, %c0_7] : memref<2x512xbf16, #tpu.memory_space<vmem>>, vector<2x512xbf16>
    tpu.vector_store %arg4[%c0_6, %c0_7], %8 {strides = array<i32>} : memref<2x512xbf16, #tpu.memory_space<vmem>>, vector<2x512xbf16>,
    return
  }
  func.func @transform_0(%arg0: i32) -> (i32, i32) {
    %c0_i32 = arith.constant 0 : i32
    %c0_i32_0 = arith.constant 0 : i32
    return %arg0, %c0_i32 : i32, i32
  }
  func.func @transform_1(%arg0: i32) -> (i32, i32) {
    %c0_i32 = arith.constant 0 : i32
    %c0_i32_0 = arith.constant 0 : i32
    %c0_i32_1 = arith.constant 0 : i32
    return %c0_i32, %c0_i32_0 : i32, i32
  }
  func.func @transform_2(%arg0: i32) -> (i32, i32) {
    %c0_i32 = arith.constant 0 : i32
    %c0_i32_0 = arith.constant 0 : i32
    %c0_i32_1 = arith.constant 0 : i32
    return %c0_i32, %c0_i32_0 : i32, i32
  }
  func.func @transform_3(%arg0: i32) -> (i32, i32) {
    %c0_i32 = arith.constant 0 : i32
    %c0_i32_0 = arith.constant 0 : i32
    return %arg0, %c0_i32 : i32, i32
  }
}

module attributes {stable_mosaic.version = 11 : i64} {
  func.func @_fuse_kernel(%arg0: i32, %arg1: memref<1x1x512xbf16, #tpu.memory_space<vmem>>, %arg2: memref<1x4x320xbf16, #tpu.memory_space<vmem>>, %arg3: memref<512x320xbf16, #tpu.memory_space<vmem>>, %arg4: memref<1x320xf32, #tpu.memory_space<vmem>>, %arg5: memref<4x1xbf16, #tpu.memory_space<vmem>>, %arg6: memref<1x4x320xbf16, #tpu.memory_space<vmem>>) attributes {dimension_semantics = [#tpu.dimension_semantics<parallel>], iteration_bounds = array<i64: 2>, scalar_prefetch = 0 : i64, scratch_operands = 0 : i64, tpu.core_type = #tpu.core_type<tc>, window_params = [{transform_indices = @transform_0, window_bounds = array<i64: 1, 1, 512>}, {transform_indices = @transform_1, window_bounds = array<i64: 1, 4, 320>}, {pipeline_mode = #tpu.pipeline_mode<synchronous>, transform_indices = @transform_2, window_bounds = array<i64: 512, 320>}, {pipeline_mode = #tpu.pipeline_mode<synchronous>, transform_indices = @transform_3, window_bounds = array<i64: 1, 320>}, {pipeline_mode = #tpu.pipeline_mode<synchronous>, transform_indices = @transform_4, window_bounds = array<i64: 4, 1>}, {transform_indices = @transform_5, window_bounds = array<i64: 1, 4, 320>}]} {
    %c0 = arith.constant 0 : index
    %c0_0 = arith.constant 0 : index
    %c0_1 = arith.constant 0 : index
    %0 = vector.load %arg1[%c0, %c0_0, %c0_1] : memref<1x1x512xbf16, #tpu.memory_space<vmem>>, vector<1x1x512xbf16>
    %1 = vector.shape_cast %0 : vector<1x1x512xbf16> to vector<1x512xbf16>
    %c0_2 = arith.constant 0 : index
    %c0_3 = arith.constant 0 : index
    %2 = vector.load %arg3[%c0_2, %c0_3] : memref<512x320xbf16, #tpu.memory_space<vmem>>, vector<512x320xbf16>
    %cst = arith.constant dense<0.000000e+00> : vector<1x320xf32>
    %3 = tpu.matmul %1, %2, %cst {dimension_numbers = #tpu.dot_dimension_numbers<[1], [0], [0], [1], [0, 0, 1, 1], [], []>} : vector<1x512xbf16>, vector<512x320xbf16>, vector<1x320xf32> -> vector<1x320xf32>
    %c0_4 = arith.constant 0 : index
    %c0_5 = arith.constant 0 : index
    %4 = vector.load %arg4[%c0_4, %c0_5] : memref<1x320xf32, #tpu.memory_space<vmem>>, vector<1x320xf32>
    %5 = arith.addf %3, %4 : vector<1x320xf32>
    %c0_6 = arith.constant 0 : index
    %c0_7 = arith.constant 0 : index
    %6 = vector.load %arg5[%c0_6, %c0_7] : memref<4x1xbf16, #tpu.memory_space<vmem>>, vector<4x1xbf16>
    %7 = arith.truncf %5 : vector<1x320xf32> to vector<1x320xbf16>
    %cst_8 = arith.constant dense<0.000000e+00> : vector<4x320xf32>
    %8 = tpu.matmul %6, %7, %cst_8 {dimension_numbers = #tpu.dot_dimension_numbers<[1], [0], [0], [1], [0, 0, 1, 1], [], []>} : vector<4x1xbf16>, vector<1x320xbf16>, vector<4x320xf32> -> vector<4x320xf32>
    %c0_9 = arith.constant 0 : index
    %c0_10 = arith.constant 0 : index
    %c0_11 = arith.constant 0 : index
    %9 = vector.load %arg2[%c0_9, %c0_10, %c0_11] : memref<1x4x320xbf16, #tpu.memory_space<vmem>>, vector<1x4x320xbf16>
    %10 = vector.shape_cast %9 : vector<1x4x320xbf16> to vector<4x320xbf16>
    %11 = arith.extf %10 : vector<4x320xbf16> to vector<4x320xf32>
    %12 = arith.addf %8, %11 : vector<4x320xf32>
    %cst_12 = arith.constant 0.000000e+00 : f32
    %13 = vector.broadcast %cst_12 : f32 to vector<4x320xf32>
    %14 = arith.maximumf %12, %13 : vector<4x320xf32>
    %15 = arith.truncf %14 : vector<4x320xf32> to vector<4x320xbf16>
    %c0_13 = arith.constant 0 : index
    %c0_14 = arith.constant 0 : index
    %c0_15 = arith.constant 0 : index
    %16 = vector.load %arg6[%c0_13, %c0_14, %c0_15] : memref<1x4x320xbf16, #tpu.memory_space<vmem>>, vector<1x4x320xbf16>
    %17 = vector.shape_cast %16 : vector<1x4x320xbf16> to vector<4x320xbf16>
    %18 = vector.shape_cast %15 : vector<4x320xbf16> to vector<1x4x320xbf16>
    tpu.vector_store %arg6[%c0_13, %c0_14, %c0_15], %18 {strides = array<i32>} : memref<1x4x320xbf16, #tpu.memory_space<vmem>>, vector<1x4x320xbf16>,
    return
  }
  func.func @transform_0(%arg0: i32) -> (i32, i32, i32) {
    %c0_i32 = arith.constant 0 : i32
    %c0_i32_0 = arith.constant 0 : i32
    %c0_i32_1 = arith.constant 0 : i32
    return %arg0, %c0_i32, %c0_i32_0 : i32, i32, i32
  }
  func.func @transform_1(%arg0: i32) -> (i32, i32, i32) {
    %c0_i32 = arith.constant 0 : i32
    %c0_i32_0 = arith.constant 0 : i32
    %c0_i32_1 = arith.constant 0 : i32
    return %arg0, %c0_i32, %c0_i32_0 : i32, i32, i32
  }
  func.func @transform_2(%arg0: i32) -> (i32, i32) {
    %c0_i32 = arith.constant 0 : i32
    %c0_i32_0 = arith.constant 0 : i32
    %c0_i32_1 = arith.constant 0 : i32
    return %c0_i32, %c0_i32_0 : i32, i32
  }
  func.func @transform_3(%arg0: i32) -> (i32, i32) {
    %c0_i32 = arith.constant 0 : i32
    %c0_i32_0 = arith.constant 0 : i32
    %c0_i32_1 = arith.constant 0 : i32
    return %c0_i32, %c0_i32_0 : i32, i32
  }
  func.func @transform_4(%arg0: i32) -> (i32, i32) {
    %c0_i32 = arith.constant 0 : i32
    %c0_i32_0 = arith.constant 0 : i32
    %c0_i32_1 = arith.constant 0 : i32
    return %c0_i32, %c0_i32_0 : i32, i32
  }
  func.func @transform_5(%arg0: i32) -> (i32, i32, i32) {
    %c0_i32 = arith.constant 0 : i32
    %c0_i32_0 = arith.constant 0 : i32
    %c0_i32_1 = arith.constant 0 : i32
    return %arg0, %c0_i32, %c0_i32_0 : i32, i32, i32
  }
}

module attributes {stable_mosaic.version = 11 : i64} {
  func.func @_fuse_kernel(%arg0: i32, %arg1: memref<1x4x320xbf16, #tpu.memory_space<vmem>>, %arg2: memref<1x16x128xbf16, #tpu.memory_space<vmem>>, %arg3: memref<320x128xbf16, #tpu.memory_space<vmem>>, %arg4: memref<1x128xf32, #tpu.memory_space<vmem>>, %arg5: memref<16x4xbf16, #tpu.memory_space<vmem>>, %arg6: memref<1x16x128xbf16, #tpu.memory_space<vmem>>) attributes {dimension_semantics = [#tpu.dimension_semantics<parallel>], iteration_bounds = array<i64: 2>, scalar_prefetch = 0 : i64, scratch_operands = 0 : i64, tpu.core_type = #tpu.core_type<tc>, window_params = [{transform_indices = @transform_0, window_bounds = array<i64: 1, 4, 320>}, {transform_indices = @transform_1, window_bounds = array<i64: 1, 16, 128>}, {pipeline_mode = #tpu.pipeline_mode<synchronous>, transform_indices = @transform_2, window_bounds = array<i64: 320, 128>}, {pipeline_mode = #tpu.pipeline_mode<synchronous>, transform_indices = @transform_3, window_bounds = array<i64: 1, 128>}, {pipeline_mode = #tpu.pipeline_mode<synchronous>, transform_indices = @transform_4, window_bounds = array<i64: 16, 4>}, {transform_indices = @transform_5, window_bounds = array<i64: 1, 16, 128>}]} {
    %c0 = arith.constant 0 : index
    %c0_0 = arith.constant 0 : index
    %c0_1 = arith.constant 0 : index
    %0 = vector.load %arg1[%c0, %c0_0, %c0_1] : memref<1x4x320xbf16, #tpu.memory_space<vmem>>, vector<1x4x320xbf16>
    %1 = vector.shape_cast %0 : vector<1x4x320xbf16> to vector<4x320xbf16>
    %c0_2 = arith.constant 0 : index
    %c0_3 = arith.constant 0 : index
    %2 = vector.load %arg3[%c0_2, %c0_3] : memref<320x128xbf16, #tpu.memory_space<vmem>>, vector<320x128xbf16>
    %cst = arith.constant dense<0.000000e+00> : vector<4x128xf32>
    %3 = tpu.matmul %1, %2, %cst {dimension_numbers = #tpu.dot_dimension_numbers<[1], [0], [0], [1], [0, 0, 1, 1], [], []>} : vector<4x320xbf16>, vector<320x128xbf16>, vector<4x128xf32> -> vector<4x128xf32>
    %c0_4 = arith.constant 0 : index
    %c0_5 = arith.constant 0 : index
    %4 = vector.load %arg4[%c0_4, %c0_5] : memref<1x128xf32, #tpu.memory_space<vmem>>, vector<1x128xf32>
    %5 = vector.broadcast %4 : vector<1x128xf32> to vector<4x128xf32>
    %6 = arith.addf %3, %5 : vector<4x128xf32>
    %c0_6 = arith.constant 0 : index
    %c0_7 = arith.constant 0 : index
    %7 = vector.load %arg5[%c0_6, %c0_7] : memref<16x4xbf16, #tpu.memory_space<vmem>>, vector<16x4xbf16>
    %8 = arith.truncf %6 : vector<4x128xf32> to vector<4x128xbf16>
    %cst_8 = arith.constant dense<0.000000e+00> : vector<16x128xf32>
    %9 = tpu.matmul %7, %8, %cst_8 {dimension_numbers = #tpu.dot_dimension_numbers<[1], [0], [0], [1], [0, 0, 1, 1], [], []>} : vector<16x4xbf16>, vector<4x128xbf16>, vector<16x128xf32> -> vector<16x128xf32>
    %c0_9 = arith.constant 0 : index
    %c0_10 = arith.constant 0 : index
    %c0_11 = arith.constant 0 : index
    %10 = vector.load %arg2[%c0_9, %c0_10, %c0_11] : memref<1x16x128xbf16, #tpu.memory_space<vmem>>, vector<1x16x128xbf16>
    %11 = vector.shape_cast %10 : vector<1x16x128xbf16> to vector<16x128xbf16>
    %12 = arith.extf %11 : vector<16x128xbf16> to vector<16x128xf32>
    %13 = arith.addf %9, %12 : vector<16x128xf32>
    %cst_12 = arith.constant 0.000000e+00 : f32
    %14 = vector.broadcast %cst_12 : f32 to vector<16x128xf32>
    %15 = arith.maximumf %13, %14 : vector<16x128xf32>
    %16 = arith.truncf %15 : vector<16x128xf32> to vector<16x128xbf16>
    %c0_13 = arith.constant 0 : index
    %c0_14 = arith.constant 0 : index
    %c0_15 = arith.constant 0 : index
    %17 = vector.load %arg6[%c0_13, %c0_14, %c0_15] : memref<1x16x128xbf16, #tpu.memory_space<vmem>>, vector<1x16x128xbf16>
    %18 = vector.shape_cast %17 : vector<1x16x128xbf16> to vector<16x128xbf16>
    %19 = vector.shape_cast %16 : vector<16x128xbf16> to vector<1x16x128xbf16>
    tpu.vector_store %arg6[%c0_13, %c0_14, %c0_15], %19 {strides = array<i32>} : memref<1x16x128xbf16, #tpu.memory_space<vmem>>, vector<1x16x128xbf16>,
    return
  }
  func.func @transform_0(%arg0: i32) -> (i32, i32, i32) {
    %c0_i32 = arith.constant 0 : i32
    %c0_i32_0 = arith.constant 0 : i32
    %c0_i32_1 = arith.constant 0 : i32
    return %arg0, %c0_i32, %c0_i32_0 : i32, i32, i32
  }
  func.func @transform_1(%arg0: i32) -> (i32, i32, i32) {
    %c0_i32 = arith.constant 0 : i32
    %c0_i32_0 = arith.constant 0 : i32
    %c0_i32_1 = arith.constant 0 : i32
    return %arg0, %c0_i32, %c0_i32_0 : i32, i32, i32
  }
  func.func @transform_2(%arg0: i32) -> (i32, i32) {
    %c0_i32 = arith.constant 0 : i32
    %c0_i32_0 = arith.constant 0 : i32
    %c0_i32_1 = arith.constant 0 : i32
    return %c0_i32, %c0_i32_0 : i32, i32
  }
  func.func @transform_3(%arg0: i32) -> (i32, i32) {
    %c0_i32 = arith.constant 0 : i32
    %c0_i32_0 = arith.constant 0 : i32
    %c0_i32_1 = arith.constant 0 : i32
    return %c0_i32, %c0_i32_0 : i32, i32
  }
  func.func @transform_4(%arg0: i32) -> (i32, i32) {
    %c0_i32 = arith.constant 0 : i32
    %c0_i32_0 = arith.constant 0 : i32
    %c0_i32_1 = arith.constant 0 : i32
    return %c0_i32, %c0_i32_0 : i32, i32
  }
  func.func @transform_5(%arg0: i32) -> (i32, i32, i32) {
    %c0_i32 = arith.constant 0 : i32
    %c0_i32_0 = arith.constant 0 : i32
    %c0_i32_1 = arith.constant 0 : i32
    return %arg0, %c0_i32, %c0_i32_0 : i32, i32, i32
  }
}

module attributes {stable_mosaic.version = 11 : i64} {
  func.func @_fuse_kernel(%arg0: i32, %arg1: memref<1x16x128xbf16, #tpu.memory_space<vmem>>, %arg2: memref<1x64x64xbf16, #tpu.memory_space<vmem>>, %arg3: memref<128x64xbf16, #tpu.memory_space<vmem>>, %arg4: memref<1x64xf32, #tpu.memory_space<vmem>>, %arg5: memref<64x16xbf16, #tpu.memory_space<vmem>>, %arg6: memref<1x64x64xbf16, #tpu.memory_space<vmem>>) attributes {dimension_semantics = [#tpu.dimension_semantics<parallel>], iteration_bounds = array<i64: 2>, scalar_prefetch = 0 : i64, scratch_operands = 0 : i64, tpu.core_type = #tpu.core_type<tc>, window_params = [{transform_indices = @transform_0, window_bounds = array<i64: 1, 16, 128>}, {transform_indices = @transform_1, window_bounds = array<i64: 1, 64, 64>}, {pipeline_mode = #tpu.pipeline_mode<synchronous>, transform_indices = @transform_2, window_bounds = array<i64: 128, 64>}, {pipeline_mode = #tpu.pipeline_mode<synchronous>, transform_indices = @transform_3, window_bounds = array<i64: 1, 64>}, {pipeline_mode = #tpu.pipeline_mode<synchronous>, transform_indices = @transform_4, window_bounds = array<i64: 64, 16>}, {transform_indices = @transform_5, window_bounds = array<i64: 1, 64, 64>}]} {
    %c0 = arith.constant 0 : index
    %c0_0 = arith.constant 0 : index
    %c0_1 = arith.constant 0 : index
    %0 = vector.load %arg1[%c0, %c0_0, %c0_1] : memref<1x16x128xbf16, #tpu.memory_space<vmem>>, vector<1x16x128xbf16>
    %1 = vector.shape_cast %0 : vector<1x16x128xbf16> to vector<16x128xbf16>
    %c0_2 = arith.constant 0 : index
    %c0_3 = arith.constant 0 : index
    %2 = vector.load %arg3[%c0_2, %c0_3] : memref<128x64xbf16, #tpu.memory_space<vmem>>, vector<128x64xbf16>
    %cst = arith.constant dense<0.000000e+00> : vector<16x64xf32>
    %3 = tpu.matmul %1, %2, %cst {dimension_numbers = #tpu.dot_dimension_numbers<[1], [0], [0], [1], [0, 0, 1, 1], [], []>} : vector<16x128xbf16>, vector<128x64xbf16>, vector<16x64xf32> -> vector<16x64xf32>
    %c0_4 = arith.constant 0 : index
    %c0_5 = arith.constant 0 : index
    %4 = vector.load %arg4[%c0_4, %c0_5] : memref<1x64xf32, #tpu.memory_space<vmem>>, vector<1x64xf32>
    %5 = vector.broadcast %4 : vector<1x64xf32> to vector<16x64xf32>
    %6 = arith.addf %3, %5 : vector<16x64xf32>
    %c0_6 = arith.constant 0 : index
    %c0_7 = arith.constant 0 : index
    %7 = vector.load %arg5[%c0_6, %c0_7] : memref<64x16xbf16, #tpu.memory_space<vmem>>, vector<64x16xbf16>
    %8 = arith.truncf %6 : vector<16x64xf32> to vector<16x64xbf16>
    %cst_8 = arith.constant dense<0.000000e+00> : vector<64x64xf32>
    %9 = tpu.matmul %7, %8, %cst_8 {dimension_numbers = #tpu.dot_dimension_numbers<[1], [0], [0], [1], [0, 0, 1, 1], [], []>} : vector<64x16xbf16>, vector<16x64xbf16>, vector<64x64xf32> -> vector<64x64xf32>
    %c0_9 = arith.constant 0 : index
    %c0_10 = arith.constant 0 : index
    %c0_11 = arith.constant 0 : index
    %10 = vector.load %arg2[%c0_9, %c0_10, %c0_11] : memref<1x64x64xbf16, #tpu.memory_space<vmem>>, vector<1x64x64xbf16>
    %11 = vector.shape_cast %10 : vector<1x64x64xbf16> to vector<64x64xbf16>
    %12 = arith.extf %11 : vector<64x64xbf16> to vector<64x64xf32>
    %13 = arith.addf %9, %12 : vector<64x64xf32>
    %cst_12 = arith.constant 0.000000e+00 : f32
    %14 = vector.broadcast %cst_12 : f32 to vector<64x64xf32>
    %15 = arith.maximumf %13, %14 : vector<64x64xf32>
    %16 = arith.truncf %15 : vector<64x64xf32> to vector<64x64xbf16>
    %c0_13 = arith.constant 0 : index
    %c0_14 = arith.constant 0 : index
    %c0_15 = arith.constant 0 : index
    %17 = vector.load %arg6[%c0_13, %c0_14, %c0_15] : memref<1x64x64xbf16, #tpu.memory_space<vmem>>, vector<1x64x64xbf16>
    %18 = vector.shape_cast %17 : vector<1x64x64xbf16> to vector<64x64xbf16>
    %19 = vector.shape_cast %16 : vector<64x64xbf16> to vector<1x64x64xbf16>
    tpu.vector_store %arg6[%c0_13, %c0_14, %c0_15], %19 {strides = array<i32>} : memref<1x64x64xbf16, #tpu.memory_space<vmem>>, vector<1x64x64xbf16>,
    return
  }
  func.func @transform_0(%arg0: i32) -> (i32, i32, i32) {
    %c0_i32 = arith.constant 0 : i32
    %c0_i32_0 = arith.constant 0 : i32
    %c0_i32_1 = arith.constant 0 : i32
    return %arg0, %c0_i32, %c0_i32_0 : i32, i32, i32
  }
  func.func @transform_1(%arg0: i32) -> (i32, i32, i32) {
    %c0_i32 = arith.constant 0 : i32
    %c0_i32_0 = arith.constant 0 : i32
    %c0_i32_1 = arith.constant 0 : i32
    return %arg0, %c0_i32, %c0_i32_0 : i32, i32, i32
  }
  func.func @transform_2(%arg0: i32) -> (i32, i32) {
    %c0_i32 = arith.constant 0 : i32
    %c0_i32_0 = arith.constant 0 : i32
    %c0_i32_1 = arith.constant 0 : i32
    return %c0_i32, %c0_i32_0 : i32, i32
  }
  func.func @transform_3(%arg0: i32) -> (i32, i32) {
    %c0_i32 = arith.constant 0 : i32
    %c0_i32_0 = arith.constant 0 : i32
    %c0_i32_1 = arith.constant 0 : i32
    return %c0_i32, %c0_i32_0 : i32, i32
  }
  func.func @transform_4(%arg0: i32) -> (i32, i32) {
    %c0_i32 = arith.constant 0 : i32
    %c0_i32_0 = arith.constant 0 : i32
    %c0_i32_1 = arith.constant 0 : i32
    return %c0_i32, %c0_i32_0 : i32, i32
  }
  func.func @transform_5(%arg0: i32) -> (i32, i32, i32) {
    %c0_i32 = arith.constant 0 : i32
    %c0_i32_0 = arith.constant 0 : i32
    %c0_i32_1 = arith.constant 0 : i32
    return %arg0, %c0_i32, %c0_i32_0 : i32, i32, i32
  }
}

module attributes {stable_mosaic.version = 11 : i64} {
  func.func @_head_kernel(%arg0: i32, %arg1: i32, %arg2: memref<1x8x512xbf16, #tpu.memory_space<vmem>>, %arg3: memref<1x512x32xbf16, #tpu.memory_space<vmem>>, %arg4: memref<1x1xf32, #tpu.memory_space<vmem>>, %arg5: memref<32x8xf32, #tpu.memory_space<vmem>>, %arg6: memref<1x1x32x32xf32, #tpu.memory_space<vmem>>) attributes {dimension_semantics = [#tpu.dimension_semantics<parallel>, #tpu.dimension_semantics<parallel>], iteration_bounds = array<i64: 2, 1>, scalar_prefetch = 0 : i64, scratch_operands = 0 : i64, tpu.core_type = #tpu.core_type<tc>, window_params = [{transform_indices = @transform_0, window_bounds = array<i64: 1, 8, 512>}, {transform_indices = @transform_1, window_bounds = array<i64: 1, 512, 32>}, {transform_indices = @transform_2, window_bounds = array<i64: 1, 1>}, {pipeline_mode = #tpu.pipeline_mode<synchronous>, transform_indices = @transform_3, window_bounds = array<i64: 32, 8>}, {transform_indices = @transform_4, window_bounds = array<i64: 1, 1, 32, 32>}]} {
    %c0 = arith.constant 0 : index
    %c0_0 = arith.constant 0 : index
    %c0_1 = arith.constant 0 : index
    %0 = vector.load %arg2[%c0, %c0_0, %c0_1] : memref<1x8x512xbf16, #tpu.memory_space<vmem>>, vector<1x8x512xbf16>
    %1 = vector.shape_cast %0 : vector<1x8x512xbf16> to vector<8x512xbf16>
    %c0_2 = arith.constant 0 : index
    %c0_3 = arith.constant 0 : index
    %c0_4 = arith.constant 0 : index
    %2 = vector.load %arg3[%c0_2, %c0_3, %c0_4] : memref<1x512x32xbf16, #tpu.memory_space<vmem>>, vector<1x512x32xbf16>
    %3 = vector.shape_cast %2 : vector<1x512x32xbf16> to vector<512x32xbf16>
    %cst = arith.constant dense<0.000000e+00> : vector<8x32xf32>
    %4 = tpu.matmul %1, %3, %cst {dimension_numbers = #tpu.dot_dimension_numbers<[1], [0], [0], [1], [0, 0, 1, 1], [], []>} : vector<8x512xbf16>, vector<512x32xbf16>, vector<8x32xf32> -> vector<8x32xf32>
    %c0_5 = arith.constant 0 : index
    %c0_6 = arith.constant 0 : index
    %5 = vector.load %arg4[%c0_5, %c0_6] : memref<1x1xf32, #tpu.memory_space<vmem>>, vector<1x1xf32>
    %6 = vector.broadcast %5 : vector<1x1xf32> to vector<8x32xf32>
    %7 = arith.addf %4, %6 : vector<8x32xf32>
    %c0_7 = arith.constant 0 : index
    %c0_8 = arith.constant 0 : index
    %8 = vector.load %arg5[%c0_7, %c0_8] : memref<32x8xf32, #tpu.memory_space<vmem>>, vector<32x8xf32>
    %cst_9 = arith.constant dense<0.000000e+00> : vector<32x32xf32>
    %9 = tpu.matmul %8, %7, %cst_9 {dimension_numbers = #tpu.dot_dimension_numbers<[1], [0], [0], [1], [0, 0, 1, 1], [], []>} : vector<32x8xf32>, vector<8x32xf32>, vector<32x32xf32> -> vector<32x32xf32>
    %c0_10 = arith.constant 0 : index
    %c0_11 = arith.constant 0 : index
    %c0_12 = arith.constant 0 : index
    %c0_13 = arith.constant 0 : index
    %10 = vector.load %arg6[%c0_10, %c0_11, %c0_12, %c0_13] : memref<1x1x32x32xf32, #tpu.memory_space<vmem>>, vector<1x1x32x32xf32>
    %11 = vector.shape_cast %10 : vector<1x1x32x32xf32> to vector<32x32xf32>
    %12 = vector.shape_cast %9 : vector<32x32xf32> to vector<1x1x32x32xf32>
    tpu.vector_store %arg6[%c0_10, %c0_11, %c0_12, %c0_13], %12 {strides = array<i32>} : memref<1x1x32x32xf32, #tpu.memory_space<vmem>>, vector<1x1x32x32xf32>,
    return
  }
  func.func @transform_0(%arg0: i32, %arg1: i32) -> (i32, i32, i32) {
    %c0_i32 = arith.constant 0 : i32
    %c0_i32_0 = arith.constant 0 : i32
    %c0_i32_1 = arith.constant 0 : i32
    return %arg0, %c0_i32, %c0_i32_0 : i32, i32, i32
  }
  func.func @transform_1(%arg0: i32, %arg1: i32) -> (i32, i32, i32) {
    %c0_i32 = arith.constant 0 : i32
    %c0_i32_0 = arith.constant 0 : i32
    %c0_i32_1 = arith.constant 0 : i32
    return %arg1, %c0_i32, %c0_i32_0 : i32, i32, i32
  }
  func.func @transform_2(%arg0: i32, %arg1: i32) -> (i32, i32) {
    %c0_i32 = arith.constant 0 : i32
    %c0_i32_0 = arith.constant 0 : i32
    return %c0_i32, %arg1 : i32, i32
  }
  func.func @transform_3(%arg0: i32, %arg1: i32) -> (i32, i32) {
    %c0_i32 = arith.constant 0 : i32
    %c0_i32_0 = arith.constant 0 : i32
    %c0_i32_1 = arith.constant 0 : i32
    return %c0_i32, %c0_i32_0 : i32, i32
  }
  func.func @transform_4(%arg0: i32, %arg1: i32) -> (i32, i32, i32, i32) {
    %c0_i32 = arith.constant 0 : i32
    %c0_i32_0 = arith.constant 0 : i32
    %c0_i32_1 = arith.constant 0 : i32
    return %arg0, %arg1, %c0_i32, %c0_i32_0 : i32, i32, i32, i32
  }
}

</mosaic_0001>

<bundles_post_ra>
// kernel: pvt_dense_decoder_forward.14
= control target key start
LH: loop header
LB: loop body
LE: loop exit
PB: predicated region body
PF: predicated region fallthrough
CT: control target
= control target key end

     0   :  { %8 = vsyncpa [#allocation3], 0  ;;  %s1631_s0 = inlined_call_operand.vmem [shape: bf16[2048,1], index: 0, kind: input, shape index: {}]   ;;  %s1632_s1 = inlined_call_operand.hbm [shape: bf16[1,3], index: 1, kind: input, shape index: {}]   ;;  %s1633_s2 = inlined_call_operand.hbm [shape: f32[1,3], index: 2, kind: input, shape index: {}]   ;;  %s1634_s3 = inlined_call_operand.vmem [shape: bf16[2048,3], index: 3, kind: output, shape index: {}]  }
   0x1   :  { %9 = vsyncpa [#allocation5], 0  ;;  %s1317_s12 = smov 0  }
   0x2 LB: > { %s126_s15 = sshll.u32 %s1632_s1, 4  ;;  %s977_s16 = sadd.s32 4294967295, %s1292_s12   ;;  %s1292_s12 = sphi %s1317_s12, %s15_s12   ;;  %s127_s15 = int_to_ptr.hbm [resolvable:$true] %s126_s15 }
   0x3   : > { %p979_p0 = scmp.ge.s32.totalorder %s1292_s12, 1  ;;  %p114_p1 = scmp.lt.s32.totalorder %s1292_s12, 5 }
   0x4   : > { %p1328_p2 = scmp.eq.s32.totalorder %s977_s16, 0  ;;  %s1294_s19 = smov [#allocation2]  }
   0x5   : > { %p1332_p3 = pnand %p979_p0, %p114_p1  ;;  %s128_s20 = sshll.u32 %s1294_s19, 4  ;;  %s129_s20 = int_to_ptr.vmem [resolvable:$true] %s128_s20 }
   0x6   : > { %s138_s23 = sshll.u32 %s1633_s2, 4  ;;  %s1295_s24 = smov [#allocation4]   ;;  %s139_s23 = int_to_ptr.hbm [resolvable:$true] %s138_s23 }
   0x7   : > { %p1195_p4 = pneg %p1332_p3  ;;  %s140_s25 = sshll.u32 %s1295_s24, 4  ;;  %s141_s25 = int_to_ptr.vmem [resolvable:$true] %s140_s25 }
   0x8   : > { %162 = sbr.rel (%p1332_p3) target bundleno = 285 (0x11d), region = 32 }
   0x9   : > { %p1196_p5 = pnand %p1328_p2, %p1195_p4 }
   0xb   : > { %1198 = dma.hbm_to_vmem [thread:$0]  (!%p1196_p5), %s127_s15, 16, %s129_s20, [#allocation3]  }
   0xc   : > { %1201 = dma.hbm_to_vmem [thread:$0]  (!%p1196_p5), %s139_s23, 16, %s141_s25, [#allocation5]  }
   0xd   : > { %1283 = dma.done.wait (%p1328_p2), [#allocation3], 16  }
   0xe   : > { %1285 = vsyncadd (%p1328_p2), [#allocation3], 4294967280 }
   0xf   : > { %1287 = dma.done.wait (%p1328_p2), [#allocation5], 16  }
  0x10   : > { %1289 = vsyncadd (%p1328_p2), [#allocation5], 4294967280  ;;  %s986_s26 = sshll.u32 %s977_s16, 6  ;;  %vm531_vm0 = vcmask 1040384   ;;  %v1296_v0 = vmov 0   ;;  %vm434_vm1 = vcmask 7168  }
  0x11   : > { %p193_p6 = scmp.lt.s32.totalorder %s986_s26, 255  ;;  %v533_v1 = vsel %vm531_vm0, 65535, %v1296_v0  ;;  %v269_v2 = vld [vmem:[#allocation2] sm:$0x1]  ;;  %v1427_v36 = vld [vmem:[#allocation4] ss:$0 sm:$0xff] }
  0x12   : > { %v535_v3 = vand.u32 %v533_v1, %v269_v2  ;;  %vm834_vm2 = vcmask 19456  }
  0x13   : > { %s1638_s26 = smov (!%p193_p6, %s986_s26), 255 }
  0x14   : > { %s987_s27 = sshll.u32 %s1638_s26, 2  ;;  %544 = vmatpush.bf16.msra.mxu0 %v535_v3  ;;  %1184 = vmatpush.bf16.msra.mxu1 %v535_v3 }
  0x15   : > { %s1361_s30 = scalar_lea.vmem %s1631_s0, %s987_s27  ;;  %1185 = vmatpush.bf16.msra.mxu2 %v535_v3  ;;  %1186 = vmatpush.bf16.msra.mxu3 %v535_v3  ;;  %s1436_s6 = scalar_lea.vmem %s1634_s3, %s987_s27 }
  0x16   : > { %v1152_v4 = vld [vmem:[%s1361_s30] sm:$0xff]  ;;  %v1153_v8 = vld [vmem:[%s1361_s30 + $0x8] sm:$0xff]  ;;  %v1154_v12 = vld [vmem:[%s1361_s30 + $0x10] sm:$0xff] }
  0x17   : > { %v1160_v5 = vld [vmem:[%s1361_s30 + $0x40] sm:$0xff]  ;;  %1118 = vmatmul.msk.bf16.vlgmr.msra.gmra.mxu0 %vm434_vm1, %v1152_v4  ;;  %v1161_v9 = vld [vmem:[%s1361_s30 + $0x48] sm:$0xff]  ;;  %v1162_v13 = vld [vmem:[%s1361_s30 + $0x50] sm:$0xff] }
  0x18   : > { %v1168_v6 = vld [vmem:[%s1361_s30 + $0x80] sm:$0xff]  ;;  %1126 = vmatmul.msk.bf16.vlgmr.msra.gmra.mxu1 %vm434_vm1, %v1160_v5  ;;  %v1169_v10 = vld [vmem:[%s1361_s30 + $0x88] sm:$0xff]  ;;  %v1170_v14 = vld [vmem:[%s1361_s30 + $0x90] sm:$0xff] }
  0x19   : > { %v1176_v7 = vld [vmem:[%s1361_s30 + $0xc0] sm:$0xff]  ;;  %1134 = vmatmul.msk.bf16.vlgmr.msra.gmra.mxu2 %vm434_vm1, %v1168_v6  ;;  %v1177_v11 = vld [vmem:[%s1361_s30 + $0xc8] sm:$0xff]  ;;  %v1178_v15 = vld [vmem:[%s1361_s30 + $0xd0] sm:$0xff] }
  0x1a   : > { %1142 = vmatmul.msk.bf16.vlgmr.msra.gmra.mxu3 %vm434_vm1, %v1176_v7  ;;  %v1155_v16 = vld [vmem:[%s1361_s30 + $0x18] sm:$0xff]  ;;  %v1156_v20 = vld [vmem:[%s1361_s30 + $0x20] sm:$0xff]  ;;  %v1157_v24 = vld [vmem:[%s1361_s30 + $0x28] sm:$0xff] }
  0x1b   : > { %v1163_v17 = vld [vmem:[%s1361_s30 + $0x58] sm:$0xff]  ;;  %v1164_v21 = vld [vmem:[%s1361_s30 + $0x60] sm:$0xff]  ;;  %v1165_v25 = vld [vmem:[%s1361_s30 + $0x68] sm:$0xff] }
  0x1c   : > { %v1171_v18 = vld [vmem:[%s1361_s30 + $0x98] sm:$0xff]  ;;  %v1172_v22 = vld [vmem:[%s1361_s30 + $0xa0] sm:$0xff]  ;;  %v1173_v26 = vld [vmem:[%s1361_s30 + $0xa8] sm:$0xff] }
  0x1d   : > { %v1179_v19 = vld [vmem:[%s1361_s30 + $0xd8] sm:$0xff]  ;;  %v1180_v23 = vld [vmem:[%s1361_s30 + $0xe0] sm:$0xff]  ;;  %v1181_v27 = vld [vmem:[%s1361_s30 + $0xe8] sm:$0xff] }
  0x1e   : > { %v1158_v28 = vld [vmem:[%s1361_s30 + $0x30] sm:$0xff]  ;;  %v1159_v32 = vld [vmem:[%s1361_s30 + $0x38] sm:$0xff] }
  0x1f   : > { %v1166_v29 = vld [vmem:[%s1361_s30 + $0x70] sm:$0xff]  ;;  %v1167_v33 = vld [vmem:[%s1361_s30 + $0x78] sm:$0xff] }
  0x20   : > { %v1174_v30 = vld [vmem:[%s1361_s30 + $0xb0] sm:$0xff]  ;;  %v1175_v34 = vld [vmem:[%s1361_s30 + $0xb8] sm:$0xff] }
  0x21   : > { %v1182_v31 = vld [vmem:[%s1361_s30 + $0xf0] sm:$0xff]  ;;  %v1183_v35 = vld [vmem:[%s1361_s30 + $0xf8] sm:$0xff] }
  0x27   : > { %1119 = vmatmul.msk.bf16.gmra.mxu0 %vm434_vm1, %v1153_v8 }
  0x28   : > { %1127 = vmatmul.msk.bf16.gmra.mxu1 %vm434_vm1, %v1161_v9 }
  0x29   : > { %1135 = vmatmul.msk.bf16.gmra.mxu2 %vm434_vm1, %v1169_v10 }
  0x2a   : > { %1143 = vmatmul.msk.bf16.gmra.mxu3 %vm434_vm1, %v1177_v11 }
  0x37   : > { %1120 = vmatmul.msk.bf16.gmra.mxu0 %vm434_vm1, %v1154_v12 }
  0x38   : > { %1128 = vmatmul.msk.bf16.gmra.mxu1 %vm434_vm1, %v1162_v13 }
  0x39   : > { %1136 = vmatmul.msk.bf16.gmra.mxu2 %vm434_vm1, %v1170_v14 }
  0x3a   : > { %1144 = vmatmul.msk.bf16.gmra.mxu3 %vm434_vm1, %v1178_v15 }
  0x47   : > { %1121 = vmatmul.msk.bf16.gmra.mxu0 %vm434_vm1, %v1155_v16 }
  0x48   : > { %1129 = vmatmul.msk.bf16.gmra.mxu1 %vm434_vm1, %v1163_v17 }
  0x49   : > { %1137 = vmatmul.msk.bf16.gmra.mxu2 %vm434_vm1, %v1171_v18 }
  0x4a   : > { %1145 = vmatmul.msk.bf16.gmra.mxu3 %vm434_vm1, %v1179_v19 }
  0x57   : > { %1122 = vmatmul.msk.bf16.gmra.mxu0 %vm434_vm1, %v1156_v20 }
  0x58   : > { %1130 = vmatmul.msk.bf16.gmra.mxu1 %vm434_vm1, %v1164_v21 }
  0x59   : > { %1138 = vmatmul.msk.bf16.gmra.mxu2 %vm434_vm1, %v1172_v22 }
  0x5a   : > { %1146 = vmatmul.msk.bf16.gmra.mxu3 %vm434_vm1, %v1180_v23 }
  0x67   : > { %1123 = vmatmul.msk.bf16.gmra.mxu0 %vm434_vm1, %v1157_v24 }
  0x68   : > { %1131 = vmatmul.msk.bf16.gmra.mxu1 %vm434_vm1, %v1165_v25 }
  0x69   : > { %1139 = vmatmul.msk.bf16.gmra.mxu2 %vm434_vm1, %v1173_v26 }
  0x6a   : > { %1147 = vmatmul.msk.bf16.gmra.mxu3 %vm434_vm1, %v1181_v27 }
  0x77   : > { %1124 = vmatmul.msk.bf16.gmra.mxu0 %vm434_vm1, %v1158_v28 }
  0x78   : > { %1132 = vmatmul.msk.bf16.gmra.mxu1 %vm434_vm1, %v1166_v29 }
  0x79   : > { %1140 = vmatmul.msk.bf16.gmra.mxu2 %vm434_vm1, %v1174_v30 }
  0x7a   : > { %1148 = vmatmul.msk.bf16.gmra.mxu3 %vm434_vm1, %v1182_v31 }
  0x87   : > { %1125 = vmatmul.msk.bf16.gmra.mxu0 %vm434_vm1, %v1159_v32 }
  0x88   : > { %1133 = vmatmul.msk.bf16.gmra.mxu1 %vm434_vm1, %v1167_v33 }
  0x89   : > { %1141 = vmatmul.msk.bf16.gmra.mxu2 %vm434_vm1, %v1175_v34 }
  0x8a   : > { %1149 = vmatmul.msk.bf16.gmra.mxu3 %vm434_vm1, %v1183_v35 }
  0x94   : > { %v546_v37 = vpop.f32.mrf.mxu0 }
  0x95   : > { %v586_v38 = vpop.f32.mrf.mxu1  ;;  %v547_v39 = vadd.f32 %v1427_v36, %v546_v37 }
  0x96   : > { %v587_v40 = vadd.f32 %v1427_v36, %v586_v38 }
  0x97   : > { %v706_v41 = vmax.f32 %v547_v39, 0.0 }
  0x98   : > { %v722_v42 = vmax.f32 %v587_v40, 0.0 }
  0x99   : > { %v770_v43 = vpack.c.bf16 %v706_v41, %v706_v41 }
  0x9a   : > { %v786_v44 = vpack.c.bf16 %v722_v42, %v722_v42 }
  0x9b   : > { %835 = vst.msk [vmem:[%s1436_s6] sm:$0xf] %vm834_vm2, %v770_v43 }
  0x9c   : > { %v626_v45 = vpop.f32.mrf.mxu2  ;;  %851 = vst.msk [vmem:[%s1436_s6 + $0x40] sm:$0xf] %vm834_vm2, %v786_v44  ;;  %v548_v49 = vpop.f32.mrf.mxu0 }
  0x9d   : > { %v666_v46 = vpop.f32.mrf.mxu3  ;;  %v627_v47 = vadd.f32 %v1427_v36, %v626_v45  ;;  %v588_v50 = vpop.f32.mrf.mxu1  ;;  %v549_v51 = vadd.f32 %v1427_v36, %v548_v49 }
  0x9e   : > { %v667_v48 = vadd.f32 %v1427_v36, %v666_v46  ;;  %v589_v52 = vadd.f32 %v1427_v36, %v588_v50 }
  0x9f   : > { %v738_v53 = vmax.f32 %v627_v47, 0.0  ;;  %v707_v55 = vmax.f32 %v549_v51, 0.0 }
  0xa0   : > { %v754_v54 = vmax.f32 %v667_v48, 0.0  ;;  %v723_v56 = vmax.f32 %v589_v52, 0.0 }
  0xa1   : > { %v802_v57 = vpack.c.bf16 %v738_v53, %v738_v53  ;;  %v771_v59 = vpack.c.bf16 %v707_v55, %v707_v55 }
  0xa2   : > { %v818_v58 = vpack.c.bf16 %v754_v54, %v754_v54  ;;  %v787_v60 = vpack.c.bf16 %v723_v56, %v723_v56 }
  0xa3   : > { %867 = vst.msk [vmem:[%s1436_s6 + $0x80] sm:$0xf] %vm834_vm2, %v802_v57 }
  0xa4   : > { %883 = vst.msk [vmem:[%s1436_s6 + $0xc0] sm:$0xf] %vm834_vm2, %v818_v58  ;;  %v628_v61 = vpop.f32.mrf.mxu2  ;;  %v551_v1 = vpop.f32.mrf.mxu0 }
  0xa5   : > { %v668_v62 = vpop.f32.mrf.mxu3  ;;  %836 = vst.msk [vmem:[%s1436_s6 + $0x4] sm:$0xf] %vm834_vm2, %v771_v59  ;;  %v629_v63 = vadd.f32 %v1427_v36, %v628_v61  ;;  %v591_v2 = vpop.f32.mrf.mxu1  ;;  %v552_v3 = vadd.f32 %v1427_v36, %v551_v1 }
  0xa6   : > { %v669_v0 = vadd.f32 %v1427_v36, %v668_v62  ;;  %852 = vst.msk [vmem:[%s1436_s6 + $0x44] sm:$0xf] %vm834_vm2, %v787_v60  ;;  %v592_v4 = vadd.f32 %v1427_v36, %v591_v2 }
  0xa7   : > { %v739_v5 = vmax.f32 %v629_v63, 0.0  ;;  %v708_v7 = vmax.f32 %v552_v3, 0.0 }
  0xa8   : > { %v755_v6 = vmax.f32 %v669_v0, 0.0  ;;  %v724_v8 = vmax.f32 %v592_v4, 0.0 }
  0xa9   : > { %v803_v9 = vpack.c.bf16 %v739_v5, %v739_v5  ;;  %v772_v11 = vpack.c.bf16 %v708_v7, %v708_v7 }
  0xaa   : > { %v819_v10 = vpack.c.bf16 %v755_v6, %v755_v6  ;;  %v788_v12 = vpack.c.bf16 %v724_v8, %v724_v8 }
  0xab   : > { %868 = vst.msk [vmem:[%s1436_s6 + $0x84] sm:$0xf] %vm834_vm2, %v803_v9 }
  0xac   : > { %884 = vst.msk [vmem:[%s1436_s6 + $0xc4] sm:$0xf] %vm834_vm2, %v819_v10  ;;  %v631_v13 = vpop.f32.mrf.mxu2  ;;  %v553_v17 = vpop.f32.mrf.mxu0 }
  0xad   : > { %v671_v14 = vpop.f32.mrf.mxu3  ;;  %837 = vst.msk [vmem:[%s1436_s6 + $0x8] sm:$0xf] %vm834_vm2, %v772_v11  ;;  %v632_v15 = vadd.f32 %v1427_v36, %v631_v13  ;;  %v593_v18 = vpop.f32.mrf.mxu1  ;;  %v554_v19 = vadd.f32 %v1427_v36, %v553_v17 }
  0xae   : > { %v672_v16 = vadd.f32 %v1427_v36, %v671_v14  ;;  %853 = vst.msk [vmem:[%s1436_s6 + $0x48] sm:$0xf] %vm834_vm2, %v788_v12  ;;  %v594_v20 = vadd.f32 %v1427_v36, %v593_v18 }
  0xaf   : > { %v740_v21 = vmax.f32 %v632_v15, 0.0  ;;  %v709_v23 = vmax.f32 %v554_v19, 0.0 }
  0xb0   : > { %v756_v22 = vmax.f32 %v672_v16, 0.0  ;;  %v725_v24 = vmax.f32 %v594_v20, 0.0 }
  0xb1   : > { %v804_v25 = vpack.c.bf16 %v740_v21, %v740_v21  ;;  %v773_v27 = vpack.c.bf16 %v709_v23, %v709_v23 }
  0xb2   : > { %v820_v26 = vpack.c.bf16 %v756_v22, %v756_v22  ;;  %v789_v28 = vpack.c.bf16 %v725_v24, %v725_v24 }
  0xb3   : > { %869 = vst.msk [vmem:[%s1436_s6 + $0x88] sm:$0xf] %vm834_vm2, %v804_v25 }
  0xb4   : > { %885 = vst.msk [vmem:[%s1436_s6 + $0xc8] sm:$0xf] %vm834_vm2, %v820_v26  ;;  %v633_v29 = vpop.f32.mrf.mxu2  ;;  %v556_v33 = vpop.f32.mrf.mxu0 }
  0xb5   : > { %v673_v30 = vpop.f32.mrf.mxu3  ;;  %838 = vst.msk [vmem:[%s1436_s6 + $0xc] sm:$0xf] %vm834_vm2, %v773_v27  ;;  %v634_v31 = vadd.f32 %v1427_v36, %v633_v29  ;;  %v596_v34 = vpop.f32.mrf.mxu1  ;;  %v557_v35 = vadd.f32 %v1427_v36, %v556_v33 }
  0xb6   : > { %v674_v32 = vadd.f32 %v1427_v36, %v673_v30  ;;  %854 = vst.msk [vmem:[%s1436_s6 + $0x4c] sm:$0xf] %vm834_vm2, %v789_v28  ;;  %v597_v37 = vadd.f32 %v1427_v36, %v596_v34 }
  0xb7   : > { %v741_v38 = vmax.f32 %v634_v31, 0.0  ;;  %v710_v40 = vmax.f32 %v557_v35, 0.0 }
  0xb8   : > { %v757_v39 = vmax.f32 %v674_v32, 0.0  ;;  %v726_v41 = vmax.f32 %v597_v37, 0.0 }
  0xb9   : > { %v805_v42 = vpack.c.bf16 %v741_v38, %v741_v38  ;;  %v774_v44 = vpack.c.bf16 %v710_v40, %v710_v40 }
  0xba   : > { %v821_v43 = vpack.c.bf16 %v757_v39, %v757_v39  ;;  %v790_v45 = vpack.c.bf16 %v726_v41, %v726_v41 }
  0xbb   : > { %870 = vst.msk [vmem:[%s1436_s6 + $0x8c] sm:$0xf] %vm834_vm2, %v805_v42 }
  0xbc   : > { %886 = vst.msk [vmem:[%s1436_s6 + $0xcc] sm:$0xf] %vm834_vm2, %v821_v43  ;;  %v636_v46 = vpop.f32.mrf.mxu2  ;;  %v558_v50 = vpop.f32.mrf.mxu0 }
  0xbd   : > { %v676_v47 = vpop.f32.mrf.mxu3  ;;  %839 = vst.msk [vmem:[%s1436_s6 + $0x10] sm:$0xf] %vm834_vm2, %v774_v44  ;;  %v637_v48 = vadd.f32 %v1427_v36, %v636_v46  ;;  %v598_v51 = vpop.f32.mrf.mxu1  ;;  %v559_v52 = vadd.f32 %v1427_v36, %v558_v50 }
  0xbe   : > { %v677_v49 = vadd.f32 %v1427_v36, %v676_v47  ;;  %855 = vst.msk [vmem:[%s1436_s6 + $0x50] sm:$0xf] %vm834_vm2, %v790_v45  ;;  %v599_v53 = vadd.f32 %v1427_v36, %v598_v51 }
  0xbf   : > { %v742_v54 = vmax.f32 %v637_v48, 0.0  ;;  %v711_v56 = vmax.f32 %v559_v52, 0.0 }
  0xc0   : > { %v758_v55 = vmax.f32 %v677_v49, 0.0  ;;  %v727_v57 = vmax.f32 %v599_v53, 0.0 }
  0xc1   : > { %v806_v58 = vpack.c.bf16 %v742_v54, %v742_v54  ;;  %v775_v60 = vpack.c.bf16 %v711_v56, %v711_v56 }
  0xc2   : > { %v822_v59 = vpack.c.bf16 %v758_v55, %v758_v55  ;;  %v791_v61 = vpack.c.bf16 %v727_v57, %v727_v57 }
  0xc3   : > { %871 = vst.msk [vmem:[%s1436_s6 + $0x90] sm:$0xf] %vm834_vm2, %v806_v58 }
  0xc4   : > { %887 = vst.msk [vmem:[%s1436_s6 + $0xd0] sm:$0xf] %vm834_vm2, %v822_v59  ;;  %v638_v62 = vpop.f32.mrf.mxu2  ;;  %v561_v2 = vpop.f32.mrf.mxu0 }
  0xc5   : > { %v678_v63 = vpop.f32.mrf.mxu3  ;;  %840 = vst.msk [vmem:[%s1436_s6 + $0x14] sm:$0xf] %vm834_vm2, %v775_v60  ;;  %v639_v0 = vadd.f32 %v1427_v36, %v638_v62  ;;  %v601_v3 = vpop.f32.mrf.mxu1  ;;  %v562_v4 = vadd.f32 %v1427_v36, %v561_v2 }
  0xc6   : > { %v679_v1 = vadd.f32 %v1427_v36, %v678_v63  ;;  %856 = vst.msk [vmem:[%s1436_s6 + $0x54] sm:$0xf] %vm834_vm2, %v791_v61  ;;  %v602_v5 = vadd.f32 %v1427_v36, %v601_v3 }
  0xc7   : > { %v743_v6 = vmax.f32 %v639_v0, 0.0  ;;  %v712_v8 = vmax.f32 %v562_v4, 0.0 }
  0xc8   : > { %v759_v7 = vmax.f32 %v679_v1, 0.0  ;;  %v728_v9 = vmax.f32 %v602_v5, 0.0 }
  0xc9   : > { %v807_v10 = vpack.c.bf16 %v743_v6, %v743_v6  ;;  %v776_v12 = vpack.c.bf16 %v712_v8, %v712_v8 }
  0xca   : > { %v823_v11 = vpack.c.bf16 %v759_v7, %v759_v7  ;;  %v792_v13 = vpack.c.bf16 %v728_v9, %v728_v9 }
  0xcb   : > { %872 = vst.msk [vmem:[%s1436_s6 + $0x94] sm:$0xf] %vm834_vm2, %v807_v10 }
  0xcc   : > { %888 = vst.msk [vmem:[%s1436_s6 + $0xd4] sm:$0xf] %vm834_vm2, %v823_v11  ;;  %v641_v14 = vpop.f32.mrf.mxu2  ;;  %v563_v18 = vpop.f32.mrf.mxu0 }
  0xcd   : > { %v681_v15 = vpop.f32.mrf.mxu3  ;;  %841 = vst.msk [vmem:[%s1436_s6 + $0x18] sm:$0xf] %vm834_vm2, %v776_v12  ;;  %v642_v16 = vadd.f32 %v1427_v36, %v641_v14  ;;  %v603_v19 = vpop.f32.mrf.mxu1  ;;  %v564_v20 = vadd.f32 %v1427_v36, %v563_v18 }
  0xce   : > { %v682_v17 = vadd.f32 %v1427_v36, %v681_v15  ;;  %857 = vst.msk [vmem:[%s1436_s6 + $0x58] sm:$0xf] %vm834_vm2, %v792_v13  ;;  %v604_v21 = vadd.f32 %v1427_v36, %v603_v19 }
  0xcf   : > { %v744_v22 = vmax.f32 %v642_v16, 0.0  ;;  %v713_v24 = vmax.f32 %v564_v20, 0.0 }
  0xd0   : > { %v760_v23 = vmax.f32 %v682_v17, 0.0  ;;  %v729_v25 = vmax.f32 %v604_v21, 0.0 }
  0xd1   : > { %v808_v26 = vpack.c.bf16 %v744_v22, %v744_v22  ;;  %v777_v28 = vpack.c.bf16 %v713_v24, %v713_v24 }
  0xd2   : > { %v824_v27 = vpack.c.bf16 %v760_v23, %v760_v23  ;;  %v793_v29 = vpack.c.bf16 %v729_v25, %v729_v25 }
  0xd3   : > { %873 = vst.msk [vmem:[%s1436_s6 + $0x98] sm:$0xf] %vm834_vm2, %v808_v26 }
  0xd4   : > { %889 = vst.msk [vmem:[%s1436_s6 + $0xd8] sm:$0xf] %vm834_vm2, %v824_v27  ;;  %v643_v30 = vpop.f32.mrf.mxu2  ;;  %v566_v34 = vpop.f32.mrf.mxu0 }
  0xd5   : > { %v683_v31 = vpop.f32.mrf.mxu3  ;;  %842 = vst.msk [vmem:[%s1436_s6 + $0x1c] sm:$0xf] %vm834_vm2, %v777_v28  ;;  %v644_v32 = vadd.f32 %v1427_v36, %v643_v30  ;;  %v606_v35 = vpop.f32.mrf.mxu1  ;;  %v567_v37 = vadd.f32 %v1427_v36, %v566_v34 }
  0xd6   : > { %v684_v33 = vadd.f32 %v1427_v36, %v683_v31  ;;  %858 = vst.msk [vmem:[%s1436_s6 + $0x5c] sm:$0xf] %vm834_vm2, %v793_v29  ;;  %v607_v38 = vadd.f32 %v1427_v36, %v606_v35 }
  0xd7   : > { %v745_v39 = vmax.f32 %v644_v32, 0.0  ;;  %v714_v41 = vmax.f32 %v567_v37, 0.0 }
  0xd8   : > { %v761_v40 = vmax.f32 %v684_v33, 0.0  ;;  %v730_v42 = vmax.f32 %v607_v38, 0.0 }
  0xd9   : > { %v809_v43 = vpack.c.bf16 %v745_v39, %v745_v39  ;;  %v778_v45 = vpack.c.bf16 %v714_v41, %v714_v41 }
  0xda   : > { %v825_v44 = vpack.c.bf16 %v761_v40, %v761_v40  ;;  %v794_v46 = vpack.c.bf16 %v730_v42, %v730_v42 }
  0xdb   : > { %874 = vst.msk [vmem:[%s1436_s6 + $0x9c] sm:$0xf] %vm834_vm2, %v809_v43 }
  0xdc   : > { %890 = vst.msk [vmem:[%s1436_s6 + $0xdc] sm:$0xf] %vm834_vm2, %v825_v44  ;;  %v646_v47 = vpop.f32.mrf.mxu2  ;;  %v568_v51 = vpop.f32.mrf.mxu0 }
  0xdd   : > { %v686_v48 = vpop.f32.mrf.mxu3  ;;  %843 = vst.msk [vmem:[%s1436_s6 + $0x20] sm:$0xf] %vm834_vm2, %v778_v45  ;;  %v647_v49 = vadd.f32 %v1427_v36, %v646_v47  ;;  %v608_v52 = vpop.f32.mrf.mxu1  ;;  %v569_v53 = vadd.f32 %v1427_v36, %v568_v51 }
  0xde   : > { %v687_v50 = vadd.f32 %v1427_v36, %v686_v48  ;;  %859 = vst.msk [vmem:[%s1436_s6 + $0x60] sm:$0xf] %vm834_vm2, %v794_v46  ;;  %v609_v54 = vadd.f32 %v1427_v36, %v608_v52 }
  0xdf   : > { %v746_v55 = vmax.f32 %v647_v49, 0.0  ;;  %v715_v57 = vmax.f32 %v569_v53, 0.0 }
  0xe0   : > { %v762_v56 = vmax.f32 %v687_v50, 0.0  ;;  %v731_v58 = vmax.f32 %v609_v54, 0.0 }
  0xe1   : > { %v810_v59 = vpack.c.bf16 %v746_v55, %v746_v55  ;;  %v779_v61 = vpack.c.bf16 %v715_v57, %v715_v57 }
  0xe2   : > { %v826_v60 = vpack.c.bf16 %v762_v56, %v762_v56  ;;  %v795_v62 = vpack.c.bf16 %v731_v58, %v731_v58 }
  0xe3   : > { %875 = vst.msk [vmem:[%s1436_s6 + $0xa0] sm:$0xf] %vm834_vm2, %v810_v59 }
  0xe4   : > { %891 = vst.msk [vmem:[%s1436_s6 + $0xe0] sm:$0xf] %vm834_vm2, %v826_v60  ;;  %v648_v63 = vpop.f32.mrf.mxu2  ;;  %v571_v3 = vpop.f32.mrf.mxu0 }
  0xe5   : > { %v688_v0 = vpop.f32.mrf.mxu3  ;;  %844 = vst.msk [vmem:[%s1436_s6 + $0x24] sm:$0xf] %vm834_vm2, %v779_v61  ;;  %v649_v1 = vadd.f32 %v1427_v36, %v648_v63  ;;  %v611_v4 = vpop.f32.mrf.mxu1  ;;  %v572_v5 = vadd.f32 %v1427_v36, %v571_v3 }
  0xe6   : > { %v689_v2 = vadd.f32 %v1427_v36, %v688_v0  ;;  %860 = vst.msk [vmem:[%s1436_s6 + $0x64] sm:$0xf] %vm834_vm2, %v795_v62  ;;  %v612_v6 = vadd.f32 %v1427_v36, %v611_v4 }
  0xe7   : > { %v747_v7 = vmax.f32 %v649_v1, 0.0  ;;  %v716_v9 = vmax.f32 %v572_v5, 0.0 }
  0xe8   : > { %v763_v8 = vmax.f32 %v689_v2, 0.0  ;;  %v732_v10 = vmax.f32 %v612_v6, 0.0 }
  0xe9   : > { %v811_v11 = vpack.c.bf16 %v747_v7, %v747_v7  ;;  %v780_v13 = vpack.c.bf16 %v716_v9, %v716_v9 }
  0xea   : > { %v827_v12 = vpack.c.bf16 %v763_v8, %v763_v8  ;;  %v796_v14 = vpack.c.bf16 %v732_v10, %v732_v10 }
  0xeb   : > { %876 = vst.msk [vmem:[%s1436_s6 + $0xa4] sm:$0xf] %vm834_vm2, %v811_v11 }
  0xec   : > { %892 = vst.msk [vmem:[%s1436_s6 + $0xe4] sm:$0xf] %vm834_vm2, %v827_v12  ;;  %v651_v15 = vpop.f32.mrf.mxu2  ;;  %v573_v19 = vpop.f32.mrf.mxu0 }
  0xed   : > { %v691_v16 = vpop.f32.mrf.mxu3  ;;  %845 = vst.msk [vmem:[%s1436_s6 + $0x28] sm:$0xf] %vm834_vm2, %v780_v13  ;;  %v652_v17 = vadd.f32 %v1427_v36, %v651_v15  ;;  %v613_v20 = vpop.f32.mrf.mxu1  ;;  %v574_v21 = vadd.f32 %v1427_v36, %v573_v19 }
  0xee   : > { %v692_v18 = vadd.f32 %v1427_v36, %v691_v16  ;;  %861 = vst.msk [vmem:[%s1436_s6 + $0x68] sm:$0xf] %vm834_vm2, %v796_v14  ;;  %v614_v22 = vadd.f32 %v1427_v36, %v613_v20 }
  0xef   : > { %v748_v23 = vmax.f32 %v652_v17, 0.0  ;;  %v717_v25 = vmax.f32 %v574_v21, 0.0 }
  0xf0   : > { %v764_v24 = vmax.f32 %v692_v18, 0.0  ;;  %v733_v26 = vmax.f32 %v614_v22, 0.0 }
  0xf1   : > { %v812_v27 = vpack.c.bf16 %v748_v23, %v748_v23  ;;  %v781_v29 = vpack.c.bf16 %v717_v25, %v717_v25 }
  0xf2   : > { %v828_v28 = vpack.c.bf16 %v764_v24, %v764_v24  ;;  %v797_v30 = vpack.c.bf16 %v733_v26, %v733_v26 }
  0xf3   : > { %877 = vst.msk [vmem:[%s1436_s6 + $0xa8] sm:$0xf] %vm834_vm2, %v812_v27 }
  0xf4   : > { %893 = vst.msk [vmem:[%s1436_s6 + $0xe8] sm:$0xf] %vm834_vm2, %v828_v28  ;;  %v653_v31 = vpop.f32.mrf.mxu2  ;;  %v576_v35 = vpop.f32.mrf.mxu0 }
  0xf5   : > { %v693_v32 = vpop.f32.mrf.mxu3  ;;  %846 = vst.msk [vmem:[%s1436_s6 + $0x2c] sm:$0xf] %vm834_vm2, %v781_v29  ;;  %v654_v33 = vadd.f32 %v1427_v36, %v653_v31  ;;  %v616_v37 = vpop.f32.mrf.mxu1  ;;  %v577_v38 = vadd.f32 %v1427_v36, %v576_v35 }
  0xf6   : > { %v694_v34 = vadd.f32 %v1427_v36, %v693_v32  ;;  %862 = vst.msk [vmem:[%s1436_s6 + $0x6c] sm:$0xf] %vm834_vm2, %v797_v30  ;;  %v617_v39 = vadd.f32 %v1427_v36, %v616_v37 }
  0xf7   : > { %v749_v40 = vmax.f32 %v654_v33, 0.0  ;;  %v718_v42 = vmax.f32 %v577_v38, 0.0 }
  0xf8   : > { %v765_v41 = vmax.f32 %v694_v34, 0.0  ;;  %v734_v43 = vmax.f32 %v617_v39, 0.0 }
  0xf9   : > { %v813_v44 = vpack.c.bf16 %v749_v40, %v749_v40  ;;  %v782_v46 = vpack.c.bf16 %v718_v42, %v718_v42 }
  0xfa   : > { %v829_v45 = vpack.c.bf16 %v765_v41, %v765_v41  ;;  %v798_v47 = vpack.c.bf16 %v734_v43, %v734_v43 }
  0xfb   : > { %878 = vst.msk [vmem:[%s1436_s6 + $0xac] sm:$0xf] %vm834_vm2, %v813_v44 }
  0xfc   : > { %894 = vst.msk [vmem:[%s1436_s6 + $0xec] sm:$0xf] %vm834_vm2, %v829_v45  ;;  %v656_v48 = vpop.f32.mrf.mxu2  ;;  %v578_v52 = vpop.f32.mrf.mxu0 }
  0xfd   : > { %v696_v49 = vpop.f32.mrf.mxu3  ;;  %847 = vst.msk [vmem:[%s1436_s6 + $0x30] sm:$0xf] %vm834_vm2, %v782_v46  ;;  %v657_v50 = vadd.f32 %v1427_v36, %v656_v48  ;;  %v618_v53 = vpop.f32.mrf.mxu1  ;;  %v579_v54 = vadd.f32 %v1427_v36, %v578_v52 }
  0xfe   : > { %v697_v51 = vadd.f32 %v1427_v36, %v696_v49  ;;  %863 = vst.msk [vmem:[%s1436_s6 + $0x70] sm:$0xf] %vm834_vm2, %v798_v47  ;;  %v619_v55 = vadd.f32 %v1427_v36, %v618_v53 }
  0xff   : > { %v750_v56 = vmax.f32 %v657_v50, 0.0  ;;  %v719_v58 = vmax.f32 %v579_v54, 0.0 }
 0x100   : > { %v766_v57 = vmax.f32 %v697_v51, 0.0  ;;  %v735_v59 = vmax.f32 %v619_v55, 0.0 }
 0x101   : > { %v814_v60 = vpack.c.bf16 %v750_v56, %v750_v56  ;;  %v783_v62 = vpack.c.bf16 %v719_v58, %v719_v58 }
 0x102   : > { %v830_v61 = vpack.c.bf16 %v766_v57, %v766_v57  ;;  %v799_v63 = vpack.c.bf16 %v735_v59, %v735_v59 }
 0x103   : > { %879 = vst.msk [vmem:[%s1436_s6 + $0xb0] sm:$0xf] %vm834_vm2, %v814_v60 }
 0x104   : > { %895 = vst.msk [vmem:[%s1436_s6 + $0xf0] sm:$0xf] %vm834_vm2, %v830_v61  ;;  %v658_v0 = vpop.f32.mrf.mxu2  ;;  %v581_v4 = vpop.f32.mrf.mxu0 }
 0x105   : > { %v698_v1 = vpop.f32.mrf.mxu3  ;;  %848 = vst.msk [vmem:[%s1436_s6 + $0x34] sm:$0xf] %vm834_vm2, %v783_v62  ;;  %v659_v2 = vadd.f32 %v1427_v36, %v658_v0  ;;  %v621_v5 = vpop.f32.mrf.mxu1  ;;  %v582_v6 = vadd.f32 %v1427_v36, %v581_v4 }
 0x106   : > { %v699_v3 = vadd.f32 %v1427_v36, %v698_v1  ;;  %864 = vst.msk [vmem:[%s1436_s6 + $0x74] sm:$0xf] %vm834_vm2, %v799_v63  ;;  %v622_v7 = vadd.f32 %v1427_v36, %v621_v5 }
 0x107   : > { %v751_v8 = vmax.f32 %v659_v2, 0.0  ;;  %v720_v10 = vmax.f32 %v582_v6, 0.0 }
 0x108   : > { %v767_v9 = vmax.f32 %v699_v3, 0.0  ;;  %v736_v11 = vmax.f32 %v622_v7, 0.0 }
 0x109   : > { %v815_v12 = vpack.c.bf16 %v751_v8, %v751_v8  ;;  %v784_v14 = vpack.c.bf16 %v720_v10, %v720_v10 }
 0x10a   : > { %v831_v13 = vpack.c.bf16 %v767_v9, %v767_v9  ;;  %v800_v15 = vpack.c.bf16 %v736_v11, %v736_v11 }
 0x10b   : > { %880 = vst.msk [vmem:[%s1436_s6 + $0xb4] sm:$0xf] %vm834_vm2, %v815_v12 }
 0x10c   : > { %896 = vst.msk [vmem:[%s1436_s6 + $0xf4] sm:$0xf] %vm834_vm2, %v831_v13  ;;  %v661_v16 = vpop.f32.mrf.mxu2  ;;  %v583_v20 = vpop.f32.mrf.mxu0 }
 0x10d   : > { %v701_v17 = vpop.f32.mrf.mxu3  ;;  %849 = vst.msk [vmem:[%s1436_s6 + $0x38] sm:$0xf] %vm834_vm2, %v784_v14  ;;  %v662_v18 = vadd.f32 %v1427_v36, %v661_v16  ;;  %v623_v21 = vpop.f32.mrf.mxu1  ;;  %v584_v22 = vadd.f32 %v1427_v36, %v583_v20 }
 0x10e   : > { %v702_v19 = vadd.f32 %v1427_v36, %v701_v17  ;;  %865 = vst.msk [vmem:[%s1436_s6 + $0x78] sm:$0xf] %vm834_vm2, %v800_v15  ;;  %v624_v23 = vadd.f32 %v1427_v36, %v623_v21 }
 0x10f   : > { %v752_v24 = vmax.f32 %v662_v18, 0.0  ;;  %v721_v26 = vmax.f32 %v584_v22, 0.0 }
 0x110   : > { %v768_v25 = vmax.f32 %v702_v19, 0.0  ;;  %v737_v27 = vmax.f32 %v624_v23, 0.0 }
 0x111   : > { %v816_v28 = vpack.c.bf16 %v752_v24, %v752_v24  ;;  %v785_v30 = vpack.c.bf16 %v721_v26, %v721_v26 }
 0x112   : > { %v832_v29 = vpack.c.bf16 %v768_v25, %v768_v25  ;;  %v801_v31 = vpack.c.bf16 %v737_v27, %v737_v27 }
 0x113   : > { %881 = vst.msk [vmem:[%s1436_s6 + $0xb8] sm:$0xf] %vm834_vm2, %v816_v28 }
 0x114   : > { %897 = vst.msk [vmem:[%s1436_s6 + $0xf8] sm:$0xf] %vm834_vm2, %v832_v29  ;;  %v663_v32 = vpop.f32.mrf.mxu2 }
 0x115   : > { %v703_v33 = vpop.f32.mrf.mxu3  ;;  %850 = vst.msk [vmem:[%s1436_s6 + $0x3c] sm:$0xf] %vm834_vm2, %v785_v30  ;;  %v664_v34 = vadd.f32 %v1427_v36, %v663_v32 }
 0x116   : > { %v704_v35 = vadd.f32 %v1427_v36, %v703_v33  ;;  %866 = vst.msk [vmem:[%s1436_s6 + $0x7c] sm:$0xf] %vm834_vm2, %v801_v31 }
 0x117   : > { %v753_v37 = vmax.f32 %v664_v34, 0.0 }
 0x118   : > { %v769_v38 = vmax.f32 %v704_v35, 0.0 }
 0x119   : > { %v817_v39 = vpack.c.bf16 %v753_v37, %v753_v37 }
 0x11a   : > { %v833_v40 = vpack.c.bf16 %v769_v38, %v769_v38 }
 0x11b   : > { %882 = vst.msk [vmem:[%s1436_s6 + $0xbc] sm:$0xf] %vm834_vm2, %v817_v39 }
 0x11c   : > { %898 = vst.msk [vmem:[%s1436_s6 + $0xfc] sm:$0xf] %vm834_vm2, %v833_v40 }
 0x11d PF: > { %s15_s12 = sadd.s32 1, %s1292_s12  }
 0x11e   : > { %p12_p7 = scmp.ge.s32.totalorder %s15_s12, 6  }
 0x120   :  { %14 = sbr.rel (!%p12_p7) target bundleno = 2 (0x2), region = 71 }
 0x125   :  { %921 = vsyncpa [#allocation3], 1 }
 0x126   :  { %923 = vsyncpa [#allocation3 + $0x1], 1 }
 0x127   :  { %924 = vsyncpa [#allocation5], 1 }

// kernel: pvt_dense_decoder_forward.15
= control target key start
LH: loop header
LB: loop body
LE: loop exit
PB: predicated region body
PF: predicated region fallthrough
CT: control target
= control target key end

     0   :  { %vm99_vm0 = vcmask 392192   ;;  %vm205_vm1 = vcmask 519168   ;;  %s445_s1 = inlined_call_operand.vmem [shape: bf16[48,64], index: 1, kind: input, shape index: {}]   ;;  %s446_s2 = inlined_call_operand.vmem [shape: f32[1,64], index: 2, kind: input, shape index: {}]   ;;  %s447_s0 = inlined_call_operand.vmem [shape: bf16[128,48], index: 0, kind: input, shape index: {}]   ;;  %s448_s3 = inlined_call_operand.vmem [shape: bf16[128,64], index: 3, kind: output, shape index: {}]  }
   0x1   :  { %v288_v0 = vld [vmem:[%s445_s1 + $0x10] sm:$0xff]  ;;  %v287_v1 = vld [vmem:[%s445_s1 + $0x8] sm:$0xff]  ;;  %v286_v2 = vld [vmem:[%s445_s1] sm:$0xff] }
   0x2   :  { %129 = vmatpush.bf16.msra.mxu0 %v288_v0  ;;  %289 = vmatpush.bf16.msra.mxu1 %v288_v0  ;;  %v278_v3 = vld [vmem:[%s447_s0] sm:$0xff]  ;;  %v280_v4 = vld [vmem:[%s447_s0 + $0x10] sm:$0xff]  ;;  %v279_v7 = vld [vmem:[%s447_s0 + $0x8] sm:$0xff] }
   0x3   :  { %290 = vmatpush.bf16.msra.mxu2 %v288_v0  ;;  %291 = vmatpush.bf16.msra.mxu3 %v288_v0  ;;  %v282_v5 = vld [vmem:[%s447_s0 + $0x20] sm:$0xff]  ;;  %v284_v6 = vld [vmem:[%s447_s0 + $0x30] sm:$0xff]  ;;  %v281_v8 = vld [vmem:[%s447_s0 + $0x18] sm:$0xff] }
   0x4   :  { %v283_v9 = vld [vmem:[%s447_s0 + $0x28] sm:$0xff]  ;;  %v285_v10 = vld [vmem:[%s447_s0 + $0x38] sm:$0xff]  ;;  %v363_v11 = vld [vmem:[%s446_s2] ss:$0 sm:$0xff] }
   0x6   :  { %130 = vmatpush.bf16.msra.mxu0 %v287_v1  ;;  %292 = vmatpush.bf16.msra.mxu1 %v287_v1 }
   0x7   :  { %293 = vmatpush.bf16.msra.mxu2 %v287_v1  ;;  %294 = vmatpush.bf16.msra.mxu3 %v287_v1 }
   0xa   :  { %131 = vmatpush.bf16.msra.mxu0 %v286_v2  ;;  %295 = vmatpush.bf16.msra.mxu1 %v286_v2 }
   0xb   :  { %296 = vmatpush.bf16.msra.mxu2 %v286_v2  ;;  %297 = vmatpush.bf16.msra.mxu3 %v286_v2 }
   0xd   :  { %270 = vmatmul.msk.bf16.vlgmr.msra.gmra.mxu0 %vm99_vm0, %v278_v3  ;;  %272 = vmatmul.msk.bf16.vlgmr.msra.gmra.mxu1 %vm99_vm0, %v280_v4 }
   0xe   :  { %274 = vmatmul.msk.bf16.vlgmr.msra.gmra.mxu2 %vm99_vm0, %v282_v5  ;;  %276 = vmatmul.msk.bf16.vlgmr.msra.gmra.mxu3 %vm99_vm0, %v284_v6 }
  0x1d   :  { %271 = vmatmul.msk.bf16.gmra.mxu0 %vm99_vm0, %v279_v7  ;;  %273 = vmatmul.msk.bf16.gmra.mxu1 %vm99_vm0, %v281_v8 }
  0x1e   :  { %275 = vmatmul.msk.bf16.gmra.mxu2 %vm99_vm0, %v283_v9  ;;  %277 = vmatmul.msk.bf16.gmra.mxu3 %vm99_vm0, %v285_v10 }
  0x8a   :  { %v133_v12 = vpop.f32.mrf.mxu0  ;;  %v143_v13 = vpop.f32.mrf.mxu1 }
  0x8b   :  { %v134_v14 = vadd.f32 %v363_v11, %v133_v12  ;;  %v144_v15 = vadd.f32 %v363_v11, %v143_v13 }
  0x8d   :  { %v173_v16 = vmax.f32 %v134_v14, 0.0  ;;  %v177_v17 = vmax.f32 %v144_v15, 0.0 }
  0x8f   :  { %v189_v18 = vpack.c.bf16 %v173_v16, %v173_v16  ;;  %v193_v19 = vpack.c.bf16 %v177_v17, %v177_v17 }
  0x91   :  { %206 = vst.msk [vmem:[%s448_s3] sm:$0xf] %vm205_vm1, %v189_v18  ;;  %v153_v20 = vpop.f32.mrf.mxu2  ;;  %v163_v21 = vpop.f32.mrf.mxu3 }
  0x92   :  { %210 = vst.msk [vmem:[%s448_s3 + $0x10] sm:$0xf] %vm205_vm1, %v193_v19  ;;  %v154_v22 = vadd.f32 %v363_v11, %v153_v20  ;;  %v164_v23 = vadd.f32 %v363_v11, %v163_v21  ;;  %v135_v24 = vpop.f32.mrf.mxu0  ;;  %v145_v25 = vpop.f32.mrf.mxu1 }
  0x93   :  { %v136_v26 = vadd.f32 %v363_v11, %v135_v24  ;;  %v146_v27 = vadd.f32 %v363_v11, %v145_v25 }
  0x94   :  { %v181_v28 = vmax.f32 %v154_v22, 0.0  ;;  %v185_v29 = vmax.f32 %v164_v23, 0.0 }
  0x95   :  { %v174_v30 = vmax.f32 %v136_v26, 0.0  ;;  %v178_v31 = vmax.f32 %v146_v27, 0.0 }
  0x96   :  { %v197_v32 = vpack.c.bf16 %v181_v28, %v181_v28  ;;  %v201_v33 = vpack.c.bf16 %v185_v29, %v185_v29 }
  0x97   :  { %v190_v34 = vpack.c.bf16 %v174_v30, %v174_v30  ;;  %v194_v35 = vpack.c.bf16 %v178_v31, %v178_v31 }
  0x98   :  { %214 = vst.msk [vmem:[%s448_s3 + $0x20] sm:$0xf] %vm205_vm1, %v197_v32 }
  0x99   :  { %218 = vst.msk [vmem:[%s448_s3 + $0x30] sm:$0xf] %vm205_vm1, %v201_v33  ;;  %v155_v36 = vpop.f32.mrf.mxu2  ;;  %v165_v37 = vpop.f32.mrf.mxu3 }
  0x9a   :  { %207 = vst.msk [vmem:[%s448_s3 + $0x4] sm:$0xf] %vm205_vm1, %v190_v34  ;;  %v156_v38 = vadd.f32 %v363_v11, %v155_v36  ;;  %v166_v39 = vadd.f32 %v363_v11, %v165_v37  ;;  %v138_v40 = vpop.f32.mrf.mxu0  ;;  %v148_v41 = vpop.f32.mrf.mxu1 }
  0x9b   :  { %211 = vst.msk [vmem:[%s448_s3 + $0x14] sm:$0xf] %vm205_vm1, %v194_v35  ;;  %v139_v42 = vadd.f32 %v363_v11, %v138_v40  ;;  %v149_v43 = vadd.f32 %v363_v11, %v148_v41 }
  0x9c   :  { %v182_v44 = vmax.f32 %v156_v38, 0.0  ;;  %v186_v45 = vmax.f32 %v166_v39, 0.0 }
  0x9d   :  { %v175_v46 = vmax.f32 %v139_v42, 0.0  ;;  %v179_v47 = vmax.f32 %v149_v43, 0.0 }
  0x9e   :  { %v198_v48 = vpack.c.bf16 %v182_v44, %v182_v44  ;;  %v202_v49 = vpack.c.bf16 %v186_v45, %v186_v45 }
  0x9f   :  { %v191_v50 = vpack.c.bf16 %v175_v46, %v175_v46  ;;  %v195_v51 = vpack.c.bf16 %v179_v47, %v179_v47 }
  0xa0   :  { %215 = vst.msk [vmem:[%s448_s3 + $0x24] sm:$0xf] %vm205_vm1, %v198_v48 }
  0xa1   :  { %219 = vst.msk [vmem:[%s448_s3 + $0x34] sm:$0xf] %vm205_vm1, %v202_v49  ;;  %v158_v52 = vpop.f32.mrf.mxu2  ;;  %v168_v53 = vpop.f32.mrf.mxu3 }
  0xa2   :  { %208 = vst.msk [vmem:[%s448_s3 + $0x8] sm:$0xf] %vm205_vm1, %v191_v50  ;;  %v159_v54 = vadd.f32 %v363_v11, %v158_v52  ;;  %v169_v55 = vadd.f32 %v363_v11, %v168_v53  ;;  %v140_v56 = vpop.f32.mrf.mxu0  ;;  %v150_v57 = vpop.f32.mrf.mxu1 }
  0xa3   :  { %212 = vst.msk [vmem:[%s448_s3 + $0x18] sm:$0xf] %vm205_vm1, %v195_v51  ;;  %v141_v58 = vadd.f32 %v363_v11, %v140_v56  ;;  %v151_v59 = vadd.f32 %v363_v11, %v150_v57 }
  0xa4   :  { %v183_v60 = vmax.f32 %v159_v54, 0.0  ;;  %v187_v61 = vmax.f32 %v169_v55, 0.0 }
  0xa5   :  { %v176_v62 = vmax.f32 %v141_v58, 0.0  ;;  %v180_v63 = vmax.f32 %v151_v59, 0.0 }
  0xa6   :  { %v199_v0 = vpack.c.bf16 %v183_v60, %v183_v60  ;;  %v203_v1 = vpack.c.bf16 %v187_v61, %v187_v61 }
  0xa7   :  { %v192_v2 = vpack.c.bf16 %v176_v62, %v176_v62  ;;  %v196_v3 = vpack.c.bf16 %v180_v63, %v180_v63 }
  0xa8   :  { %216 = vst.msk [vmem:[%s448_s3 + $0x28] sm:$0xf] %vm205_vm1, %v199_v0 }
  0xa9   :  { %220 = vst.msk [vmem:[%s448_s3 + $0x38] sm:$0xf] %vm205_vm1, %v203_v1  ;;  %v160_v4 = vpop.f32.mrf.mxu2  ;;  %v170_v5 = vpop.f32.mrf.mxu3 }
  0xaa   :  { %209 = vst.msk [vmem:[%s448_s3 + $0xc] sm:$0xf] %vm205_vm1, %v192_v2  ;;  %v161_v6 = vadd.f32 %v363_v11, %v160_v4  ;;  %v171_v7 = vadd.f32 %v363_v11, %v170_v5 }
  0xab   :  { %213 = vst.msk [vmem:[%s448_s3 + $0x1c] sm:$0xf] %vm205_vm1, %v196_v3 }
  0xac   :  { %v184_v8 = vmax.f32 %v161_v6, 0.0  ;;  %v188_v9 = vmax.f32 %v171_v7, 0.0 }
  0xae   :  { %v200_v10 = vpack.c.bf16 %v184_v8, %v184_v8  ;;  %v204_v12 = vpack.c.bf16 %v188_v9, %v188_v9 }
  0xb0   :  { %217 = vst.msk [vmem:[%s448_s3 + $0x2c] sm:$0xf] %vm205_vm1, %v200_v10 }
  0xb1   :  { %221 = vst.msk [vmem:[%s448_s3 + $0x3c] sm:$0xf] %vm205_vm1, %v204_v12 }

// kernel: pvt_dense_decoder_forward.16
= control target key start
LH: loop header
LB: loop body
LE: loop exit
PB: predicated region body
PF: predicated region fallthrough
CT: control target
= control target key end

     0   :  { %s453_s1 = inlined_call_operand.vmem [shape: bf16[256,128], index: 1, kind: input, shape index: {}]   ;;  %s454_s2 = inlined_call_operand.vmem [shape: f32[1,128], index: 2, kind: input, shape index: {}]   ;;  %s455_s0 = inlined_call_operand.vmem [shape: bf16[32,256], index: 0, kind: input, shape index: {}]   ;;  %s456_s3 = inlined_call_operand.vmem [shape: bf16[32,128], index: 3, kind: output, shape index: {}]  }
   0x1   :  { %v315_v0 = vld [vmem:[%s453_s1 + $0x38] sm:$0xff]  ;;  %v314_v2 = vld [vmem:[%s453_s1 + $0x30] sm:$0xff]  ;;  %v313_v4 = vld [vmem:[%s453_s1 + $0x28] sm:$0xff] }
   0x2   :  { %v323_v1 = vld [vmem:[%s453_s1 + $0x78] sm:$0xff]  ;;  %170 = vmatpush.bf16.msra.mxu0 %v315_v0  ;;  %335 = vmatpush.bf16.msra.mxu2 %v315_v0  ;;  %v322_v3 = vld [vmem:[%s453_s1 + $0x70] sm:$0xff]  ;;  %v321_v5 = vld [vmem:[%s453_s1 + $0x68] sm:$0xff] }
   0x3   :  { %189 = vmatpush.bf16.msra.mxu1 %v323_v1  ;;  %343 = vmatpush.bf16.msra.mxu3 %v323_v1  ;;  %v312_v6 = vld [vmem:[%s453_s1 + $0x20] sm:$0xff]  ;;  %v311_v8 = vld [vmem:[%s453_s1 + $0x18] sm:$0xff]  ;;  %v310_v10 = vld [vmem:[%s453_s1 + $0x10] sm:$0xff] }
   0x4   :  { %v320_v7 = vld [vmem:[%s453_s1 + $0x60] sm:$0xff]  ;;  %v319_v9 = vld [vmem:[%s453_s1 + $0x58] sm:$0xff]  ;;  %v318_v11 = vld [vmem:[%s453_s1 + $0x50] sm:$0xff] }
   0x5   :  { %v309_v12 = vld [vmem:[%s453_s1 + $0x8] sm:$0xff]  ;;  %v308_v14 = vld [vmem:[%s453_s1] sm:$0xff]  ;;  %v234_v18 = vld [vmem:[%s455_s0 + $0x10] sm:$0xf] }
   0x6   :  { %171 = vmatpush.bf16.msra.mxu0 %v314_v2  ;;  %336 = vmatpush.bf16.msra.mxu2 %v314_v2  ;;  %v317_v13 = vld [vmem:[%s453_s1 + $0x48] sm:$0xff]  ;;  %v316_v15 = vld [vmem:[%s453_s1 + $0x40] sm:$0xff]  ;;  %v307_v19 = vld [vmem:[%s455_s0 + $0x14] sm:$0xf0] }
   0x7   :  { %190 = vmatpush.bf16.msra.mxu1 %v322_v3  ;;  %344 = vmatpush.bf16.msra.mxu3 %v322_v3  ;;  %v226_v16 = vld [vmem:[%s455_s0] sm:$0xf]  ;;  %v305_v17 = vld [vmem:[%s455_s0 + $0x4] sm:$0xf0]  ;;  %v304_v20 = vld [vmem:[%s455_s0 + $0x4] sm:$0xf]  ;;  %v235_v25 = vor.u32 %v307_v19, %v234_v18 }
   0x8   :  { %v228_v21 = vld [vmem:[%s455_s0 + $0x8] sm:$0xf0]  ;;  %v306_v22 = vld [vmem:[%s455_s0 + $0x14] sm:$0xf]  ;;  %v236_v23 = vld [vmem:[%s455_s0 + $0x18] sm:$0xf0]  ;;  %v227_v24 = vor.u32 %v305_v17, %v226_v16 }
   0x9   :  { %v231_v26 = vor.u32 %v304_v20, %v228_v21  ;;  %v239_v27 = vor.u32 %v306_v22, %v236_v23  ;;  %v351_v29 = vld [vmem:[%s454_s2] ss:$0 sm:$0xff] }
   0xa   :  { %172 = vmatpush.bf16.msra.mxu0 %v313_v4  ;;  %337 = vmatpush.bf16.msra.mxu2 %v313_v4 }
   0xb   :  { %191 = vmatpush.bf16.msra.mxu1 %v321_v5  ;;  %345 = vmatpush.bf16.msra.mxu3 %v321_v5 }
   0xe   :  { %173 = vmatpush.bf16.msra.mxu0 %v312_v6  ;;  %338 = vmatpush.bf16.msra.mxu2 %v312_v6 }
   0xf   :  { %192 = vmatpush.bf16.msra.mxu1 %v320_v7  ;;  %346 = vmatpush.bf16.msra.mxu3 %v320_v7 }
  0x12   :  { %174 = vmatpush.bf16.msra.mxu0 %v311_v8  ;;  %339 = vmatpush.bf16.msra.mxu2 %v311_v8 }
  0x13   :  { %193 = vmatpush.bf16.msra.mxu1 %v319_v9  ;;  %347 = vmatpush.bf16.msra.mxu3 %v319_v9 }
  0x16   :  { %175 = vmatpush.bf16.msra.mxu0 %v310_v10  ;;  %340 = vmatpush.bf16.msra.mxu2 %v310_v10 }
  0x17   :  { %194 = vmatpush.bf16.msra.mxu1 %v318_v11  ;;  %348 = vmatpush.bf16.msra.mxu3 %v318_v11 }
  0x1a   :  { %176 = vmatpush.bf16.msra.mxu0 %v309_v12  ;;  %341 = vmatpush.bf16.msra.mxu2 %v309_v12 }
  0x1b   :  { %195 = vmatpush.bf16.msra.mxu1 %v317_v13  ;;  %349 = vmatpush.bf16.msra.mxu3 %v317_v13 }
  0x1e   :  { %177 = vmatpush.bf16.msra.mxu0 %v308_v14  ;;  %342 = vmatpush.bf16.msra.mxu2 %v308_v14 }
  0x1f   :  { %196 = vmatpush.bf16.msra.mxu1 %v316_v15  ;;  %350 = vmatpush.bf16.msra.mxu3 %v316_v15 }
  0x21   :  { %178 = vmatmul.bf16.vlgmr.msra.gmra.mxu0 %v227_v24  ;;  %183 = vmatmul.bf16.vlgmr.msra.gmra.mxu2 %v235_v25 }
  0x22   :  { %197 = vmatmul.bf16.vlgmr.msra.gmra.mxu1 %v231_v26  ;;  %202 = vmatmul.bf16.vlgmr.msra.gmra.mxu3 %v239_v27 }
  0x9e   :  { %v179_v28 = vpop.f32.mrf.mxu0 }
  0x9f   :  { %v198_v30 = vpop.f32.mrf.mxu1  ;;  %v180_v31 = vadd.f32 %v351_v29, %v179_v28 }
  0xa1   :  { %v199_v35 = vadd.f32 %v198_v30, %v180_v31 }
  0xa3   :  { %v208_v40 = vmax.f32 %v199_v35, 0.0 }
  0xa4   :  { %v184_v32 = vpop.f32.mrf.mxu2 }
  0xa5   :  { %v203_v33 = vpop.f32.mrf.mxu3  ;;  %v185_v38 = vadd.f32 %v351_v29, %v184_v32 }
  0xa6   :  { %v181_v34 = vpop.f32.mrf.mxu0 }
  0xa7   :  { %v182_v36 = vadd.f32 %v351_v29, %v181_v34  ;;  %v200_v37 = vpop.f32.mrf.mxu1  ;;  %v204_v43 = vadd.f32 %v203_v33, %v185_v38 }
  0xa9   :  { %v201_v39 = vadd.f32 %v200_v37, %v182_v36  ;;  %v210_v48 = vmax.f32 %v204_v43, 0.0 }
  0xab   :  { %v209_v41 = vmax.f32 %v201_v39, 0.0 }
  0xac   :  { %v186_v42 = vpop.f32.mrf.mxu2 }
  0xad   :  { %v327_v44 = vpack.c.bf16 %v209_v41, %v208_v40  ;;  %v187_v45 = vadd.f32 %v351_v29, %v186_v42  ;;  %v205_v46 = vpop.f32.mrf.mxu3 }
  0xaf   :  { %328 = vst [vmem:[%s456_s3] sm:$0xff] %v327_v44   ;;  %v206_v47 = vadd.f32 %v205_v46, %v187_v45 }
  0xb1   :  { %v211_v49 = vmax.f32 %v206_v47, 0.0 }
  0xb3   :  { %v332_v50 = vpack.c.bf16 %v211_v49, %v210_v48 }
  0xb5   :  { %334 = vst [vmem:[%s456_s3 + $0x8] sm:$0xff] %v332_v50  }

// kernel: pvt_dense_decoder_forward.17
= control target key start
LH: loop header
LB: loop body
LE: loop exit
PB: predicated region body
PF: predicated region fallthrough
CT: control target
= control target key end

     0   :  { %vm840_vm0 = vcmask 519168   ;;  %s1957_s1 = inlined_call_operand.vmem [shape: bf16[512,320], index: 1, kind: input, shape index: {}]   ;;  %s1958_s0 = inlined_call_operand.vmem [shape: bf16[8,512], index: 0, kind: input, shape index: {}]   ;;  %s1959_s2 = inlined_call_operand.vmem [shape: f32[1,320], index: 2, kind: input, shape index: {}]   ;;  %s1960_s3 = inlined_call_operand.vmem [shape: bf16[8,320], index: 3, kind: output, shape index: {}]  }
   0x1   :  { %v932_v0 = vld [vmem:[%s1957_s1 + $0xa8] sm:$0xf]  ;;  %v1252_v1 = vld [vmem:[%s1957_s1 + $0xb0] sm:$0xf0]  ;;  %v920_v11 = vld [vmem:[%s1957_s1 + $0x90] sm:$0xf] }
   0x2   :  { %v1028_v2 = vld [vmem:[%s1957_s1 + $0x168] sm:$0xf]  ;;  %v933_v3 = vor.u32 %v1252_v1, %v932_v0  ;;  %v1276_v4 = vld [vmem:[%s1957_s1 + $0x170] sm:$0xf0]  ;;  %v1249_v13 = vld [vmem:[%s1957_s1 + $0x98] sm:$0xf0] }
   0x3   :  { %v1124_v5 = vld [vmem:[%s1957_s1 + $0x228] sm:$0xf]  ;;  %v1300_v6 = vld [vmem:[%s1957_s1 + $0x230] sm:$0xf0]  ;;  %v1029_v7 = vor.u32 %v1276_v4, %v1028_v2  ;;  %v1016_v14 = vld [vmem:[%s1957_s1 + $0x150] sm:$0xf]  ;;  %v921_v16 = vor.u32 %v1249_v13, %v920_v11 }
   0x4   :  { %v1125_v8 = vor.u32 %v1300_v6, %v1124_v5  ;;  %v1220_v9 = vld [vmem:[%s1957_s1 + $0x2e8] sm:$0xf]  ;;  %v1324_v10 = vld [vmem:[%s1957_s1 + $0x2f0] sm:$0xf0]  ;;  %678 = vmatpush.bf16.msra.mxu0 %v933_v3  ;;  %v1273_v15 = vld [vmem:[%s1957_s1 + $0x158] sm:$0xf0] }
   0x5   :  { %v1221_v12 = vor.u32 %v1324_v10, %v1220_v9  ;;  %691 = vmatpush.bf16.msra.mxu1 %v1029_v7  ;;  %v1017_v17 = vor.u32 %v1273_v15, %v1016_v14  ;;  %v1112_v18 = vld [vmem:[%s1957_s1 + $0x210] sm:$0xf]  ;;  %v1297_v19 = vld [vmem:[%s1957_s1 + $0x218] sm:$0xf0]  ;;  %v908_v23 = vld [vmem:[%s1957_s1 + $0x78] sm:$0xf] }
   0x6   :  { %704 = vmatpush.bf16.msra.mxu2 %v1125_v8  ;;  %v1208_v20 = vld [vmem:[%s1957_s1 + $0x2d0] sm:$0xf]  ;;  %v1113_v21 = vor.u32 %v1297_v19, %v1112_v18  ;;  %v1321_v22 = vld [vmem:[%s1957_s1 + $0x2d8] sm:$0xf0]  ;;  %v1246_v24 = vld [vmem:[%s1957_s1 + $0x80] sm:$0xf0] }
   0x7   :  { %717 = vmatpush.bf16.msra.mxu3 %v1221_v12  ;;  %v1209_v25 = vor.u32 %v1321_v22, %v1208_v20  ;;  %v1004_v26 = vld [vmem:[%s1957_s1 + $0x138] sm:$0xf]  ;;  %v1270_v27 = vld [vmem:[%s1957_s1 + $0x140] sm:$0xf0]  ;;  %v909_v29 = vor.u32 %v1246_v24, %v908_v23  ;;  %v896_v35 = vld [vmem:[%s1957_s1 + $0x60] sm:$0xf] }
   0x8   :  { %v1100_v28 = vld [vmem:[%s1957_s1 + $0x1f8] sm:$0xf]  ;;  %679 = vmatpush.bf16.msra.mxu0 %v921_v16  ;;  %v1294_v30 = vld [vmem:[%s1957_s1 + $0x200] sm:$0xf0]  ;;  %v1005_v33 = vor.u32 %v1270_v27, %v1004_v26  ;;  %v1243_v36 = vld [vmem:[%s1957_s1 + $0x68] sm:$0xf0] }
   0x9   :  { %v1196_v31 = vld [vmem:[%s1957_s1 + $0x2b8] sm:$0xf]  ;;  %v1318_v32 = vld [vmem:[%s1957_s1 + $0x2c0] sm:$0xf0]  ;;  %692 = vmatpush.bf16.msra.mxu1 %v1017_v17  ;;  %v1101_v34 = vor.u32 %v1294_v30, %v1100_v28  ;;  %v992_v37 = vld [vmem:[%s1957_s1 + $0x120] sm:$0xf]  ;;  %v897_v44 = vor.u32 %v1243_v36, %v896_v35 }
   0xa   :  { %705 = vmatpush.bf16.msra.mxu2 %v1113_v21  ;;  %v1197_v38 = vor.u32 %v1318_v32, %v1196_v31  ;;  %v1267_v39 = vld [vmem:[%s1957_s1 + $0x128] sm:$0xf0]  ;;  %v1088_v40 = vld [vmem:[%s1957_s1 + $0x1e0] sm:$0xf]  ;;  %v884_v47 = vld [vmem:[%s1957_s1 + $0x48] sm:$0xf] }
   0xb   :  { %718 = vmatpush.bf16.msra.mxu3 %v1209_v25  ;;  %v1291_v41 = vld [vmem:[%s1957_s1 + $0x1e8] sm:$0xf0]  ;;  %v1184_v42 = vld [vmem:[%s1957_s1 + $0x2a0] sm:$0xf]  ;;  %v993_v45 = vor.u32 %v1267_v39, %v992_v37  ;;  %v1240_v48 = vld [vmem:[%s1957_s1 + $0x50] sm:$0xf0] }
   0xc   :  { %v1315_v43 = vld [vmem:[%s1957_s1 + $0x2a8] sm:$0xf0]  ;;  %680 = vmatpush.bf16.msra.mxu0 %v909_v29  ;;  %v1089_v46 = vor.u32 %v1291_v41, %v1088_v40  ;;  %v980_v49 = vld [vmem:[%s1957_s1 + $0x108] sm:$0xf]  ;;  %v1264_v51 = vld [vmem:[%s1957_s1 + $0x110] sm:$0xf0]  ;;  %v885_v56 = vor.u32 %v1240_v48, %v884_v47 }
   0xd   :  { %693 = vmatpush.bf16.msra.mxu1 %v1005_v33  ;;  %v1185_v50 = vor.u32 %v1315_v43, %v1184_v42  ;;  %v1076_v52 = vld [vmem:[%s1957_s1 + $0x1c8] sm:$0xf]  ;;  %v1288_v53 = vld [vmem:[%s1957_s1 + $0x1d0] sm:$0xf0]  ;;  %v981_v57 = vor.u32 %v1264_v51, %v980_v49  ;;  %v872_v59 = vld [vmem:[%s1957_s1 + $0x30] sm:$0xf] }
   0xe   :  { %706 = vmatpush.bf16.msra.mxu2 %v1101_v34  ;;  %v1172_v54 = vld [vmem:[%s1957_s1 + $0x288] sm:$0xf]  ;;  %v1312_v55 = vld [vmem:[%s1957_s1 + $0x290] sm:$0xf0]  ;;  %v1077_v58 = vor.u32 %v1288_v53, %v1076_v52  ;;  %v1237_v60 = vld [vmem:[%s1957_s1 + $0x38] sm:$0xf0] }
   0xf   :  { %719 = vmatpush.bf16.msra.mxu3 %v1197_v38  ;;  %v968_v61 = vld [vmem:[%s1957_s1 + $0xf0] sm:$0xf]  ;;  %v1173_v62 = vor.u32 %v1312_v55, %v1172_v54  ;;  %v1261_v63 = vld [vmem:[%s1957_s1 + $0xf8] sm:$0xf0]  ;;  %v873_v4 = vor.u32 %v1237_v60, %v872_v59  ;;  %v860_v7 = vld [vmem:[%s1957_s1 + $0x18] sm:$0xf] }
  0x10   :  { %681 = vmatpush.bf16.msra.mxu0 %v897_v44  ;;  %v1064_v0 = vld [vmem:[%s1957_s1 + $0x1b0] sm:$0xf]  ;;  %v1285_v1 = vld [vmem:[%s1957_s1 + $0x1b8] sm:$0xf0]  ;;  %v969_v5 = vor.u32 %v1261_v63, %v968_v61  ;;  %v1234_v8 = vld [vmem:[%s1957_s1 + $0x20] sm:$0xf0] }
  0x11   :  { %694 = vmatpush.bf16.msra.mxu1 %v993_v45  ;;  %v1160_v2 = vld [vmem:[%s1957_s1 + $0x270] sm:$0xf]  ;;  %v1309_v3 = vld [vmem:[%s1957_s1 + $0x278] sm:$0xf0]  ;;  %v1065_v6 = vor.u32 %v1285_v1, %v1064_v0  ;;  %v956_v9 = vld [vmem:[%s1957_s1 + $0xd8] sm:$0xf]  ;;  %v861_v16 = vor.u32 %v1234_v8, %v860_v7 }
  0x12   :  { %707 = vmatpush.bf16.msra.mxu2 %v1089_v46  ;;  %v1161_v10 = vor.u32 %v1309_v3, %v1160_v2  ;;  %v1258_v11 = vld [vmem:[%s1957_s1 + $0xe0] sm:$0xf0]  ;;  %v1052_v12 = vld [vmem:[%s1957_s1 + $0x198] sm:$0xf]  ;;  %v848_v17 = vld [vmem:[%s1957_s1] sm:$0xf] }
  0x13   :  { %720 = vmatpush.bf16.msra.mxu3 %v1185_v50  ;;  %v1282_v13 = vld [vmem:[%s1957_s1 + $0x1a0] sm:$0xf0]  ;;  %v1148_v14 = vld [vmem:[%s1957_s1 + $0x258] sm:$0xf]  ;;  %v1231_v18 = vld [vmem:[%s1957_s1 + $0x8] sm:$0xf0]  ;;  %v957_v19 = vor.u32 %v1258_v11, %v956_v9 }
  0x14   :  { %682 = vmatpush.bf16.msra.mxu0 %v885_v56  ;;  %v1306_v15 = vld [vmem:[%s1957_s1 + $0x260] sm:$0xf0]  ;;  %v1053_v20 = vor.u32 %v1282_v13, %v1052_v12  ;;  %v944_v21 = vld [vmem:[%s1957_s1 + $0xc0] sm:$0xf]  ;;  %v1255_v22 = vld [vmem:[%s1957_s1 + $0xc8] sm:$0xf0]  ;;  %v849_v31 = vor.u32 %v1231_v18, %v848_v17 }
  0x15   :  { %695 = vmatpush.bf16.msra.mxu1 %v981_v57  ;;  %v1040_v23 = vld [vmem:[%s1957_s1 + $0x180] sm:$0xf]  ;;  %v1149_v24 = vor.u32 %v1306_v15, %v1148_v14  ;;  %v1279_v25 = vld [vmem:[%s1957_s1 + $0x188] sm:$0xf0]  ;;  %v934_v29 = vld [vmem:[%s1957_s1 + $0xb4] sm:$0xf0]  ;;  %v945_v35 = vor.u32 %v1255_v22, %v944_v21 }
  0x16   :  { %708 = vmatpush.bf16.msra.mxu2 %v1077_v58  ;;  %v1136_v26 = vld [vmem:[%s1957_s1 + $0x240] sm:$0xf]  ;;  %v1303_v27 = vld [vmem:[%s1957_s1 + $0x248] sm:$0xf0]  ;;  %v1030_v32 = vld [vmem:[%s1957_s1 + $0x174] sm:$0xf0]  ;;  %v1041_v36 = vor.u32 %v1279_v25, %v1040_v23 }
  0x17   :  { %721 = vmatpush.bf16.msra.mxu3 %v1173_v62  ;;  %v1251_v28 = vld [vmem:[%s1957_s1 + $0xac] sm:$0xf]  ;;  %v1126_v34 = vld [vmem:[%s1957_s1 + $0x234] sm:$0xf0]  ;;  %v1137_v39 = vor.u32 %v1303_v27, %v1136_v26  ;;  %v1248_v43 = vld [vmem:[%s1957_s1 + $0x94] sm:$0xf] }
  0x18   :  { %683 = vmatpush.bf16.msra.mxu0 %v873_v4  ;;  %v1275_v30 = vld [vmem:[%s1957_s1 + $0x16c] sm:$0xf]  ;;  %v1222_v38 = vld [vmem:[%s1957_s1 + $0x2f4] sm:$0xf0]  ;;  %v937_v40 = vor.u32 %v1251_v28, %v934_v29  ;;  %v922_v44 = vld [vmem:[%s1957_s1 + $0x9c] sm:$0xf0] }
  0x19   :  { %696 = vmatpush.bf16.msra.mxu1 %v969_v5  ;;  %v1299_v33 = vld [vmem:[%s1957_s1 + $0x22c] sm:$0xf]  ;;  %v1033_v41 = vor.u32 %v1275_v30, %v1030_v32  ;;  %v1272_v45 = vld [vmem:[%s1957_s1 + $0x154] sm:$0xf]  ;;  %v1018_v47 = vld [vmem:[%s1957_s1 + $0x15c] sm:$0xf0]  ;;  %v925_v53 = vor.u32 %v1248_v43, %v922_v44 }
  0x1a   :  { %709 = vmatpush.bf16.msra.mxu2 %v1065_v6  ;;  %v1323_v37 = vld [vmem:[%s1957_s1 + $0x2ec] sm:$0xf]  ;;  %v1129_v42 = vor.u32 %v1299_v33, %v1126_v34  ;;  %v1296_v48 = vld [vmem:[%s1957_s1 + $0x214] sm:$0xf]  ;;  %v1114_v49 = vld [vmem:[%s1957_s1 + $0x21c] sm:$0xf0]  ;;  %v1021_v57 = vor.u32 %v1272_v45, %v1018_v47 }
  0x1b   :  { %722 = vmatpush.bf16.msra.mxu3 %v1161_v10  ;;  %v1225_v46 = vor.u32 %v1323_v37, %v1222_v38  ;;  %v1320_v50 = vld [vmem:[%s1957_s1 + $0x2d4] sm:$0xf]  ;;  %v1210_v51 = vld [vmem:[%s1957_s1 + $0x2dc] sm:$0xf0]  ;;  %v15_v52 = vld [vmem:[%s1958_s0 + $0x8] sm:$0xff]  ;;  %v1117_v58 = vor.u32 %v1296_v48, %v1114_v49 }
  0x1c   :  { %684 = vmatpush.bf16.msra.mxu0 %v861_v16  ;;  %v1245_v54 = vld [vmem:[%s1957_s1 + $0x7c] sm:$0xf]  ;;  %v156_v55 = vunpack.c.l.b16 %v15_v52  ;;  %v157_v56 = vunpack.c.h.b16 %v15_v52  ;;  %v910_v59 = vld [vmem:[%s1957_s1 + $0x84] sm:$0xf0]  ;;  %v1213_v62 = vor.u32 %v1320_v50, %v1210_v51  ;;  %v14_v2 = vld [vmem:[%s1958_s0] sm:$0xff] }
  0x1d   :  { %697 = vmatpush.bf16.msra.mxu1 %v957_v19  ;;  %v1269_v60 = vld [vmem:[%s1957_s1 + $0x13c] sm:$0xf]  ;;  %v1006_v61 = vld [vmem:[%s1957_s1 + $0x144] sm:$0xf0]  ;;  %v154_v5 = vunpack.c.l.b16 %v14_v2  ;;  %v155_v7 = vunpack.c.h.b16 %v14_v2  ;;  %v913_v8 = vor.u32 %v1245_v54, %v910_v59  ;;  %v1242_v11 = vld [vmem:[%s1957_s1 + $0x64] sm:$0xf] }
  0x1e   :  { %710 = vmatpush.bf16.msra.mxu2 %v1053_v20  ;;  %v1293_v63 = vld [vmem:[%s1957_s1 + $0x1fc] sm:$0xf]  ;;  %v1102_v0 = vld [vmem:[%s1957_s1 + $0x204] sm:$0xf0]  ;;  %v1607_v1 = vpack.c.b16 %v156_v55, %v156_v55  ;;  %v1618_v6 = vpack.c.b16 %v157_v56, %v157_v56  ;;  %v1009_v9 = vor.u32 %v1269_v60, %v1006_v61  ;;  %v898_v12 = vld [vmem:[%s1957_s1 + $0x6c] sm:$0xf0] }
  0x1f   :  { %723 = vmatpush.bf16.msra.mxu3 %v1149_v24  ;;  %v1317_v3 = vld [vmem:[%s1957_s1 + $0x2bc] sm:$0xf]  ;;  %v1198_v4 = vld [vmem:[%s1957_s1 + $0x2c4] sm:$0xf0]  ;;  %v1105_v10 = vor.u32 %v1293_v63, %v1102_v0  ;;  %v1266_v13 = vld [vmem:[%s1957_s1 + $0x124] sm:$0xf]  ;;  %v1630_v14 = vpack.c.b16 %v154_v5, %v154_v5  ;;  %v1632_v15 = vpack.c.b16 %v155_v7, %v155_v7  ;;  %v901_v22 = vor.u32 %v1242_v11, %v898_v12 }
  0x20   :  { %685 = vmatpush.bf16.msra.mxu0 %v849_v31  ;;  %v1201_v16 = vor.u32 %v1317_v3, %v1198_v4  ;;  %v994_v17 = vld [vmem:[%s1957_s1 + $0x12c] sm:$0xf0]  ;;  %v1290_v18 = vld [vmem:[%s1957_s1 + $0x1e4] sm:$0xf]  ;;  %v1239_v25 = vld [vmem:[%s1957_s1 + $0x4c] sm:$0xf] }
  0x21   :  { %698 = vmatpush.bf16.msra.mxu1 %v945_v35  ;;  %v1090_v19 = vld [vmem:[%s1957_s1 + $0x1ec] sm:$0xf0]  ;;  %v1314_v20 = vld [vmem:[%s1957_s1 + $0x2a4] sm:$0xf]  ;;  %v997_v23 = vor.u32 %v1266_v13, %v994_v17  ;;  %v886_v26 = vld [vmem:[%s1957_s1 + $0x54] sm:$0xf0] }
  0x22   :  { %711 = vmatpush.bf16.msra.mxu2 %v1041_v36  ;;  %v1186_v21 = vld [vmem:[%s1957_s1 + $0x2ac] sm:$0xf0]  ;;  %v1093_v24 = vor.u32 %v1290_v18, %v1090_v19  ;;  %v1263_v27 = vld [vmem:[%s1957_s1 + $0x10c] sm:$0xf]  ;;  %v982_v29 = vld [vmem:[%s1957_s1 + $0x114] sm:$0xf0]  ;;  %v889_v34 = vor.u32 %v1239_v25, %v886_v26 }
  0x23   :  { %724 = vmatpush.bf16.msra.mxu3 %v1137_v39  ;;  %686 = vmatmul.bf16.vlgmr.msra.gmra.mxu0 %v1630_v14  ;;  %v1189_v28 = vor.u32 %v1314_v20, %v1186_v21  ;;  %v1287_v30 = vld [vmem:[%s1957_s1 + $0x1cc] sm:$0xf]  ;;  %v1078_v31 = vld [vmem:[%s1957_s1 + $0x1d4] sm:$0xf0]  ;;  %v985_v35 = vor.u32 %v1263_v27, %v982_v29  ;;  %v1236_v37 = vld [vmem:[%s1957_s1 + $0x34] sm:$0xf] }
  0x24   :  { %730 = vmatpush.bf16.msrb.mxu0 %v937_v40  ;;  %699 = vmatmul.bf16.vlgmr.msra.gmra.mxu1 %v1632_v15  ;;  %v1311_v32 = vld [vmem:[%s1957_s1 + $0x28c] sm:$0xf]  ;;  %v1174_v33 = vld [vmem:[%s1957_s1 + $0x294] sm:$0xf0]  ;;  %v1081_v36 = vor.u32 %v1287_v30, %v1078_v31  ;;  %v874_v38 = vld [vmem:[%s1957_s1 + $0x3c] sm:$0xf0] }
  0x25   :  { %743 = vmatpush.bf16.msrb.mxu1 %v1033_v41  ;;  %712 = vmatmul.bf16.vlgmr.msra.gmra.mxu2 %v1607_v1  ;;  %v1260_v39 = vld [vmem:[%s1957_s1 + $0xf4] sm:$0xf]  ;;  %v1177_v40 = vor.u32 %v1311_v32, %v1174_v33  ;;  %v970_v41 = vld [vmem:[%s1957_s1 + $0xfc] sm:$0xf0]  ;;  %v1233_v49 = vld [vmem:[%s1957_s1 + $0x1c] sm:$0xf] }
  0x26   :  { %756 = vmatpush.bf16.msrb.mxu2 %v1129_v42  ;;  %725 = vmatmul.bf16.vlgmr.msra.gmra.mxu3 %v1618_v6  ;;  %v1284_v42 = vld [vmem:[%s1957_s1 + $0x1b4] sm:$0xf]  ;;  %v1066_v43 = vld [vmem:[%s1957_s1 + $0x1bc] sm:$0xf0]  ;;  %v973_v47 = vor.u32 %v1260_v39, %v970_v41  ;;  %v862_v50 = vld [vmem:[%s1957_s1 + $0x24] sm:$0xf0] }
  0x27   :  { %769 = vmatpush.bf16.msrb.mxu3 %v1225_v46  ;;  %v1308_v44 = vld [vmem:[%s1957_s1 + $0x274] sm:$0xf]  ;;  %v1162_v45 = vld [vmem:[%s1957_s1 + $0x27c] sm:$0xf0]  ;;  %v877_v46 = vor.u32 %v1236_v37, %v874_v38  ;;  %v1069_v48 = vor.u32 %v1284_v42, %v1066_v43  ;;  %v1257_v51 = vld [vmem:[%s1957_s1 + $0xdc] sm:$0xf] }
  0x28   :  { %731 = vmatpush.bf16.msrb.mxu0 %v925_v53  ;;  %v1165_v52 = vor.u32 %v1308_v44, %v1162_v45  ;;  %v958_v53 = vld [vmem:[%s1957_s1 + $0xe4] sm:$0xf0]  ;;  %v1281_v54 = vld [vmem:[%s1957_s1 + $0x19c] sm:$0xf]  ;;  %v1230_v59 = vld [vmem:[%s1957_s1 + $0x4] sm:$0xf] }
  0x29   :  { %744 = vmatpush.bf16.msrb.mxu1 %v1021_v57  ;;  %v1054_v55 = vld [vmem:[%s1957_s1 + $0x1a4] sm:$0xf0]  ;;  %v1305_v56 = vld [vmem:[%s1957_s1 + $0x25c] sm:$0xf]  ;;  %v850_v60 = vld [vmem:[%s1957_s1 + $0xc] sm:$0xf0]  ;;  %v961_v61 = vor.u32 %v1257_v51, %v958_v53 }
  0x2a   :  { %757 = vmatpush.bf16.msrb.mxu2 %v1117_v58  ;;  %v1150_v57 = vld [vmem:[%s1957_s1 + $0x264] sm:$0xf0]  ;;  %v865_v58 = vor.u32 %v1233_v49, %v862_v50  ;;  %v1254_v63 = vld [vmem:[%s1957_s1 + $0xc4] sm:$0xf]  ;;  %v946_v0 = vld [vmem:[%s1957_s1 + $0xcc] sm:$0xf0]  ;;  %v853_v11 = vor.u32 %v1230_v59, %v850_v60 }
  0x2b   :  { %770 = vmatpush.bf16.msrb.mxu3 %v1213_v62  ;;  %v1057_v62 = vor.u32 %v1281_v54, %v1054_v55  ;;  %v1278_v2 = vld [vmem:[%s1957_s1 + $0x184] sm:$0xf]  ;;  %v1153_v3 = vor.u32 %v1305_v56, %v1150_v57  ;;  %v1042_v4 = vld [vmem:[%s1957_s1 + $0x18c] sm:$0xf0]  ;;  %v1277_v12 = vld [vmem:[%s1957_s1 + $0x178] sm:$0xf0]  ;;  %v949_v17 = vor.u32 %v1254_v63, %v946_v0 }
  0x2c   :  { %732 = vmatpush.bf16.msrb.mxu0 %v913_v8  ;;  %v1302_v5 = vld [vmem:[%s1957_s1 + $0x244] sm:$0xf]  ;;  %v1138_v7 = vld [vmem:[%s1957_s1 + $0x24c] sm:$0xf0]  ;;  %v1045_v18 = vor.u32 %v1278_v2, %v1042_v4  ;;  %v1325_v20 = vld [vmem:[%s1957_s1 + $0x2f8] sm:$0xf0] }
  0x2d   :  { %745 = vmatpush.bf16.msrb.mxu1 %v1009_v9  ;;  %v940_v8 = vld [vmem:[%s1957_s1 + $0xb0] sm:$0xf]  ;;  %v1253_v9 = vld [vmem:[%s1957_s1 + $0xb8] sm:$0xf0]  ;;  %v1141_v21 = vor.u32 %v1302_v5, %v1138_v7  ;;  %v928_v25 = vld [vmem:[%s1957_s1 + $0x98] sm:$0xf] }
  0x2e   :  { %758 = vmatpush.bf16.msrb.mxu2 %v1105_v10  ;;  %v1036_v10 = vld [vmem:[%s1957_s1 + $0x170] sm:$0xf]  ;;  %v1250_v26 = vld [vmem:[%s1957_s1 + $0xa0] sm:$0xf0]  ;;  %v1024_v27 = vld [vmem:[%s1957_s1 + $0x158] sm:$0xf] }
  0x2f   :  { %771 = vmatpush.bf16.msrb.mxu3 %v1201_v16  ;;  %v1132_v13 = vld [vmem:[%s1957_s1 + $0x230] sm:$0xf]  ;;  %v1301_v16 = vld [vmem:[%s1957_s1 + $0x238] sm:$0xf0]  ;;  %v1274_v29 = vld [vmem:[%s1957_s1 + $0x160] sm:$0xf0] }
  0x30   :  { %733 = vmatpush.bf16.msrb.mxu0 %v901_v22  ;;  %v1228_v19 = vld [vmem:[%s1957_s1 + $0x2f0] sm:$0xf]  ;;  %v941_v22 = vor.u32 %v1253_v9, %v940_v8  ;;  %v1120_v30 = vld [vmem:[%s1957_s1 + $0x218] sm:$0xf]  ;;  %v1298_v31 = vld [vmem:[%s1957_s1 + $0x220] sm:$0xf0] }
  0x31   :  { %746 = vmatpush.bf16.msrb.mxu1 %v997_v23  ;;  %v1037_v23 = vor.u32 %v1277_v12, %v1036_v10  ;;  %v1216_v32 = vld [vmem:[%s1957_s1 + $0x2d8] sm:$0xf]  ;;  %v1322_v33 = vld [vmem:[%s1957_s1 + $0x2e0] sm:$0xf0]  ;;  %v916_v37 = vld [vmem:[%s1957_s1 + $0x80] sm:$0xf] }
  0x32   :  { %759 = vmatpush.bf16.msrb.mxu2 %v1093_v24  ;;  %v1133_v24 = vor.u32 %v1301_v16, %v1132_v13  ;;  %v1247_v38 = vld [vmem:[%s1957_s1 + $0x88] sm:$0xf0]  ;;  %v1012_v39 = vld [vmem:[%s1957_s1 + $0x140] sm:$0xf]  ;;  %v904_v49 = vld [vmem:[%s1957_s1 + $0x68] sm:$0xf] }
  0x33   :  { %772 = vmatpush.bf16.msrb.mxu3 %v1189_v28  ;;  %v1229_v28 = vor.u32 %v1325_v20, %v1228_v19  ;;  %v1271_v41 = vld [vmem:[%s1957_s1 + $0x148] sm:$0xf0]  ;;  %v1108_v42 = vld [vmem:[%s1957_s1 + $0x200] sm:$0xf]  ;;  %v1244_v50 = vld [vmem:[%s1957_s1 + $0x70] sm:$0xf0] }
  0x34   :  { %734 = vmatpush.bf16.msrb.mxu0 %v889_v34  ;;  %v929_v34 = vor.u32 %v1250_v26, %v928_v25  ;;  %v1295_v43 = vld [vmem:[%s1957_s1 + $0x208] sm:$0xf0]  ;;  %v1204_v44 = vld [vmem:[%s1957_s1 + $0x2c0] sm:$0xf]  ;;  %v1000_v51 = vld [vmem:[%s1957_s1 + $0x128] sm:$0xf] }
  0x35   :  { %747 = vmatpush.bf16.msrb.mxu1 %v985_v35  ;;  %v1025_v35 = vor.u32 %v1274_v29, %v1024_v27  ;;  %v1319_v45 = vld [vmem:[%s1957_s1 + $0x2c8] sm:$0xf0]  ;;  %v1268_v53 = vld [vmem:[%s1957_s1 + $0x130] sm:$0xf0]  ;;  %v1096_v54 = vld [vmem:[%s1957_s1 + $0x1e8] sm:$0xf] }
  0x36   :  { %760 = vmatpush.bf16.msrb.mxu2 %v1081_v36  ;;  %v1121_v36 = vor.u32 %v1298_v31, %v1120_v30  ;;  %v1292_v55 = vld [vmem:[%s1957_s1 + $0x1f0] sm:$0xf0]  ;;  %v1192_v56 = vld [vmem:[%s1957_s1 + $0x2a8] sm:$0xf]  ;;  %v1001_v59 = vor.u32 %v1268_v53, %v1000_v51  ;;  %v988_v63 = vld [vmem:[%s1957_s1 + $0x110] sm:$0xf] }
  0x37   :  { %773 = vmatpush.bf16.msrb.mxu3 %v1177_v40  ;;  %v1217_v40 = vor.u32 %v1322_v33, %v1216_v32  ;;  %v1316_v57 = vld [vmem:[%s1957_s1 + $0x2b0] sm:$0xf0]  ;;  %v1097_v60 = vor.u32 %v1292_v55, %v1096_v54  ;;  %v1265_v2 = vld [vmem:[%s1957_s1 + $0x118] sm:$0xf0]  ;;  %v1180_v5 = vld [vmem:[%s1957_s1 + $0x290] sm:$0xf] }
  0x38   :  { %735 = vmatpush.bf16.msrb.mxu0 %v877_v46  ;;  %v917_v46 = vor.u32 %v1247_v38, %v916_v37  ;;  %v1193_v0 = vor.u32 %v1316_v57, %v1192_v56  ;;  %v1289_v4 = vld [vmem:[%s1957_s1 + $0x1d8] sm:$0xf0]  ;;  %v989_v9 = vor.u32 %v1265_v2, %v988_v63  ;;  %v1238_v12 = vld [vmem:[%s1957_s1 + $0x40] sm:$0xf0]  ;;  %v976_v13 = vld [vmem:[%s1957_s1 + $0xf8] sm:$0xf] }
  0x39   :  { %748 = vmatpush.bf16.msrb.mxu1 %v973_v47  ;;  %v1013_v47 = vor.u32 %v1271_v41, %v1012_v39  ;;  %v1313_v7 = vld [vmem:[%s1957_s1 + $0x298] sm:$0xf0]  ;;  %v1286_v19 = vld [vmem:[%s1957_s1 + $0x1c0] sm:$0xf0]  ;;  %v1168_v20 = vld [vmem:[%s1957_s1 + $0x278] sm:$0xf] }
  0x3a   :  { %761 = vmatpush.bf16.msrb.mxu2 %v1069_v48  ;;  %v1109_v48 = vor.u32 %v1295_v43, %v1108_v42  ;;  %v1181_v16 = vor.u32 %v1313_v7, %v1180_v5  ;;  %v868_v25 = vld [vmem:[%s1957_s1 + $0x20] sm:$0xf]  ;;  %v1235_v26 = vld [vmem:[%s1957_s1 + $0x28] sm:$0xf0]  ;;  %v856_v37 = vld [vmem:[%s1957_s1 + $0x8] sm:$0xf] }
  0x3b   :  { %774 = vmatpush.bf16.msrb.mxu3 %v1165_v52  ;;  %v1205_v52 = vor.u32 %v1319_v45, %v1204_v44  ;;  %v964_v27 = vld [vmem:[%s1957_s1 + $0xe0] sm:$0xf]  ;;  %v1259_v29 = vld [vmem:[%s1957_s1 + $0xe8] sm:$0xf0]  ;;  %v1232_v38 = vld [vmem:[%s1957_s1 + $0x10] sm:$0xf0] }
  0x3c   :  { %736 = vmatpush.bf16.msrb.mxu0 %v865_v58  ;;  %v905_v58 = vor.u32 %v1244_v50, %v904_v49  ;;  %v1060_v30 = vld [vmem:[%s1957_s1 + $0x1a0] sm:$0xf]  ;;  %v1283_v31 = vld [vmem:[%s1957_s1 + $0x1a8] sm:$0xf0]  ;;  %v952_v39 = vld [vmem:[%s1957_s1 + $0xc8] sm:$0xf] }
  0x3d   :  { %749 = vmatpush.bf16.msrb.mxu1 %v961_v61  ;;  %v892_v61 = vld [vmem:[%s1957_s1 + $0x50] sm:$0xf]  ;;  %v1156_v32 = vld [vmem:[%s1957_s1 + $0x260] sm:$0xf]  ;;  %v1307_v33 = vld [vmem:[%s1957_s1 + $0x268] sm:$0xf0] }
  0x3e   :  { %762 = vmatpush.bf16.msrb.mxu2 %v1057_v62  ;;  %v1241_v62 = vld [vmem:[%s1957_s1 + $0x58] sm:$0xf0]  ;;  %v1256_v41 = vld [vmem:[%s1957_s1 + $0xd0] sm:$0xf0]  ;;  %v1048_v42 = vld [vmem:[%s1957_s1 + $0x188] sm:$0xf] }
  0x3f   :  { %775 = vmatpush.bf16.msrb.mxu3 %v1153_v3  ;;  %v1084_v3 = vld [vmem:[%s1957_s1 + $0x1d0] sm:$0xf]  ;;  %v893_v8 = vor.u32 %v1241_v62, %v892_v61  ;;  %v1280_v43 = vld [vmem:[%s1957_s1 + $0x190] sm:$0xf0]  ;;  %v1144_v44 = vld [vmem:[%s1957_s1 + $0x248] sm:$0xf] }
  0x40   :  { %737 = vmatpush.bf16.msrb.mxu0 %v853_v11  ;;  %v1085_v10 = vor.u32 %v1289_v4, %v1084_v3  ;;  %v880_v11 = vld [vmem:[%s1957_s1 + $0x38] sm:$0xf]  ;;  %v1304_v45 = vld [vmem:[%s1957_s1 + $0x250] sm:$0xf0]  ;;  %v144_v57 = vld [vmem:[%s1959_s2] sm:$0x7] }
  0x41   :  { %750 = vmatpush.bf16.msrb.mxu1 %v949_v17  ;;  %v1262_v17 = vld [vmem:[%s1957_s1 + $0x100] sm:$0xf0]  ;;  %v1145_v49 = vor.u32 %v1304_v45, %v1144_v44 }
  0x42   :  { %763 = vmatpush.bf16.msrb.mxu2 %v1045_v18  ;;  %v1072_v18 = vld [vmem:[%s1957_s1 + $0x1b8] sm:$0xf] }
  0x43   :  { %776 = vmatpush.bf16.msrb.mxu3 %v1141_v21  ;;  %738 = vmatmul.bf16.vlgmr.msrb.gmra.mxu0 %v1630_v14  ;;  %v1310_v21 = vld [vmem:[%s1957_s1 + $0x280] sm:$0xf0] }
  0x44   :  { %782 = vmatpush.bf16.msra.mxu0 %v941_v22  ;;  %751 = vmatmul.bf16.vlgmr.msrb.gmra.mxu1 %v1632_v15  ;;  %v881_v22 = vor.u32 %v1238_v12, %v880_v11 }
  0x45   :  { %795 = vmatpush.bf16.msra.mxu1 %v1037_v23  ;;  %764 = vmatmul.bf16.vlgmr.msrb.gmra.mxu2 %v1607_v1  ;;  %v977_v23 = vor.u32 %v1262_v17, %v976_v13 }
  0x46   :  { %808 = vmatpush.bf16.msra.mxu2 %v1133_v24  ;;  %777 = vmatmul.bf16.vlgmr.msrb.gmra.mxu3 %v1618_v6  ;;  %v1073_v24 = vor.u32 %v1286_v19, %v1072_v18 }
  0x47   :  { %821 = vmatpush.bf16.msra.mxu3 %v1229_v28  ;;  %v1169_v28 = vor.u32 %v1310_v21, %v1168_v20 }
  0x48   :  { %783 = vmatpush.bf16.msra.mxu0 %v929_v34  ;;  %v869_v34 = vor.u32 %v1235_v26, %v868_v25 }
  0x49   :  { %796 = vmatpush.bf16.msra.mxu1 %v1025_v35  ;;  %v965_v35 = vor.u32 %v1259_v29, %v964_v27 }
  0x4a   :  { %809 = vmatpush.bf16.msra.mxu2 %v1121_v36  ;;  %v1061_v36 = vor.u32 %v1283_v31, %v1060_v30 }
  0x4b   :  { %822 = vmatpush.bf16.msra.mxu3 %v1217_v40  ;;  %v1157_v40 = vor.u32 %v1307_v33, %v1156_v32 }
  0x4c   :  { %784 = vmatpush.bf16.msra.mxu0 %v917_v46  ;;  %v857_v46 = vor.u32 %v1232_v38, %v856_v37 }
  0x4d   :  { %797 = vmatpush.bf16.msra.mxu1 %v1013_v47  ;;  %v953_v47 = vor.u32 %v1256_v41, %v952_v39 }
  0x4e   :  { %810 = vmatpush.bf16.msra.mxu2 %v1109_v48  ;;  %v1049_v48 = vor.u32 %v1280_v43, %v1048_v42 }
  0x4f   :  { %823 = vmatpush.bf16.msra.mxu3 %v1205_v52 }
  0x50   :  { %785 = vmatpush.bf16.msra.mxu0 %v905_v58 }
  0x51   :  { %798 = vmatpush.bf16.msra.mxu1 %v1001_v59  ;;  %v146_v59 = vperm.slane %v144_v57, 0 }
  0x52   :  { %811 = vmatpush.bf16.msra.mxu2 %v1097_v60  ;;  %v147_v60 = vperm.slane %v144_v57, 1 }
  0x53   :  { %824 = vmatpush.bf16.msra.mxu3 %v1193_v0 }
  0x54   :  { %786 = vmatpush.bf16.msra.mxu0 %v893_v8 }
  0x55   :  { %799 = vmatpush.bf16.msra.mxu1 %v989_v9 }
  0x56   :  { %812 = vmatpush.bf16.msra.mxu2 %v1085_v10 }
  0x57   :  { %825 = vmatpush.bf16.msra.mxu3 %v1181_v16  ;;  %v148_v16 = vperm.slane %v144_v57, 2 }
  0x58   :  { %787 = vmatpush.bf16.msra.mxu0 %v881_v22 }
  0x59   :  { %800 = vmatpush.bf16.msra.mxu1 %v977_v23 }
  0x5a   :  { %813 = vmatpush.bf16.msra.mxu2 %v1073_v24 }
  0x5b   :  { %826 = vmatpush.bf16.msra.mxu3 %v1169_v28 }
  0x5c   :  { %788 = vmatpush.bf16.msra.mxu0 %v869_v34 }
  0x5d   :  { %801 = vmatpush.bf16.msra.mxu1 %v965_v35 }
  0x5e   :  { %814 = vmatpush.bf16.msra.mxu2 %v1061_v36 }
  0x5f   :  { %827 = vmatpush.bf16.msra.mxu3 %v1157_v40 }
  0x60   :  { %789 = vmatpush.bf16.msra.mxu0 %v857_v46 }
  0x61   :  { %802 = vmatpush.bf16.msra.mxu1 %v953_v47 }
  0x62   :  { %815 = vmatpush.bf16.msra.mxu2 %v1049_v48 }
  0x63   :  { %828 = vmatpush.bf16.msra.mxu3 %v1145_v49  ;;  %790 = vmatmul.bf16.vlgmr.msra.gmra.mxu0 %v1630_v14 }
  0x64   :  { %803 = vmatmul.bf16.vlgmr.msra.gmra.mxu1 %v1632_v15 }
  0x65   :  { %816 = vmatmul.bf16.vlgmr.msra.gmra.mxu2 %v1607_v1 }
  0x66   :  { %829 = vmatmul.bf16.vlgmr.msra.gmra.mxu3 %v1618_v6 }
  0xa0   :  { %v687_v50 = vpop.f32.mrf.mxu0 }
  0xa1   :  { %v700_v51 = vpop.f32.mrf.mxu1  ;;  %v688_v14 = vadd.f32 %v687_v50, %v146_v59 }
  0xa3   :  { %v701_v15 = vadd.f32 %v700_v51, %v688_v14 }
  0xa8   :  { %v713_v52 = vpop.f32.mrf.mxu2  ;;  %v689_v54 = vpop.f32.mrf.mxu0 }
  0xa9   :  { %v726_v53 = vpop.f32.mrf.mxu3  ;;  %v702_v55 = vpop.f32.mrf.mxu1  ;;  %v714_v6 = vadd.f32 %v713_v52, %v701_v15 }
  0xab   :  { %v727_v2 = vadd.f32 %v726_v53, %v714_v6 }
  0xad   :  { %v834_v9 = vmax.f32 %v727_v2, 0.0 }
  0xb0   :  { %v715_v56 = vpop.f32.mrf.mxu2 }
  0xb1   :  { %v728_v58 = vpop.f32.mrf.mxu3 }
  0xc0   :  { %v739_v61 = vpop.f32.mrf.mxu0 }
  0xc1   :  { %v740_v1 = vadd.f32 %v739_v61, %v147_v60  ;;  %v752_v62 = vpop.f32.mrf.mxu1 }
  0xc3   :  { %v753_v63 = vadd.f32 %v752_v62, %v740_v1 }
  0xc8   :  { %v765_v0 = vpop.f32.mrf.mxu2  ;;  %v741_v7 = vpop.f32.mrf.mxu0 }
  0xc9   :  { %v766_v3 = vadd.f32 %v765_v0, %v753_v63  ;;  %v778_v4 = vpop.f32.mrf.mxu3  ;;  %v754_v8 = vpop.f32.mrf.mxu1 }
  0xcb   :  { %v779_v5 = vadd.f32 %v778_v4, %v766_v3 }
  0xcd   :  { %v835_v10 = vmax.f32 %v779_v5, 0.0 }
  0xcf   :  { %v837_v11 = vpack.c.bf16 %v835_v10, %v834_v9 }
  0xd0   :  { %v767_v12 = vpop.f32.mrf.mxu2 }
  0xd1   :  { %839 = vst [vmem:[%s1960_s3] sm:$0xff] %v837_v11  ;;  %v780_v13 = vpop.f32.mrf.mxu3 }
  0xe0   :  { %v791_v17 = vpop.f32.mrf.mxu0 }
  0xe1   :  { %v792_v18 = vadd.f32 %v791_v17, %v148_v16  ;;  %v804_v19 = vpop.f32.mrf.mxu1 }
  0xe3   :  { %v805_v20 = vadd.f32 %v804_v19, %v792_v18 }
  0xe8   :  { %v817_v21 = vpop.f32.mrf.mxu2  ;;  %v793_v24 = vpop.f32.mrf.mxu0 }
  0xe9   :  { %v818_v22 = vadd.f32 %v817_v21, %v805_v20  ;;  %v830_v23 = vpop.f32.mrf.mxu3  ;;  %v806_v25 = vpop.f32.mrf.mxu1 }
  0xeb   :  { %v831_v26 = vadd.f32 %v830_v23, %v818_v22 }
  0xed   :  { %v836_v27 = vmax.f32 %v831_v26, 0.0 }
  0xef   :  { %v838_v28 = vpack.c.bf16 %v836_v27, %v836_v27 }
  0xf0   :  { %v819_v29 = vpop.f32.mrf.mxu2 }
  0xf1   :  { %841 = vst.msk [vmem:[%s1960_s3 + $0x8] sm:$0xf] %vm840_vm0, %v838_v28  ;;  %v832_v30 = vpop.f32.mrf.mxu3 }

// kernel: pvt_dense_decoder_forward.21
= control target key start
LH: loop header
LB: loop body
LE: loop exit
PB: predicated region body
PF: predicated region fallthrough
CT: control target
= control target key end

     0   :  { %s667_s18 = smov 0   ;;  %s748_s0 = inlined_call_operand.vmem [shape: bf16[2,16,128], index: 0, kind: input, shape index: {}]   ;;  %s749_s1 = inlined_call_operand.vmem [shape: bf16[2,64,64], index: 1, kind: input, shape index: {}]   ;;  %s750_s2 = inlined_call_operand.vmem [shape: bf16[128,64], index: 2, kind: input, shape index: {}]   ;;  %s751_s3 = inlined_call_operand.vmem [shape: f32[1,64], index: 3, kind: input, shape index: {}]   ;;  %s752_s4 = inlined_call_operand.vmem [shape: bf16[64,16], index: 4, kind: input, shape index: {}]   ;;  %s753_s5 = inlined_call_operand.vmem [shape: bf16[2,64,64], index: 5, kind: output, shape index: {}]  }
   0x1 LB: > { %s515_s19 = sadd.s32 4294967295, %s635_s18   ;;  %p519_p0 = scmp.ge.s32.totalorder %s635_s18, 1  ;;  %s635_s18 = sphi %s667_s18, %s15_s18  }
   0x2   : > { %p197_p1 = scmp.lt.s32.totalorder %s635_s18, 3 }
   0x4   : > { %p198_p2 = pnand %p519_p0, %p197_p1 }
   0x5   : > { %p230_p3 = scmp.lt.s32.totalorder (!%p198_p2), %s515_s19, 1 }
   0x6   : > { %201 = sbr.rel (%p198_p2) target bundleno = 347 (0x15b), region = 40 }
   0xb   : > { %v595_v0 = vld [vmem:[%s750_s2 + $0x38] sm:$0xff]  ;;  %v594_v1 = vld [vmem:[%s750_s2 + $0x30] sm:$0xff]  ;;  %v593_v2 = vld [vmem:[%s750_s2 + $0x28] sm:$0xff]  ;;  %s755_s19 = smov (!%p230_p3, %s515_s19), 1  ;;  %vm381_vm0 = vcmask 130048   ;;  %vm439_vm1 = vcmask 519168  }
   0xc   : > { %322 = vmatpush.bf16.msra.mxu0 %v595_v0  ;;  %v592_v3 = vld [vmem:[%s750_s2 + $0x20] sm:$0xff]  ;;  %v591_v4 = vld [vmem:[%s750_s2 + $0x18] sm:$0xff]  ;;  %v590_v5 = vld [vmem:[%s750_s2 + $0x10] sm:$0xff]  ;;  %s584_s9 = sshll.u32 %s755_s19, 3  ;;  %s585_s27 = sshll.u32 %s755_s19, 5 }
   0xd   : > { %v589_v6 = vld [vmem:[%s750_s2 + $0x8] sm:$0xff]  ;;  %v588_v7 = vld [vmem:[%s750_s2] sm:$0xff]  ;;  %s234_s14 = scalar_lea.vmem %s748_s0, %s584_s9  ;;  %v598_v16 = vld [vmem:[%s752_s4 + $0x10] sm:$0xff]  ;;  %s239_s30 = scalar_lea.vmem %s749_s1, %s585_s27 }
   0xe   : > { %v587_v8 = vld [vmem:[%s234_s14] sm:$0xff]  ;;  %v597_v17 = vld [vmem:[%s752_s4 + $0x8] sm:$0xff]  ;;  %v599_v18 = vld [vmem:[%s752_s4 + $0x18] sm:$0xff]  ;;  %s727_s8 = scalar_lea.vmem %s753_s5, %s585_s27 }
   0xf   : > { %v628_v10 = vld [vmem:[%s751_s3] ss:$0 sm:$0xff]  ;;  %v617_v22 = vld [vmem:[%s239_s30 + $0x10] sm:$0xff]   ;;  %v616_v33 = vld [vmem:[%s239_s30 + $0x8] sm:$0xff]  }
  0x10   : > { %323 = vmatpush.bf16.msra.mxu0 %v594_v1  ;;  %v596_v15 = vld [vmem:[%s752_s4] sm:$0xff]  ;;  %v610_v25 = vunpack.c.l.bf16 %v617_v22  ;;  %v611_v36 = vunpack.c.h.bf16 %v617_v22  ;;  %v606_v38 = vunpack.c.l.bf16 %v616_v33  ;;  %v618_v42 = vld [vmem:[%s239_s30 + $0x18] sm:$0xff]   ;;  %v607_v49 = vunpack.c.h.bf16 %v616_v33 }
  0x11   : > { %v601_v19 = vld [vmem:[%s239_s30] sm:$0xff]   ;;  %v614_v47 = vunpack.c.l.bf16 %v618_v42  ;;  %v615_v57 = vunpack.c.h.bf16 %v618_v42 }
  0x12   : > { %v602_v20 = vunpack.c.l.bf16 %v601_v19  ;;  %v603_v27 = vunpack.c.h.bf16 %v601_v19 }
  0x14   : > { %324 = vmatpush.bf16.msra.mxu0 %v593_v2 }
  0x18   : > { %325 = vmatpush.bf16.msra.mxu0 %v592_v3 }
  0x1c   : > { %326 = vmatpush.bf16.msra.mxu0 %v591_v4 }
  0x20   : > { %327 = vmatpush.bf16.msra.mxu0 %v590_v5 }
  0x24   : > { %328 = vmatpush.bf16.msra.mxu0 %v589_v6 }
  0x28   : > { %329 = vmatpush.bf16.msra.mxu0 %v588_v7 }
  0x2b   : > { %330 = vmatmul.bf16.vlgmr.msra.gmra.mxu0 %v587_v8 }
  0xa8   : > { %v331_v9 = vpop.f32.mrf.mxu0 }
  0xa9   : > { %v332_v12 = vadd.f32 %v628_v10, %v331_v9 }
  0xb0   : > { %v333_v11 = vpop.f32.mrf.mxu0 }
  0xb1   : > { %v334_v13 = vadd.f32 %v628_v10, %v333_v11 }
  0xb3   : > { %v344_v14 = vpack.c.bf16 %v334_v13, %v332_v12 }
  0xb5   : > { %401 = vmatpush.bf16.msra.mxu1 %v344_v14  ;;  %619 = vmatpush.bf16.msra.mxu2 %v344_v14 }
  0xb8   : > { %578 = vmatmul.msk.bf16.vlgmr.msra.gmra.mxu1 %vm381_vm0, %v596_v15  ;;  %580 = vmatmul.msk.bf16.vlgmr.msra.gmra.mxu2 %vm381_vm0, %v598_v16 }
  0xc8   : > { %579 = vmatmul.msk.bf16.gmra.mxu1 %vm381_vm0, %v597_v17  ;;  %581 = vmatmul.msk.bf16.gmra.mxu2 %vm381_vm0, %v599_v18 }
 0x135   : > { %v403_v21 = vpop.f32.mrf.mxu1 }
 0x136   : > { %v404_v23 = vadd.f32 %v602_v20, %v403_v21 }
 0x138   : > { %v423_v24 = vmax.f32 %v404_v23, 0.0 }
 0x13a   : > { %v431_v26 = vpack.c.bf16 %v423_v24, %v423_v24 }
 0x13b   : > { %v413_v28 = vpop.f32.mrf.mxu2 }
 0x13c   : > { %440 = vst.msk [vmem:[%s727_s8] sm:$0xf] %vm439_vm1, %v431_v26  ;;  %v414_v29 = vadd.f32 %v610_v25, %v413_v28 }
 0x13d   : > { %v405_v30 = vpop.f32.mrf.mxu1 }
 0x13e   : > { %v427_v31 = vmax.f32 %v414_v29, 0.0  ;;  %v406_v32 = vadd.f32 %v603_v27, %v405_v30 }
 0x140   : > { %v435_v34 = vpack.c.bf16 %v427_v31, %v427_v31  ;;  %v424_v35 = vmax.f32 %v406_v32, 0.0 }
 0x142   : > { %444 = vst.msk [vmem:[%s727_s8 + $0x10] sm:$0xf] %vm439_vm1, %v435_v34  ;;  %v432_v37 = vpack.c.bf16 %v424_v35, %v424_v35 }
 0x143   : > { %v415_v39 = vpop.f32.mrf.mxu2 }
 0x144   : > { %441 = vst.msk [vmem:[%s727_s8 + $0x4] sm:$0xf] %vm439_vm1, %v432_v37  ;;  %v416_v40 = vadd.f32 %v611_v36, %v415_v39 }
 0x145   : > { %v408_v41 = vpop.f32.mrf.mxu1 }
 0x146   : > { %v428_v43 = vmax.f32 %v416_v40, 0.0  ;;  %v409_v44 = vadd.f32 %v606_v38, %v408_v41 }
 0x148   : > { %v436_v45 = vpack.c.bf16 %v428_v43, %v428_v43  ;;  %v425_v46 = vmax.f32 %v409_v44, 0.0 }
 0x14a   : > { %445 = vst.msk [vmem:[%s727_s8 + $0x14] sm:$0xf] %vm439_vm1, %v436_v45  ;;  %v433_v48 = vpack.c.bf16 %v425_v46, %v425_v46 }
 0x14b   : > { %v418_v50 = vpop.f32.mrf.mxu2 }
 0x14c   : > { %442 = vst.msk [vmem:[%s727_s8 + $0x8] sm:$0xf] %vm439_vm1, %v433_v48  ;;  %v419_v51 = vadd.f32 %v614_v47, %v418_v50 }
 0x14d   : > { %v410_v52 = vpop.f32.mrf.mxu1 }
 0x14e   : > { %v429_v53 = vmax.f32 %v419_v51, 0.0  ;;  %v411_v54 = vadd.f32 %v607_v49, %v410_v52 }
 0x150   : > { %v437_v55 = vpack.c.bf16 %v429_v53, %v429_v53  ;;  %v426_v56 = vmax.f32 %v411_v54, 0.0 }
 0x152   : > { %446 = vst.msk [vmem:[%s727_s8 + $0x18] sm:$0xf] %vm439_vm1, %v437_v55  ;;  %v434_v58 = vpack.c.bf16 %v426_v56, %v426_v56 }
 0x153   : > { %v420_v59 = vpop.f32.mrf.mxu2 }
 0x154   : > { %443 = vst.msk [vmem:[%s727_s8 + $0xc] sm:$0xf] %vm439_vm1, %v434_v58  ;;  %v421_v60 = vadd.f32 %v615_v57, %v420_v59 }
 0x156   : > { %v430_v61 = vmax.f32 %v421_v60, 0.0 }
 0x158   : > { %v438_v62 = vpack.c.bf16 %v430_v61, %v430_v61 }
 0x15a   : > { %447 = vst.msk [vmem:[%s727_s8 + $0x1c] sm:$0xf] %vm439_vm1, %v438_v62 }
 0x15b PF: > { %s15_s18 = sadd.s32 1, %s635_s18  }
 0x15c   : > { %p12_p4 = scmp.ge.s32.totalorder %s15_s18, 4  }
 0x15e   :  { %14 = sbr.rel (!%p12_p4) target bundleno = 1 (0x1), region = 73 }

// kernel: pvt_dense_decoder_forward.20
= control target key start
LH: loop header
LB: loop body
LE: loop exit
PB: predicated region body
PF: predicated region fallthrough
CT: control target
= control target key end

     0   :  { %s745_s18 = smov 0   ;;  %s835_s0 = inlined_call_operand.vmem [shape: bf16[2,4,320], index: 0, kind: input, shape index: {}]   ;;  %s836_s1 = inlined_call_operand.vmem [shape: bf16[2,16,128], index: 1, kind: input, shape index: {}]   ;;  %s837_s2 = inlined_call_operand.vmem [shape: bf16[320,128], index: 2, kind: input, shape index: {}]   ;;  %s838_s3 = inlined_call_operand.vmem [shape: f32[1,128], index: 3, kind: input, shape index: {}]   ;;  %s839_s4 = inlined_call_operand.vmem [shape: bf16[16,4], index: 4, kind: input, shape index: {}]   ;;  %s840_s5 = inlined_call_operand.vmem [shape: bf16[2,16,128], index: 5, kind: output, shape index: {}]  }
   0x1 LB: > { %s567_s19 = sadd.s32 4294967295, %s713_s18   ;;  %p571_p0 = scmp.ge.s32.totalorder %s713_s18, 1  ;;  %s713_s18 = sphi %s745_s18, %s15_s18  }
   0x2   : > { %p197_p1 = scmp.lt.s32.totalorder %s713_s18, 3 }
   0x4   : > { %p198_p2 = pnand %p571_p0, %p197_p1 }
   0x5   : > { %p230_p3 = scmp.lt.s32.totalorder (!%p198_p2), %s567_s19, 1 }
   0x6   : > { %201 = sbr.rel (%p198_p2) target bundleno = 328 (0x148), region = 40 }
   0xb   : > { %v674_v0 = vld [vmem:[%s837_s2 + $0x38] sm:$0xff]  ;;  %v673_v3 = vld [vmem:[%s837_s2 + $0x30] sm:$0xff]  ;;  %s842_s19 = smov (!%p230_p3, %s567_s19), 1  ;;  %v672_v6 = vld [vmem:[%s837_s2 + $0x28] sm:$0xff]  ;;  %vm418_vm0 = vcmask 523264   ;;  %vm476_vm1 = vcmask 1041408  }
   0xc   : > { %v682_v1 = vld [vmem:[%s837_s2 + $0x78] sm:$0xff]  ;;  %421 = vmatpush.bf16.msra.mxu0 %v674_v0  ;;  %v681_v4 = vld [vmem:[%s837_s2 + $0x70] sm:$0xff]  ;;  %s697_s7 = smul.u32 6, %s842_s19  ;;  %v680_v7 = vld [vmem:[%s837_s2 + $0x68] sm:$0xff]  ;;  %vm472_vm2 = vcmask 31744   ;;  %s665_s22 = sshll.u32 %s842_s19, 3 }
   0xd   : > { %v686_v2 = vld [vmem:[%s837_s2 + $0x98] sm:$0xff]  ;;  %434 = vmatpush.bf16.msra.mxu1 %v682_v1  ;;  %v685_v5 = vld [vmem:[%s837_s2 + $0x90] sm:$0xff]  ;;  %v684_v8 = vld [vmem:[%s837_s2 + $0x88] sm:$0xff]  ;;  %s239_s25 = scalar_lea.vmem %s836_s1, %s665_s22  ;;  %s244_s28 = scalar_lea.vmem %s840_s5, %s665_s22 }
   0xe   : > { %451 = vmatpush.bf16.msra.mxu2 %v686_v2  ;;  %s234_s14 = scalar_lea.vmem %s835_s0, %s697_s7  ;;  %v671_v10 = vld [vmem:[%s837_s2 + $0x20] sm:$0xff]  ;;  %v670_v13 = vld [vmem:[%s837_s2 + $0x18] sm:$0xff]  ;;  %v669_v16 = vld [vmem:[%s837_s2 + $0x10] sm:$0xff] }
   0xf   : > { %v246_v9 = vld [vmem:[%s234_s14] sm:$0x3f]  ;;  %v678_v14 = vld [vmem:[%s837_s2 + $0x58] sm:$0xff]  ;;  %v677_v17 = vld [vmem:[%s837_s2 + $0x50] sm:$0xff] }
  0x10   : > { %422 = vmatpush.bf16.msra.mxu0 %v673_v3  ;;  %292 = vst [vmem:[#allocation1] ss:$4 sm:$0xff] %v246_v9  ;;  %v679_v11 = vld [vmem:[%s837_s2 + $0x60] sm:$0xff]  ;;  %v668_v18 = vld [vmem:[%s837_s2 + $0x8] sm:$0xff] }
  0x11   : > { %435 = vmatpush.bf16.msra.mxu1 %v681_v4  ;;  %v683_v12 = vld [vmem:[%s837_s2 + $0x80] sm:$0xff]  ;;  %v676_v19 = vld [vmem:[%s837_s2 + $0x48] sm:$0xff] }
  0x12   : > { %452 = vmatpush.bf16.msra.mxu2 %v685_v5  ;;  %v667_v20 = vld [vmem:[%s837_s2] sm:$0xff] }
  0x13   : > { %v675_v21 = vld [vmem:[%s837_s2 + $0x40] sm:$0xff] }
  0x14   : > { %423 = vmatpush.bf16.msra.mxu0 %v672_v6  ;;  %v706_v25 = vld [vmem:[%s838_s3] ss:$0 sm:$0xff] }
  0x15   : > { %436 = vmatpush.bf16.msra.mxu1 %v680_v7  ;;  %v687_v36 = vld [vmem:[%s839_s4] sm:$0xff] }
  0x16   : > { %453 = vmatpush.bf16.msra.mxu2 %v684_v8  ;;  %v689_v37 = vld [vmem:[%s239_s25] sm:$0xff]  }
  0x17   : > { %v295_v15 = vld.sshfl [vmem:[#allocation1 + $0x10] sm:$0xff pattern:$0x73625140]  ;;  %v293_v22 = vld.sshfl [vmem:[#allocation1] sm:$0xff pattern:$0x73625140]  ;;  %v690_v39 = vunpack.c.l.bf16 %v689_v37  ;;  %v691_v40 = vunpack.c.h.bf16 %v689_v37 }
  0x18   : > { %424 = vmatpush.bf16.msra.mxu0 %v671_v10  ;;  %v294_v23 = vld.sshfl [vmem:[#allocation1 + $0x8] sm:$0xff pattern:$0x73625140] }
  0x19   : > { %437 = vmatpush.bf16.msra.mxu1 %v679_v11 }
  0x1a   : > { %454 = vmatpush.bf16.msra.mxu2 %v683_v12 }
  0x1c   : > { %425 = vmatpush.bf16.msra.mxu0 %v670_v13 }
  0x1d   : > { %438 = vmatpush.bf16.msra.mxu1 %v678_v14  ;;  %657 = vmatmul.msk.bf16.vlgmr.msra.gmra.mxu2 %vm418_vm0, %v295_v15 }
  0x20   : > { %426 = vmatpush.bf16.msra.mxu0 %v669_v16 }
  0x21   : > { %439 = vmatpush.bf16.msra.mxu1 %v677_v17 }
  0x24   : > { %427 = vmatpush.bf16.msra.mxu0 %v668_v18 }
  0x25   : > { %440 = vmatpush.bf16.msra.mxu1 %v676_v19 }
  0x28   : > { %428 = vmatpush.bf16.msra.mxu0 %v667_v20 }
  0x29   : > { %441 = vmatpush.bf16.msra.mxu1 %v675_v21 }
  0x2b   : > { %429 = vmatmul.bf16.vlgmr.msra.gmra.mxu0 %v293_v22 }
  0x2c   : > { %442 = vmatmul.bf16.vlgmr.msra.gmra.mxu1 %v294_v23 }
  0xa0   : > { %v456_v24 = vpop.f32.mrf.mxu2 }
  0xa8   : > { %v430_v26 = vpop.f32.mrf.mxu0  ;;  %v458_v29 = vpop.f32.mrf.mxu2 }
  0xa9   : > { %v443_v27 = vpop.f32.mrf.mxu1  ;;  %v431_v28 = vadd.f32 %v706_v25, %v430_v26 }
  0xab   : > { %v444_v30 = vadd.f32 %v443_v27, %v431_v28 }
  0xad   : > { %v457_v31 = vadd.f32 %v456_v24, %v444_v30 }
  0xaf   : > { %v462_v32 = vpack.c.bf16 %v457_v31, %v457_v31 }
  0xb0   : > { %v432_v33 = vpop.f32.mrf.mxu0 }
  0xb1   : > { %v445_v34 = vpop.f32.mrf.mxu1  ;;  %v478_v35 = vsel %vm476_vm1, %v462_v32, 0 }
  0xb2   : > { %487 = vmatpush.bf16.msra.mxu3 %v478_v35 }
  0xb5   : > { %662 = vmatmul.msk.bf16.vlgmr.msra.gmra.mxu3 %vm472_vm2, %v687_v36 }
 0x138   : > { %v489_v38 = vpop.f32.mrf.mxu3 }
 0x139   : > { %v490_v41 = vadd.f32 %v690_v39, %v489_v38 }
 0x13b   : > { %v494_v44 = vmax.f32 %v490_v41, 0.0 }
 0x140   : > { %v491_v42 = vpop.f32.mrf.mxu3 }
 0x141   : > { %v492_v43 = vadd.f32 %v691_v40, %v491_v42 }
 0x143   : > { %v495_v45 = vmax.f32 %v492_v43, 0.0 }
 0x145   : > { %v695_v46 = vpack.c.bf16 %v495_v45, %v494_v44 }
 0x147   : > { %696 = vst [vmem:[%s244_s28] sm:$0xff] %v695_v46  }
 0x148 PF: > { %s15_s18 = sadd.s32 1, %s713_s18  }
 0x149   : > { %p12_p4 = scmp.ge.s32.totalorder %s15_s18, 4  }
 0x14b   :  { %14 = sbr.rel (!%p12_p4) target bundleno = 1 (0x1), region = 73 }

// kernel: pvt_dense_decoder_forward.19
= control target key start
LH: loop header
LB: loop body
LE: loop exit
PB: predicated region body
PF: predicated region fallthrough
CT: control target
= control target key end

     0   :  { %s1766_s18 = smov 0   ;;  %s2403_s0 = inlined_call_operand.vmem [shape: bf16[2,1,512], index: 0, kind: input, shape index: {}]   ;;  %s2404_s1 = inlined_call_operand.vmem [shape: bf16[2,4,320], index: 1, kind: input, shape index: {}]   ;;  %s2405_s2 = inlined_call_operand.vmem [shape: bf16[512,320], index: 2, kind: input, shape index: {}]   ;;  %s2406_s3 = inlined_call_operand.vmem [shape: f32[1,320], index: 3, kind: input, shape index: {}]   ;;  %s2407_s4 = inlined_call_operand.vmem [shape: bf16[4,1], index: 4, kind: input, shape index: {}]   ;;  %s2408_s5 = inlined_call_operand.vmem [shape: bf16[2,4,320], index: 5, kind: output, shape index: {}]  }
   0x1 LB: > { %s1224_s19 = sadd.s32 4294967295, %s1733_s18   ;;  %p1228_p0 = scmp.ge.s32.totalorder %s1733_s18, 1  ;;  %s1733_s18 = sphi %s1766_s18, %s15_s18  }
   0x2   : > { %p196_p1 = scmp.lt.s32.totalorder %s1733_s18, 3 }
   0x4   : > { %p197_p2 = pnand %p1228_p0, %p196_p1 }
   0x5   : > { %p228_p3 = scmp.lt.s32.totalorder (!%p197_p2), %s1224_s19, 1 }
   0x6   : > { %200 = sbr.rel (%p197_p2) target bundleno = 397 (0x18d), region = 40 }
   0xb   : > { %v1318_v0 = vld [vmem:[%s2405_s2 + $0xa8] sm:$0xf]  ;;  %v1643_v1 = vld [vmem:[%s2405_s2 + $0xb0] sm:$0xf0]  ;;  %v1306_v11 = vld [vmem:[%s2405_s2 + $0x90] sm:$0xf] }
   0xc   : > { %v1414_v2 = vld [vmem:[%s2405_s2 + $0x168] sm:$0xf]  ;;  %v1319_v3 = vor.u32 %v1643_v1, %v1318_v0  ;;  %v1667_v4 = vld [vmem:[%s2405_s2 + $0x170] sm:$0xf0]  ;;  %v1640_v13 = vld [vmem:[%s2405_s2 + $0x98] sm:$0xf0] }
   0xd   : > { %v1510_v5 = vld [vmem:[%s2405_s2 + $0x228] sm:$0xf]  ;;  %v1691_v6 = vld [vmem:[%s2405_s2 + $0x230] sm:$0xf0]  ;;  %v1415_v7 = vor.u32 %v1667_v4, %v1414_v2  ;;  %v1402_v14 = vld [vmem:[%s2405_s2 + $0x150] sm:$0xf]  ;;  %v1307_v16 = vor.u32 %v1640_v13, %v1306_v11 }
   0xe   : > { %v1511_v8 = vor.u32 %v1691_v6, %v1510_v5  ;;  %v1606_v9 = vld [vmem:[%s2405_s2 + $0x2e8] sm:$0xf]  ;;  %v1715_v10 = vld [vmem:[%s2405_s2 + $0x2f0] sm:$0xf0]  ;;  %902 = vmatpush.bf16.msra.mxu0 %v1319_v3  ;;  %v1664_v15 = vld [vmem:[%s2405_s2 + $0x158] sm:$0xf0] }
   0xf   : > { %v1607_v12 = vor.u32 %v1715_v10, %v1606_v9  ;;  %915 = vmatpush.bf16.msra.mxu1 %v1415_v7  ;;  %v1403_v17 = vor.u32 %v1664_v15, %v1402_v14  ;;  %v1498_v18 = vld [vmem:[%s2405_s2 + $0x210] sm:$0xf]  ;;  %v1688_v19 = vld [vmem:[%s2405_s2 + $0x218] sm:$0xf0]  ;;  %v1294_v23 = vld [vmem:[%s2405_s2 + $0x78] sm:$0xf] }
  0x10   : > { %928 = vmatpush.bf16.msra.mxu2 %v1511_v8  ;;  %v1594_v20 = vld [vmem:[%s2405_s2 + $0x2d0] sm:$0xf]  ;;  %v1499_v21 = vor.u32 %v1688_v19, %v1498_v18  ;;  %v1712_v22 = vld [vmem:[%s2405_s2 + $0x2d8] sm:$0xf0]  ;;  %v1637_v24 = vld [vmem:[%s2405_s2 + $0x80] sm:$0xf0] }
  0x11   : > { %941 = vmatpush.bf16.msra.mxu3 %v1607_v12  ;;  %v1595_v25 = vor.u32 %v1712_v22, %v1594_v20  ;;  %v1390_v26 = vld [vmem:[%s2405_s2 + $0x138] sm:$0xf]  ;;  %v1661_v27 = vld [vmem:[%s2405_s2 + $0x140] sm:$0xf0]  ;;  %v1295_v29 = vor.u32 %v1637_v24, %v1294_v23  ;;  %v1282_v35 = vld [vmem:[%s2405_s2 + $0x60] sm:$0xf] }
  0x12   : > { %v1486_v28 = vld [vmem:[%s2405_s2 + $0x1f8] sm:$0xf]  ;;  %903 = vmatpush.bf16.msra.mxu0 %v1307_v16  ;;  %v1685_v30 = vld [vmem:[%s2405_s2 + $0x200] sm:$0xf0]  ;;  %v1391_v33 = vor.u32 %v1661_v27, %v1390_v26  ;;  %v1634_v36 = vld [vmem:[%s2405_s2 + $0x68] sm:$0xf0] }
  0x13   : > { %v1582_v31 = vld [vmem:[%s2405_s2 + $0x2b8] sm:$0xf]  ;;  %v1709_v32 = vld [vmem:[%s2405_s2 + $0x2c0] sm:$0xf0]  ;;  %916 = vmatpush.bf16.msra.mxu1 %v1403_v17  ;;  %v1487_v34 = vor.u32 %v1685_v30, %v1486_v28  ;;  %v1378_v37 = vld [vmem:[%s2405_s2 + $0x120] sm:$0xf]  ;;  %v1283_v44 = vor.u32 %v1634_v36, %v1282_v35 }
  0x14   : > { %929 = vmatpush.bf16.msra.mxu2 %v1499_v21  ;;  %v1583_v38 = vor.u32 %v1709_v32, %v1582_v31  ;;  %v1658_v39 = vld [vmem:[%s2405_s2 + $0x128] sm:$0xf0]  ;;  %v1474_v40 = vld [vmem:[%s2405_s2 + $0x1e0] sm:$0xf]  ;;  %v1270_v47 = vld [vmem:[%s2405_s2 + $0x48] sm:$0xf] }
  0x15   : > { %942 = vmatpush.bf16.msra.mxu3 %v1595_v25  ;;  %v1682_v41 = vld [vmem:[%s2405_s2 + $0x1e8] sm:$0xf0]  ;;  %v1570_v42 = vld [vmem:[%s2405_s2 + $0x2a0] sm:$0xf]  ;;  %v1379_v45 = vor.u32 %v1658_v39, %v1378_v37  ;;  %v1631_v48 = vld [vmem:[%s2405_s2 + $0x50] sm:$0xf0] }
  0x16   : > { %v1706_v43 = vld [vmem:[%s2405_s2 + $0x2a8] sm:$0xf0]  ;;  %904 = vmatpush.bf16.msra.mxu0 %v1295_v29  ;;  %v1475_v46 = vor.u32 %v1682_v41, %v1474_v40  ;;  %v1366_v49 = vld [vmem:[%s2405_s2 + $0x108] sm:$0xf]  ;;  %v1655_v51 = vld [vmem:[%s2405_s2 + $0x110] sm:$0xf0]  ;;  %v1271_v56 = vor.u32 %v1631_v48, %v1270_v47 }
  0x17   : > { %917 = vmatpush.bf16.msra.mxu1 %v1391_v33  ;;  %v1571_v50 = vor.u32 %v1706_v43, %v1570_v42  ;;  %v1462_v52 = vld [vmem:[%s2405_s2 + $0x1c8] sm:$0xf]  ;;  %v1679_v53 = vld [vmem:[%s2405_s2 + $0x1d0] sm:$0xf0]  ;;  %v1367_v57 = vor.u32 %v1655_v51, %v1366_v49  ;;  %v1258_v59 = vld [vmem:[%s2405_s2 + $0x30] sm:$0xf] }
  0x18   : > { %930 = vmatpush.bf16.msra.mxu2 %v1487_v34  ;;  %v1558_v54 = vld [vmem:[%s2405_s2 + $0x288] sm:$0xf]  ;;  %v1703_v55 = vld [vmem:[%s2405_s2 + $0x290] sm:$0xf0]  ;;  %v1463_v58 = vor.u32 %v1679_v53, %v1462_v52  ;;  %v1628_v60 = vld [vmem:[%s2405_s2 + $0x38] sm:$0xf0] }
  0x19   : > { %943 = vmatpush.bf16.msra.mxu3 %v1583_v38  ;;  %v1354_v61 = vld [vmem:[%s2405_s2 + $0xf0] sm:$0xf]  ;;  %v1559_v62 = vor.u32 %v1703_v55, %v1558_v54  ;;  %v1652_v63 = vld [vmem:[%s2405_s2 + $0xf8] sm:$0xf0]  ;;  %v1259_v4 = vor.u32 %v1628_v60, %v1258_v59  ;;  %v1246_v7 = vld [vmem:[%s2405_s2 + $0x18] sm:$0xf] }
  0x1a   : > { %905 = vmatpush.bf16.msra.mxu0 %v1283_v44  ;;  %v1450_v0 = vld [vmem:[%s2405_s2 + $0x1b0] sm:$0xf]  ;;  %v1676_v1 = vld [vmem:[%s2405_s2 + $0x1b8] sm:$0xf0]  ;;  %v1355_v5 = vor.u32 %v1652_v63, %v1354_v61  ;;  %v1625_v8 = vld [vmem:[%s2405_s2 + $0x20] sm:$0xf0] }
  0x1b   : > { %918 = vmatpush.bf16.msra.mxu1 %v1379_v45  ;;  %v1546_v2 = vld [vmem:[%s2405_s2 + $0x270] sm:$0xf]  ;;  %v1700_v3 = vld [vmem:[%s2405_s2 + $0x278] sm:$0xf0]  ;;  %v1451_v6 = vor.u32 %v1676_v1, %v1450_v0  ;;  %v1342_v9 = vld [vmem:[%s2405_s2 + $0xd8] sm:$0xf]  ;;  %v1247_v16 = vor.u32 %v1625_v8, %v1246_v7 }
  0x1c   : > { %931 = vmatpush.bf16.msra.mxu2 %v1475_v46  ;;  %v1547_v10 = vor.u32 %v1700_v3, %v1546_v2  ;;  %v1649_v11 = vld [vmem:[%s2405_s2 + $0xe0] sm:$0xf0]  ;;  %v1438_v12 = vld [vmem:[%s2405_s2 + $0x198] sm:$0xf]  ;;  %v1234_v17 = vld [vmem:[%s2405_s2] sm:$0xf] }
  0x1d   : > { %944 = vmatpush.bf16.msra.mxu3 %v1571_v50  ;;  %v1673_v13 = vld [vmem:[%s2405_s2 + $0x1a0] sm:$0xf0]  ;;  %v1534_v14 = vld [vmem:[%s2405_s2 + $0x258] sm:$0xf]  ;;  %v1622_v18 = vld [vmem:[%s2405_s2 + $0x8] sm:$0xf0]  ;;  %v1343_v19 = vor.u32 %v1649_v11, %v1342_v9 }
  0x1e   : > { %906 = vmatpush.bf16.msra.mxu0 %v1271_v56  ;;  %v1697_v15 = vld [vmem:[%s2405_s2 + $0x260] sm:$0xf0]  ;;  %v1439_v20 = vor.u32 %v1673_v13, %v1438_v12  ;;  %v1330_v21 = vld [vmem:[%s2405_s2 + $0xc0] sm:$0xf]  ;;  %v1646_v22 = vld [vmem:[%s2405_s2 + $0xc8] sm:$0xf0]  ;;  %v1235_v31 = vor.u32 %v1622_v18, %v1234_v17 }
  0x1f   : > { %919 = vmatpush.bf16.msra.mxu1 %v1367_v57  ;;  %v1426_v23 = vld [vmem:[%s2405_s2 + $0x180] sm:$0xf]  ;;  %v1535_v24 = vor.u32 %v1697_v15, %v1534_v14  ;;  %v1670_v25 = vld [vmem:[%s2405_s2 + $0x188] sm:$0xf0]  ;;  %v1320_v29 = vld [vmem:[%s2405_s2 + $0xb4] sm:$0xf0]  ;;  %v1331_v35 = vor.u32 %v1646_v22, %v1330_v21 }
  0x20   : > { %932 = vmatpush.bf16.msra.mxu2 %v1463_v58  ;;  %v1522_v26 = vld [vmem:[%s2405_s2 + $0x240] sm:$0xf]  ;;  %v1694_v27 = vld [vmem:[%s2405_s2 + $0x248] sm:$0xf0]  ;;  %v1416_v32 = vld [vmem:[%s2405_s2 + $0x174] sm:$0xf0]  ;;  %v1427_v36 = vor.u32 %v1670_v25, %v1426_v23 }
  0x21   : > { %945 = vmatpush.bf16.msra.mxu3 %v1559_v62  ;;  %v1642_v28 = vld [vmem:[%s2405_s2 + $0xac] sm:$0xf]  ;;  %v1512_v34 = vld [vmem:[%s2405_s2 + $0x234] sm:$0xf0]  ;;  %v1523_v39 = vor.u32 %v1694_v27, %v1522_v26  ;;  %v1639_v43 = vld [vmem:[%s2405_s2 + $0x94] sm:$0xf] }
  0x22   : > { %907 = vmatpush.bf16.msra.mxu0 %v1259_v4  ;;  %v1666_v30 = vld [vmem:[%s2405_s2 + $0x16c] sm:$0xf]  ;;  %v1608_v38 = vld [vmem:[%s2405_s2 + $0x2f4] sm:$0xf0]  ;;  %v1323_v40 = vor.u32 %v1642_v28, %v1320_v29  ;;  %v1308_v44 = vld [vmem:[%s2405_s2 + $0x9c] sm:$0xf0] }
  0x23   : > { %920 = vmatpush.bf16.msra.mxu1 %v1355_v5  ;;  %v1690_v33 = vld [vmem:[%s2405_s2 + $0x22c] sm:$0xf]  ;;  %v1419_v41 = vor.u32 %v1666_v30, %v1416_v32  ;;  %v1663_v45 = vld [vmem:[%s2405_s2 + $0x154] sm:$0xf]  ;;  %v1404_v47 = vld [vmem:[%s2405_s2 + $0x15c] sm:$0xf0]  ;;  %v1311_v52 = vor.u32 %v1639_v43, %v1308_v44 }
  0x24   : > { %933 = vmatpush.bf16.msra.mxu2 %v1451_v6  ;;  %v1714_v37 = vld [vmem:[%s2405_s2 + $0x2ec] sm:$0xf]  ;;  %v1515_v42 = vor.u32 %v1690_v33, %v1512_v34  ;;  %v1687_v48 = vld [vmem:[%s2405_s2 + $0x214] sm:$0xf]  ;;  %v1500_v49 = vld [vmem:[%s2405_s2 + $0x21c] sm:$0xf0]  ;;  %v1407_v54 = vor.u32 %v1663_v45, %v1404_v47 }
  0x25   : > { %946 = vmatpush.bf16.msra.mxu3 %v1547_v10  ;;  %v1611_v46 = vor.u32 %v1714_v37, %v1608_v38  ;;  %v1711_v50 = vld [vmem:[%s2405_s2 + $0x2d4] sm:$0xf]  ;;  %v1596_v51 = vld [vmem:[%s2405_s2 + $0x2dc] sm:$0xf0]  ;;  %v1636_v53 = vld [vmem:[%s2405_s2 + $0x7c] sm:$0xf]  ;;  %v1503_v55 = vor.u32 %v1687_v48, %v1500_v49 }
  0x26   : > { %908 = vmatpush.bf16.msra.mxu0 %v1247_v16  ;;  %v1296_v56 = vld [vmem:[%s2405_s2 + $0x84] sm:$0xf0]  ;;  %v1660_v57 = vld [vmem:[%s2405_s2 + $0x13c] sm:$0xf]  ;;  %v1599_v58 = vor.u32 %v1711_v50, %v1596_v51  ;;  %s2410_s19 = smov (!%p228_p3, %s1224_s19), 1  ;;  %vm1080_vm0 = vcmask 1040384  }
  0x27   : > { %921 = vmatpush.bf16.msra.mxu1 %v1343_v19  ;;  %v1392_v59 = vld [vmem:[%s2405_s2 + $0x144] sm:$0xf0]  ;;  %v1684_v60 = vld [vmem:[%s2405_s2 + $0x1fc] sm:$0xf]  ;;  %v1299_v0 = vor.u32 %v1636_v53, %v1296_v56  ;;  %v1633_v1 = vld [vmem:[%s2405_s2 + $0x64] sm:$0xf] }
  0x28   : > { %934 = vmatpush.bf16.msra.mxu2 %v1439_v20  ;;  %v1488_v61 = vld [vmem:[%s2405_s2 + $0x204] sm:$0xf0]  ;;  %v1708_v62 = vld [vmem:[%s2405_s2 + $0x2bc] sm:$0xf]  ;;  %v1395_v2 = vor.u32 %v1660_v57, %v1392_v59  ;;  %v1284_v4 = vld [vmem:[%s2405_s2 + $0x6c] sm:$0xf0] }
  0x29   : > { %947 = vmatpush.bf16.msra.mxu3 %v1535_v24  ;;  %v1584_v63 = vld [vmem:[%s2405_s2 + $0x2c4] sm:$0xf0]  ;;  %v1491_v3 = vor.u32 %v1684_v60, %v1488_v61  ;;  %v1657_v5 = vld [vmem:[%s2405_s2 + $0x124] sm:$0xf]  ;;  %s1229_s16 = sshll.u32 %s2410_s19, 2  ;;  %s1717_s17 = smul.u32 6, %s2410_s19  ;;  %v1287_v13 = vor.u32 %v1633_v1, %v1284_v4 }
  0x2a   : > { %909 = vmatpush.bf16.msra.mxu0 %v1235_v31  ;;  %v1587_v6 = vor.u32 %v1708_v62, %v1584_v63  ;;  %v1380_v7 = vld [vmem:[%s2405_s2 + $0x12c] sm:$0xf0]  ;;  %v1681_v8 = vld [vmem:[%s2405_s2 + $0x1e4] sm:$0xf]  ;;  %s231_s28 = scalar_lea.vmem %s2403_s0, %s1229_s16  ;;  %v1630_v14 = vld [vmem:[%s2405_s2 + $0x4c] sm:$0xf] }
  0x2b   : > { %922 = vmatpush.bf16.msra.mxu1 %v1331_v35  ;;  %v1476_v9 = vld [vmem:[%s2405_s2 + $0x1ec] sm:$0xf0]  ;;  %v1705_v10 = vld [vmem:[%s2405_s2 + $0x2a4] sm:$0xf]  ;;  %v243_v12 = vld [vmem:[%s231_s28] sm:$0xf]  ;;  %s236_s10 = scalar_lea.vmem %s2404_s1, %s1717_s17  ;;  %v1383_v15 = vor.u32 %v1657_v5, %v1380_v7  ;;  %s241_s11 = scalar_lea.vmem %s2408_s5, %s1717_s17 }
  0x2c   : > { %935 = vmatpush.bf16.msra.mxu2 %v1427_v36  ;;  %v1572_v11 = vld [vmem:[%s2405_s2 + $0x2ac] sm:$0xf0]  ;;  %374 = vst [vmem:[#allocation1] ss:$9 sm:$0xff] %v243_v12  ;;  %v1479_v16 = vor.u32 %v1681_v8, %v1476_v9  ;;  %v1272_v17 = vld [vmem:[%s2405_s2 + $0x54] sm:$0xf0] }
  0x2d   : > { %948 = vmatpush.bf16.msra.mxu3 %v1523_v39  ;;  %v1654_v18 = vld [vmem:[%s2405_s2 + $0x10c] sm:$0xf]  ;;  %v1368_v19 = vld [vmem:[%s2405_s2 + $0x114] sm:$0xf0]  ;;  %v1575_v20 = vor.u32 %v1705_v10, %v1572_v11  ;;  %v1062_v23 = vld [vmem:[%s236_s10] sm:$0x3f]  ;;  %v1275_v26 = vor.u32 %v1630_v14, %v1272_v17 }
  0x2e   : > { %954 = vmatpush.bf16.msrb.mxu0 %v1323_v40  ;;  %v1678_v21 = vld [vmem:[%s2405_s2 + $0x1cc] sm:$0xf]  ;;  %v1464_v22 = vld [vmem:[%s2405_s2 + $0x1d4] sm:$0xf0]  ;;  %v1627_v27 = vld [vmem:[%s2405_s2 + $0x34] sm:$0xf]  ;;  %v1371_v29 = vor.u32 %v1654_v18, %v1368_v19  ;;  %v1063_v34 = vunpack.c.l.bf16 %v1062_v23  ;;  %v1064_v39 = vunpack.c.h.bf16 %v1062_v23 }
  0x2f   : > { %967 = vmatpush.bf16.msrb.mxu1 %v1419_v41  ;;  %v1702_v24 = vld [vmem:[%s2405_s2 + $0x28c] sm:$0xf]  ;;  %v1560_v25 = vld [vmem:[%s2405_s2 + $0x294] sm:$0xf0]  ;;  %v1260_v28 = vld [vmem:[%s2405_s2 + $0x3c] sm:$0xf0]  ;;  %v1467_v30 = vor.u32 %v1678_v21, %v1464_v22 }
  0x30   : > { %980 = vmatpush.bf16.msrb.mxu2 %v1515_v42  ;;  %v1651_v31 = vld [vmem:[%s2405_s2 + $0xf4] sm:$0xf]  ;;  %v1356_v32 = vld [vmem:[%s2405_s2 + $0xfc] sm:$0xf0]  ;;  %v1563_v35 = vor.u32 %v1702_v24, %v1560_v25  ;;  %v1624_v42 = vld [vmem:[%s2405_s2 + $0x1c] sm:$0xf]  ;;  %v1263_v43 = vor.u32 %v1627_v27, %v1260_v28 }
  0x31   : > { %993 = vmatpush.bf16.msrb.mxu3 %v1611_v46  ;;  %v1675_v33 = vld [vmem:[%s2405_s2 + $0x1b4] sm:$0xf]  ;;  %v1452_v36 = vld [vmem:[%s2405_s2 + $0x1bc] sm:$0xf0]  ;;  %v1248_v46 = vld [vmem:[%s2405_s2 + $0x24] sm:$0xf0]  ;;  %v1359_v47 = vor.u32 %v1651_v31, %v1356_v32 }
  0x32   : > { %955 = vmatpush.bf16.msrb.mxu0 %v1311_v52  ;;  %v1699_v37 = vld [vmem:[%s2405_s2 + $0x274] sm:$0xf]  ;;  %v1548_v38 = vld [vmem:[%s2405_s2 + $0x27c] sm:$0xf0]  ;;  %v1455_v48 = vor.u32 %v1675_v33, %v1452_v36  ;;  %v1648_v49 = vld [vmem:[%s2405_s2 + $0xdc] sm:$0xf]  ;;  %v1251_v56 = vor.u32 %v1624_v42, %v1248_v46 }
  0x33   : > { %968 = vmatpush.bf16.msrb.mxu1 %v1407_v54  ;;  %v2126_v40 = vld [vmem:[#allocation1 + $0x12] sm:$0xff]  ;;  %v2128_v41 = vld [vmem:[#allocation1] sm:$0xff]  ;;  %v2136_v45 = vld [vmem:[#allocation1 + $0x9] sm:$0xff]  ;;  %v1551_v51 = vor.u32 %v1699_v37, %v1548_v38  ;;  %vm1076_vm1 = vcmask 7168   ;;  %vm1152_vm2 = vcmask 1043458   ;;  %vm1141_vm3 = vcmask 1041408  }
  0x34   : > { %981 = vmatpush.bf16.msrb.mxu2 %v1503_v55  ;;  %v2134_v44 = vld [vmem:[#allocation1 + $0x1b] sm:$0xff]  ;;  %1067 = vst [vmem:[#allocation1] ss:$2 sm:$0xff] %v1063_v34  ;;  %v1344_v50 = vld [vmem:[%s2405_s2 + $0xe4] sm:$0xf0]  ;;  %910 = vmatmul.bf16.vlgmr.msra.gmra.mxu0 %v2128_v41  ;;  %vm1153_vm4 = vmor %vm1152_vm2, %vm1141_vm3  ;;  %vm1154_vm5 = vcmask 521220  }
  0x35   : > { %994 = vmatpush.bf16.msrb.mxu3 %v1599_v58  ;;  %936 = vmatmul.bf16.vlgmr.msra.gmra.mxu2 %v2126_v40  ;;  %1069 = vst [vmem:[#allocation1 + $0x10] ss:$2 sm:$0xff] %v1064_v39  ;;  %v1672_v52 = vld [vmem:[%s2405_s2 + $0x19c] sm:$0xf]  ;;  %v1440_v53 = vld [vmem:[%s2405_s2 + $0x1a4] sm:$0xf0]  ;;  %v1347_v59 = vor.u32 %v1648_v49, %v1344_v50  ;;  %vm1155_vm8 = vmor %vm1154_vm5, %vm1153_vm4 }
  0x36   : > { %956 = vmatpush.bf16.msrb.mxu0 %v1299_v0  ;;  %949 = vmatmul.bf16.vlgmr.msra.gmra.mxu3 %v2134_v44  ;;  %v1696_v54 = vld [vmem:[%s2405_s2 + $0x25c] sm:$0xf]  ;;  %v1536_v55 = vld [vmem:[%s2405_s2 + $0x264] sm:$0xf0]  ;;  %v1621_v57 = vld [vmem:[%s2405_s2 + $0x4] sm:$0xf]  ;;  %v1443_v60 = vor.u32 %v1672_v52, %v1440_v53 }
  0x37   : > { %969 = vmatpush.bf16.msrb.mxu1 %v1395_v2  ;;  %v1236_v58 = vld [vmem:[%s2405_s2 + $0xc] sm:$0xf0]  ;;  %v1645_v61 = vld [vmem:[%s2405_s2 + $0xc4] sm:$0xf]  ;;  %v1539_v0 = vor.u32 %v1696_v54, %v1536_v55  ;;  %v1644_v5 = vld [vmem:[%s2405_s2 + $0xb8] sm:$0xf0] }
  0x38   : > { %982 = vmatpush.bf16.msrb.mxu2 %v1491_v3  ;;  %923 = vmatmul.bf16.vlgmr.msra.gmra.mxu1 %v2136_v45  ;;  %v1332_v62 = vld [vmem:[%s2405_s2 + $0xcc] sm:$0xf0]  ;;  %v1669_v63 = vld [vmem:[%s2405_s2 + $0x184] sm:$0xf]  ;;  %v1239_v7 = vor.u32 %v1621_v57, %v1236_v58  ;;  %v1668_v8 = vld [vmem:[%s2405_s2 + $0x178] sm:$0xf0] }
  0x39   : > { %995 = vmatpush.bf16.msrb.mxu3 %v1587_v6  ;;  %v1428_v1 = vld [vmem:[%s2405_s2 + $0x18c] sm:$0xf0]  ;;  %v1693_v2 = vld [vmem:[%s2405_s2 + $0x244] sm:$0xf]  ;;  %v1692_v10 = vld [vmem:[%s2405_s2 + $0x238] sm:$0xf0]  ;;  %v1335_v11 = vor.u32 %v1645_v61, %v1332_v62 }
  0x3a   : > { %957 = vmatpush.bf16.msrb.mxu0 %v1287_v13  ;;  %v1524_v3 = vld [vmem:[%s2405_s2 + $0x24c] sm:$0xf0]  ;;  %v1431_v12 = vor.u32 %v1669_v63, %v1428_v1  ;;  %v1716_v14 = vld [vmem:[%s2405_s2 + $0x2f8] sm:$0xf0]  ;;  %v1314_v19 = vld [vmem:[%s2405_s2 + $0x98] sm:$0xf] }
  0x3b   : > { %970 = vmatpush.bf16.msrb.mxu1 %v1383_v15  ;;  %v1326_v4 = vld [vmem:[%s2405_s2 + $0xb0] sm:$0xf]  ;;  %v1527_v15 = vor.u32 %v1693_v2, %v1524_v3  ;;  %v1410_v21 = vld [vmem:[%s2405_s2 + $0x158] sm:$0xf]  ;;  %v1665_v23 = vld [vmem:[%s2405_s2 + $0x160] sm:$0xf0] }
  0x3c   : > { %983 = vmatpush.bf16.msrb.mxu2 %v1479_v16  ;;  %v1422_v6 = vld [vmem:[%s2405_s2 + $0x170] sm:$0xf]  ;;  %v1327_v16 = vor.u32 %v1644_v5, %v1326_v4  ;;  %v1506_v24 = vld [vmem:[%s2405_s2 + $0x218] sm:$0xf]  ;;  %v1689_v25 = vld [vmem:[%s2405_s2 + $0x220] sm:$0xf0] }
  0x3d   : > { %996 = vmatpush.bf16.msrb.mxu3 %v1575_v20  ;;  %v1518_v9 = vld [vmem:[%s2405_s2 + $0x230] sm:$0xf]  ;;  %v1423_v17 = vor.u32 %v1668_v8, %v1422_v6  ;;  %v1641_v20 = vld [vmem:[%s2405_s2 + $0xa0] sm:$0xf0]  ;;  %v1302_v31 = vld [vmem:[%s2405_s2 + $0x80] sm:$0xf] }
  0x3e   : > { %958 = vmatpush.bf16.msrb.mxu0 %v1275_v26  ;;  %v1614_v13 = vld [vmem:[%s2405_s2 + $0x2f0] sm:$0xf]  ;;  %v1519_v18 = vor.u32 %v1692_v10, %v1518_v9  ;;  %v1602_v26 = vld [vmem:[%s2405_s2 + $0x2d8] sm:$0xf]  ;;  %v1713_v27 = vld [vmem:[%s2405_s2 + $0x2e0] sm:$0xf0]  ;;  %v1315_v28 = vor.u32 %v1641_v20, %v1314_v19 }
  0x3f   : > { %971 = vmatpush.bf16.msrb.mxu1 %v1371_v29  ;;  %v1615_v22 = vor.u32 %v1716_v14, %v1614_v13  ;;  %v1411_v29 = vor.u32 %v1665_v23, %v1410_v21  ;;  %v1638_v32 = vld [vmem:[%s2405_s2 + $0x88] sm:$0xf0]  ;;  %v1398_v33 = vld [vmem:[%s2405_s2 + $0x140] sm:$0xf]  ;;  %v1603_v34 = vor.u32 %v1713_v27, %v1602_v26  ;;  %v1386_v49 = vld [vmem:[%s2405_s2 + $0x128] sm:$0xf] }
  0x40   : > { %984 = vmatpush.bf16.msrb.mxu2 %v1467_v30  ;;  %v1507_v30 = vor.u32 %v1689_v25, %v1506_v24  ;;  %v1494_v36 = vld [vmem:[%s2405_s2 + $0x200] sm:$0xf]  ;;  %v1686_v37 = vld [vmem:[%s2405_s2 + $0x208] sm:$0xf0]  ;;  %v1303_v42 = vor.u32 %v1638_v32, %v1302_v31  ;;  %v1482_v52 = vld [vmem:[%s2405_s2 + $0x1e8] sm:$0xf] }
  0x41   : > { %997 = vmatpush.bf16.msrb.mxu3 %v1563_v35  ;;  %v1662_v35 = vld [vmem:[%s2405_s2 + $0x148] sm:$0xf0]  ;;  %v1590_v38 = vld [vmem:[%s2405_s2 + $0x2c0] sm:$0xf]  ;;  %v1495_v46 = vor.u32 %v1686_v37, %v1494_v36  ;;  %v1683_v53 = vld [vmem:[%s2405_s2 + $0x1f0] sm:$0xf0] }
  0x42   : > { %959 = vmatpush.bf16.msrb.mxu0 %v1263_v43  ;;  %v1710_v39 = vld [vmem:[%s2405_s2 + $0x2c8] sm:$0xf0]  ;;  %v1399_v43 = vor.u32 %v1662_v35, %v1398_v33  ;;  %v1578_v54 = vld [vmem:[%s2405_s2 + $0x2a8] sm:$0xf]  ;;  %v1707_v55 = vld [vmem:[%s2405_s2 + $0x2b0] sm:$0xf0]  ;;  %v1483_v58 = vor.u32 %v1683_v53, %v1482_v52 }
  0x43   : > { %972 = vmatpush.bf16.msrb.mxu1 %v1359_v47  ;;  %v1290_v47 = vld [vmem:[%s2405_s2 + $0x68] sm:$0xf]  ;;  %v1591_v50 = vor.u32 %v1710_v39, %v1590_v38  ;;  %v1374_v61 = vld [vmem:[%s2405_s2 + $0x110] sm:$0xf]  ;;  %v1579_v62 = vor.u32 %v1707_v55, %v1578_v54  ;;  %v1656_v63 = vld [vmem:[%s2405_s2 + $0x118] sm:$0xf0] }
  0x44   : > { %985 = vmatpush.bf16.msrb.mxu2 %v1455_v48  ;;  %v1635_v48 = vld [vmem:[%s2405_s2 + $0x70] sm:$0xf0]  ;;  %v1680_v1 = vld [vmem:[%s2405_s2 + $0x1d8] sm:$0xf0]  ;;  %v1566_v2 = vld [vmem:[%s2405_s2 + $0x290] sm:$0xf]  ;;  %v1375_v5 = vor.u32 %v1656_v63, %v1374_v61 }
  0x45   : > { %998 = vmatpush.bf16.msrb.mxu3 %v1551_v51  ;;  %v1659_v51 = vld [vmem:[%s2405_s2 + $0x130] sm:$0xf0]  ;;  %v1704_v3 = vld [vmem:[%s2405_s2 + $0x298] sm:$0xf0]  ;;  %v1629_v8 = vld [vmem:[%s2405_s2 + $0x40] sm:$0xf0] }
  0x46   : > { %960 = vmatpush.bf16.msrb.mxu0 %v1251_v56  ;;  %v1291_v56 = vor.u32 %v1635_v48, %v1290_v47  ;;  %v1387_v57 = vor.u32 %v1659_v51, %v1386_v49  ;;  %v1362_v9 = vld [vmem:[%s2405_s2 + $0xf8] sm:$0xf]  ;;  %v1567_v10 = vor.u32 %v1704_v3, %v1566_v2  ;;  %v1677_v13 = vld [vmem:[%s2405_s2 + $0x1c0] sm:$0xf0]  ;;  %v1254_v19 = vld [vmem:[%s2405_s2 + $0x20] sm:$0xf] }
  0x47   : > { %973 = vmatpush.bf16.msrb.mxu1 %v1347_v59  ;;  %v1278_v59 = vld [vmem:[%s2405_s2 + $0x50] sm:$0xf]  ;;  %v1554_v14 = vld [vmem:[%s2405_s2 + $0x278] sm:$0xf]  ;;  %v1626_v20 = vld [vmem:[%s2405_s2 + $0x28] sm:$0xf0] }
  0x48   : > { %986 = vmatpush.bf16.msrb.mxu2 %v1443_v60  ;;  %v1632_v60 = vld [vmem:[%s2405_s2 + $0x58] sm:$0xf0]  ;;  %v1350_v21 = vld [vmem:[%s2405_s2 + $0xe0] sm:$0xf]  ;;  %v1650_v23 = vld [vmem:[%s2405_s2 + $0xe8] sm:$0xf0] }
  0x49   : > { %999 = vmatpush.bf16.msrb.mxu3 %v1539_v0  ;;  %v1470_v0 = vld [vmem:[%s2405_s2 + $0x1d0] sm:$0xf]  ;;  %v1279_v4 = vor.u32 %v1632_v60, %v1278_v59  ;;  %v1446_v24 = vld [vmem:[%s2405_s2 + $0x1a0] sm:$0xf]  ;;  %v1674_v25 = vld [vmem:[%s2405_s2 + $0x1a8] sm:$0xf0] }
  0x4a   : > { %961 = vmatpush.bf16.msrb.mxu0 %v1239_v7  ;;  %v1471_v6 = vor.u32 %v1680_v1, %v1470_v0  ;;  %v1266_v7 = vld [vmem:[%s2405_s2 + $0x38] sm:$0xf]  ;;  %v1542_v26 = vld [vmem:[%s2405_s2 + $0x260] sm:$0xf]  ;;  %v1698_v27 = vld [vmem:[%s2405_s2 + $0x268] sm:$0xf0] }
  0x4b   : > { %974 = vmatpush.bf16.msrb.mxu1 %v1335_v11  ;;  %v1653_v11 = vld [vmem:[%s2405_s2 + $0x100] sm:$0xf0]  ;;  %v1242_v31 = vld [vmem:[%s2405_s2 + $0x8] sm:$0xf]  ;;  %v1623_v32 = vld [vmem:[%s2405_s2 + $0x10] sm:$0xf0] }
  0x4c   : > { %987 = vmatpush.bf16.msrb.mxu2 %v1431_v12  ;;  %v1458_v12 = vld [vmem:[%s2405_s2 + $0x1b8] sm:$0xf]  ;;  %v1338_v33 = vld [vmem:[%s2405_s2 + $0xc8] sm:$0xf]  ;;  %v1647_v35 = vld [vmem:[%s2405_s2 + $0xd0] sm:$0xf0] }
  0x4d   : > { %1000 = vmatpush.bf16.msrb.mxu3 %v1527_v15  ;;  %962 = vmatmul.bf16.vlgmr.msrb.gmra.mxu0 %v2128_v41  ;;  %v1701_v15 = vld [vmem:[%s2405_s2 + $0x280] sm:$0xf0]  ;;  %v1434_v36 = vld [vmem:[%s2405_s2 + $0x188] sm:$0xf]  ;;  %v1671_v37 = vld [vmem:[%s2405_s2 + $0x190] sm:$0xf0] }
  0x4e   : > { %1006 = vmatpush.bf16.msra.mxu0 %v1327_v16  ;;  %975 = vmatmul.bf16.vlgmr.msrb.gmra.mxu1 %v2136_v45  ;;  %v1267_v16 = vor.u32 %v1629_v8, %v1266_v7  ;;  %v1530_v38 = vld [vmem:[%s2405_s2 + $0x248] sm:$0xf]  ;;  %v1695_v39 = vld [vmem:[%s2405_s2 + $0x250] sm:$0xf0]  ;;  %v372_v48 = vld [vmem:[%s2406_s3] sm:$0x7] }
  0x4f   : > { %1019 = vmatpush.bf16.msra.mxu1 %v1423_v17  ;;  %988 = vmatmul.bf16.vlgmr.msrb.gmra.mxu2 %v2126_v40  ;;  %v1363_v17 = vor.u32 %v1653_v11, %v1362_v9  ;;  %v1531_v47 = vor.u32 %v1695_v39, %v1530_v38  ;;  %v896_v49 = vperm.slane %v372_v48, 0  ;;  %v1058_v9 = vld [vmem:[%s2407_s4] sm:$0x3]  ;;  %v1072_v39 = vld.sshfl [vmem:[#allocation1 + $0x10] sm:$0xff pattern:$0x75316420] }
  0x50   : > { %1032 = vmatpush.bf16.msra.mxu2 %v1519_v18  ;;  %1001 = vmatmul.bf16.vlgmr.msrb.gmra.mxu3 %v2134_v44  ;;  %v1459_v18 = vor.u32 %v1677_v13, %v1458_v12  ;;  %vm1145_vm6 = vcmask 1045508   ;;  %vm1149_vm7 = vcmask 1043456  }
  0x51   : > { %1045 = vmatpush.bf16.msra.mxu3 %v1615_v22  ;;  %v1555_v22 = vor.u32 %v1701_v15, %v1554_v14  ;;  %v898_v14 = vperm.slane %v372_v48, 2 }
  0x52   : > { %1007 = vmatpush.bf16.msra.mxu0 %v1315_v28  ;;  %v1255_v28 = vor.u32 %v1626_v20, %v1254_v19 }
  0x53   : > { %1020 = vmatpush.bf16.msra.mxu1 %v1411_v29  ;;  %v1351_v29 = vor.u32 %v1650_v23, %v1350_v21 }
  0x54   : > { %1033 = vmatpush.bf16.msra.mxu2 %v1507_v30  ;;  %v1447_v30 = vor.u32 %v1674_v25, %v1446_v24 }
  0x55   : > { %1046 = vmatpush.bf16.msra.mxu3 %v1603_v34  ;;  %v1543_v34 = vor.u32 %v1698_v27, %v1542_v26 }
  0x56   : > { %1008 = vmatpush.bf16.msra.mxu0 %v1303_v42  ;;  %v1243_v42 = vor.u32 %v1623_v32, %v1242_v31 }
  0x57   : > { %1021 = vmatpush.bf16.msra.mxu1 %v1399_v43  ;;  %v1339_v43 = vor.u32 %v1647_v35, %v1338_v33  ;;  %v1070_v33 = vld.sshfl [vmem:[#allocation1] sm:$0xff pattern:$0x75316420] }
  0x58   : > { %1034 = vmatpush.bf16.msra.mxu2 %v1495_v46  ;;  %v1435_v46 = vor.u32 %v1671_v37, %v1434_v36 }
  0x59   : > { %1047 = vmatpush.bf16.msra.mxu3 %v1591_v50 }
  0x5a   : > { %1009 = vmatpush.bf16.msra.mxu0 %v1291_v56 }
  0x5b   : > { %1022 = vmatpush.bf16.msra.mxu1 %v1387_v57 }
  0x5c   : > { %1035 = vmatpush.bf16.msra.mxu2 %v1483_v58 }
  0x5d   : > { %1048 = vmatpush.bf16.msra.mxu3 %v1579_v62  ;;  %v897_v62 = vperm.slane %v372_v48, 1 }
  0x5e   : > { %1010 = vmatpush.bf16.msra.mxu0 %v1279_v4 }
  0x5f   : > { %1023 = vmatpush.bf16.msra.mxu1 %v1375_v5 }
  0x60   : > { %1036 = vmatpush.bf16.msra.mxu2 %v1471_v6 }
  0x61   : > { %1049 = vmatpush.bf16.msra.mxu3 %v1567_v10 }
  0x62   : > { %1011 = vmatpush.bf16.msra.mxu0 %v1267_v16 }
  0x63   : > { %1024 = vmatpush.bf16.msra.mxu1 %v1363_v17 }
  0x64   : > { %1037 = vmatpush.bf16.msra.mxu2 %v1459_v18 }
  0x65   : > { %1050 = vmatpush.bf16.msra.mxu3 %v1555_v22 }
  0x66   : > { %1012 = vmatpush.bf16.msra.mxu0 %v1255_v28 }
  0x67   : > { %1025 = vmatpush.bf16.msra.mxu1 %v1351_v29 }
  0x68   : > { %1038 = vmatpush.bf16.msra.mxu2 %v1447_v30 }
  0x69   : > { %1051 = vmatpush.bf16.msra.mxu3 %v1543_v34  ;;  %v1071_v34 = vld.sshfl [vmem:[#allocation1 + $0x8] sm:$0xff pattern:$0x75316420] }
  0x6a   : > { %1013 = vmatpush.bf16.msra.mxu0 %v1243_v42 }
  0x6b   : > { %1026 = vmatpush.bf16.msra.mxu1 %v1339_v43 }
  0x6c   : > { %1039 = vmatpush.bf16.msra.mxu2 %v1435_v46 }
  0x6d   : > { %1052 = vmatpush.bf16.msra.mxu3 %v1531_v47  ;;  %1014 = vmatmul.bf16.vlgmr.msra.gmra.mxu0 %v2128_v41 }
  0x6e   : > { %1027 = vmatmul.bf16.vlgmr.msra.gmra.mxu1 %v2136_v45  ;;  %v1735_v45 = vmov 0  }
  0x6f   : > { %1040 = vmatmul.bf16.vlgmr.msra.gmra.mxu2 %v2126_v40  ;;  %v1082_v58 = vsel %vm1080_vm0, 65535, %v1735_v45 }
  0x70   : > { %1053 = vmatmul.bf16.vlgmr.msra.gmra.mxu3 %v2134_v44 }
  0xb1   : > { %v911_v50 = vpop.f32.mrf.mxu0 }
  0xb2   : > { %v912_v51 = vadd.f32 %v911_v50, %v896_v49 }
  0xb5   : > { %v924_v52 = vpop.f32.mrf.mxu1 }
  0xb6   : > { %v925_v53 = vadd.f32 %v924_v52, %v912_v51 }
  0xb8   : > { %v937_v54 = vpop.f32.mrf.mxu2 }
  0xb9   : > { %v938_v55 = vadd.f32 %v937_v54, %v925_v53  ;;  %v950_v56 = vpop.f32.mrf.mxu3  ;;  %v913_v57 = vpop.f32.mrf.mxu0 }
  0xbb   : > { %v951_v41 = vadd.f32 %v950_v56, %v938_v55 }
  0xbd   : > { %v926_v40 = vpop.f32.mrf.mxu1  ;;  %v1059_v59 = vpack.c.bf16 %v951_v41, %v951_v41 }
  0xbf   : > { %v1084_v44 = vand.u32 %v1082_v58, %v1059_v59 }
  0xc0   : > { %v939_v60 = vpop.f32.mrf.mxu2 }
  0xc1   : > { %1099 = vmatpush.bf16.msrb.mxu0 %v1084_v44  ;;  %v952_v61 = vpop.f32.mrf.mxu3 }
  0xc4   : > { %1616 = vmatmul.msk.bf16.vlgmr.msrb.gmra.mxu0 %vm1076_vm1, %v1058_v9 }
  0xca   : > { %v963_v63 = vpop.f32.mrf.mxu0 }
  0xcb   : > { %v964_v0 = vadd.f32 %v963_v63, %v897_v62  ;;  %v976_v1 = vpop.f32.mrf.mxu1 }
  0xcd   : > { %v977_v3 = vadd.f32 %v976_v1, %v964_v0 }
  0xd2   : > { %v989_v2 = vpop.f32.mrf.mxu2  ;;  %v965_v7 = vpop.f32.mrf.mxu0 }
  0xd3   : > { %v990_v4 = vadd.f32 %v989_v2, %v977_v3  ;;  %v1002_v5 = vpop.f32.mrf.mxu3  ;;  %v978_v8 = vpop.f32.mrf.mxu1 }
  0xd5   : > { %v1003_v6 = vadd.f32 %v1002_v5, %v990_v4 }
  0xd7   : > { %v1060_v10 = vpack.c.bf16 %v1003_v6, %v1003_v6 }
  0xd9   : > { %v1087_v12 = vand.u32 %v1082_v58, %v1060_v10 }
  0xda   : > { %v991_v11 = vpop.f32.mrf.mxu2 }
  0xdb   : > { %1112 = vmatpush.bf16.msrb.mxu1 %v1087_v12  ;;  %v1004_v13 = vpop.f32.mrf.mxu3 }
  0xde   : > { %1617 = vmatmul.msk.bf16.vlgmr.msrb.gmra.mxu1 %vm1076_vm1, %v1058_v9 }
  0xea   : > { %v1015_v15 = vpop.f32.mrf.mxu0 }
  0xeb   : > { %v1016_v16 = vadd.f32 %v1015_v15, %v898_v14  ;;  %v1028_v17 = vpop.f32.mrf.mxu1 }
  0xed   : > { %v1029_v18 = vadd.f32 %v1028_v17, %v1016_v16 }
  0xf2   : > { %v1041_v19 = vpop.f32.mrf.mxu2  ;;  %v1017_v22 = vpop.f32.mrf.mxu0 }
  0xf3   : > { %v1042_v20 = vadd.f32 %v1041_v19, %v1029_v18  ;;  %v1054_v21 = vpop.f32.mrf.mxu3  ;;  %v1030_v23 = vpop.f32.mrf.mxu1 }
  0xf5   : > { %v1055_v24 = vadd.f32 %v1054_v21, %v1042_v20 }
  0xf7   : > { %v1061_v25 = vpack.c.bf16 %v1055_v24, %v1055_v24 }
  0xf9   : > { %v1090_v26 = vand.u32 %v1082_v58, %v1061_v25 }
  0xfa   : > { %v1043_v27 = vpop.f32.mrf.mxu2 }
  0xfb   : > { %v1056_v28 = vpop.f32.mrf.mxu3  ;;  %1125 = vmatpush.bf16.msrb.mxu2 %v1090_v26 }
  0xfe   : > { %1618 = vmatmul.msk.bf16.vlgmr.msrb.gmra.mxu2 %vm1076_vm1, %v1058_v9 }
 0x141   : > { %v1101_v29 = vpop.f32.mrf.mxu0 }
 0x142   : > { %v1102_v35 = vadd.f32 %v1101_v29, %v1070_v33 }
 0x144   : > { %v1131_v37 = vmax.f32 %v1102_v35, 0.0 }
 0x149   : > { %v1103_v31 = vpop.f32.mrf.mxu0 }
 0x15b   : > { %v1114_v30 = vpop.f32.mrf.mxu1 }
 0x15c   : > { %v1115_v36 = vadd.f32 %v1114_v30, %v1071_v34 }
 0x15e   : > { %v1132_v38 = vmax.f32 %v1115_v36, 0.0 }
 0x160   : > { %v1134_v43 = vpack.c.bf16 %v1132_v38, %v1131_v37 }
 0x162   : > { %v1138_v48 = vrot.slane %v1134_v43, 2 }
 0x163   : > { %v1116_v32 = vpop.f32.mrf.mxu1 }
 0x164   : > { %v1144_v53 = vsel %vm1141_vm3, %v1134_v43, %v1138_v48 }
 0x181   : > { %v1127_v42 = vpop.f32.mrf.mxu2 }
 0x182   : > { %v1128_v46 = vadd.f32 %v1127_v42, %v1072_v39 }
 0x184   : > { %v1133_v47 = vmax.f32 %v1128_v46, 0.0 }
 0x186   : > { %v1135_v49 = vpack.c.bf16 %v1133_v47, %v1133_v47 }
 0x188   : > { %v1139_v50 = vrot.slane %v1135_v49, 4  ;;  %v1140_v51 = vrot.slane %v1135_v49, 6 }
 0x189   : > { %v1129_v52 = vpop.f32.mrf.mxu2 }
 0x18a   : > { %v1148_v54 = vsel %vm1145_vm6, %v1139_v50, %v1140_v51 }
 0x18b   : > { %v1150_v55 = vsel %vm1149_vm7, %v1144_v53, %v1148_v54 }
 0x18c   : > { %1156 = vst.msk [vmem:[%s241_s11] sm:$0x3f] %vm1155_vm8, %v1150_v55 }
 0x18d PF: > { %s15_s18 = sadd.s32 1, %s1733_s18  }
 0x18e   : > { %p12_p4 = scmp.ge.s32.totalorder %s15_s18, 4  }
 0x190   :  { %14 = sbr.rel (!%p12_p4) target bundleno = 1 (0x1), region = 74 }

// kernel: pvt_dense_decoder_forward.18
= control target key start
LH: loop header
LB: loop body
LE: loop exit
PB: predicated region body
PF: predicated region fallthrough
CT: control target
= control target key end

     0   :  { %vm2501_vm0 = vcmask 1040384   ;;  %vm2505_vm1 = vcmask 1042434   ;;  %vm2509_vm2 = vcmask 1041408   ;;  %s6159_s1 = inlined_call_operand.vmem [shape: bf16[1280,512], index: 1, kind: input, shape index: {}]   ;;  %s6160_s0 = inlined_call_operand.vmem [shape: bf16[2,1280], index: 0, kind: input, shape index: {}]   ;;  %s6161_s2 = inlined_call_operand.vmem [shape: f32[1,512], index: 2, kind: input, shape index: {}]   ;;  %s6162_s3 = inlined_call_operand.vmem [shape: bf16[2,512], index: 3, kind: output, shape index: {}]  }
   0x1   :  { %v2631_v0 = vld [vmem:[%s6159_s1 + $0xe0] sm:$0xf]  ;;  %v3827_v1 = vld [vmem:[%s6159_s1 + $0xec] sm:$0xf0] }
   0x2   :  { %v2759_v2 = vld [vmem:[%s6159_s1 + $0x1e0] sm:$0xf]  ;;  %v2632_v3 = vor.u32 %v3827_v1, %v2631_v0  ;;  %v3859_v4 = vld [vmem:[%s6159_s1 + $0x1ec] sm:$0xf0] }
   0x3   :  { %v2887_v5 = vld [vmem:[%s6159_s1 + $0x2e0] sm:$0xf]  ;;  %v3891_v6 = vld [vmem:[%s6159_s1 + $0x2ec] sm:$0xf0]  ;;  %v2760_v7 = vor.u32 %v3859_v4, %v2759_v2 }
   0x4   :  { %v2888_v8 = vor.u32 %v3891_v6, %v2887_v5  ;;  %v3015_v9 = vld [vmem:[%s6159_s1 + $0x3e0] sm:$0xf]  ;;  %v3923_v10 = vld [vmem:[%s6159_s1 + $0x3ec] sm:$0xf0]  ;;  %1970 = vmatpush.bf16.msra.mxu0 %v2632_v3 }
   0x5   :  { %v2615_v11 = vld [vmem:[%s6159_s1 + $0xc0] sm:$0xf]  ;;  %v3016_v12 = vor.u32 %v3923_v10, %v3015_v9  ;;  %v3823_v13 = vld [vmem:[%s6159_s1 + $0xcc] sm:$0xf0]  ;;  %1983 = vmatpush.bf16.msra.mxu1 %v2760_v7 }
   0x6   :  { %v2743_v14 = vld [vmem:[%s6159_s1 + $0x1c0] sm:$0xf]  ;;  %v3855_v15 = vld [vmem:[%s6159_s1 + $0x1cc] sm:$0xf0]  ;;  %1996 = vmatpush.bf16.msra.mxu2 %v2888_v8  ;;  %v2616_v16 = vor.u32 %v3823_v13, %v2615_v11 }
   0x7   :  { %v2744_v17 = vor.u32 %v3855_v15, %v2743_v14  ;;  %v2871_v18 = vld [vmem:[%s6159_s1 + $0x2c0] sm:$0xf]  ;;  %v3887_v19 = vld [vmem:[%s6159_s1 + $0x2cc] sm:$0xf0]  ;;  %2009 = vmatpush.bf16.msra.mxu3 %v3016_v12 }
   0x8   :  { %v2999_v20 = vld [vmem:[%s6159_s1 + $0x3c0] sm:$0xf]  ;;  %v2872_v21 = vor.u32 %v3887_v19, %v2871_v18  ;;  %v3919_v22 = vld [vmem:[%s6159_s1 + $0x3cc] sm:$0xf0]  ;;  %1971 = vmatpush.bf16.msra.mxu0 %v2616_v16 }
   0x9   :  { %v2599_v23 = vld [vmem:[%s6159_s1 + $0xa0] sm:$0xf]  ;;  %v3819_v24 = vld [vmem:[%s6159_s1 + $0xac] sm:$0xf0]  ;;  %v3000_v25 = vor.u32 %v3919_v22, %v2999_v20  ;;  %1984 = vmatpush.bf16.msra.mxu1 %v2744_v17 }
   0xa   :  { %v2727_v26 = vld [vmem:[%s6159_s1 + $0x1a0] sm:$0xf]  ;;  %v3851_v27 = vld [vmem:[%s6159_s1 + $0x1ac] sm:$0xf0]  ;;  %v2600_v29 = vor.u32 %v3819_v24, %v2599_v23  ;;  %1997 = vmatpush.bf16.msra.mxu2 %v2872_v21 }
   0xb   :  { %v2855_v28 = vld [vmem:[%s6159_s1 + $0x2a0] sm:$0xf]  ;;  %v3883_v30 = vld [vmem:[%s6159_s1 + $0x2ac] sm:$0xf0]  ;;  %v2728_v33 = vor.u32 %v3851_v27, %v2727_v26  ;;  %2010 = vmatpush.bf16.msra.mxu3 %v3000_v25 }
   0xc   :  { %v2983_v31 = vld [vmem:[%s6159_s1 + $0x3a0] sm:$0xf]  ;;  %v3915_v32 = vld [vmem:[%s6159_s1 + $0x3ac] sm:$0xf0]  ;;  %v2856_v34 = vor.u32 %v3883_v30, %v2855_v28  ;;  %1972 = vmatpush.bf16.msra.mxu0 %v2600_v29 }
   0xd   :  { %v2583_v35 = vld [vmem:[%s6159_s1 + $0x80] sm:$0xf]  ;;  %v3815_v36 = vld [vmem:[%s6159_s1 + $0x8c] sm:$0xf0]  ;;  %v2984_v38 = vor.u32 %v3915_v32, %v2983_v31  ;;  %1985 = vmatpush.bf16.msra.mxu1 %v2728_v33 }
   0xe   :  { %v2711_v37 = vld [vmem:[%s6159_s1 + $0x180] sm:$0xf]  ;;  %v3847_v39 = vld [vmem:[%s6159_s1 + $0x18c] sm:$0xf0]  ;;  %v2584_v44 = vor.u32 %v3815_v36, %v2583_v35  ;;  %1998 = vmatpush.bf16.msra.mxu2 %v2856_v34 }
   0xf   :  { %v2839_v40 = vld [vmem:[%s6159_s1 + $0x280] sm:$0xf]  ;;  %v3879_v41 = vld [vmem:[%s6159_s1 + $0x28c] sm:$0xf0]  ;;  %v2712_v45 = vor.u32 %v3847_v39, %v2711_v37  ;;  %2011 = vmatpush.bf16.msra.mxu3 %v2984_v38 }
  0x10   :  { %v2967_v42 = vld [vmem:[%s6159_s1 + $0x380] sm:$0xf]  ;;  %v3911_v43 = vld [vmem:[%s6159_s1 + $0x38c] sm:$0xf0]  ;;  %v2840_v46 = vor.u32 %v3879_v41, %v2839_v40  ;;  %1973 = vmatpush.bf16.msra.mxu0 %v2584_v44 }
  0x11   :  { %v2567_v47 = vld [vmem:[%s6159_s1 + $0x60] sm:$0xf]  ;;  %v3811_v48 = vld [vmem:[%s6159_s1 + $0x6c] sm:$0xf0]  ;;  %v2968_v50 = vor.u32 %v3911_v43, %v2967_v42  ;;  %1986 = vmatpush.bf16.msra.mxu1 %v2712_v45 }
  0x12   :  { %v2695_v49 = vld [vmem:[%s6159_s1 + $0x160] sm:$0xf]  ;;  %v3843_v51 = vld [vmem:[%s6159_s1 + $0x16c] sm:$0xf0]  ;;  %v2568_v56 = vor.u32 %v3811_v48, %v2567_v47  ;;  %1999 = vmatpush.bf16.msra.mxu2 %v2840_v46 }
  0x13   :  { %v2823_v52 = vld [vmem:[%s6159_s1 + $0x260] sm:$0xf]  ;;  %v3875_v53 = vld [vmem:[%s6159_s1 + $0x26c] sm:$0xf0]  ;;  %v2696_v57 = vor.u32 %v3843_v51, %v2695_v49  ;;  %2012 = vmatpush.bf16.msra.mxu3 %v2968_v50 }
  0x14   :  { %v2951_v54 = vld [vmem:[%s6159_s1 + $0x360] sm:$0xf]  ;;  %v3907_v55 = vld [vmem:[%s6159_s1 + $0x36c] sm:$0xf0]  ;;  %v2824_v58 = vor.u32 %v3875_v53, %v2823_v52  ;;  %1974 = vmatpush.bf16.msra.mxu0 %v2568_v56 }
  0x15   :  { %v2551_v59 = vld [vmem:[%s6159_s1 + $0x40] sm:$0xf]  ;;  %v3807_v60 = vld [vmem:[%s6159_s1 + $0x4c] sm:$0xf0]  ;;  %v2952_v62 = vor.u32 %v3907_v55, %v2951_v54  ;;  %1987 = vmatpush.bf16.msra.mxu1 %v2696_v57 }
  0x16   :  { %v2679_v61 = vld [vmem:[%s6159_s1 + $0x140] sm:$0xf]  ;;  %v3839_v63 = vld [vmem:[%s6159_s1 + $0x14c] sm:$0xf0]  ;;  %v2552_v4 = vor.u32 %v3807_v60, %v2551_v59  ;;  %2000 = vmatpush.bf16.msra.mxu2 %v2824_v58 }
  0x17   :  { %v2807_v0 = vld [vmem:[%s6159_s1 + $0x240] sm:$0xf]  ;;  %v3871_v1 = vld [vmem:[%s6159_s1 + $0x24c] sm:$0xf0]  ;;  %v2680_v5 = vor.u32 %v3839_v63, %v2679_v61  ;;  %2013 = vmatpush.bf16.msra.mxu3 %v2952_v62 }
  0x18   :  { %v2935_v2 = vld [vmem:[%s6159_s1 + $0x340] sm:$0xf]  ;;  %v3903_v3 = vld [vmem:[%s6159_s1 + $0x34c] sm:$0xf0]  ;;  %v2808_v6 = vor.u32 %v3871_v1, %v2807_v0  ;;  %1975 = vmatpush.bf16.msra.mxu0 %v2552_v4 }
  0x19   :  { %v2535_v7 = vld [vmem:[%s6159_s1 + $0x20] sm:$0xf]  ;;  %v3803_v8 = vld [vmem:[%s6159_s1 + $0x2c] sm:$0xf0]  ;;  %v2936_v10 = vor.u32 %v3903_v3, %v2935_v2  ;;  %1988 = vmatpush.bf16.msra.mxu1 %v2680_v5 }
  0x1a   :  { %v2663_v9 = vld [vmem:[%s6159_s1 + $0x120] sm:$0xf]  ;;  %v3835_v11 = vld [vmem:[%s6159_s1 + $0x12c] sm:$0xf0]  ;;  %v2536_v16 = vor.u32 %v3803_v8, %v2535_v7  ;;  %2001 = vmatpush.bf16.msra.mxu2 %v2808_v6 }
  0x1b   :  { %v2791_v12 = vld [vmem:[%s6159_s1 + $0x220] sm:$0xf]  ;;  %v3867_v13 = vld [vmem:[%s6159_s1 + $0x22c] sm:$0xf0]  ;;  %v2664_v19 = vor.u32 %v3835_v11, %v2663_v9  ;;  %2014 = vmatpush.bf16.msra.mxu3 %v2936_v10 }
  0x1c   :  { %v2919_v14 = vld [vmem:[%s6159_s1 + $0x320] sm:$0xf]  ;;  %v3899_v15 = vld [vmem:[%s6159_s1 + $0x32c] sm:$0xf0]  ;;  %v2792_v20 = vor.u32 %v3867_v13, %v2791_v12  ;;  %1976 = vmatpush.bf16.msra.mxu0 %v2536_v16 }
  0x1d   :  { %v2519_v17 = vld [vmem:[%s6159_s1] sm:$0xf]  ;;  %v3799_v18 = vld [vmem:[%s6159_s1 + $0xc] sm:$0xf0]  ;;  %v2920_v24 = vor.u32 %v3899_v15, %v2919_v14  ;;  %1989 = vmatpush.bf16.msra.mxu1 %v2664_v19 }
  0x1e   :  { %v2647_v21 = vld [vmem:[%s6159_s1 + $0x100] sm:$0xf]  ;;  %v3831_v22 = vld [vmem:[%s6159_s1 + $0x10c] sm:$0xf0]  ;;  %v2520_v31 = vor.u32 %v3799_v18, %v2519_v17  ;;  %2002 = vmatpush.bf16.msra.mxu2 %v2792_v20 }
  0x1f   :  { %v2775_v23 = vld [vmem:[%s6159_s1 + $0x200] sm:$0xf]  ;;  %v3863_v25 = vld [vmem:[%s6159_s1 + $0x20c] sm:$0xf0]  ;;  %v2648_v35 = vor.u32 %v3831_v22, %v2647_v21  ;;  %2015 = vmatpush.bf16.msra.mxu3 %v2920_v24 }
  0x20   :  { %v2903_v26 = vld [vmem:[%s6159_s1 + $0x300] sm:$0xf]  ;;  %v3895_v27 = vld [vmem:[%s6159_s1 + $0x30c] sm:$0xf0]  ;;  %v2776_v36 = vor.u32 %v3863_v25, %v2775_v23  ;;  %1977 = vmatpush.bf16.msra.mxu0 %v2520_v31 }
  0x21   :  { %v3143_v28 = vld [vmem:[%s6159_s1 + $0x4e0] sm:$0xf]  ;;  %v3955_v29 = vld [vmem:[%s6159_s1 + $0x4ec] sm:$0xf0]  ;;  %v2904_v39 = vor.u32 %v3895_v27, %v2903_v26  ;;  %1990 = vmatpush.bf16.msra.mxu1 %v2648_v35 }
  0x22   :  { %v3271_v30 = vld [vmem:[%s6159_s1 + $0x5e0] sm:$0xf]  ;;  %v3987_v32 = vld [vmem:[%s6159_s1 + $0x5ec] sm:$0xf0]  ;;  %v3144_v40 = vor.u32 %v3955_v29, %v3143_v28  ;;  %2003 = vmatpush.bf16.msra.mxu2 %v2776_v36 }
  0x23   :  { %v3399_v33 = vld [vmem:[%s6159_s1 + $0x6e0] sm:$0xf]  ;;  %v4019_v34 = vld [vmem:[%s6159_s1 + $0x6ec] sm:$0xf0]  ;;  %v3272_v41 = vor.u32 %v3987_v32, %v3271_v30  ;;  %2016 = vmatpush.bf16.msra.mxu3 %v2904_v39 }
  0x24   :  { %v3527_v37 = vld [vmem:[%s6159_s1 + $0x7e0] sm:$0xf]  ;;  %v4051_v38 = vld [vmem:[%s6159_s1 + $0x7ec] sm:$0xf0]  ;;  %v3400_v42 = vor.u32 %v4019_v34, %v3399_v33  ;;  %2022 = vmatpush.bf16.msrb.mxu0 %v3144_v40 }
  0x25   :  { %v3127_v43 = vld [vmem:[%s6159_s1 + $0x4c0] sm:$0xf]  ;;  %v3951_v44 = vld [vmem:[%s6159_s1 + $0x4cc] sm:$0xf0]  ;;  %v3528_v46 = vor.u32 %v4051_v38, %v3527_v37  ;;  %2035 = vmatpush.bf16.msrb.mxu1 %v3272_v41 }
  0x26   :  { %v3255_v45 = vld [vmem:[%s6159_s1 + $0x5c0] sm:$0xf]  ;;  %v3983_v47 = vld [vmem:[%s6159_s1 + $0x5cc] sm:$0xf0]  ;;  %v3128_v52 = vor.u32 %v3951_v44, %v3127_v43  ;;  %2048 = vmatpush.bf16.msrb.mxu2 %v3400_v42 }
  0x27   :  { %v3383_v48 = vld [vmem:[%s6159_s1 + $0x6c0] sm:$0xf]  ;;  %v4015_v49 = vld [vmem:[%s6159_s1 + $0x6cc] sm:$0xf0]  ;;  %v3256_v53 = vor.u32 %v3983_v47, %v3255_v45  ;;  %2061 = vmatpush.bf16.msrb.mxu3 %v3528_v46  ;;  %v15_v45 = vld [vmem:[%s6160_s0 + $0x8] sm:$0x3] }
  0x28   :  { %v3511_v50 = vld [vmem:[%s6159_s1 + $0x7c0] sm:$0xf]  ;;  %v4047_v51 = vld [vmem:[%s6159_s1 + $0x7cc] sm:$0xf0]  ;;  %v3384_v54 = vor.u32 %v4015_v49, %v3383_v48  ;;  %2023 = vmatpush.bf16.msrb.mxu0 %v3128_v52 }
  0x29   :  { %v3111_v55 = vld [vmem:[%s6159_s1 + $0x4a0] sm:$0xf]  ;;  %v3947_v56 = vld [vmem:[%s6159_s1 + $0x4ac] sm:$0xf0]  ;;  %v3512_v58 = vor.u32 %v4047_v51, %v3511_v50  ;;  %2036 = vmatpush.bf16.msrb.mxu1 %v3256_v53 }
  0x2a   :  { %v3239_v57 = vld [vmem:[%s6159_s1 + $0x5a0] sm:$0xf]  ;;  %v3979_v59 = vld [vmem:[%s6159_s1 + $0x5ac] sm:$0xf0]  ;;  %v3112_v0 = vor.u32 %v3947_v56, %v3111_v55  ;;  %2049 = vmatpush.bf16.msrb.mxu2 %v3384_v54 }
  0x2b   :  { %v3367_v60 = vld [vmem:[%s6159_s1 + $0x6a0] sm:$0xf]  ;;  %v4011_v61 = vld [vmem:[%s6159_s1 + $0x6ac] sm:$0xf0]  ;;  %v3240_v3 = vor.u32 %v3979_v59, %v3239_v57  ;;  %2062 = vmatpush.bf16.msrb.mxu3 %v3512_v58 }
  0x2c   :  { %v3495_v62 = vld [vmem:[%s6159_s1 + $0x7a0] sm:$0xf]  ;;  %v4043_v63 = vld [vmem:[%s6159_s1 + $0x7ac] sm:$0xf0]  ;;  %v3368_v4 = vor.u32 %v4011_v61, %v3367_v60  ;;  %2024 = vmatpush.bf16.msrb.mxu0 %v3112_v0 }
  0x2d   :  { %v3095_v1 = vld [vmem:[%s6159_s1 + $0x480] sm:$0xf]  ;;  %v3943_v5 = vld [vmem:[%s6159_s1 + $0x48c] sm:$0xf0]  ;;  %v3496_v7 = vor.u32 %v4043_v63, %v3495_v62  ;;  %2037 = vmatpush.bf16.msrb.mxu1 %v3240_v3 }
  0x2e   :  { %v14_v2 = vld [vmem:[%s6160_s0] sm:$0xff]  ;;  %v3975_v8 = vld [vmem:[%s6159_s1 + $0x58c] sm:$0xf0]  ;;  %v3096_v13 = vor.u32 %v3943_v5, %v3095_v1  ;;  %2050 = vmatpush.bf16.msrb.mxu2 %v3368_v4 }
  0x2f   :  { %v3223_v6 = vld [vmem:[%s6159_s1 + $0x580] sm:$0xf]  ;;  %347 = vst [vmem:[#allocation1] ss:$9 sm:$0xff] %v14_v2  ;;  %v4007_v10 = vld [vmem:[%s6159_s1 + $0x68c] sm:$0xf0]  ;;  %2063 = vmatpush.bf16.msrb.mxu3 %v3496_v7 }
  0x30   :  { %v3351_v9 = vld [vmem:[%s6159_s1 + $0x680] sm:$0xf]  ;;  %v4039_v12 = vld [vmem:[%s6159_s1 + $0x78c] sm:$0xf0]  ;;  %v3224_v14 = vor.u32 %v3975_v8, %v3223_v6  ;;  %2025 = vmatpush.bf16.msrb.mxu0 %v3096_v13 }
  0x31   :  { %v3479_v11 = vld [vmem:[%s6159_s1 + $0x780] sm:$0xf]  ;;  %v3352_v15 = vor.u32 %v4007_v10, %v3351_v9  ;;  %v3939_v17 = vld [vmem:[%s6159_s1 + $0x46c] sm:$0xf0] }
  0x32   :  { %v3079_v16 = vld [vmem:[%s6159_s1 + $0x460] sm:$0xf]  ;;  %v3480_v19 = vor.u32 %v4039_v12, %v3479_v11  ;;  %v3971_v20 = vld [vmem:[%s6159_s1 + $0x56c] sm:$0xf0]  ;;  %2038 = vmatpush.bf16.msrb.mxu1 %v3224_v14  ;;  %v3825_v11 = vld [vmem:[%s6159_s1 + $0xe4] sm:$0xf] }
  0x33   :  { %v3207_v18 = vld [vmem:[%s6159_s1 + $0x560] sm:$0xf]  ;;  %v4003_v22 = vld [vmem:[%s6159_s1 + $0x66c] sm:$0xf0]  ;;  %v3080_v26 = vor.u32 %v3939_v17, %v3079_v16  ;;  %2051 = vmatpush.bf16.msrb.mxu2 %v3352_v15  ;;  %v2633_v12 = vld [vmem:[%s6159_s1 + $0xf0] sm:$0xf0] }
  0x34   :  { %v3335_v21 = vld [vmem:[%s6159_s1 + $0x660] sm:$0xf]  ;;  %v4035_v24 = vld [vmem:[%s6159_s1 + $0x76c] sm:$0xf0]  ;;  %v3208_v30 = vor.u32 %v3971_v20, %v3207_v18  ;;  %2064 = vmatpush.bf16.msrb.mxu3 %v3480_v19  ;;  %v3857_v15 = vld [vmem:[%s6159_s1 + $0x1e4] sm:$0xf]  ;;  %v2636_v20 = vor.u32 %v3825_v11, %v2633_v12 }
  0x35   :  { %v3463_v23 = vld [vmem:[%s6159_s1 + $0x760] sm:$0xf]  ;;  %v3336_v31 = vor.u32 %v4003_v22, %v3335_v21  ;;  %v3935_v32 = vld [vmem:[%s6159_s1 + $0x44c] sm:$0xf0]  ;;  %2026 = vmatpush.bf16.msrb.mxu0 %v3080_v26  ;;  %v2761_v16 = vld [vmem:[%s6159_s1 + $0x1f0] sm:$0xf0] }
  0x36   :  { %v3063_v25 = vld [vmem:[%s6159_s1 + $0x440] sm:$0xf]  ;;  %v4458_v27 = vld [vmem:[#allocation1 + $0x12] sm:$0xff]  ;;  %v4470_v34 = vld [vmem:[#allocation1 + $0x9] sm:$0xff]  ;;  %v3464_v35 = vor.u32 %v4035_v24, %v3463_v23  ;;  %2039 = vmatpush.bf16.msrb.mxu1 %v3208_v30  ;;  %v2764_v24 = vor.u32 %v3857_v15, %v2761_v16 }
  0x37   :  { %v4460_v28 = vld [vmem:[#allocation1] sm:$0xff]  ;;  %v3967_v36 = vld [vmem:[%s6159_s1 + $0x54c] sm:$0xf0]  ;;  %2004 = vmatmul.bf16.vlgmr.msra.gmra.mxu2 %v4458_v27  ;;  %v3064_v41 = vor.u32 %v3935_v32, %v3063_v25  ;;  %1991 = vmatmul.bf16.vlgmr.msra.gmra.mxu1 %v4470_v34  ;;  %v4536_v61 = vld [vmem:[#allocation1 + $0x36] sm:$0xff] }
  0x38   :  { %v4462_v29 = vld [vmem:[#allocation1 + $0x1b] sm:$0xff]  ;;  %v3999_v38 = vld [vmem:[%s6159_s1 + $0x64c] sm:$0xf0]  ;;  %1978 = vmatmul.bf16.vlgmr.msra.gmra.mxu0 %v4460_v28  ;;  %2052 = vmatpush.bf16.msrb.mxu2 %v3336_v31  ;;  %v4538_v0 = vld [vmem:[#allocation1 + $0x24] sm:$0xff] }
  0x39   :  { %v3191_v33 = vld [vmem:[%s6159_s1 + $0x540] sm:$0xf]  ;;  %v4031_v40 = vld [vmem:[%s6159_s1 + $0x74c] sm:$0xf0]  ;;  %2017 = vmatmul.bf16.vlgmr.msra.gmra.mxu3 %v4462_v29  ;;  %2027 = vmatpush.bf16.msrb.mxu0 %v3064_v41  ;;  %v3821_v26 = vld [vmem:[%s6159_s1 + $0xc4] sm:$0xf] }
  0x3a   :  { %v3319_v37 = vld [vmem:[%s6159_s1 + $0x640] sm:$0xf]  ;;  %v3192_v43 = vor.u32 %v3967_v36, %v3191_v33  ;;  %v3931_v46 = vld [vmem:[%s6159_s1 + $0x42c] sm:$0xf0]  ;;  %2065 = vmatpush.bf16.msrb.mxu3 %v3464_v35  ;;  %v2617_v30 = vld [vmem:[%s6159_s1 + $0xd0] sm:$0xf0] }
  0x3b   :  { %v3447_v39 = vld [vmem:[%s6159_s1 + $0x740] sm:$0xf]  ;;  %v3320_v44 = vor.u32 %v3999_v38, %v3319_v37  ;;  %v3963_v48 = vld [vmem:[%s6159_s1 + $0x52c] sm:$0xf0]  ;;  %v3853_v31 = vld [vmem:[%s6159_s1 + $0x1c4] sm:$0xf]  ;;  %v2620_v36 = vor.u32 %v3821_v26, %v2617_v30 }
  0x3c   :  { %v3047_v42 = vld [vmem:[%s6159_s1 + $0x420] sm:$0xf]  ;;  %v3448_v49 = vor.u32 %v4031_v40, %v3447_v39  ;;  %v3995_v51 = vld [vmem:[%s6159_s1 + $0x62c] sm:$0xf0]  ;;  %2040 = vmatpush.bf16.msrb.mxu1 %v3192_v43  ;;  %v2745_v32 = vld [vmem:[%s6159_s1 + $0x1d0] sm:$0xf0] }
  0x3d   :  { %v3175_v47 = vld [vmem:[%s6159_s1 + $0x520] sm:$0xf]  ;;  %v4027_v53 = vld [vmem:[%s6159_s1 + $0x72c] sm:$0xf0]  ;;  %v3048_v56 = vor.u32 %v3931_v46, %v3047_v42  ;;  %2053 = vmatpush.bf16.msrb.mxu2 %v3320_v44  ;;  %v2748_v40 = vor.u32 %v3853_v31, %v2745_v32  ;;  %v3817_v42 = vld [vmem:[%s6159_s1 + $0xa4] sm:$0xf] }
  0x3e   :  { %v3303_v50 = vld [vmem:[%s6159_s1 + $0x620] sm:$0xf]  ;;  %v3927_v55 = vld [vmem:[%s6159_s1 + $0x40c] sm:$0xf0]  ;;  %v3176_v62 = vor.u32 %v3963_v48, %v3175_v47  ;;  %2066 = vmatpush.bf16.msrb.mxu3 %v3448_v49  ;;  %v2601_v43 = vld [vmem:[%s6159_s1 + $0xb0] sm:$0xf0] }
  0x3f   :  { %v3431_v52 = vld [vmem:[%s6159_s1 + $0x720] sm:$0xf]  ;;  %v3959_v58 = vld [vmem:[%s6159_s1 + $0x50c] sm:$0xf0]  ;;  %v3304_v63 = vor.u32 %v3995_v51, %v3303_v50  ;;  %2028 = vmatpush.bf16.msrb.mxu0 %v3048_v56  ;;  %v3849_v44 = vld [vmem:[%s6159_s1 + $0x1a4] sm:$0xf]  ;;  %v2604_v48 = vor.u32 %v3817_v42, %v2601_v43 }
  0x40   :  { %v3031_v54 = vld [vmem:[%s6159_s1 + $0x400] sm:$0xf]  ;;  %v3991_v60 = vld [vmem:[%s6159_s1 + $0x60c] sm:$0xf0]  ;;  %v3432_v3 = vor.u32 %v4027_v53, %v3431_v52  ;;  %2041 = vmatpush.bf16.msrb.mxu1 %v3176_v62  ;;  %v3845_v56 = vld [vmem:[%s6159_s1 + $0x184] sm:$0xf] }
  0x41   :  { %v3159_v57 = vld [vmem:[%s6159_s1 + $0x500] sm:$0xf]  ;;  %v4542_v2 = vld [vmem:[#allocation1 + $0x2d] sm:$0xff]  ;;  %v3032_v9 = vor.u32 %v3927_v55, %v3031_v54  ;;  %2054 = vmatpush.bf16.msrb.mxu2 %v3304_v63  ;;  %v3813_v54 = vld [vmem:[%s6159_s1 + $0x84] sm:$0xf] }
  0x42   :  { %v3287_v59 = vld [vmem:[%s6159_s1 + $0x600] sm:$0xf]  ;;  %v4023_v5 = vld [vmem:[%s6159_s1 + $0x70c] sm:$0xf0]  ;;  %v3160_v13 = vor.u32 %v3959_v58, %v3159_v57  ;;  %2067 = vmatpush.bf16.msrb.mxu3 %v3432_v3  ;;  %v2585_v55 = vld [vmem:[%s6159_s1 + $0x90] sm:$0xf0] }
  0x43   :  { %v4540_v1 = vld [vmem:[#allocation1 + $0x3f] sm:$0xff]  ;;  %v4083_v7 = vld [vmem:[%s6159_s1 + $0x8ec] sm:$0xf0]  ;;  %v3288_v14 = vor.u32 %v3991_v60, %v3287_v59  ;;  %2029 = vmatpush.bf16.msrb.mxu0 %v3032_v9  ;;  %v2713_v57 = vld [vmem:[%s6159_s1 + $0x190] sm:$0xf0]  ;;  %v2588_v60 = vor.u32 %v3813_v54, %v2585_v55 }
  0x44   :  { %v3415_v4 = vld [vmem:[%s6159_s1 + $0x700] sm:$0xf]  ;;  %357 = vst [vmem:[#allocation1] ss:$9 sm:$0xff] %v15_v45  ;;  %v4115_v10 = vld [vmem:[%s6159_s1 + $0x9ec] sm:$0xf0]  ;;  %2042 = vmatpush.bf16.msrb.mxu1 %v3160_v13 }
  0x45   :  { %v3655_v6 = vld [vmem:[%s6159_s1 + $0x8e0] sm:$0xf]  ;;  %v3416_v17 = vor.u32 %v4023_v5, %v3415_v4  ;;  %v4079_v22 = vld [vmem:[%s6159_s1 + $0x8cc] sm:$0xf0]  ;;  %2055 = vmatpush.bf16.msrb.mxu2 %v3288_v14  ;;  %v2729_v45 = vld [vmem:[%s6159_s1 + $0x1b0] sm:$0xf0]  ;;  %v2716_v4 = vor.u32 %v3845_v56, %v2713_v57 }
  0x46   :  { %v3783_v8 = vld [vmem:[%s6159_s1 + $0x9e0] sm:$0xf]  ;;  %v3656_v18 = vor.u32 %v4083_v7, %v3655_v6  ;;  %v4111_v25 = vld [vmem:[%s6159_s1 + $0x9cc] sm:$0xf0]  ;;  %v2732_v52 = vor.u32 %v3849_v44, %v2729_v45  ;;  %v3809_v6 = vld [vmem:[%s6159_s1 + $0x64] sm:$0xf] }
  0x47   :  { %v3784_v19 = vor.u32 %v4115_v10, %v3783_v8  ;;  %v3639_v21 = vld [vmem:[%s6159_s1 + $0x8c0] sm:$0xf]  ;;  %2068 = vmatpush.bf16.msrb.mxu3 %v3416_v17  ;;  %v4075_v38 = vld [vmem:[%s6159_s1 + $0x8ac] sm:$0xf0]  ;;  %2043 = vmatmul.bf16.vlgmr.msrb.gmra.mxu1 %v4542_v2  ;;  %v2569_v7 = vld [vmem:[%s6159_s1 + $0x70] sm:$0xf0] }
  0x48   :  { %v3767_v23 = vld [vmem:[%s6159_s1 + $0x9c0] sm:$0xf]  ;;  %2074 = vmatpush.bf16.msra.mxu0 %v3656_v18  ;;  %v3640_v33 = vor.u32 %v4079_v22, %v3639_v21  ;;  %2056 = vmatmul.bf16.vlgmr.msrb.gmra.mxu2 %v4536_v61  ;;  %v4107_v41 = vld [vmem:[%s6159_s1 + $0x9ac] sm:$0xf0]  ;;  %v3841_v8 = vld [vmem:[%s6159_s1 + $0x164] sm:$0xf]  ;;  %v2572_v12 = vor.u32 %v3809_v6, %v2569_v7 }
  0x49   :  { %2087 = vmatpush.bf16.msra.mxu1 %v3784_v19  ;;  %2100 = vmatpush.bf16.msra.mxu2 %v2636_v20  ;;  %v3768_v35 = vor.u32 %v4111_v25, %v3767_v23  ;;  %v3623_v37 = vld [vmem:[%s6159_s1 + $0x8a0] sm:$0xf]  ;;  %v4071_v50 = vld [vmem:[%s6159_s1 + $0x88c] sm:$0xf0]  ;;  %v2697_v9 = vld [vmem:[%s6159_s1 + $0x170] sm:$0xf0] }
  0x4a   :  { %v3751_v39 = vld [vmem:[%s6159_s1 + $0x9a0] sm:$0xf]  ;;  %2030 = vmatmul.bf16.vlgmr.msrb.gmra.mxu0 %v4538_v0  ;;  %2069 = vmatmul.bf16.vlgmr.msrb.gmra.mxu3 %v4540_v1  ;;  %v3624_v46 = vor.u32 %v4075_v38, %v3623_v37  ;;  %v4103_v53 = vld [vmem:[%s6159_s1 + $0x98c] sm:$0xf0]  ;;  %v2700_v16 = vor.u32 %v3841_v8, %v2697_v9  ;;  %v3805_v18 = vld [vmem:[%s6159_s1 + $0x44] sm:$0xf] }
  0x4b   :  { %2113 = vmatpush.bf16.msra.mxu3 %v2764_v24  ;;  %v3752_v47 = vor.u32 %v4107_v41, %v3751_v39  ;;  %v3607_v49 = vld [vmem:[%s6159_s1 + $0x880] sm:$0xf]  ;;  %v4067_v63 = vld [vmem:[%s6159_s1 + $0x86c] sm:$0xf0]  ;;  %v2553_v19 = vld [vmem:[%s6159_s1 + $0x50] sm:$0xf0] }
  0x4c   :  { %2075 = vmatpush.bf16.msra.mxu0 %v3640_v33  ;;  %v3735_v51 = vld [vmem:[%s6159_s1 + $0x980] sm:$0xf]  ;;  %v3608_v58 = vor.u32 %v4071_v50, %v3607_v49  ;;  %v4099_v5 = vld [vmem:[%s6159_s1 + $0x96c] sm:$0xf0]  ;;  %v3837_v20 = vld [vmem:[%s6159_s1 + $0x144] sm:$0xf]  ;;  %v2556_v24 = vor.u32 %v3805_v18, %v2553_v19 }
  0x4d   :  { %2088 = vmatpush.bf16.msra.mxu1 %v3768_v35  ;;  %2101 = vmatpush.bf16.msra.mxu2 %v2620_v36  ;;  %v3736_v59 = vor.u32 %v4103_v53, %v3735_v51  ;;  %v3591_v62 = vld [vmem:[%s6159_s1 + $0x860] sm:$0xf]  ;;  %v4063_v14 = vld [vmem:[%s6159_s1 + $0x84c] sm:$0xf0]  ;;  %v2681_v21 = vld [vmem:[%s6159_s1 + $0x150] sm:$0xf0] }
  0x4e   :  { %v3719_v3 = vld [vmem:[%s6159_s1 + $0x960] sm:$0xf]  ;;  %v3592_v10 = vor.u32 %v4067_v63, %v3591_v62  ;;  %v4095_v17 = vld [vmem:[%s6159_s1 + $0x94c] sm:$0xf0]  ;;  %v2684_v31 = vor.u32 %v3837_v20, %v2681_v21  ;;  %v3801_v33 = vld [vmem:[%s6159_s1 + $0x24] sm:$0xf] }
  0x4f   :  { %2114 = vmatpush.bf16.msra.mxu3 %v2748_v40  ;;  %v3720_v11 = vor.u32 %v4099_v5, %v3719_v3  ;;  %v3575_v13 = vld [vmem:[%s6159_s1 + $0x840] sm:$0xf]  ;;  %v4059_v26 = vld [vmem:[%s6159_s1 + $0x82c] sm:$0xf0]  ;;  %v2537_v35 = vld [vmem:[%s6159_s1 + $0x30] sm:$0xf0] }
  0x50   :  { %2076 = vmatpush.bf16.msra.mxu0 %v3624_v46  ;;  %v3703_v15 = vld [vmem:[%s6159_s1 + $0x940] sm:$0xf]  ;;  %v3576_v22 = vor.u32 %v4063_v14, %v3575_v13  ;;  %v4091_v32 = vld [vmem:[%s6159_s1 + $0x92c] sm:$0xf0]  ;;  %v3833_v36 = vld [vmem:[%s6159_s1 + $0x124] sm:$0xf]  ;;  %v2540_v42 = vor.u32 %v3801_v33, %v2537_v35 }
  0x51   :  { %2089 = vmatpush.bf16.msra.mxu1 %v3752_v47  ;;  %2102 = vmatpush.bf16.msra.mxu2 %v2604_v48  ;;  %v3704_v23 = vor.u32 %v4095_v17, %v3703_v15  ;;  %v3559_v25 = vld [vmem:[%s6159_s1 + $0x820] sm:$0xf]  ;;  %v2665_v37 = vld [vmem:[%s6159_s1 + $0x130] sm:$0xf0]  ;;  %v4055_v40 = vld [vmem:[%s6159_s1 + $0x80c] sm:$0xf0] }
  0x52   :  { %v3687_v30 = vld [vmem:[%s6159_s1 + $0x920] sm:$0xf]  ;;  %v3560_v38 = vor.u32 %v4059_v26, %v3559_v25  ;;  %v4087_v44 = vld [vmem:[%s6159_s1 + $0x90c] sm:$0xf0]  ;;  %v3797_v45 = vld [vmem:[%s6159_s1 + $0x4] sm:$0xf]  ;;  %v2668_v46 = vor.u32 %v3833_v36, %v2665_v37 }
  0x53   :  { %2115 = vmatpush.bf16.msra.mxu3 %v2732_v52  ;;  %v3543_v39 = vld [vmem:[%s6159_s1 + $0x800] sm:$0xf]  ;;  %v3688_v41 = vor.u32 %v4091_v32, %v3687_v30  ;;  %v2521_v47 = vld [vmem:[%s6159_s1 + $0x10] sm:$0xf0]  ;;  %v3829_v48 = vld [vmem:[%s6159_s1 + $0x104] sm:$0xf] }
  0x54   :  { %2077 = vmatpush.bf16.msra.mxu0 %v3608_v58  ;;  %v3671_v43 = vld [vmem:[%s6159_s1 + $0x900] sm:$0xf]  ;;  %v2649_v49 = vld [vmem:[%s6159_s1 + $0x110] sm:$0xf0]  ;;  %v3889_v50 = vld [vmem:[%s6159_s1 + $0x2e4] sm:$0xf]  ;;  %v3544_v53 = vor.u32 %v4055_v40, %v3543_v39  ;;  %v2524_v58 = vor.u32 %v3797_v45, %v2521_v47 }
  0x55   :  { %2090 = vmatpush.bf16.msra.mxu1 %v3736_v59  ;;  %2103 = vmatpush.bf16.msra.mxu2 %v2588_v60  ;;  %v2889_v51 = vld [vmem:[%s6159_s1 + $0x2f0] sm:$0xf0]  ;;  %v3921_v52 = vld [vmem:[%s6159_s1 + $0x3e4] sm:$0xf]  ;;  %v3672_v57 = vor.u32 %v4087_v44, %v3671_v43  ;;  %v2652_v62 = vor.u32 %v3829_v48, %v2649_v49  ;;  %v4796_v15 = vld [vmem:[#allocation1 + $0x9] sm:$0xff] }
  0x56   :  { %v3017_v54 = vld [vmem:[%s6159_s1 + $0x3f0] sm:$0xf0]  ;;  %v3953_v55 = vld [vmem:[%s6159_s1 + $0x4e4] sm:$0xf]  ;;  %v2892_v63 = vor.u32 %v3889_v50, %v2889_v51 }
  0x57   :  { %2116 = vmatpush.bf16.msra.mxu3 %v2716_v4  ;;  %v3145_v56 = vld [vmem:[%s6159_s1 + $0x4f0] sm:$0xf0]  ;;  %v3985_v59 = vld [vmem:[%s6159_s1 + $0x5e4] sm:$0xf]  ;;  %v3020_v3 = vor.u32 %v3921_v52, %v3017_v54 }
  0x58   :  { %2078 = vmatpush.bf16.msra.mxu0 %v3592_v10  ;;  %v3273_v60 = vld [vmem:[%s6159_s1 + $0x5f0] sm:$0xf0]  ;;  %v3148_v4 = vor.u32 %v3953_v55, %v3145_v56  ;;  %v3885_v5 = vld [vmem:[%s6159_s1 + $0x2c4] sm:$0xf] }
  0x59   :  { %2091 = vmatpush.bf16.msra.mxu1 %v3720_v11  ;;  %2104 = vmatpush.bf16.msra.mxu2 %v2572_v12  ;;  %v2873_v6 = vld [vmem:[%s6159_s1 + $0x2d0] sm:$0xf0]  ;;  %v3917_v7 = vld [vmem:[%s6159_s1 + $0x3c4] sm:$0xf]  ;;  %v3276_v8 = vor.u32 %v3985_v59, %v3273_v60 }
  0x5a   :  { %v3001_v9 = vld [vmem:[%s6159_s1 + $0x3d0] sm:$0xf0]  ;;  %v3949_v10 = vld [vmem:[%s6159_s1 + $0x4c4] sm:$0xf] }
  0x5b   :  { %2117 = vmatpush.bf16.msra.mxu3 %v2700_v16  ;;  %v3129_v11 = vld [vmem:[%s6159_s1 + $0x4d0] sm:$0xf0]  ;;  %v4788_v12 = vld [vmem:[#allocation1] sm:$0xff]  ;;  %v2876_v16 = vor.u32 %v3885_v5, %v2873_v6  ;;  %v3004_v17 = vor.u32 %v3917_v7, %v3001_v9 }
  0x5c   :  { %2079 = vmatpush.bf16.msra.mxu0 %v3576_v22  ;;  %v3981_v13 = vld [vmem:[%s6159_s1 + $0x5c4] sm:$0xf]  ;;  %v3257_v14 = vld [vmem:[%s6159_s1 + $0x5d0] sm:$0xf0]  ;;  %v3132_v18 = vor.u32 %v3949_v10, %v3129_v11 }
  0x5d   :  { %2092 = vmatpush.bf16.msra.mxu1 %v3704_v23  ;;  %2105 = vmatpush.bf16.msra.mxu2 %v2556_v24  ;;  %v3881_v19 = vld [vmem:[%s6159_s1 + $0x2a4] sm:$0xf]  ;;  %v2857_v20 = vld [vmem:[%s6159_s1 + $0x2b0] sm:$0xf0]  ;;  %v3260_v22 = vor.u32 %v3981_v13, %v3257_v14 }
  0x5e   :  { %v3913_v21 = vld [vmem:[%s6159_s1 + $0x3a4] sm:$0xf]  ;;  %v2985_v23 = vld [vmem:[%s6159_s1 + $0x3b0] sm:$0xf0] }
  0x5f   :  { %2118 = vmatpush.bf16.msra.mxu3 %v2684_v31  ;;  %v3945_v24 = vld [vmem:[%s6159_s1 + $0x4a4] sm:$0xf]  ;;  %v3113_v25 = vld [vmem:[%s6159_s1 + $0x4b0] sm:$0xf0]  ;;  %v2860_v31 = vor.u32 %v3881_v19, %v2857_v20  ;;  %v2988_v32 = vor.u32 %v3913_v21, %v2985_v23 }
  0x60   :  { %2080 = vmatpush.bf16.msra.mxu0 %v3560_v38  ;;  %v3977_v26 = vld [vmem:[%s6159_s1 + $0x5a4] sm:$0xf]  ;;  %v3241_v30 = vld [vmem:[%s6159_s1 + $0x5b0] sm:$0xf0]  ;;  %v3116_v33 = vor.u32 %v3945_v24, %v3113_v25 }
  0x61   :  { %2093 = vmatpush.bf16.msra.mxu1 %v3688_v41  ;;  %2106 = vmatpush.bf16.msra.mxu2 %v2540_v42  ;;  %v3877_v35 = vld [vmem:[%s6159_s1 + $0x284] sm:$0xf]  ;;  %v2841_v36 = vld [vmem:[%s6159_s1 + $0x290] sm:$0xf0]  ;;  %v3244_v38 = vor.u32 %v3977_v26, %v3241_v30 }
  0x62   :  { %v3909_v37 = vld [vmem:[%s6159_s1 + $0x384] sm:$0xf]  ;;  %v2969_v39 = vld [vmem:[%s6159_s1 + $0x390] sm:$0xf0]  ;;  %v2844_v44 = vor.u32 %v3877_v35, %v2841_v36 }
  0x63   :  { %2119 = vmatpush.bf16.msra.mxu3 %v2668_v46  ;;  %v3941_v40 = vld [vmem:[%s6159_s1 + $0x484] sm:$0xf]  ;;  %v3097_v41 = vld [vmem:[%s6159_s1 + $0x490] sm:$0xf0]  ;;  %v2972_v45 = vor.u32 %v3909_v37, %v2969_v39 }
  0x64   :  { %2081 = vmatpush.bf16.msra.mxu0 %v3544_v53  ;;  %v3973_v42 = vld [vmem:[%s6159_s1 + $0x584] sm:$0xf]  ;;  %v3225_v43 = vld [vmem:[%s6159_s1 + $0x590] sm:$0xf0]  ;;  %v3100_v46 = vor.u32 %v3941_v40, %v3097_v41 }
  0x65   :  { %2094 = vmatpush.bf16.msra.mxu1 %v3672_v57  ;;  %2107 = vmatpush.bf16.msra.mxu2 %v2524_v58  ;;  %v3873_v47 = vld [vmem:[%s6159_s1 + $0x264] sm:$0xf]  ;;  %v2825_v48 = vld [vmem:[%s6159_s1 + $0x270] sm:$0xf0]  ;;  %v3228_v50 = vor.u32 %v3973_v42, %v3225_v43 }
  0x66   :  { %v3905_v49 = vld [vmem:[%s6159_s1 + $0x364] sm:$0xf]  ;;  %v2953_v51 = vld [vmem:[%s6159_s1 + $0x370] sm:$0xf0]  ;;  %v2828_v56 = vor.u32 %v3873_v47, %v2825_v48 }
  0x67   :  { %2120 = vmatpush.bf16.msra.mxu3 %v2652_v62  ;;  %2082 = vmatmul.bf16.vlgmr.msra.gmra.mxu0 %v4788_v12  ;;  %v3937_v52 = vld [vmem:[%s6159_s1 + $0x464] sm:$0xf]  ;;  %v3081_v53 = vld [vmem:[%s6159_s1 + $0x470] sm:$0xf0]  ;;  %v2956_v57 = vor.u32 %v3905_v49, %v2953_v51 }
  0x68   :  { %2126 = vmatpush.bf16.msrb.mxu0 %v2892_v63  ;;  %2095 = vmatmul.bf16.vlgmr.msra.gmra.mxu1 %v4796_v15  ;;  %v3969_v54 = vld [vmem:[%s6159_s1 + $0x564] sm:$0xf]  ;;  %v3209_v55 = vld [vmem:[%s6159_s1 + $0x570] sm:$0xf0]  ;;  %v3084_v58 = vor.u32 %v3937_v52, %v3081_v53 }
  0x69   :  { %2139 = vmatpush.bf16.msrb.mxu1 %v3020_v3  ;;  %2152 = vmatpush.bf16.msrb.mxu2 %v3148_v4  ;;  %v3869_v59 = vld [vmem:[%s6159_s1 + $0x244] sm:$0xf]  ;;  %v2809_v60 = vld [vmem:[%s6159_s1 + $0x250] sm:$0xf0]  ;;  %v3212_v63 = vor.u32 %v3969_v54, %v3209_v55 }
  0x6a   :  { %2108 = vmatmul.bf16.vlgmr.msra.gmra.mxu2 %v4460_v28  ;;  %2121 = vmatmul.bf16.vlgmr.msra.gmra.mxu3 %v4470_v34  ;;  %v3901_v62 = vld [vmem:[%s6159_s1 + $0x344] sm:$0xf]  ;;  %v2937_v3 = vld [vmem:[%s6159_s1 + $0x350] sm:$0xf0] }
  0x6b   :  { %2165 = vmatpush.bf16.msrb.mxu3 %v3276_v8  ;;  %v3933_v4 = vld [vmem:[%s6159_s1 + $0x444] sm:$0xf]  ;;  %v3065_v5 = vld [vmem:[%s6159_s1 + $0x450] sm:$0xf0]  ;;  %v2812_v8 = vor.u32 %v3869_v59, %v2809_v60  ;;  %v2940_v9 = vor.u32 %v3901_v62, %v2937_v3 }
  0x6c   :  { %2127 = vmatpush.bf16.msrb.mxu0 %v2876_v16  ;;  %v3965_v6 = vld [vmem:[%s6159_s1 + $0x544] sm:$0xf]  ;;  %v3193_v7 = vld [vmem:[%s6159_s1 + $0x550] sm:$0xf0]  ;;  %v3068_v10 = vor.u32 %v3933_v4, %v3065_v5 }
  0x6d   :  { %2140 = vmatpush.bf16.msrb.mxu1 %v3004_v17  ;;  %2153 = vmatpush.bf16.msrb.mxu2 %v3132_v18  ;;  %v3865_v11 = vld [vmem:[%s6159_s1 + $0x224] sm:$0xf]  ;;  %v2793_v13 = vld [vmem:[%s6159_s1 + $0x230] sm:$0xf0]  ;;  %v3196_v16 = vor.u32 %v3965_v6, %v3193_v7 }
  0x6e   :  { %v3897_v14 = vld [vmem:[%s6159_s1 + $0x324] sm:$0xf]  ;;  %v2921_v17 = vld [vmem:[%s6159_s1 + $0x330] sm:$0xf0] }
  0x6f   :  { %2166 = vmatpush.bf16.msrb.mxu3 %v3260_v22  ;;  %v3929_v18 = vld [vmem:[%s6159_s1 + $0x424] sm:$0xf]  ;;  %v3049_v19 = vld [vmem:[%s6159_s1 + $0x430] sm:$0xf0]  ;;  %v2796_v22 = vor.u32 %v3865_v11, %v2793_v13  ;;  %v2924_v25 = vor.u32 %v3897_v14, %v2921_v17 }
  0x70   :  { %2128 = vmatpush.bf16.msrb.mxu0 %v2860_v31  ;;  %v3961_v20 = vld [vmem:[%s6159_s1 + $0x524] sm:$0xf]  ;;  %v3177_v21 = vld [vmem:[%s6159_s1 + $0x530] sm:$0xf0]  ;;  %v3052_v26 = vor.u32 %v3929_v18, %v3049_v19 }
  0x71   :  { %2141 = vmatpush.bf16.msrb.mxu1 %v2988_v32  ;;  %2154 = vmatpush.bf16.msrb.mxu2 %v3116_v33  ;;  %v3861_v23 = vld [vmem:[%s6159_s1 + $0x204] sm:$0xf]  ;;  %v2777_v24 = vld [vmem:[%s6159_s1 + $0x210] sm:$0xf0]  ;;  %v3180_v33 = vor.u32 %v3961_v20, %v3177_v21 }
  0x72   :  { %v3893_v30 = vld [vmem:[%s6159_s1 + $0x304] sm:$0xf]  ;;  %v2905_v31 = vld [vmem:[%s6159_s1 + $0x310] sm:$0xf0]  ;;  %v2780_v41 = vor.u32 %v3861_v23, %v2777_v24 }
  0x73   :  { %2167 = vmatpush.bf16.msrb.mxu3 %v3244_v38  ;;  %v3925_v32 = vld [vmem:[%s6159_s1 + $0x404] sm:$0xf]  ;;  %v3033_v35 = vld [vmem:[%s6159_s1 + $0x410] sm:$0xf0] }
  0x74   :  { %2129 = vmatpush.bf16.msrb.mxu0 %v2844_v44  ;;  %v3957_v36 = vld [vmem:[%s6159_s1 + $0x504] sm:$0xf]  ;;  %v3161_v37 = vld [vmem:[%s6159_s1 + $0x510] sm:$0xf0] }
  0x75   :  { %2142 = vmatpush.bf16.msrb.mxu1 %v2972_v45  ;;  %2155 = vmatpush.bf16.msrb.mxu2 %v3100_v46  ;;  %v4017_v38 = vld [vmem:[%s6159_s1 + $0x6e4] sm:$0xf]  ;;  %v3401_v39 = vld [vmem:[%s6159_s1 + $0x6f0] sm:$0xf0]  ;;  %v2908_v45 = vor.u32 %v3893_v30, %v2905_v31  ;;  %v3036_v46 = vor.u32 %v3925_v32, %v3033_v35  ;;  %v3164_v49 = vor.u32 %v3957_v36, %v3161_v37 }
  0x76   :  { %v4049_v40 = vld [vmem:[%s6159_s1 + $0x7e4] sm:$0xf]  ;;  %v3529_v42 = vld [vmem:[%s6159_s1 + $0x7f0] sm:$0xf0] }
  0x77   :  { %2168 = vmatpush.bf16.msrb.mxu3 %v3228_v50  ;;  %v4081_v43 = vld [vmem:[%s6159_s1 + $0x8e4] sm:$0xf]  ;;  %v3657_v44 = vld [vmem:[%s6159_s1 + $0x8f0] sm:$0xf0]  ;;  %v3404_v50 = vor.u32 %v4017_v38, %v3401_v39  ;;  %v3532_v51 = vor.u32 %v4049_v40, %v3529_v42 }
  0x78   :  { %2130 = vmatpush.bf16.msrb.mxu0 %v2828_v56  ;;  %v4113_v47 = vld [vmem:[%s6159_s1 + $0x9e4] sm:$0xf]  ;;  %v3785_v48 = vld [vmem:[%s6159_s1 + $0x9f0] sm:$0xf0]  ;;  %v3660_v52 = vor.u32 %v4081_v43, %v3657_v44 }
  0x79   :  { %2143 = vmatpush.bf16.msrb.mxu1 %v2956_v57  ;;  %2156 = vmatpush.bf16.msrb.mxu2 %v3084_v58  ;;  %v4013_v53 = vld [vmem:[%s6159_s1 + $0x6c4] sm:$0xf]  ;;  %v3385_v54 = vld [vmem:[%s6159_s1 + $0x6d0] sm:$0xf0]  ;;  %v3788_v56 = vor.u32 %v4113_v47, %v3785_v48 }
  0x7a   :  { %v4045_v55 = vld [vmem:[%s6159_s1 + $0x7c4] sm:$0xf]  ;;  %v3513_v57 = vld [vmem:[%s6159_s1 + $0x7d0] sm:$0xf0] }
  0x7b   :  { %2169 = vmatpush.bf16.msrb.mxu3 %v3212_v63  ;;  %v4077_v58 = vld [vmem:[%s6159_s1 + $0x8c4] sm:$0xf]  ;;  %v3641_v59 = vld [vmem:[%s6159_s1 + $0x8d0] sm:$0xf0]  ;;  %v3388_v63 = vor.u32 %v4013_v53, %v3385_v54  ;;  %v3516_v3 = vor.u32 %v4045_v55, %v3513_v57 }
  0x7c   :  { %2131 = vmatpush.bf16.msrb.mxu0 %v2812_v8  ;;  %v4109_v60 = vld [vmem:[%s6159_s1 + $0x9c4] sm:$0xf]  ;;  %v3769_v62 = vld [vmem:[%s6159_s1 + $0x9d0] sm:$0xf0]  ;;  %v3644_v4 = vor.u32 %v4077_v58, %v3641_v59 }
  0x7d   :  { %2144 = vmatpush.bf16.msrb.mxu1 %v2940_v9  ;;  %2157 = vmatpush.bf16.msrb.mxu2 %v3068_v10  ;;  %v4009_v5 = vld [vmem:[%s6159_s1 + $0x6a4] sm:$0xf]  ;;  %v3369_v6 = vld [vmem:[%s6159_s1 + $0x6b0] sm:$0xf0]  ;;  %v3772_v8 = vor.u32 %v4109_v60, %v3769_v62 }
  0x7e   :  { %v4041_v7 = vld [vmem:[%s6159_s1 + $0x7a4] sm:$0xf]  ;;  %v3497_v9 = vld [vmem:[%s6159_s1 + $0x7b0] sm:$0xf0] }
  0x7f   :  { %2170 = vmatpush.bf16.msrb.mxu3 %v3196_v16  ;;  %v4073_v10 = vld [vmem:[%s6159_s1 + $0x8a4] sm:$0xf]  ;;  %v3625_v11 = vld [vmem:[%s6159_s1 + $0x8b0] sm:$0xf0]  ;;  %v3372_v16 = vor.u32 %v4009_v5, %v3369_v6  ;;  %v3500_v17 = vor.u32 %v4041_v7, %v3497_v9 }
  0x80   :  { %2132 = vmatpush.bf16.msrb.mxu0 %v2796_v22  ;;  %v4105_v13 = vld [vmem:[%s6159_s1 + $0x9a4] sm:$0xf]  ;;  %v3753_v14 = vld [vmem:[%s6159_s1 + $0x9b0] sm:$0xf0]  ;;  %v3628_v18 = vor.u32 %v4073_v10, %v3625_v11 }
  0x81   :  { %2145 = vmatpush.bf16.msrb.mxu1 %v2924_v25  ;;  %2158 = vmatpush.bf16.msrb.mxu2 %v3052_v26  ;;  %v4005_v19 = vld [vmem:[%s6159_s1 + $0x684] sm:$0xf]  ;;  %v3353_v20 = vld [vmem:[%s6159_s1 + $0x690] sm:$0xf0]  ;;  %v3756_v22 = vor.u32 %v4105_v13, %v3753_v14 }
  0x82   :  { %v4037_v21 = vld [vmem:[%s6159_s1 + $0x784] sm:$0xf]  ;;  %v3481_v23 = vld [vmem:[%s6159_s1 + $0x790] sm:$0xf0]  ;;  %v3356_v31 = vor.u32 %v4005_v19, %v3353_v20 }
  0x83   :  { %2171 = vmatpush.bf16.msrb.mxu3 %v3180_v33  ;;  %v4069_v24 = vld [vmem:[%s6159_s1 + $0x884] sm:$0xf]  ;;  %v3609_v25 = vld [vmem:[%s6159_s1 + $0x890] sm:$0xf0]  ;;  %v3484_v32 = vor.u32 %v4037_v21, %v3481_v23  ;;  %v3828_v23 = vld [vmem:[%s6159_s1 + $0xf4] sm:$0xf0] }
  0x84   :  { %2133 = vmatpush.bf16.msrb.mxu0 %v2780_v41  ;;  %v4101_v26 = vld [vmem:[%s6159_s1 + $0x984] sm:$0xf]  ;;  %v3737_v30 = vld [vmem:[%s6159_s1 + $0x990] sm:$0xf0]  ;;  %v3612_v33 = vor.u32 %v4069_v24, %v3609_v25  ;;  %v2767_v24 = vld [vmem:[%s6159_s1 + $0x1e8] sm:$0xf] }
  0x85   :  { %2146 = vmatpush.bf16.msrb.mxu1 %v2908_v45  ;;  %2159 = vmatpush.bf16.msrb.mxu2 %v3036_v46  ;;  %v4001_v35 = vld [vmem:[%s6159_s1 + $0x664] sm:$0xf]  ;;  %v3337_v36 = vld [vmem:[%s6159_s1 + $0x670] sm:$0xf0]  ;;  %v3740_v38 = vor.u32 %v4101_v26, %v3737_v30  ;;  %v3860_v26 = vld [vmem:[%s6159_s1 + $0x1f4] sm:$0xf0] }
  0x86   :  { %v4033_v37 = vld [vmem:[%s6159_s1 + $0x764] sm:$0xf]  ;;  %v3465_v39 = vld [vmem:[%s6159_s1 + $0x770] sm:$0xf0]  ;;  %v3340_v44 = vor.u32 %v4001_v35, %v3337_v36  ;;  %v2895_v30 = vld [vmem:[%s6159_s1 + $0x2e8] sm:$0xf] }
  0x87   :  { %2172 = vmatpush.bf16.msrb.mxu3 %v3164_v49  ;;  %2134 = vmatmul.bf16.vlgmr.msrb.gmra.mxu0 %v4458_v27  ;;  %v4065_v40 = vld [vmem:[%s6159_s1 + $0x864] sm:$0xf]  ;;  %v3593_v41 = vld [vmem:[%s6159_s1 + $0x870] sm:$0xf0]  ;;  %v3468_v45 = vor.u32 %v4033_v37, %v3465_v39  ;;  %v3023_v35 = vld [vmem:[%s6159_s1 + $0x3e8] sm:$0xf]  ;;  %v2768_v39 = vor.u32 %v3860_v26, %v2767_v24 }
  0x88   :  { %2178 = vmatpush.bf16.msra.mxu0 %v3404_v50  ;;  %2160 = vmatmul.bf16.vlgmr.msrb.gmra.mxu2 %v4538_v0  ;;  %v4097_v42 = vld [vmem:[%s6159_s1 + $0x964] sm:$0xf]  ;;  %v3721_v43 = vld [vmem:[%s6159_s1 + $0x970] sm:$0xf0]  ;;  %v3596_v46 = vor.u32 %v4065_v40, %v3593_v41  ;;  %v3924_v36 = vld [vmem:[%s6159_s1 + $0x3f4] sm:$0xf0] }
  0x89   :  { %2191 = vmatpush.bf16.msra.mxu1 %v3532_v51  ;;  %2204 = vmatpush.bf16.msra.mxu2 %v3660_v52  ;;  %v3997_v47 = vld [vmem:[%s6159_s1 + $0x644] sm:$0xf]  ;;  %v3321_v48 = vld [vmem:[%s6159_s1 + $0x650] sm:$0xf0]  ;;  %v3724_v50 = vor.u32 %v4097_v42, %v3721_v43  ;;  %v2623_v41 = vld [vmem:[%s6159_s1 + $0xc8] sm:$0xf] }
  0x8a   :  { %2173 = vmatmul.bf16.vlgmr.msrb.gmra.mxu3 %v4542_v2  ;;  %2147 = vmatmul.bf16.vlgmr.msrb.gmra.mxu1 %v4462_v29  ;;  %v4029_v49 = vld [vmem:[%s6159_s1 + $0x744] sm:$0xf]  ;;  %v3449_v51 = vld [vmem:[%s6159_s1 + $0x750] sm:$0xf0]  ;;  %v3824_v42 = vld [vmem:[%s6159_s1 + $0xd4] sm:$0xf0] }
  0x8b   :  { %2217 = vmatpush.bf16.msra.mxu3 %v3788_v56  ;;  %v4061_v52 = vld [vmem:[%s6159_s1 + $0x844] sm:$0xf]  ;;  %v3577_v53 = vld [vmem:[%s6159_s1 + $0x850] sm:$0xf0]  ;;  %v3324_v56 = vor.u32 %v3997_v47, %v3321_v48  ;;  %v3452_v57 = vor.u32 %v4029_v49, %v3449_v51  ;;  %v2751_v43 = vld [vmem:[%s6159_s1 + $0x1c8] sm:$0xf] }
  0x8c   :  { %2179 = vmatpush.bf16.msra.mxu0 %v3388_v63  ;;  %v4093_v54 = vld [vmem:[%s6159_s1 + $0x944] sm:$0xf]  ;;  %v3705_v55 = vld [vmem:[%s6159_s1 + $0x950] sm:$0xf0]  ;;  %v3580_v58 = vor.u32 %v4061_v52, %v3577_v53  ;;  %v3888_v47 = vld [vmem:[%s6159_s1 + $0x2d4] sm:$0xf0] }
  0x8d   :  { %2192 = vmatpush.bf16.msra.mxu1 %v3516_v3  ;;  %2205 = vmatpush.bf16.msra.mxu2 %v3644_v4  ;;  %v3993_v59 = vld [vmem:[%s6159_s1 + $0x624] sm:$0xf]  ;;  %v3305_v60 = vld [vmem:[%s6159_s1 + $0x630] sm:$0xf0]  ;;  %v3708_v63 = vor.u32 %v4093_v54, %v3705_v55  ;;  %v3007_v48 = vld [vmem:[%s6159_s1 + $0x3c8] sm:$0xf] }
  0x8e   :  { %v4025_v62 = vld [vmem:[%s6159_s1 + $0x724] sm:$0xf]  ;;  %v3433_v3 = vld [vmem:[%s6159_s1 + $0x730] sm:$0xf0]  ;;  %v3920_v49 = vld [vmem:[%s6159_s1 + $0x3d4] sm:$0xf0] }
  0x8f   :  { %2218 = vmatpush.bf16.msra.mxu3 %v3772_v8  ;;  %v4057_v4 = vld [vmem:[%s6159_s1 + $0x824] sm:$0xf]  ;;  %v3561_v5 = vld [vmem:[%s6159_s1 + $0x830] sm:$0xf0]  ;;  %v3308_v8 = vor.u32 %v3993_v59, %v3305_v60  ;;  %v3436_v11 = vor.u32 %v4025_v62, %v3433_v3  ;;  %v2607_v53 = vld [vmem:[%s6159_s1 + $0xa8] sm:$0xf] }
  0x90   :  { %2180 = vmatpush.bf16.msra.mxu0 %v3372_v16  ;;  %v4089_v6 = vld [vmem:[%s6159_s1 + $0x924] sm:$0xf]  ;;  %v3689_v7 = vld [vmem:[%s6159_s1 + $0x930] sm:$0xf0]  ;;  %v3564_v13 = vor.u32 %v4057_v4, %v3561_v5  ;;  %v3820_v54 = vld [vmem:[%s6159_s1 + $0xb4] sm:$0xf0] }
  0x91   :  { %2193 = vmatpush.bf16.msra.mxu1 %v3500_v17  ;;  %2206 = vmatpush.bf16.msra.mxu2 %v3628_v18  ;;  %v3989_v9 = vld [vmem:[%s6159_s1 + $0x604] sm:$0xf]  ;;  %v3289_v10 = vld [vmem:[%s6159_s1 + $0x610] sm:$0xf0]  ;;  %v3692_v18 = vor.u32 %v4089_v6, %v3689_v7  ;;  %v2735_v55 = vld [vmem:[%s6159_s1 + $0x1a8] sm:$0xf] }
  0x92   :  { %v4021_v14 = vld [vmem:[%s6159_s1 + $0x704] sm:$0xf]  ;;  %v3417_v16 = vld [vmem:[%s6159_s1 + $0x710] sm:$0xf0]  ;;  %v3292_v25 = vor.u32 %v3989_v9, %v3289_v10  ;;  %v3884_v59 = vld [vmem:[%s6159_s1 + $0x2b4] sm:$0xf0] }
  0x93   :  { %2219 = vmatpush.bf16.msra.mxu3 %v3756_v22  ;;  %v4053_v17 = vld [vmem:[%s6159_s1 + $0x804] sm:$0xf]  ;;  %v3545_v19 = vld [vmem:[%s6159_s1 + $0x810] sm:$0xf0]  ;;  %v2639_v22 = vld [vmem:[%s6159_s1 + $0xe8] sm:$0xf] }
  0x94   :  { %2181 = vmatpush.bf16.msra.mxu0 %v3356_v31  ;;  %v4085_v20 = vld [vmem:[%s6159_s1 + $0x904] sm:$0xf]  ;;  %v3673_v21 = vld [vmem:[%s6159_s1 + $0x910] sm:$0xf0]  ;;  %v3892_v31 = vld [vmem:[%s6159_s1 + $0x2f4] sm:$0xf0] }
  0x95   :  { %2194 = vmatpush.bf16.msra.mxu1 %v3484_v32  ;;  %2207 = vmatpush.bf16.msra.mxu2 %v3612_v33  ;;  %v3420_v32 = vor.u32 %v4021_v14, %v3417_v16  ;;  %v3548_v33 = vor.u32 %v4053_v17, %v3545_v19  ;;  %v3676_v37 = vor.u32 %v4085_v20, %v3673_v21  ;;  %v2991_v60 = vld [vmem:[%s6159_s1 + $0x3a8] sm:$0xf]  ;;  %v3916_v62 = vld [vmem:[%s6159_s1 + $0x3b4] sm:$0xf0] }
  0x96   :  { %v2896_v40 = vor.u32 %v3892_v31, %v2895_v30  ;;  %v3816_v5 = vld [vmem:[%s6159_s1 + $0x94] sm:$0xf0]  ;;  %v2719_v6 = vld [vmem:[%s6159_s1 + $0x188] sm:$0xf] }
  0x97   :  { %2220 = vmatpush.bf16.msra.mxu3 %v3740_v38  ;;  %v2640_v38 = vor.u32 %v3828_v23, %v2639_v22  ;;  %v3848_v7 = vld [vmem:[%s6159_s1 + $0x194] sm:$0xf0]  ;;  %v2975_v10 = vld [vmem:[%s6159_s1 + $0x388] sm:$0xf] }
  0x98   :  { %2182 = vmatpush.bf16.msra.mxu0 %v3340_v44  ;;  %v3024_v44 = vor.u32 %v3924_v36, %v3023_v35  ;;  %v3880_v9 = vld [vmem:[%s6159_s1 + $0x294] sm:$0xf0]  ;;  %v2720_v14 = vor.u32 %v3848_v7, %v2719_v6  ;;  %v2575_v17 = vld [vmem:[%s6159_s1 + $0x68] sm:$0xf] }
  0x99   :  { %2195 = vmatpush.bf16.msra.mxu1 %v3468_v45  ;;  %2208 = vmatpush.bf16.msra.mxu2 %v3596_v46  ;;  %v3856_v45 = vld [vmem:[%s6159_s1 + $0x1d4] sm:$0xf0]  ;;  %v2879_v46 = vld [vmem:[%s6159_s1 + $0x2c8] sm:$0xf] }
  0x9a   :  { %v2752_v51 = vor.u32 %v3856_v45, %v2751_v43  ;;  %v2880_v52 = vor.u32 %v3888_v47, %v2879_v46  ;;  %v2703_v19 = vld [vmem:[%s6159_s1 + $0x168] sm:$0xf]  ;;  %v3844_v21 = vld [vmem:[%s6159_s1 + $0x174] sm:$0xf0] }
  0x9b   :  { %2221 = vmatpush.bf16.msra.mxu3 %v3724_v50  ;;  %v2624_v50 = vor.u32 %v3824_v42, %v2623_v41  ;;  %v2831_v22 = vld [vmem:[%s6159_s1 + $0x268] sm:$0xf]  ;;  %v3876_v23 = vld [vmem:[%s6159_s1 + $0x274] sm:$0xf0]  ;;  %v2704_v31 = vor.u32 %v3844_v21, %v2703_v19 }
  0x9c   :  { %2183 = vmatpush.bf16.msra.mxu0 %v3324_v56  ;;  %v3008_v56 = vor.u32 %v3920_v49, %v3007_v48  ;;  %v2959_v24 = vld [vmem:[%s6159_s1 + $0x368] sm:$0xf]  ;;  %v3840_v36 = vld [vmem:[%s6159_s1 + $0x154] sm:$0xf0] }
  0x9d   :  { %2196 = vmatpush.bf16.msra.mxu1 %v3452_v57  ;;  %2209 = vmatpush.bf16.msra.mxu2 %v3580_v58  ;;  %v3852_v57 = vld [vmem:[%s6159_s1 + $0x1b4] sm:$0xf0]  ;;  %v2863_v58 = vld [vmem:[%s6159_s1 + $0x2a8] sm:$0xf] }
  0x9e   :  { %v2736_v3 = vor.u32 %v3852_v57, %v2735_v55  ;;  %v2864_v4 = vor.u32 %v3884_v59, %v2863_v58  ;;  %v2559_v30 = vld [vmem:[%s6159_s1 + $0x48] sm:$0xf]  ;;  %v3904_v42 = vld [vmem:[%s6159_s1 + $0x354] sm:$0xf0] }
  0x9f   :  { %2222 = vmatpush.bf16.msra.mxu3 %v3708_v63  ;;  %v2608_v63 = vor.u32 %v3820_v54, %v2607_v53  ;;  %v2687_v35 = vld [vmem:[%s6159_s1 + $0x148] sm:$0xf]  ;;  %v3804_v47 = vld [vmem:[%s6159_s1 + $0x34] sm:$0xf0] }
  0xa0   :  { %2184 = vmatpush.bf16.msra.mxu0 %v3308_v8  ;;  %v2847_v8 = vld [vmem:[%s6159_s1 + $0x288] sm:$0xf]  ;;  %v2688_v45 = vor.u32 %v3840_v36, %v2687_v35  ;;  %v3868_v53 = vld [vmem:[%s6159_s1 + $0x234] sm:$0xf0] }
  0xa1   :  { %2197 = vmatpush.bf16.msra.mxu1 %v3436_v11  ;;  %2210 = vmatpush.bf16.msra.mxu2 %v3564_v13  ;;  %v3912_v11 = vld [vmem:[%s6159_s1 + $0x394] sm:$0xf0]  ;;  %v2848_v16 = vor.u32 %v3880_v9, %v2847_v8  ;;  %v2943_v41 = vld [vmem:[%s6159_s1 + $0x348] sm:$0xf] }
  0xa2   :  { %v2976_v20 = vor.u32 %v3912_v11, %v2975_v10  ;;  %v2671_v48 = vld [vmem:[%s6159_s1 + $0x128] sm:$0xf]  ;;  %v3900_v55 = vld [vmem:[%s6159_s1 + $0x334] sm:$0xf0] }
  0xa3   :  { %2223 = vmatpush.bf16.msra.mxu3 %v3692_v18  ;;  %v3812_v18 = vld [vmem:[%s6159_s1 + $0x74] sm:$0xf0]  ;;  %v2927_v54 = vld [vmem:[%s6159_s1 + $0x328] sm:$0xf] }
  0xa4   :  { %2185 = vmatpush.bf16.msra.mxu0 %v3292_v25  ;;  %v3908_v25 = vld [vmem:[%s6159_s1 + $0x374] sm:$0xf0]  ;;  %v2576_v26 = vor.u32 %v3812_v18, %v2575_v17  ;;  %v2527_v57 = vld [vmem:[%s6159_s1 + $0x8] sm:$0xf]  ;;  %v2928_v6 = vor.u32 %v3900_v55, %v2927_v54 }
  0xa5   :  { %2198 = vmatpush.bf16.msra.mxu1 %v3420_v32  ;;  %2211 = vmatpush.bf16.msra.mxu2 %v3548_v33  ;;  %v2832_v32 = vor.u32 %v3876_v23, %v2831_v22  ;;  %v3808_v33 = vld [vmem:[%s6159_s1 + $0x54] sm:$0xf0]  ;;  %v2911_v7 = vld [vmem:[%s6159_s1 + $0x308] sm:$0xf] }
  0xa6   :  { %v2560_v43 = vor.u32 %v3808_v33, %v2559_v30  ;;  %v3800_v58 = vld [vmem:[%s6159_s1 + $0x14] sm:$0xf0]  ;;  %v3151_v9 = vld [vmem:[%s6159_s1 + $0x4e8] sm:$0xf] }
  0xa7   :  { %2224 = vmatpush.bf16.msra.mxu3 %v3676_v37  ;;  %2186 = vmatmul.bf16.vlgmr.msra.gmra.mxu0 %v4536_v61  ;;  %v2960_v37 = vor.u32 %v3908_v25, %v2959_v24  ;;  %v3896_v8 = vld [vmem:[%s6159_s1 + $0x314] sm:$0xf0]  ;;  %v3279_v11 = vld [vmem:[%s6159_s1 + $0x5e8] sm:$0xf] }
  0xa8   :  { %2230 = vmatpush.bf16.msrb.mxu0 %v2640_v38  ;;  %2212 = vmatmul.bf16.vlgmr.msra.gmra.mxu2 %v4788_v12  ;;  %v2591_v12 = vld [vmem:[%s6159_s1 + $0x88] sm:$0xf]  ;;  %v3956_v10 = vld [vmem:[%s6159_s1 + $0x4f4] sm:$0xf0]  ;;  %v2912_v24 = vor.u32 %v3896_v8, %v2911_v7 }
  0xa9   :  { %2243 = vmatpush.bf16.msrb.mxu1 %v2768_v39  ;;  %2256 = vmatpush.bf16.msrb.mxu2 %v2896_v40  ;;  %v2592_v13 = vor.u32 %v3816_v5, %v2591_v12  ;;  %v2815_v38 = vld [vmem:[%s6159_s1 + $0x248] sm:$0xf]  ;;  %v3872_v39 = vld [vmem:[%s6159_s1 + $0x254] sm:$0xf0]  ;;  %v5287_v40 = vld [vmem:[%s6161_s2] sm:$0xf]  ;;  %v3152_v25 = vor.u32 %v3956_v10, %v3151_v9 }
  0xaa   :  { %2199 = vmatmul.bf16.vlgmr.msra.gmra.mxu1 %v4540_v1  ;;  %2225 = vmatmul.bf16.vlgmr.msra.gmra.mxu3 %v4796_v15  ;;  %v2992_v15 = vor.u32 %v3916_v62, %v2991_v60  ;;  %v2816_v46 = vor.u32 %v3872_v39, %v2815_v38  ;;  %v338_v49 = vperm.slane %v5287_v40, 0  ;;  %v3407_v17 = vld [vmem:[%s6159_s1 + $0x6e8] sm:$0xf]  ;;  %v4020_v18 = vld [vmem:[%s6159_s1 + $0x6f4] sm:$0xf0] }
  0xab   :  { %2269 = vmatpush.bf16.msrb.mxu3 %v3024_v44  ;;  %v2543_v44 = vld [vmem:[%s6159_s1 + $0x28] sm:$0xf]  ;;  %v4052_v22 = vld [vmem:[%s6159_s1 + $0x7f4] sm:$0xf0] }
  0xac   :  { %2231 = vmatpush.bf16.msrb.mxu0 %v2624_v50  ;;  %v2944_v50 = vor.u32 %v3904_v42, %v2943_v41  ;;  %v3535_v21 = vld [vmem:[%s6159_s1 + $0x7e8] sm:$0xf]  ;;  %v3952_v35 = vld [vmem:[%s6159_s1 + $0x4d4] sm:$0xf0] }
  0xad   :  { %2244 = vmatpush.bf16.msrb.mxu1 %v2752_v51  ;;  %2257 = vmatpush.bf16.msrb.mxu2 %v2880_v52  ;;  %v3836_v51 = vld [vmem:[%s6159_s1 + $0x134] sm:$0xf0]  ;;  %v2799_v52 = vld [vmem:[%s6159_s1 + $0x228] sm:$0xf] }
  0xae   :  { %v2672_v60 = vor.u32 %v3836_v51, %v2671_v48  ;;  %v2800_v62 = vor.u32 %v3868_v53, %v2799_v52  ;;  %v3135_v33 = vld [vmem:[%s6159_s1 + $0x4c8] sm:$0xf]  ;;  %v3984_v38 = vld [vmem:[%s6159_s1 + $0x5d4] sm:$0xf0] }
  0xaf   :  { %2270 = vmatpush.bf16.msrb.mxu3 %v3008_v56  ;;  %v2544_v56 = vor.u32 %v3804_v47, %v2543_v44  ;;  %v3263_v36 = vld [vmem:[%s6159_s1 + $0x5c8] sm:$0xf]  ;;  %v4016_v41 = vld [vmem:[%s6159_s1 + $0x6d4] sm:$0xf0]  ;;  %v3136_v47 = vor.u32 %v3952_v35, %v3135_v33 }
  0xb0   :  { %2232 = vmatpush.bf16.msrb.mxu0 %v2608_v63  ;;  %v2655_v63 = vld [vmem:[%s6159_s1 + $0x108] sm:$0xf]  ;;  %v3264_v48 = vor.u32 %v3984_v38, %v3263_v36  ;;  %v3948_v51 = vld [vmem:[%s6159_s1 + $0x4b4] sm:$0xf0] }
  0xb1   :  { %2245 = vmatpush.bf16.msrb.mxu1 %v2736_v3  ;;  %2258 = vmatpush.bf16.msrb.mxu2 %v2864_v4  ;;  %v3832_v3 = vld [vmem:[%s6159_s1 + $0x114] sm:$0xf0]  ;;  %v2783_v4 = vld [vmem:[%s6159_s1 + $0x208] sm:$0xf] }
  0xb2   :  { %v2656_v19 = vor.u32 %v3832_v3, %v2655_v63  ;;  %v3391_v39 = vld [vmem:[%s6159_s1 + $0x6c8] sm:$0xf]  ;;  %v3980_v54 = vld [vmem:[%s6159_s1 + $0x5b4] sm:$0xf0] }
  0xb3   :  { %2271 = vmatpush.bf16.msrb.mxu3 %v2992_v15  ;;  %v3864_v15 = vld [vmem:[%s6159_s1 + $0x214] sm:$0xf0]  ;;  %v3519_v44 = vld [vmem:[%s6159_s1 + $0x7c8] sm:$0xf] }
  0xb4   :  { %2233 = vmatpush.bf16.msrb.mxu0 %v2592_v13  ;;  %v1992_v5 = vpop.f32.mrf.mxu1  ;;  %v3247_v52 = vld [vmem:[%s6159_s1 + $0x5a8] sm:$0xf]  ;;  %v4008_v8 = vld [vmem:[%s6159_s1 + $0x694] sm:$0xf0] }
  0xb5   :  { %2246 = vmatpush.bf16.msrb.mxu1 %v2720_v14  ;;  %2259 = vmatpush.bf16.msrb.mxu2 %v2848_v16  ;;  %v1979_v59 = vpop.f32.mrf.mxu0  ;;  %v2528_v14 = vor.u32 %v3800_v58, %v2527_v57  ;;  %v3988_v16 = vld [vmem:[%s6159_s1 + $0x5f4] sm:$0xf0]  ;;  %v3375_v55 = vld [vmem:[%s6159_s1 + $0x6a8] sm:$0xf]  ;;  %v3248_v63 = vor.u32 %v3980_v54, %v3247_v52 }
  0xb6   :  { %v1980_v12 = vadd.f32 %v1979_v59, %v338_v49  ;;  %v3392_v49 = vor.u32 %v4016_v41, %v3391_v39  ;;  %v3503_v57 = vld [vmem:[%s6159_s1 + $0x7a8] sm:$0xf]  ;;  %v4044_v58 = vld [vmem:[%s6159_s1 + $0x7b4] sm:$0xf0] }
  0xb7   :  { %2272 = vmatpush.bf16.msrb.mxu3 %v2976_v20  ;;  %v2784_v20 = vor.u32 %v3864_v15, %v2783_v4  ;;  %v3103_v4 = vld [vmem:[%s6159_s1 + $0x488] sm:$0xf]  ;;  %v3976_v15 = vld [vmem:[%s6159_s1 + $0x594] sm:$0xf0] }
  0xb8   :  { %2234 = vmatpush.bf16.msrb.mxu0 %v2576_v26  ;;  %v1993_v13 = vadd.f32 %v1992_v5, %v1980_v12  ;;  %v3944_v12 = vld [vmem:[%s6159_s1 + $0x494] sm:$0xf0]  ;;  %v3231_v5 = vld [vmem:[%s6159_s1 + $0x588] sm:$0xf] }
  0xb9   :  { %2247 = vmatpush.bf16.msrb.mxu1 %v2704_v31  ;;  %2260 = vmatpush.bf16.msrb.mxu2 %v2832_v32  ;;  %v3280_v31 = vor.u32 %v3988_v16, %v3279_v11  ;;  %v3408_v32 = vor.u32 %v4020_v18, %v3407_v17  ;;  %v3359_v7 = vld [vmem:[%s6159_s1 + $0x688] sm:$0xf]  ;;  %v4040_v10 = vld [vmem:[%s6159_s1 + $0x794] sm:$0xf0]  ;;  %v3104_v11 = vor.u32 %v3944_v12, %v3103_v4 }
  0xba   :  { %v2005_v23 = vpop.f32.mrf.mxu2  ;;  %v3487_v9 = vld [vmem:[%s6159_s1 + $0x788] sm:$0xf]  ;;  %v3360_v16 = vor.u32 %v4008_v8, %v3359_v7  ;;  %v3940_v18 = vld [vmem:[%s6159_s1 + $0x474] sm:$0xf0] }
  0xbb   :  { %2273 = vmatpush.bf16.msrb.mxu3 %v2960_v37  ;;  %v2006_v26 = vadd.f32 %v2005_v23, %v1993_v13  ;;  %v3536_v37 = vor.u32 %v4052_v22, %v3535_v21  ;;  %v3087_v17 = vld [vmem:[%s6159_s1 + $0x468] sm:$0xf]  ;;  %v3488_v22 = vor.u32 %v4040_v10, %v3487_v9  ;;  %v3972_v23 = vld [vmem:[%s6159_s1 + $0x574] sm:$0xf0] }
  0xbc   :  { %2235 = vmatpush.bf16.msrb.mxu0 %v2560_v43  ;;  %v2018_v30 = vpop.f32.mrf.mxu3  ;;  %v3071_v36 = vld [vmem:[%s6159_s1 + $0x448] sm:$0xf]  ;;  %v3960_v8 = vld [vmem:[%s6159_s1 + $0x514] sm:$0xf0] }
  0xbd   :  { %2248 = vmatpush.bf16.msrb.mxu1 %v2688_v45  ;;  %2261 = vmatpush.bf16.msrb.mxu2 %v2816_v46  ;;  %v2019_v42 = vadd.f32 %v2018_v30, %v2006_v26  ;;  %v1981_v43 = vpop.f32.mrf.mxu0  ;;  %v4048_v45 = vld [vmem:[%s6159_s1 + $0x7d4] sm:$0xf0]  ;;  %v1994_v46 = vpop.f32.mrf.mxu1  ;;  %v3471_v26 = vld [vmem:[%s6159_s1 + $0x768] sm:$0xf] }
  0xbe   :  { %v3520_v53 = vor.u32 %v4048_v45, %v3519_v44  ;;  %v4036_v30 = vld [vmem:[%s6159_s1 + $0x774] sm:$0xf0]  ;;  %v3199_v38 = vld [vmem:[%s6159_s1 + $0x548] sm:$0xf] }
  0xbf   :  { %2274 = vmatpush.bf16.msrb.mxu3 %v2944_v50  ;;  %v3119_v50 = vld [vmem:[%s6159_s1 + $0x4a8] sm:$0xf]  ;;  %v3472_v41 = vor.u32 %v4036_v30, %v3471_v26  ;;  %v4000_v44 = vld [vmem:[%s6159_s1 + $0x654] sm:$0xf0]  ;;  %v3858_v30 = vld [vmem:[%s6159_s1 + $0x1ec] sm:$0xf] }
  0xc0   :  { %2236 = vmatpush.bf16.msrb.mxu0 %v2544_v56  ;;  %v4012_v56 = vld [vmem:[%s6159_s1 + $0x6b4] sm:$0xf0]  ;;  %v3327_v43 = vld [vmem:[%s6159_s1 + $0x648] sm:$0xf] }
  0xc1   :  { %2249 = vmatpush.bf16.msrb.mxu1 %v2672_v60  ;;  %2262 = vmatpush.bf16.msrb.mxu2 %v2800_v62  ;;  %v3120_v60 = vor.u32 %v3948_v51, %v3119_v50  ;;  %v3376_v3 = vor.u32 %v4012_v56, %v3375_v55  ;;  %v3055_v54 = vld [vmem:[%s6159_s1 + $0x428] sm:$0xf]  ;;  %v3932_v55 = vld [vmem:[%s6159_s1 + $0x434] sm:$0xf0] }
  0xc2   :  { %v2007_v59 = vpop.f32.mrf.mxu2  ;;  %v3183_v56 = vld [vmem:[%s6159_s1 + $0x528] sm:$0xf]  ;;  %v3056_v4 = vor.u32 %v3932_v55, %v3055_v54  ;;  %v4108_v55 = vld [vmem:[%s6159_s1 + $0x9b4] sm:$0xf0] }
  0xc3   :  { %2275 = vmatpush.bf16.msrb.mxu3 %v2928_v6  ;;  %v3504_v6 = vor.u32 %v4044_v58, %v3503_v57  ;;  %v3964_v59 = vld [vmem:[%s6159_s1 + $0x534] sm:$0xf0]  ;;  %v3039_v12 = vld [vmem:[%s6159_s1 + $0x408] sm:$0xf] }
  0xc4   :  { %2237 = vmatpush.bf16.msrb.mxu0 %v2528_v14  ;;  %v2020_v62 = vpop.f32.mrf.mxu3  ;;  %v3232_v14 = vor.u32 %v3976_v15, %v3231_v5  ;;  %v3928_v5 = vld [vmem:[%s6159_s1 + $0x414] sm:$0xf0]  ;;  %v3167_v7 = vld [vmem:[%s6159_s1 + $0x508] sm:$0xf] }
  0xc5   :  { %2250 = vmatpush.bf16.msrb.mxu1 %v2656_v19  ;;  %2263 = vmatpush.bf16.msrb.mxu2 %v2784_v20  ;;  %v3215_v19 = vld [vmem:[%s6159_s1 + $0x568] sm:$0xf]  ;;  %v2044_v21 = vpop.f32.mrf.mxu1  ;;  %v3996_v62 = vld [vmem:[%s6159_s1 + $0x634] sm:$0xf0] }
  0xc6   :  { %v3216_v33 = vor.u32 %v3972_v23, %v3215_v19  ;;  %v3295_v9 = vld [vmem:[%s6159_s1 + $0x608] sm:$0xf]  ;;  %v4084_v19 = vld [vmem:[%s6159_s1 + $0x8f4] sm:$0xf0]  ;;  %v3826_v23 = vld [vmem:[%s6159_s1 + $0xec] sm:$0xf] }
  0xc7   :  { %2276 = vmatpush.bf16.msrb.mxu3 %v2912_v24  ;;  %2238 = vmatmul.bf16.vlgmr.msrb.gmra.mxu0 %v4460_v28  ;;  %v2031_v13 = vpop.f32.mrf.mxu0  ;;  %v3343_v24 = vld [vmem:[%s6159_s1 + $0x668] sm:$0xf] }
  0xc8   :  { %2282 = vmatpush.bf16.msra.mxu0 %v3152_v25  ;;  %2264 = vmatmul.bf16.vlgmr.msrb.gmra.mxu2 %v4458_v27  ;;  %v2032_v20 = vadd.f32 %v2031_v13, %v2019_v42  ;;  %v4004_v25 = vld [vmem:[%s6159_s1 + $0x674] sm:$0xf0] }
  0xc9   :  { %2295 = vmatpush.bf16.msra.mxu1 %v3280_v31  ;;  %2308 = vmatpush.bf16.msra.mxu2 %v3408_v32  ;;  %v3088_v32 = vor.u32 %v3940_v18, %v3087_v17  ;;  %v3344_v35 = vor.u32 %v4004_v25, %v3343_v24  ;;  %v3968_v42 = vld [vmem:[%s6159_s1 + $0x554] sm:$0xf0]  ;;  %v3663_v18 = vld [vmem:[%s6159_s1 + $0x8e8] sm:$0xf]  ;;  %v2641_v24 = vld [vmem:[%s6159_s1 + $0xf8] sm:$0xf0]  ;;  %v3168_v25 = vor.u32 %v3960_v8, %v3167_v7 }
  0xca   :  { %2277 = vmatmul.bf16.vlgmr.msrb.gmra.mxu3 %v4462_v29  ;;  %2251 = vmatmul.bf16.vlgmr.msrb.gmra.mxu1 %v4470_v34  ;;  %v2045_v31 = vadd.f32 %v2044_v21, %v2032_v20  ;;  %v3200_v52 = vor.u32 %v3968_v42, %v3199_v38  ;;  %v3992_v13 = vld [vmem:[%s6159_s1 + $0x614] sm:$0xf0]  ;;  %v3791_v20 = vld [vmem:[%s6159_s1 + $0x9e8] sm:$0xf]  ;;  %v3040_v21 = vor.u32 %v3928_v5, %v3039_v12  ;;  %v2593_v7 = vld [vmem:[%s6159_s1 + $0x98] sm:$0xf0] }
  0xcb   :  { %2321 = vmatpush.bf16.msra.mxu3 %v3536_v37  ;;  %v3936_v37 = vld [vmem:[%s6159_s1 + $0x454] sm:$0xf0]  ;;  %v2057_v39 = vpop.f32.mrf.mxu2  ;;  %v3296_v26 = vor.u32 %v3992_v13, %v3295_v9  ;;  %v3743_v12 = vld [vmem:[%s6159_s1 + $0x988] sm:$0xf]  ;;  %v3846_v9 = vld [vmem:[%s6159_s1 + $0x18c] sm:$0xf] }
  0xcc   :  { %2283 = vmatpush.bf16.msra.mxu0 %v3136_v47  ;;  %v2058_v45 = vadd.f32 %v2057_v39, %v2045_v31  ;;  %v3455_v47 = vld [vmem:[%s6159_s1 + $0x748] sm:$0xf]  ;;  %v2769_v31 = vld [vmem:[%s6159_s1 + $0x1f8] sm:$0xf0]  ;;  %v4080_v38 = vld [vmem:[%s6159_s1 + $0x8d4] sm:$0xf0] }
  0xcd   :  { %2296 = vmatpush.bf16.msra.mxu1 %v3264_v48  ;;  %2309 = vmatpush.bf16.msra.mxu2 %v3392_v49  ;;  %v2070_v46 = vpop.f32.mrf.mxu3  ;;  %v4032_v48 = vld [vmem:[%s6159_s1 + $0x754] sm:$0xf0]  ;;  %v3072_v49 = vor.u32 %v3936_v37, %v3071_v36  ;;  %v2046_v57 = vpop.f32.mrf.mxu1  ;;  %v2644_v36 = vor.u32 %v3826_v23, %v2641_v24  ;;  %v3647_v37 = vld [vmem:[%s6159_s1 + $0x8c8] sm:$0xf]  ;;  %v3810_v23 = vld [vmem:[%s6159_s1 + $0x6c] sm:$0xf] }
  0xce   :  { %v5492_v50 = vadd.f32 %v2070_v46, %v2058_v45  ;;  %v3456_v58 = vor.u32 %v4032_v48, %v3455_v47  ;;  %v3775_v39 = vld [vmem:[%s6159_s1 + $0x9c8] sm:$0xf]  ;;  %v4112_v42 = vld [vmem:[%s6159_s1 + $0x9d4] sm:$0xf0]  ;;  %v3854_v45 = vld [vmem:[%s6159_s1 + $0x1cc] sm:$0xf]  ;;  %v3648_v47 = vor.u32 %v4080_v38, %v3647_v37 }
  0xcf   :  { %2322 = vmatpush.bf16.msra.mxu3 %v3520_v53  ;;  %v2033_v51 = vpop.f32.mrf.mxu0  ;;  %v3328_v53 = vor.u32 %v4000_v44, %v3327_v43  ;;  %v3822_v43 = vld [vmem:[%s6159_s1 + $0xcc] sm:$0xf]  ;;  %v2625_v44 = vld [vmem:[%s6159_s1 + $0xd8] sm:$0xf0]  ;;  %v3776_v48 = vor.u32 %v4112_v42, %v3775_v39  ;;  %v3711_v37 = vld [vmem:[%s6159_s1 + $0x948] sm:$0xf] }
  0xd0   :  { %2284 = vmatpush.bf16.msra.mxu0 %v3120_v60  ;;  %v3311_v60 = vld [vmem:[%s6159_s1 + $0x628] sm:$0xf]  ;;  %v2753_v46 = vld [vmem:[%s6159_s1 + $0x1d8] sm:$0xf0]  ;;  %v4096_v38 = vld [vmem:[%s6159_s1 + $0x954] sm:$0xf0] }
  0xd1   :  { %2297 = vmatpush.bf16.msra.mxu1 %v3248_v63  ;;  %2310 = vmatpush.bf16.msra.mxu2 %v3376_v3  ;;  %v3439_v63 = vld [vmem:[%s6159_s1 + $0x728] sm:$0xf]  ;;  %v4028_v3 = vld [vmem:[%s6159_s1 + $0x734] sm:$0xf0]  ;;  %v3312_v15 = vor.u32 %v3996_v62, %v3311_v60  ;;  %v2756_v54 = vor.u32 %v3854_v45, %v2753_v46  ;;  %v2609_v57 = vld [vmem:[%s6159_s1 + $0xb8] sm:$0xf0] }
  0xd2   :  { %v3631_v51 = vld [vmem:[%s6159_s1 + $0x8a8] sm:$0xf]  ;;  %v2577_v24 = vld [vmem:[%s6159_s1 + $0x78] sm:$0xf0]  ;;  %v3806_v39 = vld [vmem:[%s6159_s1 + $0x4c] sm:$0xf] }
  0xd3   :  { %2323 = vmatpush.bf16.msra.mxu3 %v3504_v6  ;;  %v3184_v6 = vor.u32 %v3964_v59, %v3183_v56  ;;  %v2059_v10 = vpop.f32.mrf.mxu2  ;;  %v3818_v56 = vld [vmem:[%s6159_s1 + $0xac] sm:$0xf]  ;;  %v2737_v59 = vld [vmem:[%s6159_s1 + $0x1b8] sm:$0xf0] }
  0xd4   :  { %2285 = vmatpush.bf16.msra.mxu0 %v3104_v11  ;;  %v3440_v11 = vor.u32 %v4028_v3, %v3439_v63  ;;  %v2612_v63 = vor.u32 %v3818_v56, %v2609_v57  ;;  %v3615_v3 = vld [vmem:[%s6159_s1 + $0x888] sm:$0xf]  ;;  %v2721_v10 = vld [vmem:[%s6159_s1 + $0x198] sm:$0xf0] }
  0xd5   :  { %2298 = vmatpush.bf16.msra.mxu1 %v3232_v14  ;;  %2311 = vmatpush.bf16.msra.mxu2 %v3360_v16  ;;  %v3423_v14 = vld [vmem:[%s6159_s1 + $0x708] sm:$0xf]  ;;  %v4024_v16 = vld [vmem:[%s6159_s1 + $0x714] sm:$0xf0]  ;;  %v2072_v17 = vpop.f32.mrf.mxu3 }
  0xd7   :  { %2324 = vmatpush.bf16.msra.mxu3 %v3488_v22  ;;  %v4116_v22 = vld [vmem:[%s6159_s1 + $0x9f4] sm:$0xf0] }
  0xd8   :  { %2286 = vmatpush.bf16.msra.mxu0 %v3088_v32  ;;  %v3424_v32 = vor.u32 %v4024_v16, %v3423_v14 }
  0xd9   :  { %2299 = vmatpush.bf16.msra.mxu1 %v3216_v33  ;;  %2312 = vmatpush.bf16.msra.mxu2 %v3344_v35  ;;  %v3664_v33 = vor.u32 %v4084_v19, %v3663_v18  ;;  %v3792_v35 = vor.u32 %v4116_v22, %v3791_v20  ;;  %v3599_v18 = vld [vmem:[%s6159_s1 + $0x868] sm:$0xf]  ;;  %v4068_v19 = vld [vmem:[%s6159_s1 + $0x874] sm:$0xf0] }
  0xda   :  { %v3727_v20 = vld [vmem:[%s6159_s1 + $0x968] sm:$0xf]  ;;  %v4100_v22 = vld [vmem:[%s6159_s1 + $0x974] sm:$0xf0] }
  0xdb   :  { %2325 = vmatpush.bf16.msra.mxu3 %v3472_v41  ;;  %v2772_v41 = vor.u32 %v3858_v30, %v2769_v31  ;;  %v339_v30 = vperm.slane %v5287_v40, 1  ;;  %v3600_v31 = vor.u32 %v4068_v19, %v3599_v18  ;;  %v3922_v18 = vld [vmem:[%s6159_s1 + $0x3ec] sm:$0xf] }
  0xdc   :  { %2287 = vmatpush.bf16.msra.mxu0 %v3072_v49  ;;  %v2628_v49 = vor.u32 %v3822_v43, %v2625_v44  ;;  %v3838_v43 = vld [vmem:[%s6159_s1 + $0x14c] sm:$0xf]  ;;  %v2689_v44 = vld [vmem:[%s6159_s1 + $0x158] sm:$0xf0] }
  0xdd   :  { %2300 = vmatpush.bf16.msra.mxu1 %v3200_v52  ;;  %2313 = vmatpush.bf16.msra.mxu2 %v3328_v53  ;;  %v4076_v52 = vld [vmem:[%s6159_s1 + $0x8b4] sm:$0xf0]  ;;  %v3759_v53 = vld [vmem:[%s6159_s1 + $0x9a8] sm:$0xf]  ;;  %v2692_v57 = vor.u32 %v3838_v43, %v2689_v44  ;;  %v3982_v43 = vld [vmem:[%s6159_s1 + $0x5cc] sm:$0xf] }
  0xde   :  { %v3632_v60 = vor.u32 %v4076_v52, %v3631_v51  ;;  %v3760_v62 = vor.u32 %v4108_v55, %v3759_v53  ;;  %v3712_v51 = vor.u32 %v4096_v38, %v3711_v37  ;;  %v3567_v53 = vld [vmem:[%s6159_s1 + $0x828] sm:$0xf]  ;;  %v2881_v37 = vld [vmem:[%s6159_s1 + $0x2d8] sm:$0xf0] }
  0xdf   :  { %2326 = vmatpush.bf16.msra.mxu3 %v3456_v58  ;;  %v3850_v58 = vld [vmem:[%s6159_s1 + $0x1ac] sm:$0xf]  ;;  %v3695_v55 = vld [vmem:[%s6159_s1 + $0x928] sm:$0xf]  ;;  %v3265_v44 = vld [vmem:[%s6159_s1 + $0x5d8] sm:$0xf0] }
  0xe0   :  { %2288 = vmatpush.bf16.msra.mxu0 %v3056_v4  ;;  %v4072_v4 = vld [vmem:[%s6159_s1 + $0x894] sm:$0xf0]  ;;  %v2740_v5 = vor.u32 %v3850_v58, %v2737_v59  ;;  %v3802_v59 = vld [vmem:[%s6159_s1 + $0x2c] sm:$0xf] }
  0xe1   :  { %2301 = vmatpush.bf16.msra.mxu1 %v3184_v6  ;;  %2314 = vmatpush.bf16.msra.mxu2 %v3312_v15  ;;  %v4104_v6 = vld [vmem:[%s6159_s1 + $0x994] sm:$0xf0]  ;;  %v3814_v15 = vld [vmem:[%s6159_s1 + $0x8c] sm:$0xf]  ;;  %v3616_v13 = vor.u32 %v4072_v4, %v3615_v3  ;;  %v3551_v4 = vld [vmem:[%s6159_s1 + $0x808] sm:$0xf] }
  0xe2   :  { %v3744_v16 = vor.u32 %v4104_v6, %v3743_v12  ;;  %v2596_v17 = vor.u32 %v3814_v15, %v2593_v7  ;;  %v4092_v58 = vld [vmem:[%s6159_s1 + $0x934] sm:$0xf0]  ;;  %v3679_v15 = vld [vmem:[%s6159_s1 + $0x908] sm:$0xf] }
  0xe3   :  { %2327 = vmatpush.bf16.msra.mxu3 %v3440_v11  ;;  %v4056_v12 = vld [vmem:[%s6159_s1 + $0x814] sm:$0xf0] }
  0xe4   :  { %2289 = vmatpush.bf16.msra.mxu0 %v3040_v21  ;;  %v2083_v8 = vpop.f32.mrf.mxu0  ;;  %v4088_v7 = vld [vmem:[%s6159_s1 + $0x914] sm:$0xf0] }
  0xe5   :  { %2302 = vmatpush.bf16.msra.mxu1 %v3168_v25  ;;  %2315 = vmatpush.bf16.msra.mxu2 %v3296_v26  ;;  %v2084_v11 = vadd.f32 %v2083_v8, %v5492_v50  ;;  %v2096_v14 = vpop.f32.mrf.mxu1  ;;  %v2724_v50 = vor.u32 %v3846_v9, %v2721_v10  ;;  %v3842_v25 = vld [vmem:[%s6159_s1 + $0x16c] sm:$0xf]  ;;  %v2705_v26 = vld [vmem:[%s6159_s1 + $0x178] sm:$0xf0] }
  0xe6   :  { %v2708_v40 = vor.u32 %v3842_v25, %v2705_v26  ;;  %v3798_v8 = vld [vmem:[%s6159_s1 + $0xc] sm:$0xf]  ;;  %v2529_v10 = vld [vmem:[%s6159_s1 + $0x18] sm:$0xf0] }
  0xe7   :  { %2328 = vmatpush.bf16.msra.mxu3 %v3424_v32  ;;  %2290 = vmatmul.bf16.vlgmr.msra.gmra.mxu0 %v4538_v0  ;;  %v5652_v21 = vadd.f32 %v2096_v14, %v2084_v11  ;;  %v3728_v32 = vor.u32 %v4100_v22, %v3727_v20  ;;  %v3830_v11 = vld [vmem:[%s6159_s1 + $0x10c] sm:$0xf]  ;;  %v3552_v20 = vor.u32 %v4056_v12, %v3551_v4  ;;  %v2849_v12 = vld [vmem:[%s6159_s1 + $0x298] sm:$0xf0] }
  0xe8   :  { %2334 = vmatpush.bf16.msrb.mxu0 %v3664_v33  ;;  %2316 = vmatmul.bf16.vlgmr.msra.gmra.mxu2 %v4536_v61  ;;  %v2580_v33 = vor.u32 %v3810_v23, %v2577_v24  ;;  %v3954_v22 = vld [vmem:[%s6159_s1 + $0x4ec] sm:$0xf]  ;;  %v3153_v23 = vld [vmem:[%s6159_s1 + $0x4f8] sm:$0xf0]  ;;  %v3680_v24 = vor.u32 %v4088_v7, %v3679_v15  ;;  %v2532_v25 = vor.u32 %v3798_v8, %v2529_v10 }
  0xe9   :  { %2347 = vmatpush.bf16.msrb.mxu1 %v3792_v35  ;;  %2360 = vmatpush.bf16.msrb.mxu2 %v2644_v36  ;;  %v3583_v35 = vld [vmem:[%s6159_s1 + $0x848] sm:$0xf]  ;;  %v4064_v36 = vld [vmem:[%s6159_s1 + $0x854] sm:$0xf0]  ;;  %v3986_v26 = vld [vmem:[%s6159_s1 + $0x5ec] sm:$0xf] }
  0xea   :  { %2329 = vmatmul.bf16.vlgmr.msra.gmra.mxu3 %v4540_v1  ;;  %2303 = vmatmul.bf16.vlgmr.msra.gmra.mxu1 %v4542_v2  ;;  %v3878_v4 = vld [vmem:[%s6159_s1 + $0x28c] sm:$0xf]  ;;  %v3105_v15 = vld [vmem:[%s6159_s1 + $0x498] sm:$0xf0] }
  0xeb   :  { %2373 = vmatpush.bf16.msrb.mxu3 %v2772_v41  ;;  %v2561_v41 = vld [vmem:[%s6159_s1 + $0x58] sm:$0xf0]  ;;  %v3974_v7 = vld [vmem:[%s6159_s1 + $0x58c] sm:$0xf] }
  0xec   :  { %2335 = vmatpush.bf16.msrb.mxu0 %v3648_v47  ;;  %v2085_v47 = vpop.f32.mrf.mxu0  ;;  %v2564_v52 = vor.u32 %v3806_v39, %v2561_v41  ;;  %v3009_v39 = vld [vmem:[%s6159_s1 + $0x3d8] sm:$0xf0]  ;;  %v3950_v41 = vld [vmem:[%s6159_s1 + $0x4cc] sm:$0xf] }
  0xed   :  { %2348 = vmatpush.bf16.msrb.mxu1 %v3776_v48  ;;  %2361 = vmatpush.bf16.msrb.mxu2 %v2628_v49  ;;  %v2109_v42 = vpop.f32.mrf.mxu2  ;;  %v2122_v46 = vpop.f32.mrf.mxu3  ;;  %v3584_v48 = vor.u32 %v4064_v36, %v3583_v35  ;;  %v3156_v35 = vor.u32 %v3954_v22, %v3153_v23  ;;  %v3886_v36 = vld [vmem:[%s6159_s1 + $0x2cc] sm:$0xf]  ;;  %v3233_v8 = vld [vmem:[%s6159_s1 + $0x598] sm:$0xf0] }
  0xee   :  { %v2110_v45 = vadd.f32 %v2109_v42, %v339_v30  ;;  %v2098_v49 = vpop.f32.mrf.mxu1  ;;  %v3281_v30 = vld [vmem:[%s6159_s1 + $0x5f8] sm:$0xf0]  ;;  %v3938_v22 = vld [vmem:[%s6159_s1 + $0x46c] sm:$0xf] }
  0xef   :  { %2374 = vmatpush.bf16.msrb.mxu3 %v2756_v54  ;;  %v4060_v54 = vld [vmem:[%s6159_s1 + $0x834] sm:$0xf0]  ;;  %v3284_v38 = vor.u32 %v3986_v26, %v3281_v30  ;;  %v3137_v42 = vld [vmem:[%s6159_s1 + $0x4d8] sm:$0xf0] }
  0xf0   :  { %2336 = vmatpush.bf16.msrb.mxu0 %v3632_v60  ;;  %v5703_v56 = vadd.f32 %v2122_v46, %v2110_v45  ;;  %v2545_v60 = vld [vmem:[%s6159_s1 + $0x38] sm:$0xf0]  ;;  %v3568_v3 = vor.u32 %v4060_v54, %v3567_v53  ;;  %v2884_v45 = vor.u32 %v3886_v36, %v2881_v37  ;;  %v3140_v47 = vor.u32 %v3950_v41, %v3137_v42 }
  0xf1   :  { %2349 = vmatpush.bf16.msrb.mxu1 %v3760_v62  ;;  %2362 = vmatpush.bf16.msrb.mxu2 %v2612_v63  ;;  %v3834_v62 = vld [vmem:[%s6159_s1 + $0x12c] sm:$0xf]  ;;  %v2673_v63 = vld [vmem:[%s6159_s1 + $0x138] sm:$0xf0]  ;;  %v2548_v6 = vor.u32 %v3802_v59, %v2545_v60  ;;  %v3268_v53 = vor.u32 %v3982_v43, %v3265_v44 }
  0xf2   :  { %v2676_v9 = vor.u32 %v3834_v62, %v2673_v63  ;;  %v2865_v49 = vld [vmem:[%s6159_s1 + $0x2b8] sm:$0xf0]  ;;  %v3978_v59 = vld [vmem:[%s6159_s1 + $0x5ac] sm:$0xf] }
  0xf3   :  { %2375 = vmatpush.bf16.msrb.mxu3 %v2740_v5  ;;  %v3696_v5 = vor.u32 %v4092_v58, %v3695_v55  ;;  %v2993_v54 = vld [vmem:[%s6159_s1 + $0x3b8] sm:$0xf0]  ;;  %v3946_v55 = vld [vmem:[%s6159_s1 + $0x4ac] sm:$0xf] }
  0xf4   :  { %2337 = vmatpush.bf16.msrb.mxu0 %v3616_v13  ;;  %v2657_v13 = vld [vmem:[%s6159_s1 + $0x118] sm:$0xf0]  ;;  %v5813_v58 = vld [vmem:[#allocation1 + $0x9] sm:$0xff] }
  0xf5   :  { %2350 = vmatpush.bf16.msrb.mxu1 %v3744_v16  ;;  %2363 = vmatpush.bf16.msrb.mxu2 %v2596_v17  ;;  %v2111_v14 = vpop.f32.mrf.mxu2  ;;  %v3890_v16 = vld [vmem:[%s6159_s1 + $0x2ec] sm:$0xf]  ;;  %v2897_v17 = vld [vmem:[%s6159_s1 + $0x2f8] sm:$0xf0]  ;;  %v2124_v19 = vpop.f32.mrf.mxu3 }
  0xf6   :  { %v3249_v60 = vld [vmem:[%s6159_s1 + $0x5b8] sm:$0xf0]  ;;  %v3874_v14 = vld [vmem:[%s6159_s1 + $0x26c] sm:$0xf] }
  0xf7   :  { %2376 = vmatpush.bf16.msrb.mxu3 %v2724_v50  ;;  %v3025_v50 = vld [vmem:[%s6159_s1 + $0x3f8] sm:$0xf0]  ;;  %v3966_v43 = vld [vmem:[%s6159_s1 + $0x54c] sm:$0xf] }
  0xf8   :  { %2338 = vmatpush.bf16.msrb.mxu0 %v3600_v31  ;;  %v2660_v31 = vor.u32 %v3830_v11, %v2657_v13  ;;  %v3089_v23 = vld [vmem:[%s6159_s1 + $0x478] sm:$0xf0] }
  0xf9   :  { %2351 = vmatpush.bf16.msrb.mxu1 %v3728_v32  ;;  %2364 = vmatpush.bf16.msrb.mxu2 %v2580_v33  ;;  %v2900_v32 = vor.u32 %v3890_v16, %v2897_v17  ;;  %v3028_v33 = vor.u32 %v3922_v18, %v3025_v50  ;;  %v2833_v16 = vld [vmem:[%s6159_s1 + $0x278] sm:$0xf0]  ;;  %v3906_v17 = vld [vmem:[%s6159_s1 + $0x36c] sm:$0xf] }
  0xfa   :  { %v2961_v50 = vld [vmem:[%s6159_s1 + $0x378] sm:$0xf0]  ;;  %v2836_v26 = vor.u32 %v3874_v14, %v2833_v16  ;;  %v4018_v16 = vld [vmem:[%s6159_s1 + $0x6ec] sm:$0xf] }
  0xfb   :  { %2377 = vmatpush.bf16.msrb.mxu3 %v2708_v40  ;;  %v3918_v40 = vld [vmem:[%s6159_s1 + $0x3cc] sm:$0xf]  ;;  %v2964_v30 = vor.u32 %v3906_v17, %v2961_v50  ;;  %v3201_v44 = vld [vmem:[%s6159_s1 + $0x558] sm:$0xf0] }
  0xfc   :  { %2339 = vmatpush.bf16.msrb.mxu0 %v3584_v48  ;;  %v3012_v46 = vor.u32 %v3918_v40, %v3009_v39  ;;  %v3882_v48 = vld [vmem:[%s6159_s1 + $0x2ac] sm:$0xf]  ;;  %v2945_v40 = vld [vmem:[%s6159_s1 + $0x358] sm:$0xf0] }
  0xfd   :  { %2352 = vmatpush.bf16.msrb.mxu1 %v3712_v51  ;;  %2365 = vmatpush.bf16.msrb.mxu2 %v2564_v52  ;;  %v3914_v51 = vld [vmem:[%s6159_s1 + $0x3ac] sm:$0xf]  ;;  %v5801_v52 = vld [vmem:[#allocation1] sm:$0xff]  ;;  %v2868_v62 = vor.u32 %v3882_v48, %v2865_v49  ;;  %v3073_v39 = vld [vmem:[%s6159_s1 + $0x458] sm:$0xf0] }
  0xfe   :  { %v2996_v63 = vor.u32 %v3914_v51, %v2993_v54  ;;  %v3866_v51 = vld [vmem:[%s6159_s1 + $0x22c] sm:$0xf]  ;;  %v3409_v17 = vld [vmem:[%s6159_s1 + $0x6f8] sm:$0xf0] }
  0xff   :  { %2378 = vmatpush.bf16.msrb.mxu3 %v2692_v57  ;;  %v3121_v57 = vld [vmem:[%s6159_s1 + $0x4b8] sm:$0xf0]  ;;  %v3898_v54 = vld [vmem:[%s6159_s1 + $0x32c] sm:$0xf] }
 0x100   :  { %2340 = vmatpush.bf16.msrb.mxu0 %v3568_v3  ;;  %v3124_v3 = vor.u32 %v3946_v55, %v3121_v57  ;;  %v3204_v57 = vor.u32 %v3966_v43, %v3201_v44  ;;  %v4082_v50 = vld [vmem:[%s6159_s1 + $0x8ec] sm:$0xf] }
 0x101   :  { %2353 = vmatpush.bf16.msrb.mxu1 %v3696_v5  ;;  %2366 = vmatpush.bf16.msrb.mxu2 %v2548_v6  ;;  %v3252_v5 = vor.u32 %v3978_v59, %v3249_v60  ;;  %v3942_v6 = vld [vmem:[%s6159_s1 + $0x48c] sm:$0xf]  ;;  %v2929_v59 = vld [vmem:[%s6159_s1 + $0x338] sm:$0xf0] }
 0x102   :  { %v3108_v13 = vor.u32 %v3942_v6, %v3105_v15  ;;  %v3930_v60 = vld [vmem:[%s6159_s1 + $0x42c] sm:$0xf]  ;;  %v2913_v15 = vld [vmem:[%s6159_s1 + $0x318] sm:$0xf0] }
 0x103   :  { %2379 = vmatpush.bf16.msrb.mxu3 %v2676_v9  ;;  %v2852_v9 = vor.u32 %v3878_v4, %v2849_v12  ;;  %v3862_v12 = vld [vmem:[%s6159_s1 + $0x20c] sm:$0xf] }
 0x104   :  { %2341 = vmatpush.bf16.msrb.mxu0 %v3552_v20  ;;  %v2135_v10 = vpop.f32.mrf.mxu0  ;;  %v3236_v20 = vor.u32 %v3974_v7, %v3233_v8  ;;  %v3894_v6 = vld [vmem:[%s6159_s1 + $0x30c] sm:$0xf] }
 0x105   :  { %2354 = vmatpush.bf16.msrb.mxu1 %v3680_v24  ;;  %2367 = vmatpush.bf16.msrb.mxu2 %v2532_v25  ;;  %v2136_v18 = vadd.f32 %v2135_v10, %v5703_v56  ;;  %v3970_v24 = vld [vmem:[%s6159_s1 + $0x56c] sm:$0xf]  ;;  %v3217_v56 = vld [vmem:[%s6159_s1 + $0x578] sm:$0xf0] }
 0x106   :  { %v3220_v37 = vor.u32 %v3970_v24, %v3217_v56  ;;  %v3926_v7 = vld [vmem:[%s6159_s1 + $0x40c] sm:$0xf]  ;;  %v3041_v10 = vld [vmem:[%s6159_s1 + $0x418] sm:$0xf0] }
 0x107   :  { %2380 = vmatpush.bf16.msrb.mxu3 %v2660_v31  ;;  %2342 = vmatmul.bf16.vlgmr.msrb.gmra.mxu0 %v5801_v52  ;;  %v2148_v19 = vpop.f32.mrf.mxu1  ;;  %v3092_v31 = vor.u32 %v3938_v22, %v3089_v23  ;;  %v3665_v22 = vld [vmem:[%s6159_s1 + $0x8f8] sm:$0xf0]  ;;  %v2916_v23 = vor.u32 %v3894_v6, %v2913_v15  ;;  %v3044_v24 = vor.u32 %v3926_v7, %v3041_v10  ;;  %v4114_v56 = vld [vmem:[%s6159_s1 + $0x9ec] sm:$0xf] }
 0x108   :  { %2386 = vmatpush.bf16.msra.mxu0 %v2900_v32  ;;  %2355 = vmatmul.bf16.vlgmr.msrb.gmra.mxu1 %v5813_v58  ;;  %v2149_v25 = vadd.f32 %v2148_v19, %v2136_v18  ;;  %v3870_v32 = vld [vmem:[%s6159_s1 + $0x24c] sm:$0xf] }
 0x109   :  { %2399 = vmatpush.bf16.msra.mxu1 %v3028_v33  ;;  %2412 = vmatpush.bf16.msra.mxu2 %v3156_v35  ;;  %v2817_v33 = vld [vmem:[%s6159_s1 + $0x258] sm:$0xf0]  ;;  %v3902_v35 = vld [vmem:[%s6159_s1 + $0x34c] sm:$0xf] }
 0x10a   :  { %2368 = vmatmul.bf16.vlgmr.msrb.gmra.mxu2 %v4460_v28  ;;  %2381 = vmatmul.bf16.vlgmr.msrb.gmra.mxu3 %v4470_v34  ;;  %v3910_v28 = vld [vmem:[%s6159_s1 + $0x38c] sm:$0xf]  ;;  %v2977_v34 = vld [vmem:[%s6159_s1 + $0x398] sm:$0xf0]  ;;  %v2948_v48 = vor.u32 %v3902_v35, %v2945_v40 }
 0x10b   :  { %2425 = vmatpush.bf16.msra.mxu3 %v3284_v38  ;;  %v2980_v11 = vor.u32 %v3910_v28, %v2977_v34  ;;  %v2161_v36 = vpop.f32.mrf.mxu2  ;;  %v3934_v38 = vld [vmem:[%s6159_s1 + $0x44c] sm:$0xf]  ;;  %v2785_v28 = vld [vmem:[%s6159_s1 + $0x218] sm:$0xf0] }
 0x10c   :  { %2387 = vmatpush.bf16.msra.mxu0 %v2884_v45  ;;  %v2162_v41 = vadd.f32 %v2161_v36, %v2149_v25  ;;  %v2820_v45 = vor.u32 %v3870_v32, %v2817_v33  ;;  %v3076_v49 = vor.u32 %v3934_v38, %v3073_v39  ;;  %v4050_v18 = vld [vmem:[%s6159_s1 + $0x7ec] sm:$0xf]  ;;  %v2788_v19 = vor.u32 %v3862_v12, %v2785_v28  ;;  %v3793_v25 = vld [vmem:[%s6159_s1 + $0x9f8] sm:$0xf0] }
 0x10d   :  { %2400 = vmatpush.bf16.msra.mxu1 %v3012_v46  ;;  %2413 = vmatpush.bf16.msra.mxu2 %v3140_v47  ;;  %v2174_v42 = vpop.f32.mrf.mxu3  ;;  %v2137_v47 = vpop.f32.mrf.mxu0  ;;  %v3668_v32 = vor.u32 %v4082_v50, %v3665_v22  ;;  %v4014_v33 = vld [vmem:[%s6159_s1 + $0x6cc] sm:$0xf]  ;;  %v3393_v35 = vld [vmem:[%s6159_s1 + $0x6d8] sm:$0xf0] }
 0x10e   :  { %v5897_v46 = vadd.f32 %v2174_v42, %v2162_v41  ;;  %v4046_v36 = vld [vmem:[%s6159_s1 + $0x7cc] sm:$0xf]  ;;  %v3521_v40 = vld [vmem:[%s6159_s1 + $0x7d8] sm:$0xf0]  ;;  %v3396_v43 = vor.u32 %v4014_v33, %v3393_v35 }
 0x10f   :  { %2426 = vmatpush.bf16.msra.mxu3 %v3268_v53  ;;  %v2801_v53 = vld [vmem:[%s6159_s1 + $0x238] sm:$0xf0]  ;;  %v2150_v55 = vpop.f32.mrf.mxu1  ;;  %v4078_v38 = vld [vmem:[%s6159_s1 + $0x8cc] sm:$0xf]  ;;  %v3524_v44 = vor.u32 %v4046_v36, %v3521_v40 }
 0x110   :  { %2388 = vmatpush.bf16.msra.mxu0 %v2868_v62  ;;  %v3057_v62 = vld [vmem:[%s6159_s1 + $0x438] sm:$0xf0]  ;;  %v2804_v4 = vor.u32 %v3866_v51, %v2801_v53  ;;  %v4110_v41 = vld [vmem:[%s6159_s1 + $0x9cc] sm:$0xf] }
 0x111   :  { %2401 = vmatpush.bf16.msra.mxu1 %v2996_v63  ;;  %2414 = vmatpush.bf16.msra.mxu2 %v3124_v3  ;;  %v3962_v63 = vld [vmem:[%s6159_s1 + $0x52c] sm:$0xf]  ;;  %v3185_v3 = vld [vmem:[%s6159_s1 + $0x538] sm:$0xf0]  ;;  %v3060_v34 = vor.u32 %v3930_v60, %v3057_v62 }
 0x112   :  { %v3649_v39 = vld [vmem:[%s6159_s1 + $0x8d8] sm:$0xf0]  ;;  %v4010_v47 = vld [vmem:[%s6159_s1 + $0x6ac] sm:$0xf] }
 0x113   :  { %2427 = vmatpush.bf16.msra.mxu3 %v3252_v5  ;;  %v2932_v5 = vor.u32 %v3898_v54, %v2929_v59  ;;  %v2163_v8 = vpop.f32.mrf.mxu2  ;;  %v3777_v42 = vld [vmem:[%s6159_s1 + $0x9d8] sm:$0xf0]  ;;  %v4074_v54 = vld [vmem:[%s6159_s1 + $0x8ac] sm:$0xf] }
 0x114   :  { %2389 = vmatpush.bf16.msra.mxu0 %v2852_v9  ;;  %v3188_v9 = vor.u32 %v3962_v63, %v3185_v3  ;;  %v3780_v51 = vor.u32 %v4110_v41, %v3777_v42  ;;  %v3505_v53 = vld [vmem:[%s6159_s1 + $0x7b8] sm:$0xf0]  ;;  %v4006_v63 = vld [vmem:[%s6159_s1 + $0x68c] sm:$0xf] }
 0x115   :  { %2402 = vmatpush.bf16.msra.mxu1 %v2980_v11  ;;  %2415 = vmatpush.bf16.msra.mxu2 %v3108_v13  ;;  %v3958_v11 = vld [vmem:[%s6159_s1 + $0x50c] sm:$0xf]  ;;  %v3169_v13 = vld [vmem:[%s6159_s1 + $0x518] sm:$0xf0]  ;;  %v2176_v14 = vpop.f32.mrf.mxu3 }
 0x116   :  { %v3633_v55 = vld [vmem:[%s6159_s1 + $0x8b8] sm:$0xf0]  ;;  %v4002_v10 = vld [vmem:[%s6159_s1 + $0x66c] sm:$0xf] }
 0x117   :  { %2428 = vmatpush.bf16.msra.mxu3 %v3236_v20  ;;  %v3537_v20 = vld [vmem:[%s6159_s1 + $0x7f8] sm:$0xf0]  ;;  %v3636_v62 = vor.u32 %v4074_v54, %v3633_v55  ;;  %v2490_v55 = vmax.f32 %v5652_v21, 0.0  ;;  %v3990_v21 = vld [vmem:[%s6159_s1 + $0x60c] sm:$0xf] }
 0x118   :  { %2390 = vmatpush.bf16.msra.mxu0 %v2836_v26  ;;  %v3172_v26 = vor.u32 %v3958_v11, %v3169_v13  ;;  %v3361_v3 = vld [vmem:[%s6159_s1 + $0x698] sm:$0xf0]  ;;  %v4034_v13 = vld [vmem:[%s6159_s1 + $0x76c] sm:$0xf] }
 0x119   :  { %2403 = vmatpush.bf16.msra.mxu1 %v2964_v30  ;;  %2416 = vmatpush.bf16.msra.mxu2 %v3092_v31  ;;  %v3412_v30 = vor.u32 %v4018_v16, %v3409_v17  ;;  %v3540_v31 = vor.u32 %v4050_v18, %v3537_v20  ;;  %v3617_v12 = vld [vmem:[%s6159_s1 + $0x898] sm:$0xf0]  ;;  %v3364_v15 = vor.u32 %v4006_v63, %v3361_v3  ;;  %v4066_v17 = vld [vmem:[%s6159_s1 + $0x86c] sm:$0xf] }
 0x11a   :  { %v3345_v11 = vld [vmem:[%s6159_s1 + $0x678] sm:$0xf0] }
 0x11b   :  { %2429 = vmatpush.bf16.msra.mxu3 %v3220_v37  ;;  %v3796_v37 = vor.u32 %v4114_v56, %v3793_v25  ;;  %v3473_v16 = vld [vmem:[%s6159_s1 + $0x778] sm:$0xf0]  ;;  %v3348_v50 = vor.u32 %v4002_v10, %v3345_v11  ;;  %v4030_v25 = vld [vmem:[%s6159_s1 + $0x74c] sm:$0xf]  ;;  %v4119_v11 = vld [vmem:[%s6161_s2] sm:$0xf] }
 0x11c   :  { %2391 = vmatpush.bf16.msra.mxu0 %v2820_v45  ;;  %v3652_v45 = vor.u32 %v4078_v38, %v3649_v39  ;;  %v3601_v18 = vld [vmem:[%s6159_s1 + $0x878] sm:$0xf0]  ;;  %v3476_v22 = vor.u32 %v4034_v13, %v3473_v16  ;;  %v340_v13 = vperm.slane %v4119_v11, 2 }
 0x11d   :  { %2404 = vmatpush.bf16.msra.mxu1 %v2948_v48  ;;  %2417 = vmatpush.bf16.msra.mxu2 %v3076_v49  ;;  %v3377_v48 = vld [vmem:[%s6159_s1 + $0x6b8] sm:$0xf0]  ;;  %v4042_v49 = vld [vmem:[%s6159_s1 + $0x7ac] sm:$0xf] }
 0x11e   :  { %v3380_v59 = vor.u32 %v4010_v47, %v3377_v48  ;;  %v3508_v60 = vor.u32 %v4042_v49, %v3505_v53  ;;  %v3729_v20 = vld [vmem:[%s6159_s1 + $0x978] sm:$0xf0]  ;;  %v4026_v48 = vld [vmem:[%s6159_s1 + $0x72c] sm:$0xf] }
 0x11f   :  { %2430 = vmatpush.bf16.msra.mxu3 %v3204_v57  ;;  %v4106_v57 = vld [vmem:[%s6159_s1 + $0x9ac] sm:$0xf]  ;;  %v3329_v56 = vld [vmem:[%s6159_s1 + $0x658] sm:$0xf0] }
 0x120   :  { %2392 = vmatpush.bf16.msra.mxu0 %v2804_v4  ;;  %v4070_v4 = vld [vmem:[%s6159_s1 + $0x88c] sm:$0xf]  ;;  %v3585_v33 = vld [vmem:[%s6159_s1 + $0x858] sm:$0xf0] }
 0x121   :  { %2405 = vmatpush.bf16.msra.mxu1 %v2932_v5  ;;  %2418 = vmatpush.bf16.msra.mxu2 %v3060_v34  ;;  %v4102_v5 = vld [vmem:[%s6159_s1 + $0x98c] sm:$0xf]  ;;  %v3745_v34 = vld [vmem:[%s6159_s1 + $0x998] sm:$0xf0] }
 0x122   :  { %v3713_v40 = vld [vmem:[%s6159_s1 + $0x958] sm:$0xf0]  ;;  %v4058_v53 = vld [vmem:[%s6159_s1 + $0x82c] sm:$0xf] }
 0x123   :  { %2431 = vmatpush.bf16.msra.mxu3 %v3188_v9  ;;  %v3620_v9 = vor.u32 %v4070_v4, %v3617_v12  ;;  %v3313_v47 = vld [vmem:[%s6159_s1 + $0x638] sm:$0xf0]  ;;  %v4054_v12 = vld [vmem:[%s6159_s1 + $0x80c] sm:$0xf] }
 0x124   :  { %2393 = vmatpush.bf16.msra.mxu0 %v2788_v19  ;;  %v2187_v28 = vpop.f32.mrf.mxu0  ;;  %v4098_v19 = vld [vmem:[%s6159_s1 + $0x96c] sm:$0xf]  ;;  %v3569_v54 = vld [vmem:[%s6159_s1 + $0x838] sm:$0xf0] }
 0x125   :  { %2406 = vmatpush.bf16.msra.mxu1 %v2916_v23  ;;  %2419 = vmatpush.bf16.msra.mxu2 %v3044_v24  ;;  %v2188_v6 = vadd.f32 %v2187_v28, %v5897_v46  ;;  %v3748_v46 = vor.u32 %v4102_v5, %v3745_v34  ;;  %v3604_v23 = vor.u32 %v4066_v17, %v3601_v18  ;;  %v3998_v24 = vld [vmem:[%s6159_s1 + $0x64c] sm:$0xf]  ;;  %v3425_v4 = vld [vmem:[%s6159_s1 + $0x718] sm:$0xf0] }
 0x126   :  { %v3332_v39 = vor.u32 %v3998_v24, %v3329_v56  ;;  %v3572_v3 = vor.u32 %v4058_v53, %v3569_v54  ;;  %v3553_v28 = vld [vmem:[%s6159_s1 + $0x818] sm:$0xf0]  ;;  %v4086_v34 = vld [vmem:[%s6159_s1 + $0x90c] sm:$0xf] }
 0x127   :  { %2432 = vmatpush.bf16.msra.mxu3 %v3172_v26  ;;  %2394 = vmatmul.bf16.vlgmr.msra.gmra.mxu0 %v4458_v27  ;;  %v4038_v27 = vld [vmem:[%s6159_s1 + $0x78c] sm:$0xf]  ;;  %v2200_v7 = vpop.f32.mrf.mxu1  ;;  %v3732_v26 = vor.u32 %v4098_v19, %v3729_v20 }
 0x128   :  { %2438 = vmatpush.bf16.msrb.mxu0 %v3412_v30  ;;  %2420 = vmatmul.bf16.vlgmr.msra.gmra.mxu2 %v4538_v0  ;;  %v3761_v0 = vld [vmem:[%s6159_s1 + $0x9b8] sm:$0xf0]  ;;  %v2201_v14 = vadd.f32 %v2200_v7, %v2188_v6 }
 0x129   :  { %2451 = vmatpush.bf16.msrb.mxu1 %v3540_v31  ;;  %2464 = vmatpush.bf16.msrb.mxu2 %v3668_v32  ;;  %v3457_v31 = vld [vmem:[%s6159_s1 + $0x758] sm:$0xf0]  ;;  %v4062_v32 = vld [vmem:[%s6159_s1 + $0x84c] sm:$0xf] }
 0x12a   :  { %2433 = vmatmul.bf16.vlgmr.msra.gmra.mxu3 %v4542_v2  ;;  %2407 = vmatmul.bf16.vlgmr.msra.gmra.mxu1 %v4462_v29  ;;  %v3764_v2 = vor.u32 %v4106_v57, %v3761_v0  ;;  %v3489_v29 = vld [vmem:[%s6159_s1 + $0x798] sm:$0xf0]  ;;  %v4090_v0 = vld [vmem:[%s6159_s1 + $0x92c] sm:$0xf] }
 0x12b   :  { %2477 = vmatpush.bf16.msrb.mxu3 %v3796_v37  ;;  %v3492_v8 = vor.u32 %v4038_v27, %v3489_v29  ;;  %v2213_v30 = vpop.f32.mrf.mxu2  ;;  %v4094_v37 = vld [vmem:[%s6159_s1 + $0x94c] sm:$0xf]  ;;  %v3297_v27 = vld [vmem:[%s6159_s1 + $0x618] sm:$0xf0] }
 0x12c   :  { %2439 = vmatpush.bf16.msrb.mxu0 %v3396_v43  ;;  %v2214_v35 = vadd.f32 %v2213_v30, %v2201_v14  ;;  %v2189_v38 = vpop.f32.mrf.mxu0  ;;  %v3460_v43 = vor.u32 %v4030_v25, %v3457_v31  ;;  %v3716_v49 = vor.u32 %v4094_v37, %v3713_v40  ;;  %v3681_v6 = vld [vmem:[%s6159_s1 + $0x918] sm:$0xf0]  ;;  %v3300_v7 = vor.u32 %v3990_v21, %v3297_v27 }
 0x12d   :  { %2452 = vmatpush.bf16.msrb.mxu1 %v3524_v44  ;;  %2465 = vmatpush.bf16.msrb.mxu2 %v3652_v45  ;;  %v2226_v36 = vpop.f32.mrf.mxu3  ;;  %v3588_v44 = vor.u32 %v4062_v32, %v3585_v33  ;;  %v3994_v45 = vld [vmem:[%s6159_s1 + $0x62c] sm:$0xf]  ;;  %v3684_v10 = vor.u32 %v4086_v34, %v3681_v6 }
 0x12e   :  { %v2227_v42 = vadd.f32 %v2226_v36, %v2214_v35 }
 0x12f   :  { %2478 = vmatpush.bf16.msrb.mxu3 %v3780_v51  ;;  %v2202_v41 = vpop.f32.mrf.mxu1  ;;  %v3441_v51 = vld [vmem:[%s6159_s1 + $0x738] sm:$0xf0] }
 0x130   :  { %2440 = vmatpush.bf16.msrb.mxu0 %v3380_v59  ;;  %v2491_v57 = vmax.f32 %v2227_v42, 0.0  ;;  %v3697_v59 = vld [vmem:[%s6159_s1 + $0x938] sm:$0xf0]  ;;  %v3444_v63 = vor.u32 %v4026_v48, %v3441_v51  ;;  %v341_v51 = vperm.slane %v4119_v11, 3 }
 0x131   :  { %2453 = vmatpush.bf16.msrb.mxu1 %v3508_v60  ;;  %2466 = vmatpush.bf16.msrb.mxu2 %v3636_v62  ;;  %v3316_v60 = vor.u32 %v3994_v45, %v3313_v47  ;;  %v3700_v29 = vor.u32 %v4090_v0, %v3697_v59 }
 0x132   :  { %v6121_v62 = vpack.c.bf16 %v2491_v57, %v2490_v55 }
 0x133   :  { %2479 = vmatpush.bf16.msrb.mxu3 %v3764_v2  ;;  %v4022_v2 = vld [vmem:[%s6159_s1 + $0x70c] sm:$0xf]  ;;  %v2215_v5 = vpop.f32.mrf.mxu2 }
 0x134   :  { %2441 = vmatpush.bf16.msrb.mxu0 %v3364_v15  ;;  %v2498_v11 = vrot.slane %v6121_v62, 3 }
 0x135   :  { %2454 = vmatpush.bf16.msrb.mxu1 %v3492_v8  ;;  %2467 = vmatpush.bf16.msrb.mxu2 %v3620_v9  ;;  %v2228_v15 = vpop.f32.mrf.mxu3  ;;  %v3428_v8 = vor.u32 %v4022_v2, %v3425_v4  ;;  %v3556_v9 = vor.u32 %v4054_v12, %v3553_v28 }
 0x137   :  { %2480 = vmatpush.bf16.msrb.mxu3 %v3748_v46 }
 0x138   :  { %2442 = vmatpush.bf16.msrb.mxu0 %v3348_v50 }
 0x139   :  { %2455 = vmatpush.bf16.msrb.mxu1 %v3476_v22  ;;  %2468 = vmatpush.bf16.msrb.mxu2 %v3604_v23 }
 0x13b   :  { %2481 = vmatpush.bf16.msrb.mxu3 %v3732_v26 }
 0x13c   :  { %2443 = vmatpush.bf16.msrb.mxu0 %v3332_v39 }
 0x13d   :  { %2456 = vmatpush.bf16.msrb.mxu1 %v3460_v43  ;;  %2469 = vmatpush.bf16.msrb.mxu2 %v3588_v44 }
 0x13f   :  { %2482 = vmatpush.bf16.msrb.mxu3 %v3716_v49 }
 0x140   :  { %2444 = vmatpush.bf16.msrb.mxu0 %v3316_v60 }
 0x141   :  { %2457 = vmatpush.bf16.msrb.mxu1 %v3444_v63  ;;  %2470 = vmatpush.bf16.msrb.mxu2 %v3572_v3 }
 0x143   :  { %2483 = vmatpush.bf16.msrb.mxu3 %v3700_v29 }
 0x144   :  { %2445 = vmatpush.bf16.msrb.mxu0 %v3300_v7  ;;  %v2239_v46 = vpop.f32.mrf.mxu0 }
 0x145   :  { %2458 = vmatpush.bf16.msrb.mxu1 %v3428_v8  ;;  %2471 = vmatpush.bf16.msrb.mxu2 %v3556_v9  ;;  %v2240_v14 = vadd.f32 %v2239_v46, %v340_v13 }
 0x147   :  { %2484 = vmatpush.bf16.msrb.mxu3 %v3684_v10  ;;  %2446 = vmatmul.bf16.vlgmr.msrb.gmra.mxu0 %v4536_v61  ;;  %v2252_v16 = vpop.f32.mrf.mxu1 }
 0x148   :  { %2459 = vmatmul.bf16.vlgmr.msrb.gmra.mxu1 %v4540_v1  ;;  %2472 = vmatmul.bf16.vlgmr.msrb.gmra.mxu2 %v5801_v52  ;;  %v2253_v17 = vadd.f32 %v2252_v16, %v2240_v14 }
 0x14a   :  { %2485 = vmatmul.bf16.vlgmr.msrb.gmra.mxu3 %v5813_v58 }
 0x14b   :  { %v2265_v18 = vpop.f32.mrf.mxu2 }
 0x14c   :  { %v2266_v19 = vadd.f32 %v2265_v18, %v2253_v17  ;;  %v2241_v61 = vpop.f32.mrf.mxu0  ;;  %v2504_v18 = vsel %vm2501_vm0, %v6121_v62, %v2498_v11 }
 0x14d   :  { %v2278_v20 = vpop.f32.mrf.mxu3 }
 0x14e   :  { %v2279_v50 = vadd.f32 %v2278_v20, %v2266_v19 }
 0x14f   :  { %v2254_v22 = vpop.f32.mrf.mxu1 }
 0x153   :  { %v2267_v1 = vpop.f32.mrf.mxu2 }
 0x155   :  { %v2280_v23 = vpop.f32.mrf.mxu3 }
 0x164   :  { %v2291_v52 = vpop.f32.mrf.mxu0 }
 0x165   :  { %v2292_v24 = vadd.f32 %v2291_v52, %v2279_v50 }
 0x167   :  { %v2304_v58 = vpop.f32.mrf.mxu1 }
 0x168   :  { %v2305_v56 = vadd.f32 %v2304_v58, %v2292_v24 }
 0x16b   :  { %v2317_v25 = vpop.f32.mrf.mxu2 }
 0x16c   :  { %v2318_v26 = vadd.f32 %v2317_v25, %v2305_v56  ;;  %v2293_v32 = vpop.f32.mrf.mxu0 }
 0x16d   :  { %v2330_v30 = vpop.f32.mrf.mxu3 }
 0x16e   :  { %v2331_v31 = vadd.f32 %v2330_v30, %v2318_v26 }
 0x16f   :  { %v2306_v33 = vpop.f32.mrf.mxu1 }
 0x173   :  { %v2319_v35 = vpop.f32.mrf.mxu2 }
 0x175   :  { %v2332_v36 = vpop.f32.mrf.mxu3 }
 0x184   :  { %v2343_v37 = vpop.f32.mrf.mxu0 }
 0x185   :  { %v2344_v40 = vadd.f32 %v2343_v37, %v2331_v31  ;;  %v2356_v38 = vpop.f32.mrf.mxu1 }
 0x187   :  { %v2357_v39 = vadd.f32 %v2356_v38, %v2344_v40 }
 0x189   :  { %v2492_v9 = vmax.f32 %v2357_v39, 0.0 }
 0x18c   :  { %v2345_v43 = vpop.f32.mrf.mxu0 }
 0x18d   :  { %v2369_v41 = vpop.f32.mrf.mxu2  ;;  %v2382_v42 = vpop.f32.mrf.mxu3 }
 0x18e   :  { %v2358_v44 = vpop.f32.mrf.mxu1  ;;  %v2370_v55 = vadd.f32 %v2369_v41, %v341_v51 }
 0x190   :  { %v2383_v59 = vadd.f32 %v2382_v42, %v2370_v55 }
 0x195   :  { %v2371_v45 = vpop.f32.mrf.mxu2  ;;  %v2384_v47 = vpop.f32.mrf.mxu3 }
 0x1a4   :  { %v2395_v48 = vpop.f32.mrf.mxu0 }
 0x1a5   :  { %v2396_v3 = vadd.f32 %v2395_v48, %v2383_v59 }
 0x1a7   :  { %v2408_v49 = vpop.f32.mrf.mxu1 }
 0x1a8   :  { %v2409_v21 = vadd.f32 %v2408_v49, %v2396_v3 }
 0x1ab   :  { %v2421_v53 = vpop.f32.mrf.mxu2 }
 0x1ac   :  { %v2397_v57 = vpop.f32.mrf.mxu0  ;;  %v2422_v27 = vadd.f32 %v2421_v53, %v2409_v21 }
 0x1ad   :  { %v2434_v54 = vpop.f32.mrf.mxu3 }
 0x1ae   :  { %v2435_v2 = vadd.f32 %v2434_v54, %v2422_v27 }
 0x1af   :  { %v2410_v0 = vpop.f32.mrf.mxu1 }
 0x1b3   :  { %v2423_v60 = vpop.f32.mrf.mxu2 }
 0x1b5   :  { %v2436_v63 = vpop.f32.mrf.mxu3 }
 0x1c4   :  { %v2447_v29 = vpop.f32.mrf.mxu0 }
 0x1c5   :  { %v2460_v4 = vpop.f32.mrf.mxu1  ;;  %v2448_v12 = vadd.f32 %v2447_v29, %v2435_v2 }
 0x1c7   :  { %v2461_v28 = vadd.f32 %v2460_v4, %v2448_v12 }
 0x1cb   :  { %v2473_v5 = vpop.f32.mrf.mxu2 }
 0x1cc   :  { %v2474_v34 = vadd.f32 %v2473_v5, %v2461_v28  ;;  %v2449_v15 = vpop.f32.mrf.mxu0 }
 0x1cd   :  { %v2486_v6 = vpop.f32.mrf.mxu3  ;;  %v2462_v7 = vpop.f32.mrf.mxu1 }
 0x1ce   :  { %v2487_v8 = vadd.f32 %v2486_v6, %v2474_v34 }
 0x1d0   :  { %v2493_v10 = vmax.f32 %v2487_v8, 0.0 }
 0x1d2   :  { %v2495_v13 = vpack.c.bf16 %v2493_v10, %v2492_v9 }
 0x1d3   :  { %v2475_v46 = vpop.f32.mrf.mxu2 }
 0x1d4   :  { %v2499_v14 = vrot.slane %v2495_v13, 6  ;;  %v2500_v16 = vrot.slane %v2495_v13, 1 }
 0x1d5   :  { %v2488_v17 = vpop.f32.mrf.mxu3 }
 0x1d6   :  { %v2508_v19 = vsel %vm2505_vm1, %v2499_v14, %v2500_v16 }
 0x1d7   :  { %v2510_v20 = vsel %vm2509_vm2, %v2504_v18, %v2508_v19 }
 0x1d8   :  { %2512 = vst [vmem:[%s6162_s3] sm:$0xf] %v2510_v20 }

// kernel: pvt_dense_decoder_forward.27
= control target key start
LH: loop header
LB: loop body
LE: loop exit
PB: predicated region body
PF: predicated region fallthrough
CT: control target
= control target key end

     0   :  { %s1306_s0 = inlined_call_operand.vmem [shape: bf16[2,8,512], index: 0, kind: input, shape index: {}]   ;;  %s1307_s1 = inlined_call_operand.vmem [shape: bf16[1,512,32], index: 1, kind: input, shape index: {}]   ;;  %s1308_s2 = inlined_call_operand.<no memory space> [shape: f32[1,1], index: 2, kind: input, shape index: {}]   ;;  %s1309_s3 = inlined_call_operand.vmem [shape: f32[32,8], index: 3, kind: input, shape index: {}]   ;;  %s1310_s4 = inlined_call_operand.hbm [shape: f32[2,1,32,32], index: 4, kind: output, shape index: {}]  }
   0x1   :  { %v9_v0 = vstv %s1308_s2 }
   0x2   :  { %10 = vst [vmem:[#allocation2] sm:$0x1] %v9_v0 }
   0x3   :  { %11 = vsyncpa [#allocation4], 0 }
   0x4   :  { %13 = vsyncpa [#allocation4 + $0x1], 0  ;;  %s1101_s17 = smov 0   ;;  %s1103_s18 = smov 0  }
   0x5   :  { %s1105_s19 = smov 0   ;;  %s1107_s20 = smov 0  }
   0x6   :  { %s1109_s21 = smov 0   ;;  %s1111_s22 = smov 0  }
   0x7 LB: > { %s746_s2 = sadd.s32 4294967295, %s1068_s22   ;;  %s747_s23 = sadd.s32 4294967294, %s1068_s22   ;;  %s1068_s22 = sphi %s1111_s22, %s19_s22   ;;  %s1064_s21 = sphi %s1109_s21, %s1317_s21   ;;  %s1060_s20 = sphi %s1107_s20, %s1316_s20   ;;  %s1056_s19 = sphi %s1105_s19, %s1315_s19   ;;  %s1052_s18 = sphi %s1103_s18, %s1314_s18   ;;  %s1048_s17 = sphi %s1101_s17, %s1313_s17  }
   0x8   : > { %s31_s24 = sadd.s32 1, %s1064_s21  ;;  %s139_s25 = sadd.s32 1, %s1056_s19 }
   0x9   : > { %p33_p0 = scmp.ge.s32.totalorder %s31_s24, 2  ;;  %p149_p1 = scmp.ne.s32.totalorder %s1056_s19, %s1052_s18 }
   0xa   : > { %p150_p2 = scmp.eq.s32.totalorder %s746_s2, 1  ;;  %p155_p3 = scmp.ne.s32.totalorder %s1052_s18, %s1048_s17 }
   0xb   : > { %s1319_s24 = smov (%p33_p0, %s31_s24), 0  ;;  %p156_p5 = scmp.eq.s32.totalorder %s747_s23, 1 }
   0xc   : > { %p1141_p4 = por %p150_p2, %p149_p1  ;;  %s134_s27 = ssub.s32 %s1064_s21, %s1319_s24 }
   0xd   : > { %p752_p6 = scmp.ge.s32.totalorder %s1068_s22, 1  ;;  %p137_p7 = scmp.eq.s32.totalorder %s134_s27, 0 }
   0xe   : > { %p1148_p8 = por %p156_p5, %p155_p3  ;;  %p199_p9 = scmp.lt.s32.totalorder %s1068_s22, 3 }
   0xf   : > { %s1154_s29 = scalar_select %p137_p7, %s1056_s19, %s139_s25  }
  0x10   : > { %p200_p10 = pnand %p752_p6, %p199_p9 }
  0x11   : > { %p233_p11 = scmp.lt.s32.totalorder (!%p200_p10), %s1060_s20, 1  ;;  %s230_s14 = sand.u32 (!%p200_p10), 1, %s1052_s18  }
  0x12   : > { %203 = sbr.rel (%p200_p10) target bundleno = 332 (0x14c), region = 36  ;;  %s926_s15 = sshll.u32 (!%p200_p10), %s1060_s20, 5 }
  0x13   : > { %s642_s23 = scalar_lea.hbm (!%p200_p10), %s1310_s4, %s926_s15  ;;  %s1010_s9 = scalar_lea.hbm (!%p200_p10), %s1310_s4, 64 }
  0x14   : > { %s645_s30 = sshll.u32 (!%p200_p10), %s642_s23, 4  ;;  %s646_s30 = int_to_ptr.hbm [resolvable:$true] %s645_s30 }
  0x17   : > { %v901_v1 = vld [vmem:[%s1307_s1 + $0x38] sm:$0xff]  ;;  %v900_v5 = vld [vmem:[%s1307_s1 + $0x30] sm:$0xff]  ;;  %v1070_v9 = vmov 0   ;;  %v899_v10 = vld [vmem:[%s1307_s1 + $0x28] sm:$0xff]  ;;  %s234_s25 = scalar_select %p233_p11, %s1060_s20, 1  ;;  %vm581_vm0 = vcmask 64512  }
  0x18   : > { %v909_v2 = vld [vmem:[%s1307_s1 + $0x78] sm:$0xff]  ;;  %525 = vmatpush.bf16.msra.mxu0 %v901_v1  ;;  %v908_v6 = vld [vmem:[%s1307_s1 + $0x70] sm:$0xff]  ;;  %988 = vset.pattern.permute.xlu0 %v1070_v9  ;;  %v907_v11 = vld [vmem:[%s1307_s1 + $0x68] sm:$0xff]  ;;  %vm623_vm1 = vcmask 261120   ;;  %s629_s20 = scalar_lea.sflag [#allocation4], %s230_s14 }
  0x19   : > { %v917_v3 = vld [vmem:[%s1307_s1 + $0xb8] sm:$0xff]  ;;  %538 = vmatpush.bf16.msra.mxu1 %v909_v2  ;;  %v916_v7 = vld [vmem:[%s1307_s1 + $0xb0] sm:$0xff]  ;;  %v915_v12 = vld [vmem:[%s1307_s1 + $0xa8] sm:$0xff]  ;;  %s893_s11 = sshll.u32 %s234_s25, 4 }
  0x1a   : > { %v925_v4 = vld [vmem:[%s1307_s1 + $0xf8] sm:$0xff]  ;;  %551 = vmatpush.bf16.msra.mxu2 %v917_v3  ;;  %v924_v8 = vld [vmem:[%s1307_s1 + $0xf0] sm:$0xff]  ;;  %v923_v13 = vld [vmem:[%s1307_s1 + $0xe8] sm:$0xff]  ;;  %s237_s5 = scalar_lea.vmem %s1306_s0, %s893_s11  ;;  %s753_s11 = sshll.u32 %s230_s14, 5 }
  0x1b   : > { %564 = vmatpush.bf16.msra.mxu3 %v925_v4  ;;  %v898_v14 = vld [vmem:[%s1307_s1 + $0x20] sm:$0xff]  ;;  %v897_v19 = vld [vmem:[%s1307_s1 + $0x18] sm:$0xff]  ;;  %v896_v23 = vld [vmem:[%s1307_s1 + $0x10] sm:$0xff]  ;;  %s232_s27 = scalar_lea.vmem [#allocation3], %s753_s11 }
  0x1c   : > { %526 = vmatpush.bf16.msra.mxu0 %v900_v5  ;;  %v906_v15 = vld [vmem:[%s1307_s1 + $0x60] sm:$0xff]  ;;  %v905_v20 = vld [vmem:[%s1307_s1 + $0x58] sm:$0xff]  ;;  %v904_v24 = vld [vmem:[%s1307_s1 + $0x50] sm:$0xff]  ;;  %s643_s25 = sshll.u32 %s232_s27, 4  ;;  %s644_s25 = int_to_ptr.vmem [resolvable:$true] %s643_s25 }
  0x1d   : > { %539 = vmatpush.bf16.msra.mxu1 %v908_v6  ;;  %v914_v16 = vld [vmem:[%s1307_s1 + $0xa0] sm:$0xff]  ;;  %v913_v21 = vld [vmem:[%s1307_s1 + $0x98] sm:$0xff]  ;;  %v912_v25 = vld [vmem:[%s1307_s1 + $0x90] sm:$0xff] }
  0x1e   : > { %552 = vmatpush.bf16.msra.mxu2 %v916_v7  ;;  %v922_v17 = vld [vmem:[%s1307_s1 + $0xe0] sm:$0xff]  ;;  %v921_v22 = vld [vmem:[%s1307_s1 + $0xd8] sm:$0xff]  ;;  %v920_v26 = vld [vmem:[%s1307_s1 + $0xd0] sm:$0xff] }
  0x1f   : > { %565 = vmatpush.bf16.msra.mxu3 %v924_v8  ;;  %v989_v18 = vld [vmem:[#allocation2] ss:$0 sm:$0xff]  ;;  %v895_v27 = vld [vmem:[%s1307_s1 + $0x8] sm:$0xff]  ;;  %v579_v56 = vld [vmem:[%s1309_s3 + $0x10] sm:$0xff] }
  0x20   : > { %527 = vmatpush.bf16.msra.mxu0 %v899_v10  ;;  %316 = vperm.xlu0 %988, %v989_v18   ;;  %v903_v28 = vld [vmem:[%s1307_s1 + $0x48] sm:$0xff]  ;;  %v246_v29 = vld [vmem:[%s237_s5] sm:$0xff]  ;;  %v580_v57 = vld [vmem:[%s1309_s3 + $0x18] sm:$0xff] }
  0x21   : > { %540 = vmatpush.bf16.msra.mxu1 %v907_v11  ;;  %v911_v30 = vld [vmem:[%s1307_s1 + $0x88] sm:$0xff]  ;;  %v321_v33 = vunpack.c.l.b16 %v246_v29  ;;  %v322_v34 = vunpack.c.h.b16 %v246_v29  ;;  %v894_v35 = vld [vmem:[%s1307_s1] sm:$0xff] }
  0x22   : > { %553 = vmatpush.bf16.msra.mxu2 %v915_v12  ;;  %v919_v31 = vld [vmem:[%s1307_s1 + $0xc8] sm:$0xff]  ;;  %v902_v36 = vld [vmem:[%s1307_s1 + $0x40] sm:$0xff] }
  0x23   : > { %566 = vmatpush.bf16.msra.mxu3 %v923_v13  ;;  %v247_v32 = vld [vmem:[%s237_s5 + $0x8] sm:$0xff]  ;;  %v910_v39 = vld [vmem:[%s1307_s1 + $0x80] sm:$0xff]  ;;  %v325_v41 = vpack.c.b16 %v321_v33, %v321_v33  ;;  %v326_v42 = vpack.c.b16 %v322_v34, %v322_v34  ;;  %s1004_s5 = sshra.s32 %s646_s30, 4  ;;  %s1005_s5 = int_to_ptr.hbm [resolvable:$true] %s1004_s5 }
  0x24   : > { %528 = vmatpush.bf16.msra.mxu0 %v898_v14  ;;  %v323_v37 = vunpack.c.l.b16 %v247_v32  ;;  %v324_v38 = vunpack.c.h.b16 %v247_v32  ;;  %v918_v40 = vld [vmem:[%s1307_s1 + $0xc0] sm:$0xff]  ;;  %v578_v59 = vld [vmem:[%s1309_s3 + $0x8] sm:$0xff]  ;;  %s1006_s6 = scalar_lea.hbm %s1005_s5, 32  ;;  %p1011_p1 = scmp.lt.s32.totalorder %s1005_s5, %s1310_s4 }
  0x25   : > { %541 = vmatpush.bf16.msra.mxu1 %v906_v15  ;;  %v577_v58 = vld [vmem:[%s1309_s3] sm:$0xff]  ;;  %p1007_p12 = scmp.ne.s32.totalorder %s1005_s5, %s1006_s6  ;;  %p1012_p2 = scmp.lt.s32.totalorder %s1010_s9, %s1006_s6 }
  0x26   : > { %554 = vmatpush.bf16.msra.mxu2 %v914_v16  ;;  %v327_v43 = vpack.c.b16 %v323_v37, %v323_v37  ;;  %v328_v44 = vpack.c.b16 %v324_v38, %v324_v38 }
  0x27   : > { %567 = vmatpush.bf16.msra.mxu3 %v922_v17  ;;  %p1008_p13 = pnand %p1007_p12, %p1141_p4  ;;  %p1013_p3 = por %p1012_p2, %p1011_p1 }
  0x28   : > { %529 = vmatpush.bf16.msra.mxu0 %v897_v19 }
  0x29   : > { %542 = vmatpush.bf16.msra.mxu1 %v905_v20  ;;  %p1009_p0 = pneg %p1008_p13 }
  0x2a   : > { %555 = vmatpush.bf16.msra.mxu2 %v913_v21 }
  0x2b   : > { %568 = vmatpush.bf16.msra.mxu3 %v921_v22  ;;  %p1014_p5 = pnand %p1013_p3, %p1009_p0 }
  0x2c   : > { %530 = vmatpush.bf16.msra.mxu0 %v896_v23 }
  0x2d   : > { %543 = vmatpush.bf16.msra.mxu1 %v904_v24 }
  0x2e   : > { %556 = vmatpush.bf16.msra.mxu2 %v912_v25 }
  0x2f   : > { %569 = vmatpush.bf16.msra.mxu3 %v920_v26 }
  0x30   : > { %531 = vmatpush.bf16.msra.mxu0 %v895_v27 }
  0x31   : > { %544 = vmatpush.bf16.msra.mxu1 %v903_v28 }
  0x32   : > { %557 = vmatpush.bf16.msra.mxu2 %v911_v30 }
  0x33   : > { %570 = vmatpush.bf16.msra.mxu3 %v919_v31 }
  0x34   : > { %532 = vmatpush.bf16.msra.mxu0 %v894_v35 }
  0x35   : > { %545 = vmatpush.bf16.msra.mxu1 %v902_v36 }
  0x36   : > { %558 = vmatpush.bf16.msra.mxu2 %v910_v39 }
  0x37   : > { %571 = vmatpush.bf16.msra.mxu3 %v918_v40  ;;  %533 = vmatmul.bf16.vlgmr.msra.gmra.mxu0 %v325_v41 }
  0x38   : > { %546 = vmatmul.bf16.vlgmr.msra.gmra.mxu1 %v326_v42 }
  0x39   : > { %559 = vmatmul.bf16.vlgmr.msra.gmra.mxu2 %v327_v43 }
  0x3a   : > { %572 = vmatmul.bf16.vlgmr.msra.gmra.mxu3 %v328_v44 }
  0x92   : > { %v317_v45 = vpop.permute.xlu0 %316 }
  0xb4   : > { %v534_v46 = vpop.f32.mrf.mxu0 }
  0xb5   : > { %v547_v47 = vpop.f32.mrf.mxu1  ;;  %v535_v48 = vadd.f32 %v534_v46, %v317_v45 }
  0xb7   : > { %v548_v49 = vadd.f32 %v547_v47, %v535_v48 }
  0xbc   : > { %v560_v50 = vpop.f32.mrf.mxu2  ;;  %v536_v53 = vpop.f32.mrf.mxu0 }
  0xbd   : > { %v573_v51 = vpop.f32.mrf.mxu3  ;;  %v561_v52 = vadd.f32 %v560_v50, %v548_v49  ;;  %v549_v54 = vpop.f32.mrf.mxu1 }
  0xbf   : > { %v574_v55 = vadd.f32 %v573_v51, %v561_v52 }
  0xc1   : > { %609 = vmatpush.msrb.mxu0 %v574_v55  ;;  %927 = vmatpush.msrb.mxu1 %v574_v55 }
  0xc2   : > { %928 = vmatpush.msrb.mxu2 %v574_v55  ;;  %929 = vmatpush.msrb.mxu3 %v574_v55 }
  0xc3   : > { %886 = vmatmul.msk.f32.vlgmr.msrb.gmra.mxu2 %vm581_vm0, %v579_v56  ;;  %887 = vmatmul.msk.f32.vlgmr.msrb.gmra.mxu3 %vm581_vm0, %v580_v57 }
  0xc4   : > { %v562_v60 = vpop.f32.mrf.mxu2  ;;  %884 = vmatmul.msk.f32.vlgmr.msrb.gmra.mxu0 %vm581_vm0, %v577_v58  ;;  %885 = vmatmul.msk.f32.vlgmr.msrb.gmra.mxu1 %vm581_vm0, %v578_v59 }
  0xc5   : > { %v575_v61 = vpop.f32.mrf.mxu3 }
 0x141   : > { %v611_v62 = vpop.f32.mrf.mxu0  ;;  %v614_v63 = vpop.f32.mrf.mxu1 }
 0x142   : > { %624 = vst.msk [vmem:[%s232_s27] sm:$0xff] %vm623_vm1, %v611_v62 }
 0x143   : > { %625 = vst.msk [vmem:[%s232_s27 + $0x8] sm:$0xff] %vm623_vm1, %v614_v63 }
 0x146   : > { %v617_v0 = vpop.f32.mrf.mxu2  ;;  %v620_v1 = vpop.f32.mrf.mxu3 }
 0x147   : > { %626 = vst.msk [vmem:[%s232_s27 + $0x10] sm:$0xff] %vm623_vm1, %v617_v0 }
 0x148   : > { %627 = vst.msk [vmem:[%s232_s27 + $0x18] sm:$0xff] %vm623_vm1, %v620_v1 }
 0x149   : > { %1017 = shalt.err (!%p1014_p5)
}
 0x14a   : > { %s1071_s13 = smov 128   ;;  %s1072_s14 = smov 8  }
 0x14b   : > { %930 = dma.vmem_to_hbm [thread:$0]  (%p1141_p4), %s644_s25, 512, %s646_s30, %s629_s20, %s1071_s13, %s1071_s13, %s1072_s14  }
 0x14c PF: > { %p936_p6 = scmp.ge.s32.totalorder %s1068_s22, 2  ;;  %s660_s11 = sand.u32 1, %s1048_s17  }
 0x14d   : > { %s661_s15 = scalar_lea.sflag [#allocation4], %s660_s11 }
 0x14e   : > { %p933_p7 = pnand %p936_p6, %p1148_p8 }
 0x150   : > { %p934_p9 = pneg %p933_p7 }
 0x152   : > { %1043 = dma.done.wait (%p934_p9), %s661_s15, 512  }
 0x153   : > { %1045 = vsyncadd (%p934_p9), %s661_s15, 4294966784  ;;  %s19_s22 = sadd.s32 1, %s1068_s22   ;;  %s1313_s17 = smov %s1052_s18 }
 0x154   : > { %p16_p10 = scmp.ge.s32.totalorder %s19_s22, 4   ;;  %s1314_s18 = smov %s1056_s19 }
 0x155   : > { %s1315_s19 = smov %s1154_s29  ;;  %s1316_s20 = smov %s1064_s21 }
 0x156   : > { %s1317_s21 = smov %s1319_s24  ;;  %18 = sbr.rel (!%p16_p10) target bundleno = 7 (0x7), region = 77 }
 0x15b   :  { %667 = vsyncpa [#allocation4], 1 }
 0x15c   :  { %669 = vsyncpa [#allocation4 + $0x1], 1 }

</bundles_post_ra>
